<compile_context>
chip_gen: v7x
topology: tpu7x:2x2x1
jax: 0.10.0
libtpu: 0.0.40
codegen_flags: <defaults>
</compile_context>

<pallas_src>
import math

import jax
import jax.numpy as jnp
from jax.experimental import pallas as pl
from jax.experimental.pallas import tpu as pltpu

SEQ = 13          # fixed by v.reshape(-1, 13, 768)
SEQ_PAD = 16      # padded to a sublane multiple -> reshapes / attention tiles are aligned
DIM = 768         # input_dim
HID = 128         # gated_dim
NCL = 3           # n_cl
NCL_PAD = 128     # classifier output padded to one full lane width


def _model_kernel(x_ref, wqkv_ref, bqkv_ref, wh_ref, bh_ref, out_ref):
    f32 = jnp.float32
    rows = x_ref.shape[0]              # bb * SEQ_PAD  (static)
    bb = rows // SEQ_PAD

    # Fused (fcl_x o {Q,K,V}) projection: one big MXU matmul, f32 accumulation.
    x = x_ref[...]                                                     # (bb*16, 768)
    qkv = jnp.dot(x, wqkv_ref[...], preferred_element_type=f32) + bqkv_ref[...]
    qkv = qkv.reshape(bb, SEQ_PAD, 3 * DIM)                            # aligned reshape
    q = qkv[:, :, 0 * DIM:1 * DIM]
    k = qkv[:, :, 1 * DIM:2 * DIM]
    v = qkv[:, :, 2 * DIM:3 * DIM]

    # scores = (Q / sqrt(D)) K^T (scale folded into Q); mask padded keys; softmax.
    scores = jnp.einsum('bqd,bkd->bqk', q, k, preferred_element_type=f32)
    key_idx = jax.lax.broadcasted_iota(jnp.int32, scores.shape, 2)
    scores = jnp.where(key_idx < SEQ, scores, f32(-1e30))
    scores = scores - jnp.max(scores, axis=-1, keepdims=True)
    p = jnp.exp(scores)
    attn = p * pl.reciprocal(jnp.sum(p, axis=-1, keepdims=True), approx=True)

    # weighted = attn @ V  -> (bb, 16, 768); padded query rows are masked out below.
    weighted = jnp.einsum('bqk,bkd->bqd', attn, v, preferred_element_type=f32)

    # Statistical pooling over the 13 valid rows: mean + unbiased std.
    row_idx = jax.lax.broadcasted_iota(jnp.int32, weighted.shape, 1)
    valid = row_idx < SEQ
    wmask = jnp.where(valid, weighted, f32(0.0))
    mean = jnp.sum(wmask, axis=1) / f32(SEQ)                           # (bb, 768)
    diff = jnp.where(valid, weighted - mean[:, None, :], f32(0.0))
    var = jnp.sum(diff * diff, axis=1) / f32(SEQ - 1)
    std = jnp.sqrt(var)                                                # (bb, 768)
    stat = jnp.concatenate([mean, std], axis=1)                        # (bb, 1536)

    # Fused (fcl o classifier) head, classifier padded to 128 lanes.
    out = jnp.dot(stat.astype(wh_ref.dtype), wh_ref[...],
                  preferred_element_type=f32) + bh_ref[...]            # (bb, 128)

    # out[:, NCL-1] = sigmoid(out[:, NCL-1]); padded lanes are don't-care.
    col = jax.lax.broadcasted_iota(jnp.int32, out.shape, 1)
    out = jnp.where(col == NCL - 1, jax.nn.sigmoid(out), out)

    out_ref[...] = out                                                 # lane-dense store


def pack_params(params, compute_dtype=jnp.bfloat16):
    """Fold/pack raw per-layer params into the kernel layout.

    Exact algebraic folds (no nonlinearity / p=0 dropout between the layers):
      - fcl_x folded into Q/K/V:  x1@Wq + bq == x@(Wx@Wq) + (bx@Wq + bq)
        (1/sqrt(DIM) attention scale folded into the Q slice),
        fused into one (768, 2304) matrix.
      - fcl folded into the classifier (padded to 128 output lanes):
        one (1536, 128) head matrix.
    Matmul weights are cast to `compute_dtype`; biases stay float32 (added to
    the f32 accumulator).
    """
    wx, bx, wq, bq, wk, bk, wv, bv, wf, bf, wc, bc = params
    scale = jnp.float32(1.0 / math.sqrt(DIM))

    wq_f = (wx @ wq) * scale
    bq_f = (bx @ wq + bq) * scale
    wk_f = wx @ wk
    bk_f = bx @ wk + bk
    wv_f = wx @ wv
    bv_f = bx @ wv + bv
    wqkv = jnp.concatenate([wq_f, wk_f, wv_f], axis=1)     # (768, 2304)
    bqkv = jnp.concatenate([bq_f, bk_f, bv_f], axis=1)     # (1, 2304)

    wc_p = jnp.zeros((HID, NCL_PAD), jnp.float32).at[:, :NCL].set(wc)
    bc_p = jnp.zeros((1, NCL_PAD), jnp.float32).at[:, :NCL].set(bc)
    wh = wf @ wc_p                                          # (1536, 128)
    bh = bf @ wc_p + bc_p                                   # (1, 128)

    cd = compute_dtype
    return (wqkv.astype(cd), bqkv.astype(jnp.float32),
            wh.astype(cd), bh.astype(jnp.float32))


def video_wrapper_forward(inputs, packed_params, *, block_b=64,
                          vmem_limit_bytes=56 << 20):
    """Pallas forward. `packed_params` comes from pack_params().

    Generation tuning: block_b=64 / <=56 MiB fits v7x (64 MiB VMEM per TC);
    on v5e/v6e block_b can be raised to 128 with vmem_limit_bytes ~100 MiB.
    """
    a, v = inputs  # audio branch `a` is unused by the PyTorch forward
    wqkv, bqkv, wh, bh = packed_params
    cd = wqkv.dtype

    x = jnp.reshape(v, (-1, SEQ, DIM))
    B = x.shape[0]
    bb = B if B <= block_b else block_b
    b_pad = pl.cdiv(B, bb) * bb

    # Zero-pad batch to a multiple of bb and the sequence 13 -> 16, then
    # pre-flatten to 2-D so the block DMA and every in-kernel reshape is
    # (8,128)-tile aligned (bb*16 rows, 768 lanes).
    x = jnp.pad(x, ((0, b_pad - B), (0, SEQ_PAD - SEQ), (0, 0)))
    x2d = x.reshape(b_pad * SEQ_PAD, DIM).astype(cd)

    grid = (b_pad // bb,)

    # Weights/biases: single-copy VMEM residents (not pipelined / double-buffered).
    wspec = pl.BlockSpec(memory_space=pltpu.MemorySpace.VMEM)

    out = pl.pallas_call(
        _model_kernel,
        out_shape=jax.ShapeDtypeStruct((b_pad, NCL_PAD), jnp.float32),
        grid=grid,
        in_specs=[pl.BlockSpec((bb * SEQ_PAD, DIM), lambda i: (i, 0))] + [wspec] * 4,
        out_specs=pl.BlockSpec((bb, NCL_PAD), lambda i: (i, 0)),
        compiler_params=pltpu.CompilerParams(
            dimension_semantics=("parallel",),   # disjoint output blocks -> megacore OK
            vmem_limit_bytes=vmem_limit_bytes,
        ),
    )(x2d, wqkv, bqkv, wh, bh)

    out = out[:B, :NCL]
    return {"gen": out[:, :-1], "age": out[:, -1]}


def init_params(key):
    """Deterministic synthetic weights. Linear(in,out) stored as (in,out) (transposed)."""
    def linear(k, fan_in, fan_out):
        kw, kb = jax.random.split(k)
        bound = 1.0 / math.sqrt(fan_in)
        w = jax.random.uniform(kw, (fan_in, fan_out), jnp.float32, -bound, bound)
        b = jax.random.uniform(kb, (1, fan_out), jnp.float32, -bound, bound)
        return w, b

    ks = jax.random.split(key, 7)
    wx, bx = linear(ks[0], DIM, DIM)           # fcl_x
    wq, bq = linear(ks[1], DIM, DIM)           # DPAL.query
    wk, bk = linear(ks[2], DIM, DIM)           # DPAL.key
    wv, bv = linear(ks[3], DIM, DIM)           # DPAL.value
    wf, bf = linear(ks[4], 2 * DIM, HID)       # fcl
    wc, bc = linear(ks[5], HID, NCL)           # classifier
    return (wx, bx, wq, bq, wk, bk, wv, bv, wf, bf, wc, bc)


def reference_forward(inputs, params):
    """Pure-JAX reference mirroring the PyTorch semantics (unfused, for verification)."""
    _, v = inputs
    x = jnp.reshape(v, (-1, SEQ, DIM)).astype(jnp.float32)
    wx, bx, wq, bq, wk, bk, wv, bv, wf, bf, wc, bc = params
    x1 = x @ wx + bx
    q = x1 @ wq + bq
    k = x1 @ wk + bk
    val = x1 @ wv + bv
    scores = jnp.einsum('bqd,bkd->bqk', q, k) / math.sqrt(DIM)
    attn = jax.nn.softmax(scores, axis=-1)
    weighted = jnp.einsum('bqk,bkd->bqd', attn, val)
    mean = jnp.mean(weighted, axis=1)
    std = jnp.std(weighted, axis=1, ddof=1)        # torch.std is unbiased
    stat = jnp.concatenate([mean, std], axis=1)
    h = stat @ wf + bf
    out = h @ wc + bc
    out = out.at[:, -1].set(jax.nn.sigmoid(out[:, -1]))
    return {"gen": out[:, :-1], "age": out[:, -1]}


if __name__ == "__main__":
    key = jax.random.PRNGKey(0)
    k_par, k_a, k_v = jax.random.split(key, 3)

    raw_params = init_params(k_par)

    # --- small case (B=2), f32 path, tight tolerance ---
    B = 2
    a = jax.random.normal(k_a, (B, 16), jnp.float32)             # unused audio branch
    v = jax.random.normal(k_v, (B, SEQ * DIM), jnp.float32)      # reshaped to (B,13,768)
    ref = reference_forward((a, v), raw_params)

    out = video_wrapper_forward((a, v), pack_params(raw_params, jnp.float32))
    jax.block_until_ready(out)
    assert out["gen"].shape == (B, NCL - 1)
    assert out["age"].shape == (B,)
    assert jnp.allclose(out["gen"], ref["gen"], atol=3e-3, rtol=3e-3)
    assert jnp.allclose(out["age"], ref["age"], atol=3e-3, rtol=3e-3)

    # --- larger batch: exercises multi-step grid + batch-padding path (f32) ---
    B2 = 40
    a2 = jnp.zeros((B2, 16), jnp.float32)
    v2 = jax.random.normal(jax.random.PRNGKey(1), (B2, SEQ * DIM), jnp.float32)
    ref2 = reference_forward((a2, v2), raw_params)

    out2 = video_wrapper_forward((a2, v2), pack_params(raw_params, jnp.float32),
                                 block_b=16)
    jax.block_until_ready(out2)
    assert jnp.allclose(out2["gen"], ref2["gen"], atol=3e-3, rtol=3e-3)
    assert jnp.allclose(out2["age"], ref2["age"], atol=3e-3, rtol=3e-3)

    # --- default fast path: bf16 weights + bf16 streamed input, f32 accumulation ---
    out_bf16 = video_wrapper_forward((a2, v2), pack_params(raw_params))
    jax.block_until_ready(out_bf16)
    assert jnp.allclose(out_bf16["gen"], ref2["gen"], atol=5e-2, rtol=5e-2)
    assert jnp.allclose(out_bf16["age"], ref2["age"], atol=5e-2, rtol=5e-2)

    print("KERNEL_OK")
</pallas_src>

<mosaic_0001>
module attributes {stable_mosaic.version = 11 : i64} {
  func.func @_model_kernel(%arg0: i32, %arg1: memref<32x768xf32, #tpu.memory_space<vmem>>, %arg2: memref<768x2304xf32, #tpu.memory_space<vmem>>, %arg3: memref<1x2304xf32, #tpu.memory_space<vmem>>, %arg4: memref<1536x128xf32, #tpu.memory_space<vmem>>, %arg5: memref<1x128xf32, #tpu.memory_space<vmem>>, %arg6: memref<2x128xf32, #tpu.memory_space<vmem>>) attributes {dimension_semantics = [#tpu.dimension_semantics<parallel>], iteration_bounds = array<i64: 1>, scalar_prefetch = 0 : i64, scratch_operands = 0 : i64, tpu.core_type = #tpu.core_type<tc>, window_params = [{transform_indices = @transform_0, window_bounds = array<i64: 32, 768>}, {pipeline_mode = #tpu.pipeline_mode<synchronous>, transform_indices = @transform_1, window_bounds = array<i64: 768, 2304>}, {pipeline_mode = #tpu.pipeline_mode<synchronous>, transform_indices = @transform_2, window_bounds = array<i64: 1, 2304>}, {pipeline_mode = #tpu.pipeline_mode<synchronous>, transform_indices = @transform_3, window_bounds = array<i64: 1536, 128>}, {pipeline_mode = #tpu.pipeline_mode<synchronous>, transform_indices = @transform_4, window_bounds = array<i64: 1, 128>}, {transform_indices = @transform_5, window_bounds = array<i64: 2, 128>}]} {
    %c0 = arith.constant 0 : index
    %c0_0 = arith.constant 0 : index
    %0 = vector.load %arg1[%c0, %c0_0] : memref<32x768xf32, #tpu.memory_space<vmem>>, vector<32x768xf32>
    %c0_1 = arith.constant 0 : index
    %c0_2 = arith.constant 0 : index
    %1 = vector.load %arg2[%c0_1, %c0_2] : memref<768x2304xf32, #tpu.memory_space<vmem>>, vector<768x2304xf32>
    %cst = arith.constant dense<0.000000e+00> : vector<32x2304xf32>
    %2 = tpu.matmul %0, %1, %cst {dimension_numbers = #tpu.dot_dimension_numbers<[1], [0], [0], [1], [0, 0, 1, 1], [], []>} : vector<32x768xf32>, vector<768x2304xf32>, vector<32x2304xf32> -> vector<32x2304xf32>
    %c0_3 = arith.constant 0 : index
    %c0_4 = arith.constant 0 : index
    %3 = vector.load %arg3[%c0_3, %c0_4] : memref<1x2304xf32, #tpu.memory_space<vmem>>, vector<1x2304xf32>
    %4 = vector.broadcast %3 : vector<1x2304xf32> to vector<32x2304xf32>
    %5 = arith.addf %2, %4 : vector<32x2304xf32>
    %6 = vector.shape_cast %5 : vector<32x2304xf32> to vector<2x16x2304xf32>
    %7 = vector.extract_strided_slice %6 {offsets = [0, 0, 0], sizes = [2, 16, 768], strides = [1, 1, 1]} : vector<2x16x2304xf32> to vector<2x16x768xf32>
    %8 = vector.extract_strided_slice %6 {offsets = [0, 0, 768], sizes = [2, 16, 768], strides = [1, 1, 1]} : vector<2x16x2304xf32> to vector<2x16x768xf32>
    %9 = vector.extract_strided_slice %6 {offsets = [0, 0, 1536], sizes = [2, 16, 768], strides = [1, 1, 1]} : vector<2x16x2304xf32> to vector<2x16x768xf32>
    "tpu.trace_start"() <{level = 10 : i32, message = "bqd,bkd->bqk"}> : () -> ()
    %cst_5 = arith.constant dense<0.000000e+00> : vector<2x16x16xf32>
    %10 = tpu.matmul %7, %8, %cst_5 {dimension_numbers = #tpu.dot_dimension_numbers<[2], [2], [1], [1], [0, 0, 0, 1, 1, 1], [0], [0]>} : vector<2x16x768xf32>, vector<2x16x768xf32>, vector<2x16x16xf32> -> vector<2x16x16xf32>
    "tpu.trace_stop"() : () -> ()
    %11 = tpu.iota {dimensions = array<i32: 2>} : vector<2x16x16xi32>
    %c13_i32 = arith.constant 13 : i32
    %12 = vector.broadcast %c13_i32 : i32 to vector<2x16x16xi32>
    %13 = arith.cmpi slt, %11, %12 : vector<2x16x16xi32>
    %cst_6 = arith.constant -1.000000e+30 : f32
    %14 = vector.broadcast %cst_6 : f32 to vector<2x16x16xf32>
    %15 = arith.select %13, %10, %14 : vector<2x16x16xi1>, vector<2x16x16xf32>
    %cst_7 = arith.constant dense<0xFF800000> : vector<2x16xf32>
    %16 = vector.multi_reduction <maximumf>, %15, %cst_7 [2] : vector<2x16x16xf32> to vector<2x16xf32>
    %17 = vector.shape_cast %16 : vector<2x16xf32> to vector<2x16x1xf32>
    %18 = vector.broadcast %17 : vector<2x16x1xf32> to vector<2x16x16xf32>
    %19 = arith.subf %15, %18 : vector<2x16x16xf32>
    %20 = math.exp %19 : vector<2x16x16xf32>
    %cst_8 = arith.constant dense<0.000000e+00> : vector<2x16xf32>
    %21 = vector.multi_reduction <add>, %20, %cst_8 [2] : vector<2x16x16xf32> to vector<2x16xf32>
    %22 = vector.shape_cast %21 : vector<2x16xf32> to vector<2x16x1xf32>
    %23 = tpu.reciprocal %22 {approx = true} : vector<2x16x1xf32> -> vector<2x16x1xf32>
    %24 = vector.broadcast %23 : vector<2x16x1xf32> to vector<2x16x16xf32>
    %25 = arith.mulf %20, %24 : vector<2x16x16xf32>
    "tpu.trace_start"() <{level = 10 : i32, message = "bqk,bkd->bqd"}> : () -> ()
    %cst_9 = arith.constant dense<0.000000e+00> : vector<2x16x768xf32>
    %26 = tpu.matmul %25, %9, %cst_9 {dimension_numbers = #tpu.dot_dimension_numbers<[2], [1], [1], [2], [0, 0, 0, 1, 1, 2], [0], [0]>} : vector<2x16x16xf32>, vector<2x16x768xf32>, vector<2x16x768xf32> -> vector<2x16x768xf32>
    "tpu.trace_stop"() : () -> ()
    %27 = tpu.iota {dimensions = array<i32: 1>} : vector<2x16x768xi32>
    %c13_i32_10 = arith.constant 13 : i32
    %28 = vector.broadcast %c13_i32_10 : i32 to vector<2x16x768xi32>
    %29 = arith.cmpi slt, %27, %28 : vector<2x16x768xi32>
    %cst_11 = arith.constant 0.000000e+00 : f32
    %30 = vector.broadcast %cst_11 : f32 to vector<2x16x768xf32>
    %31 = arith.select %29, %26, %30 : vector<2x16x768xi1>, vector<2x16x768xf32>
    %cst_12 = arith.constant dense<0.000000e+00> : vector<2x768xf32>
    %32 = vector.multi_reduction <add>, %31, %cst_12 [1] : vector<2x16x768xf32> to vector<2x768xf32>
    %cst_13 = arith.constant 1.300000e+01 : f32
    %33 = vector.broadcast %cst_13 : f32 to vector<2x768xf32>
    %34 = arith.divf %32, %33 : vector<2x768xf32>
    %35 = vector.shape_cast %34 : vector<2x768xf32> to vector<2x1x768xf32>
    %36 = vector.broadcast %35 : vector<2x1x768xf32> to vector<2x16x768xf32>
    %37 = arith.subf %26, %36 : vector<2x16x768xf32>
    %cst_14 = arith.constant 0.000000e+00 : f32
    %38 = vector.broadcast %cst_14 : f32 to vector<2x16x768xf32>
    %39 = arith.select %29, %37, %38 : vector<2x16x768xi1>, vector<2x16x768xf32>
    %40 = arith.mulf %39, %39 : vector<2x16x768xf32>
    %cst_15 = arith.constant dense<0.000000e+00> : vector<2x768xf32>
    %41 = vector.multi_reduction <add>, %40, %cst_15 [1] : vector<2x16x768xf32> to vector<2x768xf32>
    %cst_16 = arith.constant 1.200000e+01 : f32
    %42 = vector.broadcast %cst_16 : f32 to vector<2x768xf32>
    %43 = arith.divf %41, %42 : vector<2x768xf32>
    %44 = math.sqrt %43 : vector<2x768xf32>
    %45 = tpu.concatenate %34, %44 in 1 : vector<2x768xf32>, vector<2x768xf32> -> vector<2x1536xf32>
    %c0_17 = arith.constant 0 : index
    %c0_18 = arith.constant 0 : index
    %46 = vector.load %arg4[%c0_17, %c0_18] : memref<1536x128xf32, #tpu.memory_space<vmem>>, vector<1536x128xf32>
    %cst_19 = arith.constant dense<0.000000e+00> : vector<2x128xf32>
    %47 = tpu.matmul %45, %46, %cst_19 {dimension_numbers = #tpu.dot_dimension_numbers<[1], [0], [0], [1], [0, 0, 1, 1], [], []>} : vector<2x1536xf32>, vector<1536x128xf32>, vector<2x128xf32> -> vector<2x128xf32>
    %c0_20 = arith.constant 0 : index
    %c0_21 = arith.constant 0 : index
    %48 = vector.load %arg5[%c0_20, %c0_21] : memref<1x128xf32, #tpu.memory_space<vmem>>, vector<1x128xf32>
    %49 = vector.broadcast %48 : vector<1x128xf32> to vector<2x128xf32>
    %50 = arith.addf %47, %49 : vector<2x128xf32>
    %51 = tpu.iota {dimensions = array<i32: 1>} : vector<2x128xi32>
    %c2_i32 = arith.constant 2 : i32
    %52 = vector.broadcast %c2_i32 : i32 to vector<2x128xi32>
    %53 = arith.cmpi eq, %51, %52 : vector<2x128xi32>
    %54 = arith.negf %50 : vector<2x128xf32>
    %55 = math.exp %54 : vector<2x128xf32>
    %cst_22 = arith.constant 1.000000e+00 : f32
    %56 = vector.broadcast %cst_22 : f32 to vector<2x128xf32>
    %57 = arith.addf %56, %55 : vector<2x128xf32>
    %58 = arith.divf %56, %57 : vector<2x128xf32>
    %59 = arith.select %53, %58, %50 : vector<2x128xi1>, vector<2x128xf32>
    %c0_23 = arith.constant 0 : index
    %c0_24 = arith.constant 0 : index
    %60 = vector.load %arg6[%c0_23, %c0_24] : memref<2x128xf32, #tpu.memory_space<vmem>>, vector<2x128xf32>
    tpu.vector_store %arg6[%c0_23, %c0_24], %59 {strides = array<i32>} : memref<2x128xf32, #tpu.memory_space<vmem>>, vector<2x128xf32>,
    return
  }
  func.func @transform_0(%arg0: i32) -> (i32, i32) {
    %c0_i32 = arith.constant 0 : i32
    %c0_i32_0 = arith.constant 0 : i32
    return %arg0, %c0_i32 : i32, i32
  }
  func.func @transform_1(%arg0: i32) -> (i32, i32) {
    %c0_i32 = arith.constant 0 : i32
    %c0_i32_0 = arith.constant 0 : i32
    %c0_i32_1 = arith.constant 0 : i32
    return %c0_i32, %c0_i32_0 : i32, i32
  }
  func.func @transform_2(%arg0: i32) -> (i32, i32) {
    %c0_i32 = arith.constant 0 : i32
    %c0_i32_0 = arith.constant 0 : i32
    %c0_i32_1 = arith.constant 0 : i32
    return %c0_i32, %c0_i32_0 : i32, i32
  }
  func.func @transform_3(%arg0: i32) -> (i32, i32) {
    %c0_i32 = arith.constant 0 : i32
    %c0_i32_0 = arith.constant 0 : i32
    %c0_i32_1 = arith.constant 0 : i32
    return %c0_i32, %c0_i32_0 : i32, i32
  }
  func.func @transform_4(%arg0: i32) -> (i32, i32) {
    %c0_i32 = arith.constant 0 : i32
    %c0_i32_0 = arith.constant 0 : i32
    %c0_i32_1 = arith.constant 0 : i32
    return %c0_i32, %c0_i32_0 : i32, i32
  }
  func.func @transform_5(%arg0: i32) -> (i32, i32) {
    %c0_i32 = arith.constant 0 : i32
    %c0_i32_0 = arith.constant 0 : i32
    return %arg0, %c0_i32 : i32, i32
  }
}

</mosaic_0001>

<bundles_post_ra>
// kernel: tpu_custom_call.1
= control target key start
LH: loop header
LB: loop body
LE: loop exit
PB: predicated region body
PF: predicated region fallthrough
CT: control target
= control target key end

     0   :  { %10 = vsyncpa [#allocation3], 0  ;;  %s10136_s0 = inlined_call_operand.hbm [shape: f32[32,768], index: 0, kind: input, shape index: {}]   ;;  %s10137_s1 = inlined_call_operand.hbm [shape: f32[768,2304], index: 1, kind: input, shape index: {}]   ;;  %s10138_s2 = inlined_call_operand.hbm [shape: f32[1,2304], index: 2, kind: input, shape index: {}]   ;;  %s10139_s3 = inlined_call_operand.hbm [shape: f32[1536,128], index: 3, kind: input, shape index: {}]   ;;  %s10140_s4 = inlined_call_operand.hbm [shape: f32[1,128], index: 4, kind: input, shape index: {}]   ;;  %s10141_s5 = inlined_call_operand.hbm [shape: f32[2,128], index: 5, kind: output, shape index: {}]  }
   0x1   :  { %11 = vsyncpa [#allocation6], 0 }
   0x2   :  { %12 = vsyncpa [#allocation9], 0 }
   0x3   :  { %13 = vsyncpa [#allocation4], 0  ;;  %s9098_s18 = smov [#allocation5]   ;;  %s8958_s22 = scalar_lea.hbm %s10137_s1, 221184 }
   0x4   :  { %s31_s19 = sshll.u32 %s9098_s18, 4  ;;  %p8959_p0 = scmp.ne.s32.totalorder %s10137_s1, %s8958_s22  ;;  %s32_s19 = int_to_ptr.vmem [resolvable:$true] %s31_s19 }
   0x5   :  { %p8962_p1 = scmp.lt.u32.totalorder %s8958_s22, %s10137_s1 }
   0x7   :  { %p8964_p2 = pnand %p8962_p1, %p8959_p0 }
   0x9   :  { %8967 = shalt.err (!%p8964_p2)
}
   0xa   :  { %s8968_s27 = scalar_lea.vmem %s32_s19, 221184  ;;  %p8973_p4 = scmp.lt.s32.totalorder %s32_s19, %s32_s19 }
   0xb   :  { %p8969_p3 = scmp.ne.s32.totalorder %s32_s19, %s8968_s27  ;;  %p8974_p5 = scmp.lt.s32.totalorder %s8968_s27, %s8968_s27 }
   0xd   :  { %p8975_p6 = por %p8974_p5, %p8973_p4 }
   0xf   :  { %p8976_p7 = pnand %p8975_p6, %p8969_p3 }
  0x11   :  { %8979 = shalt.err (!%p8976_p7)
}
  0x12   :  { %s9099_s28 = smov 2304   ;;  %s9100_s29 = smov 144  }
  0x13   :  { %37 = dma.hbm_to_vmem [thread:$0]  %s10137_s1, 221184, %s32_s19, [#allocation6], %s9099_s28, %s9099_s28, %s9100_s29  }
  0x14   :  { %s9101_s7 = smov [#allocation8]   ;;  %s8980_s11 = scalar_lea.hbm %s10139_s3, 24576 }
  0x15   :  { %s53_s8 = sshll.u32 %s9101_s7, 4  ;;  %p8981_p8 = scmp.ne.s32.totalorder %s10139_s3, %s8980_s11  ;;  %s54_s8 = int_to_ptr.vmem [resolvable:$true] %s53_s8 }
  0x16   :  { %p8984_p9 = scmp.lt.u32.totalorder %s8980_s11, %s10139_s3 }
  0x18   :  { %p8986_p10 = pnand %p8984_p9, %p8981_p8 }
  0x1a   :  { %8989 = shalt.err (!%p8986_p10)
}
  0x1b   :  { %s8990_s16 = scalar_lea.vmem %s54_s8, 24576  ;;  %p8995_p12 = scmp.lt.s32.totalorder %s54_s8, %s54_s8 }
  0x1c   :  { %p8991_p11 = scmp.ne.s32.totalorder %s54_s8, %s8990_s16  ;;  %p8996_p13 = scmp.lt.s32.totalorder %s8990_s16, %s8990_s16 }
  0x1e   :  { %p8997_p0 = por %p8996_p13, %p8995_p12 }
  0x20   :  { %p8998_p1 = pnand %p8997_p0, %p8991_p11 }
  0x22   :  { %9001 = shalt.err (!%p8998_p1)
}
  0x23   :  { %s9102_s1 = smov 128   ;;  %s9103_s17 = smov 8  }
  0x24   :  { %59 = dma.hbm_to_vmem [thread:$0]  %s10139_s3, 24576, %s54_s8, [#allocation9], %s9102_s1, %s9102_s1, %s9103_s17  }
  0x25   :  { %s9104_s20 = smov [#allocation2]   ;;  %s9002_s24 = scalar_lea.hbm %s10136_s0, 3072 }
  0x26   :  { %s19_s21 = sshll.u32 %s9104_s20, 4  ;;  %p9003_p2 = scmp.ne.s32.totalorder %s10136_s0, %s9002_s24  ;;  %s20_s21 = int_to_ptr.vmem [resolvable:$true] %s19_s21 }
  0x27   :  { %p9006_p3 = scmp.lt.u32.totalorder %s9002_s24, %s10136_s0 }
  0x29   :  { %p9008_p4 = pnand %p9006_p3, %p9003_p2 }
  0x2b   :  { %9011 = shalt.err (!%p9008_p4)
}
  0x2c   :  { %s9012_s29 = scalar_lea.vmem %s20_s21, 3072  ;;  %p9017_p6 = scmp.lt.s32.totalorder %s20_s21, %s20_s21 }
  0x2d   :  { %p9013_p5 = scmp.ne.s32.totalorder %s20_s21, %s9012_s29  ;;  %p9018_p7 = scmp.lt.s32.totalorder %s9012_s29, %s9012_s29 }
  0x2f   :  { %p9019_p8 = por %p9018_p7, %p9017_p6 }
  0x31   :  { %p9020_p9 = pnand %p9019_p8, %p9013_p5 }
  0x33   :  { %9023 = shalt.err (!%p9020_p9)
}
  0x34   :  { %s9105_s3 = smov 768   ;;  %s9106_s30 = smov 48  }
  0x35   :  { %25 = dma.hbm_to_vmem [thread:$0]  %s10136_s0, 3072, %s20_s21, [#allocation3], %s9105_s3, %s9105_s3, %s9106_s30  }
  0x36   :  { %s9107_s8 = smov [#allocation7]   ;;  %s9108_s10 = smov [#allocation10]  }
  0x37   :  { %s44_s9 = sshll.u32 %s9107_s8, 4  ;;  %s66_s11 = sshll.u32 %s9108_s10, 4  ;;  %s45_s9 = int_to_ptr.vmem [resolvable:$true] %s44_s9  ;;  %s67_s11 = int_to_ptr.vmem [resolvable:$true] %s66_s11 }
  0x38   :  { %s9024_s14 = scalar_lea.hbm %s10138_s2, 288 }
  0x39   :  { %p9025_p10 = scmp.ne.s32.totalorder %s10138_s2, %s9024_s14  ;;  %p9028_p11 = scmp.lt.u32.totalorder %s9024_s14, %s10138_s2 }
  0x3b   :  { %p9030_p12 = pnand %p9028_p11, %p9025_p10 }
  0x3d   :  { %9033 = shalt.err (!%p9030_p12)
}
  0x3e   :  { %s9034_s0 = scalar_lea.vmem %s45_s9, 288  ;;  %p9039_p0 = scmp.lt.s32.totalorder %s45_s9, %s45_s9 }
  0x3f   :  { %p9035_p13 = scmp.ne.s32.totalorder %s45_s9, %s9034_s0  ;;  %p9040_p1 = scmp.lt.s32.totalorder %s9034_s0, %s9034_s0 }
  0x41   :  { %p9041_p2 = por %p9040_p1, %p9039_p0 }
  0x43   :  { %p9042_p3 = pnand %p9041_p2, %p9035_p13 }
  0x45   :  { %9045 = shalt.err (!%p9042_p3)
}
  0x46   :  { %47 = dma.hbm_to_vmem [thread:$0]  %s10138_s2, 288, %s45_s9, [#allocation6]  }
  0x47   :  { %s9046_s22 = scalar_lea.hbm %s10140_s4, 16 }
  0x48   :  { %p9047_p4 = scmp.ne.s32.totalorder %s10140_s4, %s9046_s22  ;;  %p9050_p5 = scmp.lt.u32.totalorder %s9046_s22, %s10140_s4 }
  0x4a   :  { %p9052_p6 = pnand %p9050_p5, %p9047_p4 }
  0x4c   :  { %9055 = shalt.err (!%p9052_p6)
}
  0x4d   :  { %s9056_s27 = scalar_lea.vmem %s67_s11, 16  ;;  %s9060_s28 = scalar_lea.vmem %s67_s11, 32 }
  0x4e   :  { %p9057_p7 = scmp.ne.s32.totalorder %s67_s11, %s9056_s27  ;;  %p9061_p8 = scmp.lt.s32.totalorder %s67_s11, %s67_s11 }
  0x4f   :  { %p9062_p9 = scmp.lt.s32.totalorder %s9060_s28, %s9056_s27 }
  0x51   :  { %p9063_p10 = por %p9062_p9, %p9061_p8 }
  0x53   :  { %p9064_p11 = pnand %p9063_p10, %p9057_p7 }
  0x55   :  { %9067 = shalt.err (!%p9064_p11)
}
  0x56   :  { %69 = dma.hbm_to_vmem [thread:$0]  %s10140_s4, 16, %s67_s11, [#allocation9]  }
  0x57   :  { %9090 = dma.done.wait [#allocation3], 3072  }
  0x58   :  { %9091 = vsyncadd [#allocation3], 4294964224 }
  0x59   :  { %9092 = dma.done.wait [#allocation6], 221472  }
  0x5a   :  { %9093 = vsyncadd [#allocation6], 4294745824 }
  0x5b   :  { %9094 = dma.done.wait [#allocation9], 24592  }
  0x5c   :  { %9095 = vsyncadd [#allocation9], 4294942704  ;;  %v110_v0 = vld [vmem:[#allocation5 + $0x8] sm:$0xff]  ;;  %v128_v1 = vld [vmem:[#allocation5 + $0x98] sm:$0xff]  ;;  %vm4793_vm1 = vcmask 130048   ;;  %vm5703_vm3 = vcmask 1041409  }
  0x5d   :  { %v112_v2 = vld [vmem:[#allocation5 + $0x18] sm:$0xff]  ;;  %v6609_v3 = vpack.c.bf16 %v128_v1, %v110_v0  ;;  %v130_v4 = vld [vmem:[#allocation5 + $0xa8] sm:$0xff]  ;;  %v109_v5 = vld [vmem:[#allocation5] sm:$0xff]  ;;  %s9110_s4 = smov [#allocation11]  }
  0x5e   :  { %v127_v6 = vld [vmem:[#allocation5 + $0x90] sm:$0xff]  ;;  %v6801_v7 = vpack.c.bf16 %v130_v4, %v112_v2  ;;  %v129_v10 = vld [vmem:[#allocation5 + $0xa0] sm:$0xff]  ;;  %v146_v11 = vld [vmem:[#allocation5 + $0x128] sm:$0xff]  ;;  %s6374_s3 = sshll.u32 %s9110_s4, 4  ;;  %s6375_s3 = int_to_ptr.vmem [resolvable:$true] %s6374_s3 }
  0x5f   :  { %v6611_v8 = vpack.c.bf16 %v127_v6, %v109_v5  ;;  %v111_v9 = vld [vmem:[#allocation5 + $0x10] sm:$0xff]  ;;  %6610 = vmatprep.subr.bf16.mxu0 %v6609_v3  ;;  %v164_v13 = vld [vmem:[#allocation5 + $0x1b8] sm:$0xff]  ;;  %v166_v15 = vld [vmem:[#allocation5 + $0x1c8] sm:$0xff]  ;;  %s9068_s30 = scalar_lea.vmem %s6375_s3, 32  ;;  %p9073_p13 = scmp.lt.s32.totalorder %s6375_s3, %s6375_s3 }
  0x60   :  { %v6803_v12 = vpack.c.bf16 %v129_v10, %v111_v9  ;;  %v148_v14 = vld [vmem:[#allocation5 + $0x138] sm:$0xff]  ;;  %6802 = vmatprep.subr.bf16.mxu1 %v6801_v7  ;;  %v6613_v16 = vpack.c.bf16 %v164_v13, %v146_v11  ;;  %v145_v18 = vld [vmem:[#allocation5 + $0x120] sm:$0xff]  ;;  %v163_v19 = vld [vmem:[#allocation5 + $0x1b0] sm:$0xff]  ;;  %p9069_p12 = scmp.ne.s32.totalorder %s6375_s3, %s9068_s30  ;;  %p9074_p0 = scmp.lt.s32.totalorder %s9068_s30, %s9068_s30 }
  0x61   :  { %6612 = vmatpush1.bf16.msra.mxu0 %v6611_v8  ;;  %v6805_v17 = vpack.c.bf16 %v166_v15, %v148_v14  ;;  %v147_v20 = vld [vmem:[#allocation5 + $0x130] sm:$0xff]  ;;  %v6615_v21 = vpack.c.bf16 %v163_v19, %v145_v18  ;;  %v165_v22 = vld [vmem:[#allocation5 + $0x1c0] sm:$0xff]  ;;  %v182_v23 = vld [vmem:[#allocation5 + $0x248] sm:$0xff] }
  0x62   :  { %6804 = vmatpush1.bf16.msra.mxu1 %v6803_v12  ;;  %v200_v24 = vld [vmem:[#allocation5 + $0x2d8] sm:$0xff]  ;;  %6614 = vmatprep.subr.bf16.mxu0 %v6613_v16  ;;  %v6807_v25 = vpack.c.bf16 %v165_v22, %v147_v20  ;;  %v202_v28 = vld [vmem:[#allocation5 + $0x2e8] sm:$0xff]  ;;  %v181_v29 = vld [vmem:[#allocation5 + $0x240] sm:$0xff]  ;;  %p9075_p1 = por %p9074_p0, %p9073_p13 }
  0x63   :  { %6806 = vmatprep.subr.bf16.mxu1 %v6805_v17  ;;  %v6617_v26 = vpack.c.bf16 %v200_v24, %v182_v23  ;;  %v184_v27 = vld [vmem:[#allocation5 + $0x258] sm:$0xff]  ;;  %v199_v31 = vld [vmem:[#allocation5 + $0x2d0] sm:$0xff]  ;;  %v201_v33 = vld [vmem:[#allocation5 + $0x2e0] sm:$0xff] }
  0x64   :  { %v6809_v30 = vpack.c.bf16 %v202_v28, %v184_v27  ;;  %v183_v32 = vld [vmem:[#allocation5 + $0x250] sm:$0xff]  ;;  %v6619_v34 = vpack.c.bf16 %v199_v31, %v181_v29  ;;  %v218_v35 = vld [vmem:[#allocation5 + $0x368] sm:$0xff]  ;;  %v236_v36 = vld [vmem:[#allocation5 + $0x3f8] sm:$0xff]  ;;  %p9076_p2 = pnand %p9075_p1, %p9069_p12 }
  0x65   :  { %6616 = vmatpush1.bf16.msra.mxu0 %v6615_v21  ;;  %v220_v37 = vld [vmem:[#allocation5 + $0x378] sm:$0xff]  ;;  %v6811_v38 = vpack.c.bf16 %v201_v33, %v183_v32  ;;  %v6621_v39 = vpack.c.bf16 %v236_v36, %v218_v35  ;;  %v238_v40 = vld [vmem:[#allocation5 + $0x408] sm:$0xff]  ;;  %v217_v41 = vld [vmem:[#allocation5 + $0x360] sm:$0xff] }
  0x66   :  { %6808 = vmatpush1.bf16.msra.mxu1 %v6807_v25  ;;  %6618 = vmatprep.subr.bf16.mxu0 %v6617_v26  ;;  %v235_v42 = vld [vmem:[#allocation5 + $0x3f0] sm:$0xff]  ;;  %v6813_v43 = vpack.c.bf16 %v238_v40, %v220_v37  ;;  %v237_v45 = vld [vmem:[#allocation5 + $0x400] sm:$0xff]  ;;  %v254_v46 = vld [vmem:[#allocation5 + $0x488] sm:$0xff] }
  0x67   :  { %6810 = vmatprep.subr.bf16.mxu1 %v6809_v30  ;;  %v219_v44 = vld [vmem:[#allocation5 + $0x370] sm:$0xff]  ;;  %v272_v47 = vld [vmem:[#allocation5 + $0x518] sm:$0xff]  ;;  %v274_v49 = vld [vmem:[#allocation5 + $0x528] sm:$0xff]  ;;  %v6623_v50 = vpack.c.bf16 %v235_v42, %v217_v41 }
  0x68   :  { %v256_v48 = vld [vmem:[#allocation5 + $0x498] sm:$0xff]  ;;  %v6815_v51 = vpack.c.bf16 %v237_v45, %v219_v44  ;;  %v6625_v52 = vpack.c.bf16 %v272_v47, %v254_v46  ;;  %v253_v53 = vld [vmem:[#allocation5 + $0x480] sm:$0xff]  ;;  %v271_v54 = vld [vmem:[#allocation5 + $0x510] sm:$0xff] }
  0x69   :  { %6620 = vmatpush1.bf16.msra.mxu0 %v6619_v34  ;;  %v255_v55 = vld [vmem:[#allocation5 + $0x490] sm:$0xff]  ;;  %v6817_v56 = vpack.c.bf16 %v274_v49, %v256_v48  ;;  %v273_v57 = vld [vmem:[#allocation5 + $0x520] sm:$0xff]  ;;  %v290_v58 = vld [vmem:[#allocation5 + $0x5a8] sm:$0xff]  ;;  %v6627_v62 = vpack.c.bf16 %v271_v54, %v253_v53 }
  0x6a   :  { %6812 = vmatpush1.bf16.msra.mxu1 %v6811_v38  ;;  %6622 = vmatprep.subr.bf16.mxu0 %v6621_v39  ;;  %v308_v59 = vld [vmem:[#allocation5 + $0x638] sm:$0xff]  ;;  %v310_v61 = vld [vmem:[#allocation5 + $0x648] sm:$0xff]  ;;  %v6819_v63 = vpack.c.bf16 %v273_v57, %v255_v55  ;;  %v289_v1 = vld [vmem:[#allocation5 + $0x5a0] sm:$0xff] }
  0x6b   :  { %6814 = vmatprep.subr.bf16.mxu1 %v6813_v43  ;;  %v292_v60 = vld [vmem:[#allocation5 + $0x5b8] sm:$0xff]  ;;  %v6629_v0 = vpack.c.bf16 %v308_v59, %v290_v58  ;;  %v307_v2 = vld [vmem:[#allocation5 + $0x630] sm:$0xff]  ;;  %v309_v5 = vld [vmem:[#allocation5 + $0x640] sm:$0xff] }
  0x6c   :  { %v291_v3 = vld [vmem:[#allocation5 + $0x5b0] sm:$0xff]  ;;  %v6821_v4 = vpack.c.bf16 %v310_v61, %v292_v60  ;;  %v326_v6 = vld [vmem:[#allocation5 + $0x6c8] sm:$0xff]  ;;  %v344_v7 = vld [vmem:[#allocation5 + $0x758] sm:$0xff]  ;;  %v6631_v10 = vpack.c.bf16 %v307_v2, %v289_v1 }
  0x6d   :  { %6624 = vmatpush1.bf16.msra.mxu0 %v6623_v50  ;;  %v328_v8 = vld [vmem:[#allocation5 + $0x6d8] sm:$0xff]  ;;  %v346_v9 = vld [vmem:[#allocation5 + $0x768] sm:$0xff]  ;;  %v6823_v11 = vpack.c.bf16 %v309_v5, %v291_v3  ;;  %v6633_v12 = vpack.c.bf16 %v344_v7, %v326_v6  ;;  %v325_v13 = vld [vmem:[#allocation5 + $0x6c0] sm:$0xff] }
  0x6e   :  { %6816 = vmatpush1.bf16.msra.mxu1 %v6815_v51  ;;  %6626 = vmatprep.subr.bf16.mxu0 %v6625_v52  ;;  %v343_v14 = vld [vmem:[#allocation5 + $0x750] sm:$0xff]  ;;  %v6825_v16 = vpack.c.bf16 %v346_v9, %v328_v8  ;;  %v345_v17 = vld [vmem:[#allocation5 + $0x760] sm:$0xff]  ;;  %v362_v18 = vld [vmem:[#allocation5 + $0x7e8] sm:$0xff] }
  0x6f   :  { %6818 = vmatprep.subr.bf16.mxu1 %v6817_v56  ;;  %v327_v15 = vld [vmem:[#allocation5 + $0x6d0] sm:$0xff]  ;;  %v380_v19 = vld [vmem:[#allocation5 + $0x878] sm:$0xff]  ;;  %v382_v21 = vld [vmem:[#allocation5 + $0x888] sm:$0xff]  ;;  %v6635_v22 = vpack.c.bf16 %v343_v14, %v325_v13 }
  0x70   :  { %v364_v20 = vld [vmem:[#allocation5 + $0x7f8] sm:$0xff]  ;;  %v6827_v23 = vpack.c.bf16 %v345_v17, %v327_v15  ;;  %v6637_v24 = vpack.c.bf16 %v380_v19, %v362_v18  ;;  %v361_v25 = vld [vmem:[#allocation5 + $0x7e0] sm:$0xff]  ;;  %v379_v26 = vld [vmem:[#allocation5 + $0x870] sm:$0xff] }
  0x71   :  { %6628 = vmatpush1.bf16.msra.mxu0 %v6627_v62  ;;  %v363_v27 = vld [vmem:[#allocation5 + $0x7f0] sm:$0xff]  ;;  %v6829_v28 = vpack.c.bf16 %v382_v21, %v364_v20  ;;  %v381_v29 = vld [vmem:[#allocation5 + $0x880] sm:$0xff]  ;;  %v398_v30 = vld [vmem:[#allocation5 + $0x908] sm:$0xff]  ;;  %v6639_v34 = vpack.c.bf16 %v379_v26, %v361_v25 }
  0x72   :  { %6820 = vmatpush1.bf16.msra.mxu1 %v6819_v63  ;;  %6630 = vmatprep.subr.bf16.mxu0 %v6629_v0  ;;  %v416_v31 = vld [vmem:[#allocation5 + $0x998] sm:$0xff]  ;;  %v418_v33 = vld [vmem:[#allocation5 + $0x9a8] sm:$0xff]  ;;  %v6831_v35 = vpack.c.bf16 %v381_v29, %v363_v27  ;;  %v397_v37 = vld [vmem:[#allocation5 + $0x900] sm:$0xff] }
  0x73   :  { %6822 = vmatprep.subr.bf16.mxu1 %v6821_v4  ;;  %v400_v32 = vld [vmem:[#allocation5 + $0x918] sm:$0xff]  ;;  %v6641_v36 = vpack.c.bf16 %v416_v31, %v398_v30  ;;  %v415_v38 = vld [vmem:[#allocation5 + $0x990] sm:$0xff]  ;;  %v417_v41 = vld [vmem:[#allocation5 + $0x9a0] sm:$0xff] }
  0x74   :  { %v399_v39 = vld [vmem:[#allocation5 + $0x910] sm:$0xff]  ;;  %v6833_v40 = vpack.c.bf16 %v418_v33, %v400_v32  ;;  %v434_v42 = vld [vmem:[#allocation5 + $0xa28] sm:$0xff]  ;;  %v452_v43 = vld [vmem:[#allocation5 + $0xab8] sm:$0xff]  ;;  %v6643_v46 = vpack.c.bf16 %v415_v38, %v397_v37 }
  0x75   :  { %6632 = vmatpush1.bf16.msra.mxu0 %v6631_v10  ;;  %v436_v44 = vld [vmem:[#allocation5 + $0xa38] sm:$0xff]  ;;  %v454_v45 = vld [vmem:[#allocation5 + $0xac8] sm:$0xff]  ;;  %v6835_v47 = vpack.c.bf16 %v417_v41, %v399_v39  ;;  %v6645_v48 = vpack.c.bf16 %v452_v43, %v434_v42  ;;  %v433_v49 = vld [vmem:[#allocation5 + $0xa20] sm:$0xff] }
  0x76   :  { %6824 = vmatpush1.bf16.msra.mxu1 %v6823_v11  ;;  %6634 = vmatprep.subr.bf16.mxu0 %v6633_v12  ;;  %v451_v50 = vld [vmem:[#allocation5 + $0xab0] sm:$0xff]  ;;  %v6837_v52 = vpack.c.bf16 %v454_v45, %v436_v44  ;;  %v453_v53 = vld [vmem:[#allocation5 + $0xac0] sm:$0xff]  ;;  %v470_v54 = vld [vmem:[#allocation5 + $0xb48] sm:$0xff] }
  0x77   :  { %6826 = vmatprep.subr.bf16.mxu1 %v6825_v16  ;;  %v435_v51 = vld [vmem:[#allocation5 + $0xa30] sm:$0xff]  ;;  %v488_v55 = vld [vmem:[#allocation5 + $0xbd8] sm:$0xff]  ;;  %v490_v57 = vld [vmem:[#allocation5 + $0xbe8] sm:$0xff]  ;;  %v6647_v58 = vpack.c.bf16 %v451_v50, %v433_v49 }
  0x78   :  { %v472_v56 = vld [vmem:[#allocation5 + $0xb58] sm:$0xff]  ;;  %v6839_v59 = vpack.c.bf16 %v453_v53, %v435_v51  ;;  %v6649_v60 = vpack.c.bf16 %v488_v55, %v470_v54  ;;  %v469_v61 = vld [vmem:[#allocation5 + $0xb40] sm:$0xff]  ;;  %v487_v62 = vld [vmem:[#allocation5 + $0xbd0] sm:$0xff] }
  0x79   :  { %6636 = vmatpush1.bf16.msra.mxu0 %v6635_v22  ;;  %v471_v63 = vld [vmem:[#allocation5 + $0xb50] sm:$0xff]  ;;  %v6841_v0 = vpack.c.bf16 %v490_v57, %v472_v56  ;;  %v489_v1 = vld [vmem:[#allocation5 + $0xbe0] sm:$0xff]  ;;  %v506_v2 = vld [vmem:[#allocation5 + $0xc68] sm:$0xff]  ;;  %v6651_v6 = vpack.c.bf16 %v487_v62, %v469_v61 }
  0x7a   :  { %6828 = vmatpush1.bf16.msra.mxu1 %v6827_v23  ;;  %6638 = vmatprep.subr.bf16.mxu0 %v6637_v24  ;;  %v524_v3 = vld [vmem:[#allocation5 + $0xcf8] sm:$0xff]  ;;  %v526_v5 = vld [vmem:[#allocation5 + $0xd08] sm:$0xff]  ;;  %v505_v7 = vld [vmem:[#allocation5 + $0xc60] sm:$0xff]  ;;  %v6843_v8 = vpack.c.bf16 %v489_v1, %v471_v63 }
  0x7b   :  { %6830 = vmatprep.subr.bf16.mxu1 %v6829_v28  ;;  %v508_v4 = vld [vmem:[#allocation5 + $0xc78] sm:$0xff]  ;;  %v6653_v9 = vpack.c.bf16 %v524_v3, %v506_v2  ;;  %v523_v10 = vld [vmem:[#allocation5 + $0xcf0] sm:$0xff]  ;;  %v525_v12 = vld [vmem:[#allocation5 + $0xd00] sm:$0xff] }
  0x7c   :  { %v507_v11 = vld [vmem:[#allocation5 + $0xc70] sm:$0xff]  ;;  %v6845_v13 = vpack.c.bf16 %v526_v5, %v508_v4  ;;  %v542_v14 = vld [vmem:[#allocation5 + $0xd88] sm:$0xff]  ;;  %v560_v15 = vld [vmem:[#allocation5 + $0xe18] sm:$0xff]  ;;  %v6655_v19 = vpack.c.bf16 %v523_v10, %v505_v7 }
  0x7d   :  { %6640 = vmatpush1.bf16.msra.mxu0 %v6639_v34  ;;  %v86_v16 = vld [vmem:[#allocation2 + $0x8] sm:$0xff]  ;;  %v544_v17 = vld [vmem:[#allocation5 + $0xd98] sm:$0xff]  ;;  %v6847_v20 = vpack.c.bf16 %v525_v12, %v507_v11  ;;  %v6657_v21 = vpack.c.bf16 %v560_v15, %v542_v14  ;;  %v541_v22 = vld [vmem:[#allocation5 + $0xd80] sm:$0xff] }
  0x7e   :  { %6832 = vmatpush1.bf16.msra.mxu1 %v6831_v35  ;;  %6642 = vmatprep.subr.bf16.mxu0 %v6641_v36  ;;  %v562_v18 = vld [vmem:[#allocation5 + $0xe28] sm:$0xff]  ;;  %v559_v23 = vld [vmem:[#allocation5 + $0xe10] sm:$0xff]  ;;  %v561_v26 = vld [vmem:[#allocation5 + $0xe20] sm:$0xff] }
  0x7f   :  { %6834 = vmatprep.subr.bf16.mxu1 %v6833_v40  ;;  %1997 = vmatprep.mubr.f32.mxu0 %v86_v16  ;;  %v543_v24 = vld [vmem:[#allocation5 + $0xd90] sm:$0xff]  ;;  %v6849_v25 = vpack.c.bf16 %v562_v18, %v544_v17  ;;  %v578_v27 = vld [vmem:[#allocation5 + $0xea8] sm:$0xff]  ;;  %v596_v28 = vld [vmem:[#allocation5 + $0xf38] sm:$0xff]  ;;  %v6659_v31 = vpack.c.bf16 %v559_v23, %v541_v22 }
  0x80   :  { %2264 = vmatprep.mubr.f32.mxu1 %v86_v16  ;;  %v580_v29 = vld [vmem:[#allocation5 + $0xeb8] sm:$0xff]  ;;  %v598_v30 = vld [vmem:[#allocation5 + $0xf48] sm:$0xff]  ;;  %v6851_v32 = vpack.c.bf16 %v561_v26, %v543_v24  ;;  %v6661_v33 = vpack.c.bf16 %v596_v28, %v578_v27  ;;  %v577_v34 = vld [vmem:[#allocation5 + $0xea0] sm:$0xff] }
  0x81   :  { %6644 = vmatpush1.bf16.msra.mxu0 %v6643_v46  ;;  %v595_v35 = vld [vmem:[#allocation5 + $0xf30] sm:$0xff]  ;;  %v6853_v37 = vpack.c.bf16 %v598_v30, %v580_v29  ;;  %v597_v38 = vld [vmem:[#allocation5 + $0xf40] sm:$0xff]  ;;  %v614_v39 = vld [vmem:[#allocation5 + $0xfc8] sm:$0xff] }
  0x82   :  { %6836 = vmatpush1.bf16.msra.mxu1 %v6835_v47  ;;  %6646 = vmatprep.subr.bf16.mxu0 %v6645_v48  ;;  %v579_v36 = vld [vmem:[#allocation5 + $0xeb0] sm:$0xff]  ;;  %v632_v40 = vld [vmem:[#allocation5 + $0x1058] sm:$0xff]  ;;  %v634_v42 = vld [vmem:[#allocation5 + $0x1068] sm:$0xff]  ;;  %v6663_v43 = vpack.c.bf16 %v595_v35, %v577_v34 }
  0x83   :  { %6838 = vmatprep.subr.bf16.mxu1 %v6837_v52  ;;  %v616_v41 = vld [vmem:[#allocation5 + $0xfd8] sm:$0xff]  ;;  %v6855_v44 = vpack.c.bf16 %v597_v38, %v579_v36  ;;  %v6665_v45 = vpack.c.bf16 %v632_v40, %v614_v39  ;;  %v613_v46 = vld [vmem:[#allocation5 + $0xfc0] sm:$0xff]  ;;  %v631_v47 = vld [vmem:[#allocation5 + $0x1050] sm:$0xff] }
  0x84   :  { %v615_v48 = vld [vmem:[#allocation5 + $0xfd0] sm:$0xff]  ;;  %v6857_v49 = vpack.c.bf16 %v634_v42, %v616_v41  ;;  %v633_v50 = vld [vmem:[#allocation5 + $0x1060] sm:$0xff]  ;;  %v650_v51 = vld [vmem:[#allocation5 + $0x10e8] sm:$0xff]  ;;  %v6667_v55 = vpack.c.bf16 %v631_v47, %v613_v46 }
  0x85   :  { %6648 = vmatpush1.bf16.msra.mxu0 %v6647_v58  ;;  %v668_v52 = vld [vmem:[#allocation5 + $0x1178] sm:$0xff]  ;;  %v670_v54 = vld [vmem:[#allocation5 + $0x1188] sm:$0xff]  ;;  %v6859_v56 = vpack.c.bf16 %v633_v50, %v615_v48  ;;  %v649_v58 = vld [vmem:[#allocation5 + $0x10e0] sm:$0xff] }
  0x86   :  { %6840 = vmatpush1.bf16.msra.mxu1 %v6839_v59  ;;  %6650 = vmatprep.subr.bf16.mxu0 %v6649_v60  ;;  %v652_v53 = vld [vmem:[#allocation5 + $0x10f8] sm:$0xff]  ;;  %v6669_v57 = vpack.c.bf16 %v668_v52, %v650_v51  ;;  %v667_v59 = vld [vmem:[#allocation5 + $0x1170] sm:$0xff]  ;;  %v669_v62 = vld [vmem:[#allocation5 + $0x1180] sm:$0xff] }
  0x87   :  { %6842 = vmatprep.subr.bf16.mxu1 %v6841_v0  ;;  %v651_v60 = vld [vmem:[#allocation5 + $0x10f0] sm:$0xff]  ;;  %v6861_v61 = vpack.c.bf16 %v670_v54, %v652_v53  ;;  %v686_v63 = vld [vmem:[#allocation5 + $0x1208] sm:$0xff]  ;;  %v704_v0 = vld [vmem:[#allocation5 + $0x1298] sm:$0xff]  ;;  %v6671_v3 = vpack.c.bf16 %v667_v59, %v649_v58 }
  0x88   :  { %v688_v1 = vld [vmem:[#allocation5 + $0x1218] sm:$0xff]  ;;  %v706_v2 = vld [vmem:[#allocation5 + $0x12a8] sm:$0xff]  ;;  %v6863_v4 = vpack.c.bf16 %v669_v62, %v651_v60  ;;  %v6673_v5 = vpack.c.bf16 %v704_v0, %v686_v63  ;;  %v703_v7 = vld [vmem:[#allocation5 + $0x1290] sm:$0xff] }
  0x89   :  { %6652 = vmatpush1.bf16.msra.mxu0 %v6651_v6  ;;  %v685_v6 = vld [vmem:[#allocation5 + $0x1200] sm:$0xff]  ;;  %v722_v11 = vld [vmem:[#allocation5 + $0x1328] sm:$0xff]  ;;  %v740_v12 = vld [vmem:[#allocation5 + $0x13b8] sm:$0xff] }
  0x8a   :  { %6844 = vmatpush1.bf16.msra.mxu1 %v6843_v8  ;;  %6654 = vmatprep.subr.bf16.mxu0 %v6653_v9  ;;  %v687_v8 = vld [vmem:[#allocation5 + $0x1210] sm:$0xff]  ;;  %v6865_v9 = vpack.c.bf16 %v706_v2, %v688_v1  ;;  %v705_v10 = vld [vmem:[#allocation5 + $0x12a0] sm:$0xff]  ;;  %v742_v14 = vld [vmem:[#allocation5 + $0x13c8] sm:$0xff]  ;;  %v6675_v16 = vpack.c.bf16 %v703_v7, %v685_v6  ;;  %v6677_v18 = vpack.c.bf16 %v740_v12, %v722_v11 }
  0x8b   :  { %6846 = vmatprep.subr.bf16.mxu1 %v6845_v13  ;;  %v724_v13 = vld [vmem:[#allocation5 + $0x1338] sm:$0xff]  ;;  %v85_v15 = vld [vmem:[#allocation2] sm:$0xff]  ;;  %v6867_v17 = vpack.c.bf16 %v705_v10, %v687_v8  ;;  %v758_v24 = vld [vmem:[#allocation5 + $0x1448] sm:$0xff] }
  0x8c   :  { %v6869_v22 = vpack.c.bf16 %v742_v14, %v724_v13  ;;  %v741_v23 = vld [vmem:[#allocation5 + $0x13c0] sm:$0xff]  ;;  %v760_v26 = vld [vmem:[#allocation5 + $0x1458] sm:$0xff]  ;;  %v778_v27 = vld [vmem:[#allocation5 + $0x14e8] sm:$0xff] }
  0x8d   :  { %6656 = vmatpush1.bf16.msra.mxu0 %v6655_v19  ;;  %v721_v19 = vld [vmem:[#allocation5 + $0x1320] sm:$0xff]  ;;  %v6873_v34 = vpack.c.bf16 %v778_v27, %v760_v26  ;;  %v794_v36 = vld [vmem:[#allocation5 + $0x1568] sm:$0xff]  ;;  %v796_v38 = vld [vmem:[#allocation5 + $0x1578] sm:$0xff] }
  0x8e   :  { %6848 = vmatpush1.bf16.msra.mxu1 %v6847_v20  ;;  %6658 = vmatprep.subr.bf16.mxu0 %v6657_v21  ;;  %v739_v20 = vld [vmem:[#allocation5 + $0x13b0] sm:$0xff]  ;;  %v777_v35 = vld [vmem:[#allocation5 + $0x14e0] sm:$0xff]  ;;  %v814_v39 = vld [vmem:[#allocation5 + $0x1608] sm:$0xff] }
  0x8f   :  { %6850 = vmatprep.subr.bf16.mxu1 %v6849_v25  ;;  %v723_v21 = vld [vmem:[#allocation5 + $0x1330] sm:$0xff]  ;;  %v776_v25 = vld [vmem:[#allocation5 + $0x14d8] sm:$0xff]  ;;  %v6679_v28 = vpack.c.bf16 %v739_v20, %v721_v19  ;;  %v6877_v46 = vpack.c.bf16 %v814_v39, %v796_v38  ;;  %v813_v47 = vld [vmem:[#allocation5 + $0x1600] sm:$0xff] }
  0x90   :  { %v6871_v29 = vpack.c.bf16 %v741_v23, %v723_v21  ;;  %v6681_v30 = vpack.c.bf16 %v776_v25, %v758_v24  ;;  %v830_v48 = vld [vmem:[#allocation5 + $0x1688] sm:$0xff]  ;;  %v832_v50 = vld [vmem:[#allocation5 + $0x1698] sm:$0xff]  ;;  %v829_v53 = vld [vmem:[#allocation5 + $0x1680] sm:$0xff] }
  0x91   :  { %6660 = vmatpush1.bf16.msra.mxu0 %v6659_v31  ;;  %v757_v31 = vld [vmem:[#allocation5 + $0x1440] sm:$0xff]  ;;  %v850_v51 = vld [vmem:[#allocation5 + $0x1728] sm:$0xff]  ;;  %v92_v62 = vld [vmem:[#allocation2 + $0x38] sm:$0xff] }
  0x92   :  { %6852 = vmatpush1.bf16.msra.mxu1 %v6851_v32  ;;  %6662 = vmatprep.subr.bf16.mxu0 %v6661_v33  ;;  %v775_v32 = vld [vmem:[#allocation5 + $0x14d0] sm:$0xff]  ;;  %v849_v58 = vld [vmem:[#allocation5 + $0x1720] sm:$0xff]  ;;  %v6881_v59 = vpack.c.bf16 %v850_v51, %v832_v50  ;;  %v866_v60 = vld [vmem:[#allocation5 + $0x17a8] sm:$0xff] }
  0x93   :  { %6854 = vmatprep.subr.bf16.mxu1 %v6853_v37  ;;  %v759_v33 = vld [vmem:[#allocation5 + $0x1450] sm:$0xff]  ;;  %v812_v37 = vld [vmem:[#allocation5 + $0x15f8] sm:$0xff]  ;;  %v6683_v40 = vpack.c.bf16 %v775_v32, %v757_v31  ;;  %v886_v0 = vld [vmem:[#allocation5 + $0x1848] sm:$0xff] }
  0x94   :  { %v6875_v41 = vpack.c.bf16 %v777_v35, %v759_v33  ;;  %v6685_v42 = vpack.c.bf16 %v812_v37, %v794_v36  ;;  %v868_v63 = vld [vmem:[#allocation5 + $0x17b8] sm:$0xff]  ;;  %v91_v1 = vld [vmem:[#allocation2 + $0x30] sm:$0xff]  ;;  %v98_v8 = vld [vmem:[#allocation2 + $0x68] sm:$0xff] }
  0x95   :  { %6664 = vmatpush1.bf16.msra.mxu0 %v6663_v43  ;;  %v793_v43 = vld [vmem:[#allocation5 + $0x1560] sm:$0xff]  ;;  %v883_v6 = vld [vmem:[#allocation5 + $0x1830] sm:$0xff]  ;;  %v902_v11 = vld [vmem:[#allocation5 + $0x18c8] sm:$0xff] }
  0x96   :  { %6856 = vmatpush1.bf16.msra.mxu1 %v6855_v44  ;;  %6666 = vmatprep.subr.bf16.mxu0 %v6665_v45  ;;  %v811_v44 = vld [vmem:[#allocation5 + $0x15f0] sm:$0xff]  ;;  %v885_v10 = vld [vmem:[#allocation5 + $0x1840] sm:$0xff]  ;;  %v920_v12 = vld [vmem:[#allocation5 + $0x1958] sm:$0xff] }
  0x97   :  { %6858 = vmatprep.subr.bf16.mxu1 %v6857_v49  ;;  %v795_v45 = vld [vmem:[#allocation5 + $0x1570] sm:$0xff]  ;;  %v848_v49 = vld [vmem:[#allocation5 + $0x1718] sm:$0xff]  ;;  %v6687_v52 = vpack.c.bf16 %v811_v44, %v793_v43  ;;  %v922_v14 = vld [vmem:[#allocation5 + $0x1968] sm:$0xff]  ;;  %v6697_v20 = vpack.c.bf16 %v920_v12, %v902_v11 }
  0x98   :  { %v6879_v54 = vpack.c.bf16 %v813_v47, %v795_v45  ;;  %v867_v7 = vld [vmem:[#allocation5 + $0x17b0] sm:$0xff]  ;;  %v904_v13 = vld [vmem:[#allocation5 + $0x18d8] sm:$0xff]  ;;  %v921_v23 = vld [vmem:[#allocation5 + $0x1960] sm:$0xff] }
  0x99   :  { %6668 = vmatpush1.bf16.msra.mxu0 %v6667_v55  ;;  %v6689_v55 = vpack.c.bf16 %v848_v49, %v830_v48  ;;  %v6887_v19 = vpack.c.bf16 %v885_v10, %v867_v7  ;;  %v919_v21 = vld [vmem:[#allocation5 + $0x1950] sm:$0xff]  ;;  %v6889_v24 = vpack.c.bf16 %v922_v14, %v904_v13  ;;  %v938_v25 = vld [vmem:[#allocation5 + $0x19e8] sm:$0xff]  ;;  %v956_v26 = vld [vmem:[#allocation5 + $0x1a78] sm:$0xff] }
  0x9a   :  { %6860 = vmatpush1.bf16.msra.mxu1 %v6859_v56  ;;  %6670 = vmatprep.subr.bf16.mxu0 %v6669_v57  ;;  %v847_v56 = vld [vmem:[#allocation5 + $0x1710] sm:$0xff]  ;;  %v88_v31 = vld [vmem:[#allocation2 + $0x18] sm:$0xff]  ;;  %v6701_v33 = vpack.c.bf16 %v956_v26, %v938_v25  ;;  %v957_v38 = vld [vmem:[#allocation5 + $0x1a80] sm:$0xff] }
  0x9b   :  { %6862 = vmatprep.subr.bf16.mxu1 %v6861_v61  ;;  %v831_v57 = vld [vmem:[#allocation5 + $0x1690] sm:$0xff]  ;;  %v884_v61 = vld [vmem:[#allocation5 + $0x1838] sm:$0xff]  ;;  %v6691_v2 = vpack.c.bf16 %v847_v56, %v829_v53  ;;  %v974_v39 = vld [vmem:[#allocation5 + $0x1b08] sm:$0xff] }
  0x9c   :  { %v103_v27 = vld [vmem:[#allocation2 + $0x90] sm:$0xff]  ;;  %v993_v50 = vld [vmem:[#allocation5 + $0x1ba0] sm:$0xff]  ;;  %v1010_v51 = vld [vmem:[#allocation5 + $0x1c28] sm:$0xff] }
  0x9d   :  { %6672 = vmatpush1.bf16.msra.mxu0 %v6671_v3  ;;  %v865_v3 = vld [vmem:[#allocation5 + $0x17a0] sm:$0xff]  ;;  %v955_v35 = vld [vmem:[#allocation5 + $0x1a70] sm:$0xff]  ;;  %v1012_v53 = vld [vmem:[#allocation5 + $0x1c38] sm:$0xff] }
  0x9e   :  { %6864 = vmatpush1.bf16.msra.mxu1 %v6863_v4  ;;  %6674 = vmatprep.subr.bf16.mxu0 %v6673_v5  ;;  %v6883_v4 = vpack.c.bf16 %v849_v58, %v831_v57  ;;  %v6693_v5 = vpack.c.bf16 %v884_v61, %v866_v60  ;;  %v939_v36 = vld [vmem:[#allocation5 + $0x19f0] sm:$0xff]  ;;  %v1009_v58 = vld [vmem:[#allocation5 + $0x1c20] sm:$0xff]  ;;  %v1082_v11 = vld [vmem:[#allocation5 + $0x1e68] sm:$0xff] }
  0x9f   :  { %6866 = vmatprep.subr.bf16.mxu1 %v6865_v9  ;;  %v6885_v9 = vpack.c.bf16 %v886_v0, %v868_v63  ;;  %v6895_v44 = vpack.c.bf16 %v957_v38, %v939_v36  ;;  %v991_v47 = vld [vmem:[#allocation5 + $0x1b90] sm:$0xff]  ;;  %v1046_v63 = vld [vmem:[#allocation5 + $0x1d48] sm:$0xff]  ;;  %v1064_v0 = vld [vmem:[#allocation5 + $0x1dd8] sm:$0xff] }
  0xa0   :  { %1998 = vmatmul.mubr.f32.vlgmr.msra.gmra.mrb[0].mxu0 %v85_v15  ;;  %v975_v48 = vld [vmem:[#allocation5 + $0x1b10] sm:$0xff]  ;;  %v1065_v10 = vld [vmem:[#allocation5 + $0x1de0] sm:$0xff]  ;;  %v1100_v12 = vld [vmem:[#allocation5 + $0x1ef8] sm:$0xff] }
  0xa1   :  { %6676 = vmatpush1.bf16.msra.mxu0 %v6675_v16  ;;  %2265 = vmatmul.mubr.f32.vlgmr.msra.gmra.mrb[0].mxu1 %v85_v15  ;;  %v97_v15 = vld [vmem:[#allocation2 + $0x60] sm:$0xff]  ;;  %v6695_v16 = vpack.c.bf16 %v883_v6, %v865_v3  ;;  %v6899_v56 = vpack.c.bf16 %v993_v50, %v975_v48  ;;  %v1011_v60 = vld [vmem:[#allocation5 + $0x1c30] sm:$0xff]  ;;  %v1084_v13 = vld [vmem:[#allocation5 + $0x1e78] sm:$0xff] }
  0xa2   :  { %6868 = vmatpush1.bf16.msra.mxu1 %v6867_v17  ;;  %6678 = vmatprep.subr.bf16.mxu0 %v6677_v18  ;;  %v901_v17 = vld [vmem:[#allocation5 + $0x18c0] sm:$0xff]  ;;  %v104_v18 = vld [vmem:[#allocation2 + $0x98] sm:$0xff]  ;;  %v1063_v7 = vld [vmem:[#allocation5 + $0x1dd0] sm:$0xff] }
  0xa3   :  { %6870 = vmatprep.subr.bf16.mxu1 %v6869_v22  ;;  %2003 = vmatprep.mubr.f32.mxu0 %v92_v62  ;;  %v903_v22 = vld [vmem:[#allocation5 + $0x18d0] sm:$0xff]  ;;  %v1045_v6 = vld [vmem:[#allocation5 + $0x1d40] sm:$0xff]  ;;  %v1102_v14 = vld [vmem:[#allocation5 + $0x1f08] sm:$0xff] }
  0xa4   :  { %2270 = vmatprep.mubr.f32.mxu1 %v92_v62  ;;  %2004 = vmatmul.mubr.f32.gmra.mrb[2].mxu0 %v91_v1  ;;  %v6891_v32 = vpack.c.bf16 %v921_v23, %v903_v22  ;;  %v1029_v62 = vld [vmem:[#allocation5 + $0x1cc0] sm:$0xff]  ;;  %v1118_v23 = vld [vmem:[#allocation5 + $0x1f88] sm:$0xff]  ;;  %v1120_v25 = vld [vmem:[#allocation5 + $0x1f98] sm:$0xff] }
  0xa5   :  { %6680 = vmatpush1.bf16.msra.mxu0 %v6679_v28  ;;  %2271 = vmatmul.mubr.f32.gmra.mrb[2].mxu1 %v91_v1  ;;  %v940_v28 = vld [vmem:[#allocation5 + $0x19f8] sm:$0xff]  ;;  %v1101_v22 = vld [vmem:[#allocation5 + $0x1f00] sm:$0xff]  ;;  %v1138_v26 = vld [vmem:[#allocation5 + $0x2028] sm:$0xff] }
  0xa6   :  { %6872 = vmatpush1.bf16.msra.mxu1 %v6871_v29  ;;  %6682 = vmatprep.subr.bf16.mxu0 %v6681_v30  ;;  %v958_v29 = vld [vmem:[#allocation5 + $0x1a88] sm:$0xff]  ;;  %v6699_v30 = vpack.c.bf16 %v919_v21, %v901_v17  ;;  %v1048_v1 = vld [vmem:[#allocation5 + $0x1d58] sm:$0xff]  ;;  %v6717_v17 = vpack.c.bf16 %v1100_v12, %v1082_v11  ;;  %v6909_v21 = vpack.c.bf16 %v1102_v14, %v1084_v13  ;;  %v1261_v14 = vld [vmem:[#allocation5 + $0x2400] sm:$0xff] }
  0xa7   :  { %6874 = vmatprep.subr.bf16.mxu1 %v6873_v34  ;;  %2009 = vmatprep.mubr.f32.mxu0 %v98_v8  ;;  %v937_v34 = vld [vmem:[#allocation5 + $0x19e0] sm:$0xff]  ;;  %v6893_v37 = vpack.c.bf16 %v958_v29, %v940_v28  ;;  %v1172_v36 = vld [vmem:[#allocation5 + $0x2138] sm:$0xff]  ;;  %v1174_v38 = vld [vmem:[#allocation5 + $0x2148] sm:$0xff] }
  0xa8   :  { %2276 = vmatprep.mubr.f32.mxu1 %v98_v8  ;;  %2010 = vmatmul.mubr.f32.gmra.mrb[4].mxu0 %v97_v15  ;;  %v6703_v43 = vpack.c.bf16 %v955_v35, %v937_v34  ;;  %v1047_v8 = vld [vmem:[#allocation5 + $0x1d50] sm:$0xff]  ;;  %v1137_v34 = vld [vmem:[#allocation5 + $0x2020] sm:$0xff]  ;;  %v1154_v35 = vld [vmem:[#allocation5 + $0x20a8] sm:$0xff] }
  0xa9   :  { %6684 = vmatpush1.bf16.msra.mxu0 %v6683_v40  ;;  %2277 = vmatmul.mubr.f32.gmra.mrb[4].mxu1 %v97_v15  ;;  %v992_v40 = vld [vmem:[#allocation5 + $0x1b98] sm:$0xff]  ;;  %v6715_v15 = vpack.c.bf16 %v1063_v7, %v1045_v6  ;;  %v1210_v50 = vld [vmem:[#allocation5 + $0x2268] sm:$0xff]  ;;  %v1245_v6 = vld [vmem:[#allocation5 + $0x2380] sm:$0xff] }
  0xaa   :  { %6876 = vmatpush1.bf16.msra.mxu1 %v6875_v41  ;;  %6686 = vmatprep.subr.bf16.mxu0 %v6685_v42  ;;  %v976_v41 = vld [vmem:[#allocation5 + $0x1b18] sm:$0xff]  ;;  %v994_v42 = vld [vmem:[#allocation5 + $0x1ba8] sm:$0xff]  ;;  %v6705_v45 = vpack.c.bf16 %v992_v40, %v974_v39 }
  0xab   :  { %6878 = vmatprep.subr.bf16.mxu1 %v6877_v46  ;;  %2015 = vmatprep.mubr.f32.mxu0 %v104_v18  ;;  %v973_v46 = vld [vmem:[#allocation5 + $0x1b00] sm:$0xff]  ;;  %v6897_v49 = vpack.c.bf16 %v994_v42, %v976_v41  ;;  %v6725_v41 = vpack.c.bf16 %v1172_v36, %v1154_v35  ;;  %v1208_v48 = vld [vmem:[#allocation5 + $0x2258] sm:$0xff]  ;;  %v1262_v7 = vld [vmem:[#allocation5 + $0x2408] sm:$0xff] }
  0xac   :  { %2282 = vmatprep.mubr.f32.mxu1 %v104_v18  ;;  %2016 = vmatmul.mubr.f32.gmra.mrb[6].mxu0 %v103_v27  ;;  %v1081_v18 = vld [vmem:[#allocation5 + $0x1e60] sm:$0xff]  ;;  %v1354_v35 = vld [vmem:[#allocation5 + $0x26e8] sm:$0xff] }
  0xad   :  { %6688 = vmatpush1.bf16.msra.mxu0 %v6687_v52  ;;  %2283 = vmatmul.mubr.f32.gmra.mrb[6].mxu1 %v103_v27  ;;  %v1028_v52 = vld [vmem:[#allocation5 + $0x1cb8] sm:$0xff]  ;;  %v1153_v42 = vld [vmem:[#allocation5 + $0x20a0] sm:$0xff]  ;;  %v94_v36 = vld [vmem:[#allocation2 + $0x48] sm:$0xff] }
  0xae   :  { %6880 = vmatpush1.bf16.msra.mxu1 %v6879_v54  ;;  %6690 = vmatprep.subr.bf16.mxu0 %v6689_v55  ;;  %v1030_v54 = vld [vmem:[#allocation5 + $0x1cc8] sm:$0xff]  ;;  %v6707_v55 = vpack.c.bf16 %v991_v47, %v973_v46  ;;  %v6709_v57 = vpack.c.bf16 %v1028_v52, %v1010_v51  ;;  %v1173_v46 = vld [vmem:[#allocation5 + $0x2140] sm:$0xff] }
  0xaf   :  { %6882 = vmatprep.subr.bf16.mxu1 %v6881_v59  ;;  %2086 = vmatprep.mubr.f32.mxu0 %v88_v31  ;;  %v1027_v59 = vld [vmem:[#allocation5 + $0x1cb0] sm:$0xff]  ;;  %v6901_v61 = vpack.c.bf16 %v1030_v54, %v1012_v53  ;;  %v1190_v47 = vld [vmem:[#allocation5 + $0x21c8] sm:$0xff]  ;;  %v1189_v54 = vld [vmem:[#allocation5 + $0x21c0] sm:$0xff] }
  0xb0   :  { %2353 = vmatprep.mubr.f32.mxu1 %v88_v31  ;;  %v6711_v3 = vpack.c.bf16 %v1027_v59, %v1009_v58  ;;  %v1135_v31 = vld [vmem:[#allocation5 + $0x2010] sm:$0xff]  ;;  %v6729_v53 = vpack.c.bf16 %v1208_v48, %v1190_v47  ;;  %v1209_v58 = vld [vmem:[#allocation5 + $0x2260] sm:$0xff]  ;;  %v1226_v59 = vld [vmem:[#allocation5 + $0x22e8] sm:$0xff] }
  0xb1   :  { %6692 = vmatpush1.bf16.msra.mxu0 %v6691_v2  ;;  %v1066_v2 = vld [vmem:[#allocation5 + $0x1de8] sm:$0xff]  ;;  %v1388_v47 = vld [vmem:[#allocation5 + $0x27f8] sm:$0xff] }
  0xb2   :  { %6884 = vmatpush1.bf16.msra.mxu1 %v6883_v4  ;;  %6694 = vmatprep.subr.bf16.mxu0 %v6693_v5  ;;  %v6903_v4 = vpack.c.bf16 %v1029_v62, %v1011_v60  ;;  %v6713_v5 = vpack.c.bf16 %v1064_v0, %v1046_v63  ;;  %v1244_v60 = vld [vmem:[#allocation5 + $0x2378] sm:$0xff]  ;;  %v1246_v62 = vld [vmem:[#allocation5 + $0x2388] sm:$0xff] }
  0xb3   :  { %6886 = vmatprep.subr.bf16.mxu1 %v6885_v9  ;;  %v6905_v9 = vpack.c.bf16 %v1066_v2, %v1048_v1  ;;  %v6733_v1 = vpack.c.bf16 %v1244_v60, %v1226_v59  ;;  %v1225_v2 = vld [vmem:[#allocation5 + $0x22e0] sm:$0xff]  ;;  %v1372_v48 = vld [vmem:[#allocation5 + $0x2778] sm:$0xff]  ;;  %v1406_v60 = vld [vmem:[#allocation5 + $0x2888] sm:$0xff] }
  0xb4   :  { %v1389_v59 = vld [vmem:[#allocation5 + $0x2800] sm:$0xff] }
  0xb5   :  { %6696 = vmatpush1.bf16.msra.mxu0 %v6695_v16  ;;  %v6907_v16 = vpack.c.bf16 %v1065_v10, %v1047_v8  ;;  %v1280_v8 = vld [vmem:[#allocation5 + $0x2498] sm:$0xff]  ;;  %v1282_v10 = vld [vmem:[#allocation5 + $0x24a8] sm:$0xff] }
  0xb6   :  { %6888 = vmatpush1.bf16.msra.mxu1 %v6887_v19  ;;  %6698 = vmatprep.subr.bf16.mxu0 %v6697_v20  ;;  %v1099_v19 = vld [vmem:[#allocation5 + $0x1ef0] sm:$0xff]  ;;  %v6737_v13 = vpack.c.bf16 %v1280_v8, %v1262_v7 }
  0xb7   :  { %6890 = vmatprep.subr.bf16.mxu1 %v6889_v24  ;;  %v1083_v20 = vld [vmem:[#allocation5 + $0x1e70] sm:$0xff]  ;;  %v1136_v24 = vld [vmem:[#allocation5 + $0x2018] sm:$0xff]  ;;  %v6719_v27 = vpack.c.bf16 %v1099_v19, %v1081_v18  ;;  %v1281_v18 = vld [vmem:[#allocation5 + $0x24a0] sm:$0xff] }
  0xb8   :  { %v6911_v28 = vpack.c.bf16 %v1101_v22, %v1083_v20  ;;  %v6721_v29 = vpack.c.bf16 %v1136_v24, %v1118_v23  ;;  %v1298_v19 = vld [vmem:[#allocation5 + $0x2528] sm:$0xff]  ;;  %v1316_v20 = vld [vmem:[#allocation5 + $0x25b8] sm:$0xff]  ;;  %v87_v23 = vld [vmem:[#allocation2 + $0x10] sm:$0xff] }
  0xb9   :  { %6700 = vmatpush1.bf16.msra.mxu0 %v6699_v30  ;;  %v1117_v30 = vld [vmem:[#allocation5 + $0x1f80] sm:$0xff]  ;;  %v1318_v22 = vld [vmem:[#allocation5 + $0x25c8] sm:$0xff]  ;;  %v1407_v7 = vld [vmem:[#allocation5 + $0x2890] sm:$0xff] }
  0xba   :  { %6892 = vmatpush1.bf16.msra.mxu1 %v6891_v32  ;;  %6702 = vmatprep.subr.bf16.mxu0 %v6701_v33  ;;  %v1119_v32 = vld [vmem:[#allocation5 + $0x1f90] sm:$0xff]  ;;  %v6913_v33 = vpack.c.bf16 %v1138_v26, %v1120_v25  ;;  %v6723_v39 = vpack.c.bf16 %v1135_v31, %v1117_v30  ;;  %v6741_v26 = vpack.c.bf16 %v1316_v20, %v1298_v19  ;;  %v1317_v31 = vld [vmem:[#allocation5 + $0x25c0] sm:$0xff] }
  0xbb   :  { %6894 = vmatprep.subr.bf16.mxu1 %v6893_v37  ;;  %v1156_v37 = vld [vmem:[#allocation5 + $0x20b8] sm:$0xff]  ;;  %v6915_v40 = vpack.c.bf16 %v1137_v34, %v1119_v32  ;;  %v1334_v32 = vld [vmem:[#allocation5 + $0x2648] sm:$0xff]  ;;  %v1459_v19 = vld [vmem:[#allocation5 + $0x2a30] sm:$0xff] }
  0xbc   :  { %v1336_v34 = vld [vmem:[#allocation5 + $0x2658] sm:$0xff]  ;;  %v1443_v20 = vld [vmem:[#allocation5 + $0x29b0] sm:$0xff] }
  0xbd   :  { %6704 = vmatpush1.bf16.msra.mxu0 %v6703_v43  ;;  %v1171_v43 = vld [vmem:[#allocation5 + $0x2130] sm:$0xff] }
  0xbe   :  { %6896 = vmatpush1.bf16.msra.mxu1 %v6895_v44  ;;  %6706 = vmatprep.subr.bf16.mxu0 %v6705_v45  ;;  %v1155_v44 = vld [vmem:[#allocation5 + $0x20b0] sm:$0xff]  ;;  %v6917_v45 = vpack.c.bf16 %v1174_v38, %v1156_v37  ;;  %v6727_v51 = vpack.c.bf16 %v1171_v43, %v1153_v42  ;;  %v93_v38 = vld [vmem:[#allocation2 + $0x40] sm:$0xff] }
  0xbf   :  { %6898 = vmatprep.subr.bf16.mxu1 %v6897_v49  ;;  %v1192_v49 = vld [vmem:[#allocation5 + $0x21d8] sm:$0xff]  ;;  %v6919_v52 = vpack.c.bf16 %v1173_v46, %v1155_v44  ;;  %v1351_v42 = vld [vmem:[#allocation5 + $0x26d0] sm:$0xff]  ;;  %v6937_v44 = vpack.c.bf16 %v1354_v35, %v1336_v34  ;;  %v1370_v46 = vld [vmem:[#allocation5 + $0x2768] sm:$0xff] }
  0xc0   :  { %v1335_v43 = vld [vmem:[#allocation5 + $0x2650] sm:$0xff]  ;;  %v1497_v34 = vld [vmem:[#allocation5 + $0x2b60] sm:$0xff]  ;;  %v1514_v35 = vld [vmem:[#allocation5 + $0x2be8] sm:$0xff] }
  0xc1   :  { %6708 = vmatpush1.bf16.msra.mxu0 %v6707_v55  ;;  %v1207_v55 = vld [vmem:[#allocation5 + $0x2250] sm:$0xff] }
  0xc2   :  { %6900 = vmatpush1.bf16.msra.mxu1 %v6899_v56  ;;  %6710 = vmatprep.subr.bf16.mxu0 %v6709_v57  ;;  %v1191_v56 = vld [vmem:[#allocation5 + $0x21d0] sm:$0xff]  ;;  %v6921_v57 = vpack.c.bf16 %v1210_v50, %v1192_v49  ;;  %v6731_v63 = vpack.c.bf16 %v1207_v55, %v1189_v54  ;;  %v1390_v49 = vld [vmem:[#allocation5 + $0x2808] sm:$0xff]  ;;  %v100_v50 = vld [vmem:[#allocation2 + $0x78] sm:$0xff]  ;;  %v6749_v54 = vpack.c.bf16 %v1388_v47, %v1370_v46 }
  0xc3   :  { %6902 = vmatprep.subr.bf16.mxu1 %v6901_v61  ;;  %v1228_v61 = vld [vmem:[#allocation5 + $0x22f8] sm:$0xff]  ;;  %v6923_v0 = vpack.c.bf16 %v1209_v58, %v1191_v56  ;;  %v1369_v55 = vld [vmem:[#allocation5 + $0x2760] sm:$0xff]  ;;  %v1387_v56 = vld [vmem:[#allocation5 + $0x27f0] sm:$0xff]  ;;  %v6941_v58 = vpack.c.bf16 %v1390_v49, %v1372_v48 }
  0xc4   :  { %v1533_v46 = vld [vmem:[#allocation5 + $0x2c80] sm:$0xff]  ;;  %v1550_v47 = vld [vmem:[#allocation5 + $0x2d08] sm:$0xff]  ;;  %v1568_v48 = vld [vmem:[#allocation5 + $0x2d98] sm:$0xff] }
  0xc5   :  { %6712 = vmatpush1.bf16.msra.mxu0 %v6711_v3  ;;  %v1243_v3 = vld [vmem:[#allocation5 + $0x2370] sm:$0xff]  ;;  %v1552_v49 = vld [vmem:[#allocation5 + $0x2d18] sm:$0xff] }
  0xc6   :  { %6904 = vmatpush1.bf16.msra.mxu1 %v6903_v4  ;;  %6714 = vmatprep.subr.bf16.mxu0 %v6713_v5  ;;  %v1227_v4 = vld [vmem:[#allocation5 + $0x22f0] sm:$0xff]  ;;  %v6925_v5 = vpack.c.bf16 %v1246_v62, %v1228_v61  ;;  %v6735_v11 = vpack.c.bf16 %v1243_v3, %v1225_v2  ;;  %v1424_v61 = vld [vmem:[#allocation5 + $0x2918] sm:$0xff]  ;;  %v105_v2 = vld [vmem:[#allocation2 + $0xa0] sm:$0xff] }
  0xc7   :  { %6906 = vmatprep.subr.bf16.mxu1 %v6905_v9  ;;  %v1264_v9 = vld [vmem:[#allocation5 + $0x2418] sm:$0xff]  ;;  %v6927_v12 = vpack.c.bf16 %v1245_v6, %v1227_v4  ;;  %v6753_v4 = vpack.c.bf16 %v1424_v61, %v1406_v60  ;;  %v1423_v6 = vld [vmem:[#allocation5 + $0x2910] sm:$0xff] }
  0xc8   :  { %v1408_v62 = vld [vmem:[#allocation5 + $0x2898] sm:$0xff] }
  0xc9   :  { %6716 = vmatpush1.bf16.msra.mxu0 %v6715_v15  ;;  %v1279_v15 = vld [vmem:[#allocation5 + $0x2490] sm:$0xff]  ;;  %v1604_v60 = vld [vmem:[#allocation5 + $0x2eb8] sm:$0xff] }
  0xca   :  { %6908 = vmatpush1.bf16.msra.mxu1 %v6907_v16  ;;  %6718 = vmatprep.subr.bf16.mxu0 %v6717_v17  ;;  %v1263_v16 = vld [vmem:[#allocation5 + $0x2410] sm:$0xff]  ;;  %v6929_v17 = vpack.c.bf16 %v1282_v10, %v1264_v9  ;;  %v6739_v24 = vpack.c.bf16 %v1279_v15, %v1261_v14  ;;  %v1425_v9 = vld [vmem:[#allocation5 + $0x2920] sm:$0xff]  ;;  %v1442_v10 = vld [vmem:[#allocation5 + $0x29a8] sm:$0xff] }
  0xcb   :  { %6910 = vmatprep.subr.bf16.mxu1 %v6909_v21  ;;  %v1300_v21 = vld [vmem:[#allocation5 + $0x2538] sm:$0xff]  ;;  %v6931_v25 = vpack.c.bf16 %v1281_v18, %v1263_v16  ;;  %v90_v14 = vld [vmem:[#allocation2 + $0x28] sm:$0xff]  ;;  %v6947_v16 = vpack.c.bf16 %v1425_v9, %v1407_v7  ;;  %v1441_v18 = vld [vmem:[#allocation5 + $0x29a0] sm:$0xff] }
  0xcc   :  { %v6933_v30 = vpack.c.bf16 %v1318_v22, %v1300_v21  ;;  %v1461_v22 = vld [vmem:[#allocation5 + $0x2a40] sm:$0xff]  ;;  %v1588_v61 = vld [vmem:[#allocation5 + $0x2e38] sm:$0xff]  ;;  %v1622_v7 = vld [vmem:[#allocation5 + $0x2f48] sm:$0xff] }
  0xcd   :  { %6720 = vmatpush1.bf16.msra.mxu0 %v6719_v27  ;;  %v1297_v27 = vld [vmem:[#allocation5 + $0x2520] sm:$0xff]  ;;  %v1624_v9 = vld [vmem:[#allocation5 + $0x2f58] sm:$0xff] }
  0xce   :  { %6912 = vmatpush1.bf16.msra.mxu1 %v6911_v28  ;;  %6722 = vmatprep.subr.bf16.mxu0 %v6721_v29  ;;  %v1315_v28 = vld [vmem:[#allocation5 + $0x25b0] sm:$0xff] }
  0xcf   :  { %6914 = vmatprep.subr.bf16.mxu1 %v6913_v33  ;;  %v1299_v29 = vld [vmem:[#allocation5 + $0x2530] sm:$0xff]  ;;  %v1352_v33 = vld [vmem:[#allocation5 + $0x26d8] sm:$0xff]  ;;  %v6743_v37 = vpack.c.bf16 %v1315_v28, %v1297_v27  ;;  %v6759_v27 = vpack.c.bf16 %v1459_v19, %v1441_v18  ;;  %v6951_v28 = vpack.c.bf16 %v1461_v22, %v1443_v20  ;;  %v1641_v18 = vld [vmem:[#allocation5 + $0x2fe0] sm:$0xff] }
  0xd0   :  { %v1658_v19 = vld [vmem:[#allocation5 + $0x3068] sm:$0xff]  ;;  %v1676_v20 = vld [vmem:[#allocation5 + $0x30f8] sm:$0xff] }
  0xd1   :  { %6724 = vmatpush1.bf16.msra.mxu0 %v6723_v39  ;;  %v6935_v39 = vpack.c.bf16 %v1317_v31, %v1299_v29  ;;  %v1495_v31 = vld [vmem:[#allocation5 + $0x2b50] sm:$0xff]  ;;  %v1678_v22 = vld [vmem:[#allocation5 + $0x3108] sm:$0xff] }
  0xd2   :  { %6916 = vmatpush1.bf16.msra.mxu1 %v6915_v40  ;;  %6726 = vmatprep.subr.bf16.mxu0 %v6725_v41  ;;  %v6745_v40 = vpack.c.bf16 %v1352_v33, %v1334_v32  ;;  %v1333_v41 = vld [vmem:[#allocation5 + $0x2640] sm:$0xff]  ;;  %v1479_v32 = vld [vmem:[#allocation5 + $0x2ad0] sm:$0xff] }
  0xd3   :  { %6918 = vmatprep.subr.bf16.mxu1 %v6917_v45  ;;  %v1353_v45 = vld [vmem:[#allocation5 + $0x26e0] sm:$0xff] }
  0xd5   :  { %6728 = vmatpush1.bf16.msra.mxu0 %v6727_v51  ;;  %v6747_v51 = vpack.c.bf16 %v1351_v42, %v1333_v41  ;;  %v1513_v42 = vld [vmem:[#allocation5 + $0x2be0] sm:$0xff] }
  0xd6   :  { %6920 = vmatpush1.bf16.msra.mxu1 %v6919_v52  ;;  %6730 = vmatprep.subr.bf16.mxu0 %v6729_v53  ;;  %v99_v52 = vld [vmem:[#allocation2 + $0x70] sm:$0xff]  ;;  %v6939_v53 = vpack.c.bf16 %v1353_v45, %v1335_v43 }
  0xd7   :  { %6922 = vmatprep.subr.bf16.mxu1 %v6921_v57  ;;  %v1371_v57 = vld [vmem:[#allocation5 + $0x2770] sm:$0xff] }
  0xd8   :  { %v6943_v3 = vpack.c.bf16 %v1389_v59, %v1371_v57  ;;  %v1531_v43 = vld [vmem:[#allocation5 + $0x2c70] sm:$0xff]  ;;  %v1586_v59 = vld [vmem:[#allocation5 + $0x2e28] sm:$0xff] }
  0xd9   :  { %6732 = vmatpush1.bf16.msra.mxu0 %v6731_v63  ;;  %v1426_v63 = vld [vmem:[#allocation5 + $0x2928] sm:$0xff] }
  0xda   :  { %6924 = vmatpush1.bf16.msra.mxu1 %v6923_v0  ;;  %6734 = vmatprep.subr.bf16.mxu0 %v6733_v1  ;;  %v106_v0 = vld [vmem:[#allocation2 + $0xa8] sm:$0xff]  ;;  %v6751_v1 = vpack.c.bf16 %v1387_v56, %v1369_v55  ;;  %v6945_v8 = vpack.c.bf16 %v1426_v63, %v1408_v62  ;;  %v1567_v55 = vld [vmem:[#allocation5 + $0x2d90] sm:$0xff] }
  0xdb   :  { %6926 = vmatprep.subr.bf16.mxu1 %v6925_v5  ;;  %v1405_v5 = vld [vmem:[#allocation5 + $0x2880] sm:$0xff]  ;;  %v1551_v56 = vld [vmem:[#allocation5 + $0x2d10] sm:$0xff]  ;;  %v1606_v62 = vld [vmem:[#allocation5 + $0x2ec8] sm:$0xff] }
  0xdc   :  { %v6755_v15 = vpack.c.bf16 %v1423_v6, %v1405_v5  ;;  %v6965_v5 = vpack.c.bf16 %v1606_v62, %v1588_v61  ;;  %v1605_v6 = vld [vmem:[#allocation5 + $0x2ec0] sm:$0xff] }
  0xdd   :  { %6736 = vmatpush1.bf16.msra.mxu0 %v6735_v11  ;;  %v1460_v11 = vld [vmem:[#allocation5 + $0x2a38] sm:$0xff]  ;;  %v1765_v62 = vld [vmem:[#allocation5 + $0x33c0] sm:$0xff] }
  0xde   :  { %6928 = vmatpush1.bf16.msra.mxu1 %v6927_v12  ;;  %6738 = vmatprep.subr.bf16.mxu0 %v6737_v13  ;;  %v1444_v12 = vld [vmem:[#allocation5 + $0x29b8] sm:$0xff]  ;;  %v1462_v13 = vld [vmem:[#allocation5 + $0x2a48] sm:$0xff] }
  0xdf   :  { %6930 = vmatprep.subr.bf16.mxu1 %v6929_v17  ;;  %v6757_v17 = vpack.c.bf16 %v1460_v11, %v1442_v10  ;;  %v6949_v21 = vpack.c.bf16 %v1462_v13, %v1444_v12  ;;  %v1642_v10 = vld [vmem:[#allocation5 + $0x2fe8] sm:$0xff] }
  0xe0   :  { %2087 = vmatmul.mubr.f32.vlgmr.msra.gmra.mrb[0].mxu0 %v87_v23 }
  0xe1   :  { %6740 = vmatpush1.bf16.msra.mxu0 %v6739_v24  ;;  %2354 = vmatmul.mubr.f32.vlgmr.msra.gmra.mrb[0].mxu1 %v87_v23  ;;  %v1478_v23 = vld [vmem:[#allocation5 + $0x2ac8] sm:$0xff]  ;;  %v1496_v24 = vld [vmem:[#allocation5 + $0x2b58] sm:$0xff] }
  0xe2   :  { %6932 = vmatpush1.bf16.msra.mxu1 %v6931_v25  ;;  %6742 = vmatprep.subr.bf16.mxu0 %v6741_v26  ;;  %v1480_v25 = vld [vmem:[#allocation5 + $0x2ad8] sm:$0xff]  ;;  %v1498_v26 = vld [vmem:[#allocation5 + $0x2b68] sm:$0xff]  ;;  %v6761_v29 = vpack.c.bf16 %v1496_v24, %v1478_v23 }
  0xe3   :  { %6934 = vmatprep.subr.bf16.mxu1 %v6933_v30  ;;  %2092 = vmatprep.mubr.f32.mxu0 %v94_v36  ;;  %v1477_v30 = vld [vmem:[#allocation5 + $0x2ac0] sm:$0xff]  ;;  %v6953_v33 = vpack.c.bf16 %v1498_v26, %v1480_v25  ;;  %v6781_v25 = vpack.c.bf16 %v1676_v20, %v1658_v19 }
  0xe4   :  { %2359 = vmatprep.mubr.f32.mxu1 %v94_v36  ;;  %2093 = vmatmul.mubr.f32.gmra.mrb[2].mxu0 %v93_v38  ;;  %v1532_v36 = vld [vmem:[#allocation5 + $0x2c78] sm:$0xff]  ;;  %v1657_v26 = vld [vmem:[#allocation5 + $0x3060] sm:$0xff] }
  0xe5   :  { %6744 = vmatpush1.bf16.msra.mxu0 %v6743_v37  ;;  %2360 = vmatmul.mubr.f32.gmra.mrb[2].mxu1 %v93_v38  ;;  %v1516_v37 = vld [vmem:[#allocation5 + $0x2bf8] sm:$0xff]  ;;  %v1534_v38 = vld [vmem:[#allocation5 + $0x2c88] sm:$0xff]  ;;  %v6765_v41 = vpack.c.bf16 %v1532_v36, %v1514_v35 }
  0xe6   :  { %6936 = vmatpush1.bf16.msra.mxu1 %v6935_v39  ;;  %6746 = vmatprep.subr.bf16.mxu0 %v6745_v40  ;;  %v6763_v39 = vpack.c.bf16 %v1495_v31, %v1477_v30  ;;  %v6955_v40 = vpack.c.bf16 %v1497_v34, %v1479_v32  ;;  %v6957_v45 = vpack.c.bf16 %v1534_v38, %v1516_v37  ;;  %v1677_v30 = vld [vmem:[#allocation5 + $0x3100] sm:$0xff]  ;;  %v1694_v31 = vld [vmem:[#allocation5 + $0x3188] sm:$0xff]  ;;  %v1712_v32 = vld [vmem:[#allocation5 + $0x3218] sm:$0xff] }
  0xe7   :  { %6938 = vmatprep.subr.bf16.mxu1 %v6937_v44  ;;  %2098 = vmatprep.mubr.f32.mxu0 %v100_v50  ;;  %v1515_v44 = vld [vmem:[#allocation5 + $0x2bf0] sm:$0xff]  ;;  %v1714_v34 = vld [vmem:[#allocation5 + $0x3228] sm:$0xff]  ;;  %v6785_v37 = vpack.c.bf16 %v1712_v32, %v1694_v31  ;;  %v1693_v38 = vld [vmem:[#allocation5 + $0x3180] sm:$0xff] }
  0xe8   :  { %2365 = vmatprep.mubr.f32.mxu1 %v100_v50  ;;  %2099 = vmatmul.mubr.f32.gmra.mrb[4].mxu0 %v99_v52  ;;  %v1570_v50 = vld [vmem:[#allocation5 + $0x2da8] sm:$0xff]  ;;  %v152_v31 = vld [vmem:[#allocation5 + $0x158] sm:$0xff] }
  0xe9   :  { %6748 = vmatpush1.bf16.msra.mxu0 %v6747_v51  ;;  %2366 = vmatmul.mubr.f32.gmra.mrb[4].mxu1 %v99_v52  ;;  %v6767_v51 = vpack.c.bf16 %v1531_v43, %v1513_v42  ;;  %v6959_v52 = vpack.c.bf16 %v1533_v46, %v1515_v44  ;;  %v6961_v57 = vpack.c.bf16 %v1570_v50, %v1552_v49  ;;  %v1713_v42 = vld [vmem:[#allocation5 + $0x3220] sm:$0xff]  ;;  %v1730_v43 = vld [vmem:[#allocation5 + $0x32a8] sm:$0xff]  ;;  %v1748_v44 = vld [vmem:[#allocation5 + $0x3338] sm:$0xff] }
  0xea   :  { %6940 = vmatpush1.bf16.msra.mxu1 %v6939_v53  ;;  %6750 = vmatprep.subr.bf16.mxu0 %v6749_v54  ;;  %v6769_v53 = vpack.c.bf16 %v1568_v48, %v1550_v47  ;;  %v1549_v54 = vld [vmem:[#allocation5 + $0x2d00] sm:$0xff]  ;;  %v1750_v46 = vld [vmem:[#allocation5 + $0x3348] sm:$0xff]  ;;  %v6789_v49 = vpack.c.bf16 %v1748_v44, %v1730_v43  ;;  %v95_v43 = vld [vmem:[#allocation2 + $0x50] sm:$0xff] }
  0xeb   :  { %6942 = vmatprep.subr.bf16.mxu1 %v6941_v58  ;;  %2104 = vmatprep.mubr.f32.mxu0 %v106_v0  ;;  %v1569_v58 = vld [vmem:[#allocation5 + $0x2da0] sm:$0xff]  ;;  %v6771_v63 = vpack.c.bf16 %v1567_v55, %v1549_v54  ;;  %v1766_v55 = vld [vmem:[#allocation5 + $0x33c8] sm:$0xff] }
  0xec   :  { %2371 = vmatprep.mubr.f32.mxu1 %v106_v0  ;;  %2105 = vmatmul.mubr.f32.gmra.mrb[6].mxu0 %v105_v2  ;;  %v6963_v0 = vpack.c.bf16 %v1569_v58, %v1551_v56  ;;  %v1729_v50 = vld [vmem:[#allocation5 + $0x32a0] sm:$0xff]  ;;  %v1784_v56 = vld [vmem:[#allocation5 + $0x3458] sm:$0xff]  ;;  %v1786_v58 = vld [vmem:[#allocation5 + $0x3468] sm:$0xff] }
  0xed   :  { %6752 = vmatpush1.bf16.msra.mxu0 %v6751_v1  ;;  %2372 = vmatmul.mubr.f32.gmra.mrb[6].mxu1 %v105_v2  ;;  %v6773_v1 = vpack.c.bf16 %v1604_v60, %v1586_v59  ;;  %v1585_v2 = vld [vmem:[#allocation5 + $0x2e20] sm:$0xff]  ;;  %v6793_v61 = vpack.c.bf16 %v1784_v56, %v1766_v55  ;;  %v170_v32 = vld [vmem:[#allocation5 + $0x1e8] sm:$0xff] }
  0xee   :  { %6944 = vmatpush1.bf16.msra.mxu1 %v6943_v3  ;;  %6754 = vmatprep.subr.bf16.mxu0 %v6753_v4  ;;  %v1603_v3 = vld [vmem:[#allocation5 + $0x2eb0] sm:$0xff]  ;;  %v1749_v54 = vld [vmem:[#allocation5 + $0x3340] sm:$0xff]  ;;  %v222_v56 = vld [vmem:[#allocation5 + $0x388] sm:$0xff] }
  0xef   :  { %6946 = vmatprep.subr.bf16.mxu1 %v6945_v8  ;;  %2175 = vmatprep.mubr.f32.mxu0 %v90_v14  ;;  %v1587_v4 = vld [vmem:[#allocation5 + $0x2e30] sm:$0xff]  ;;  %v1640_v8 = vld [vmem:[#allocation5 + $0x2fd8] sm:$0xff]  ;;  %v6775_v11 = vpack.c.bf16 %v1603_v3, %v1585_v2  ;;  %v1785_v2 = vld [vmem:[#allocation5 + $0x3460] sm:$0xff] }
  0xf0   :  { %2442 = vmatprep.mubr.f32.mxu1 %v90_v14  ;;  %v6967_v12 = vpack.c.bf16 %v1605_v6, %v1587_v4  ;;  %v6777_v13 = vpack.c.bf16 %v1640_v8, %v1622_v7  ;;  %v1621_v14 = vld [vmem:[#allocation5 + $0x2f40] sm:$0xff]  ;;  %v1802_v3 = vld [vmem:[#allocation5 + $0x34e8] sm:$0xff]  ;;  %v1820_v4 = vld [vmem:[#allocation5 + $0x3578] sm:$0xff] }
  0xf1   :  { %6756 = vmatpush1.bf16.msra.mxu0 %v6755_v15  ;;  %v1639_v15 = vld [vmem:[#allocation5 + $0x2fd0] sm:$0xff]  ;;  %v1822_v6 = vld [vmem:[#allocation5 + $0x3588] sm:$0xff] }
  0xf2   :  { %6948 = vmatpush1.bf16.msra.mxu1 %v6947_v16  ;;  %6758 = vmatprep.subr.bf16.mxu0 %v6757_v17  ;;  %v1623_v16 = vld [vmem:[#allocation5 + $0x2f50] sm:$0xff]  ;;  %v6969_v17 = vpack.c.bf16 %v1642_v10, %v1624_v9  ;;  %v6779_v23 = vpack.c.bf16 %v1639_v15, %v1621_v14  ;;  %v6797_v9 = vpack.c.bf16 %v1820_v4, %v1802_v3  ;;  %v1801_v10 = vld [vmem:[#allocation5 + $0x34e0] sm:$0xff]  ;;  %v114_v15 = vld [vmem:[#allocation5 + $0x28] sm:$0xff] }
  0xf3   :  { %6950 = vmatprep.subr.bf16.mxu1 %v6949_v21  ;;  %v1660_v21 = vld [vmem:[#allocation5 + $0x3078] sm:$0xff]  ;;  %v6971_v24 = vpack.c.bf16 %v1641_v18, %v1623_v16  ;;  %v1821_v14 = vld [vmem:[#allocation5 + $0x3580] sm:$0xff]  ;;  %v134_v18 = vld [vmem:[#allocation5 + $0xc8] sm:$0xff] }
  0xf4   :  { %v132_v16 = vld [vmem:[#allocation5 + $0xb8] sm:$0xff]  ;;  %v241_v3 = vld [vmem:[#allocation5 + $0x420] sm:$0xff]  ;;  %v258_v4 = vld [vmem:[#allocation5 + $0x4a8] sm:$0xff] }
  0xf5   :  { %6760 = vmatpush1.bf16.msra.mxu0 %v6759_v27  ;;  %v1675_v27 = vld [vmem:[#allocation5 + $0x30f0] sm:$0xff] }
  0xf6   :  { %6952 = vmatpush1.bf16.msra.mxu1 %v6951_v28  ;;  %6762 = vmatprep.subr.bf16.mxu0 %v6761_v29  ;;  %v1659_v28 = vld [vmem:[#allocation5 + $0x3070] sm:$0xff]  ;;  %v6973_v29 = vpack.c.bf16 %v1678_v22, %v1660_v21  ;;  %v6783_v35 = vpack.c.bf16 %v1675_v27, %v1657_v26  ;;  %v6993_v21 = vpack.c.bf16 %v132_v16, %v114_v15  ;;  %v113_v22 = vld [vmem:[#allocation5 + $0x20] sm:$0xff]  ;;  %v150_v27 = vld [vmem:[#allocation5 + $0x148] sm:$0xff] }
  0xf7   :  { %6954 = vmatprep.subr.bf16.mxu1 %v6953_v33  ;;  %v1696_v33 = vld [vmem:[#allocation5 + $0x3198] sm:$0xff]  ;;  %v6975_v36 = vpack.c.bf16 %v1677_v30, %v1659_v28  ;;  %v133_v26 = vld [vmem:[#allocation5 + $0xc0] sm:$0xff]  ;;  %v259_v15 = vld [vmem:[#allocation5 + $0x4b0] sm:$0xff] }
  0xf8   :  { %v168_v28 = vld [vmem:[#allocation5 + $0x1d8] sm:$0xff] }
  0xf9   :  { %6764 = vmatpush1.bf16.msra.mxu0 %v6763_v39  ;;  %v1711_v39 = vld [vmem:[#allocation5 + $0x3210] sm:$0xff] }
  0xfa   :  { %6956 = vmatpush1.bf16.msra.mxu1 %v6955_v40  ;;  %6766 = vmatprep.subr.bf16.mxu0 %v6765_v41  ;;  %v1695_v40 = vld [vmem:[#allocation5 + $0x3190] sm:$0xff]  ;;  %v6977_v41 = vpack.c.bf16 %v1714_v34, %v1696_v33  ;;  %v6787_v47 = vpack.c.bf16 %v1711_v39, %v1693_v38  ;;  %v149_v34 = vld [vmem:[#allocation5 + $0x140] sm:$0xff] }
  0xfb   :  { %6958 = vmatprep.subr.bf16.mxu1 %v6957_v45  ;;  %v1732_v45 = vld [vmem:[#allocation5 + $0x32b8] sm:$0xff]  ;;  %v6979_v48 = vpack.c.bf16 %v1713_v42, %v1695_v40  ;;  %v151_v38 = vld [vmem:[#allocation5 + $0x150] sm:$0xff]  ;;  %v169_v39 = vld [vmem:[#allocation5 + $0x1e0] sm:$0xff]  ;;  %v7189_v40 = vpack.c.bf16 %v170_v32, %v152_v31 }
  0xfc   :  { %v204_v42 = vld [vmem:[#allocation5 + $0x2f8] sm:$0xff]  ;;  %v8866_v32 = vld [vmem:[#allocation2 + $0x8] sm:$0xff] }
  0xfd   :  { %6768 = vmatpush1.bf16.msra.mxu0 %v6767_v51  ;;  %v1747_v51 = vld [vmem:[#allocation5 + $0x3330] sm:$0xff]  ;;  %v348_v31 = vld [vmem:[#allocation5 + $0x778] sm:$0xff] }
  0xfe   :  { %6960 = vmatpush1.bf16.msra.mxu1 %v6959_v52  ;;  %6770 = vmatprep.subr.bf16.mxu0 %v6769_v53  ;;  %v1731_v52 = vld [vmem:[#allocation5 + $0x32b0] sm:$0xff]  ;;  %v6981_v53 = vpack.c.bf16 %v1750_v46, %v1732_v45  ;;  %v6791_v59 = vpack.c.bf16 %v1747_v51, %v1729_v50  ;;  %v188_v45 = vld [vmem:[#allocation5 + $0x278] sm:$0xff]  ;;  %v206_v46 = vld [vmem:[#allocation5 + $0x308] sm:$0xff] }
  0xff   :  { %6962 = vmatprep.subr.bf16.mxu1 %v6961_v57  ;;  %v1768_v57 = vld [vmem:[#allocation5 + $0x33d8] sm:$0xff]  ;;  %v6983_v60 = vpack.c.bf16 %v1749_v54, %v1731_v52  ;;  %v102_v50 = vld [vmem:[#allocation2 + $0x88] sm:$0xff]  ;;  %v187_v52 = vld [vmem:[#allocation5 + $0x270] sm:$0xff]  ;;  %v7193_v55 = vpack.c.bf16 %v206_v46, %v188_v45 }
 0x100   :  { %v101_v54 = vld [vmem:[#allocation2 + $0x80] sm:$0xff]  ;;  %v368_v45 = vld [vmem:[#allocation5 + $0x818] sm:$0xff]  ;;  %v386_v46 = vld [vmem:[#allocation5 + $0x8a8] sm:$0xff] }
 0x101   :  { %6772 = vmatpush1.bf16.msra.mxu0 %v6771_v63  ;;  %v1783_v63 = vld [vmem:[#allocation5 + $0x3450] sm:$0xff] }
 0x102   :  { %6964 = vmatpush1.bf16.msra.mxu1 %v6963_v0  ;;  %6774 = vmatprep.subr.bf16.mxu0 %v6773_v1  ;;  %v1767_v0 = vld [vmem:[#allocation5 + $0x33d0] sm:$0xff]  ;;  %v6985_v1 = vpack.c.bf16 %v1786_v58, %v1768_v57  ;;  %v6795_v7 = vpack.c.bf16 %v1783_v63, %v1765_v62  ;;  %v240_v57 = vld [vmem:[#allocation5 + $0x418] sm:$0xff]  ;;  %v221_v63 = vld [vmem:[#allocation5 + $0x380] sm:$0xff] }
 0x103   :  { %6966 = vmatprep.subr.bf16.mxu1 %v6965_v5  ;;  %v1804_v5 = vld [vmem:[#allocation5 + $0x34f8] sm:$0xff]  ;;  %v6987_v8 = vpack.c.bf16 %v1785_v2, %v1767_v0  ;;  %v239_v0 = vld [vmem:[#allocation5 + $0x410] sm:$0xff]  ;;  %v7005_v2 = vpack.c.bf16 %v240_v57, %v222_v56 }
 0x104   :  { %v420_v56 = vld [vmem:[#allocation5 + $0x9b8] sm:$0xff] }
 0x105   :  { %6776 = vmatpush1.bf16.msra.mxu0 %v6775_v11  ;;  %v1819_v11 = vld [vmem:[#allocation5 + $0x3570] sm:$0xff]  ;;  %v404_v57 = vld [vmem:[#allocation5 + $0x938] sm:$0xff] }
 0x106   :  { %6968 = vmatpush1.bf16.msra.mxu1 %v6967_v12  ;;  %6778 = vmatprep.subr.bf16.mxu0 %v6777_v13  ;;  %v1803_v12 = vld [vmem:[#allocation5 + $0x34f0] sm:$0xff]  ;;  %v6989_v13 = vpack.c.bf16 %v1822_v6, %v1804_v5  ;;  %v6799_v19 = vpack.c.bf16 %v1819_v11, %v1801_v10  ;;  %v276_v5 = vld [vmem:[#allocation5 + $0x538] sm:$0xff]  ;;  %v7007_v10 = vpack.c.bf16 %v239_v0, %v221_v63 }
 0x107   :  { %6970 = vmatprep.subr.bf16.mxu1 %v6969_v17  ;;  %v116_v17 = vld [vmem:[#allocation5 + $0x38] sm:$0xff]  ;;  %v6991_v20 = vpack.c.bf16 %v1821_v14, %v1803_v12  ;;  %v7009_v12 = vpack.c.bf16 %v276_v5, %v258_v4  ;;  %v275_v14 = vld [vmem:[#allocation5 + $0x530] sm:$0xff] }
 0x108   :  { %v419_v63 = vld [vmem:[#allocation5 + $0x9b0] sm:$0xff]  ;;  %v456_v4 = vld [vmem:[#allocation5 + $0xad8] sm:$0xff] }
 0x109   :  { %6780 = vmatpush1.bf16.msra.mxu0 %v6779_v23  ;;  %v131_v23 = vld [vmem:[#allocation5 + $0xb0] sm:$0xff]  ;;  %v440_v5 = vld [vmem:[#allocation5 + $0xa58] sm:$0xff] }
 0x10a   :  { %6972 = vmatpush1.bf16.msra.mxu1 %v6971_v24  ;;  %6782 = vmatprep.subr.bf16.mxu0 %v6781_v25  ;;  %v7185_v24 = vpack.c.bf16 %v134_v18, %v116_v17  ;;  %v115_v25 = vld [vmem:[#allocation5 + $0x30] sm:$0xff]  ;;  %v6995_v30 = vpack.c.bf16 %v131_v23, %v113_v22  ;;  %v277_v17 = vld [vmem:[#allocation5 + $0x540] sm:$0xff]  ;;  %v294_v18 = vld [vmem:[#allocation5 + $0x5c8] sm:$0xff] }
 0x10b   :  { %6974 = vmatprep.subr.bf16.mxu1 %v6973_v29  ;;  %v89_v29 = vld [vmem:[#allocation2 + $0x20] sm:$0xff]  ;;  %v7187_v33 = vpack.c.bf16 %v133_v26, %v115_v25  ;;  %v7203_v23 = vpack.c.bf16 %v277_v17, %v259_v15  ;;  %v311_v26 = vld [vmem:[#allocation5 + $0x650] sm:$0xff]  ;;  %v474_v15 = vld [vmem:[#allocation5 + $0xb68] sm:$0xff] }
 0x10c   :  { %v293_v25 = vld [vmem:[#allocation5 + $0x5c0] sm:$0xff]  ;;  %v403_v0 = vld [vmem:[#allocation5 + $0x930] sm:$0xff]  ;;  %v476_v17 = vld [vmem:[#allocation5 + $0xb78] sm:$0xff] }
 0x10d   :  { %6784 = vmatpush1.bf16.msra.mxu0 %v6783_v35  ;;  %v167_v35 = vld [vmem:[#allocation5 + $0x1d0] sm:$0xff] }
 0x10e   :  { %6976 = vmatpush1.bf16.msra.mxu1 %v6975_v36  ;;  %6786 = vmatprep.subr.bf16.mxu0 %v6785_v37  ;;  %v96_v36 = vld [vmem:[#allocation2 + $0x58] sm:$0xff]  ;;  %v6997_v37 = vpack.c.bf16 %v168_v28, %v150_v27  ;;  %v6999_v44 = vpack.c.bf16 %v167_v35, %v149_v34  ;;  %v295_v27 = vld [vmem:[#allocation5 + $0x5d0] sm:$0xff]  ;;  %v350_v34 = vld [vmem:[#allocation5 + $0x788] sm:$0xff]  ;;  %v7015_v35 = vpack.c.bf16 %v311_v26, %v293_v25 }
 0x10f   :  { %6978 = vmatprep.subr.bf16.mxu1 %v6977_v41  ;;  %v186_v41 = vld [vmem:[#allocation5 + $0x268] sm:$0xff]  ;;  %v493_v26 = vld [vmem:[#allocation5 + $0xc00] sm:$0xff] }
 0x110   :  { %v7001_v51 = vpack.c.bf16 %v204_v42, %v186_v41  ;;  %v349_v42 = vld [vmem:[#allocation5 + $0x780] sm:$0xff] }
 0x111   :  { %6788 = vmatpush1.bf16.msra.mxu0 %v6787_v47  ;;  %v7191_v47 = vpack.c.bf16 %v169_v39, %v151_v38  ;;  %v329_v38 = vld [vmem:[#allocation5 + $0x6e0] sm:$0xff]  ;;  %v347_v39 = vld [vmem:[#allocation5 + $0x770] sm:$0xff] }
 0x112   :  { %6980 = vmatpush1.bf16.msra.mxu1 %v6979_v48  ;;  %6790 = vmatprep.subr.bf16.mxu0 %v6789_v49  ;;  %v185_v48 = vld [vmem:[#allocation5 + $0x260] sm:$0xff]  ;;  %v203_v49 = vld [vmem:[#allocation5 + $0x2f0] sm:$0xff] }
 0x113   :  { %6982 = vmatprep.subr.bf16.mxu1 %v6981_v53  ;;  %v205_v53 = vld [vmem:[#allocation5 + $0x300] sm:$0xff]  ;;  %v7003_v58 = vpack.c.bf16 %v203_v49, %v185_v48 }
 0x114   :  { %v7195_v62 = vpack.c.bf16 %v205_v53, %v187_v52  ;;  %v367_v52 = vld [vmem:[#allocation5 + $0x810] sm:$0xff]  ;;  %v7213_v53 = vpack.c.bf16 %v386_v46, %v368_v45  ;;  %v545_v46 = vld [vmem:[#allocation5 + $0xda0] sm:$0xff] }
 0x115   :  { %6792 = vmatpush1.bf16.msra.mxu0 %v6791_v59  ;;  %v108_v59 = vld [vmem:[#allocation2 + $0xb8] sm:$0xff] }
 0x116   :  { %6984 = vmatpush1.bf16.msra.mxu1 %v6983_v60  ;;  %6794 = vmatprep.subr.bf16.mxu0 %v6793_v61  ;;  %v224_v60 = vld [vmem:[#allocation5 + $0x398] sm:$0xff]  ;;  %v242_v61 = vld [vmem:[#allocation5 + $0x428] sm:$0xff] }
 0x117   :  { %6986 = vmatprep.subr.bf16.mxu1 %v6985_v1  ;;  %v223_v1 = vld [vmem:[#allocation5 + $0x390] sm:$0xff]  ;;  %v7197_v6 = vpack.c.bf16 %v242_v61, %v224_v60 }
 0x118   :  { %v7199_v11 = vpack.c.bf16 %v241_v3, %v223_v1  ;;  %v438_v3 = vld [vmem:[#allocation5 + $0xa48] sm:$0xff] }
 0x119   :  { %6796 = vmatpush1.bf16.msra.mxu0 %v6795_v7  ;;  %v260_v7 = vld [vmem:[#allocation5 + $0x4b8] sm:$0xff] }
 0x11a   :  { %6988 = vmatpush1.bf16.msra.mxu1 %v6987_v8  ;;  %6798 = vmatprep.subr.bf16.mxu0 %v6797_v9  ;;  %v278_v8 = vld [vmem:[#allocation5 + $0x548] sm:$0xff]  ;;  %v107_v9 = vld [vmem:[#allocation2 + $0xb0] sm:$0xff] }
 0x11b   :  { %6990 = vmatprep.subr.bf16.mxu1 %v6989_v13  ;;  %v257_v13 = vld [vmem:[#allocation5 + $0x4a0] sm:$0xff]  ;;  %v7201_v16 = vpack.c.bf16 %v278_v8, %v260_v7 }
 0x11c   :  { %v7011_v22 = vpack.c.bf16 %v275_v14, %v257_v13  ;;  %v457_v14 = vld [vmem:[#allocation5 + $0xae0] sm:$0xff] }
 0x11d   :  { %6800 = vmatpush1.bf16.msra.mxu0 %v6799_v19  ;;  %v312_v19 = vld [vmem:[#allocation5 + $0x658] sm:$0xff] }
 0x11e   :  { %6992 = vmatpush1.bf16.msra.mxu1 %v6991_v20  ;;  %6994 = vmatprep.subr.bf16.mxu0 %v6993_v21  ;;  %v296_v20 = vld [vmem:[#allocation5 + $0x5d8] sm:$0xff]  ;;  %v314_v21 = vld [vmem:[#allocation5 + $0x668] sm:$0xff] }
 0x11f   :  { %7186 = vmatprep.subr.bf16.mxu1 %v7185_v24  ;;  %v7013_v24 = vpack.c.bf16 %v312_v19, %v294_v18  ;;  %v7205_v28 = vpack.c.bf16 %v314_v21, %v296_v20  ;;  %v494_v18 = vld [vmem:[#allocation5 + $0xc08] sm:$0xff] }
 0x120   :  { %2176 = vmatmul.mubr.f32.vlgmr.msra.gmra.mrb[0].mxu0 %v89_v29  ;;  %v7225_v25 = vpack.c.bf16 %v494_v18, %v476_v17  ;;  %v653_v18 = vld [vmem:[#allocation5 + $0x1100] sm:$0xff] }
 0x121   :  { %2443 = vmatmul.mubr.f32.vlgmr.msra.gmra.mrb[0].mxu1 %v89_v29  ;;  %6996 = vmatpush1.bf16.msra.mxu0 %v6995_v30  ;;  %v313_v29 = vld [vmem:[#allocation5 + $0x660] sm:$0xff]  ;;  %v330_v30 = vld [vmem:[#allocation5 + $0x6e8] sm:$0xff] }
 0x122   :  { %7188 = vmatpush1.bf16.msra.mxu1 %v7187_v33  ;;  %2181 = vmatprep.mubr.f32.mxu0 %v96_v36  ;;  %v332_v33 = vld [vmem:[#allocation5 + $0x6f8] sm:$0xff] }
 0x123   :  { %2448 = vmatprep.mubr.f32.mxu1 %v96_v36  ;;  %6998 = vmatprep.subr.bf16.mxu0 %v6997_v37  ;;  %v7207_v36 = vpack.c.bf16 %v313_v29, %v295_v27  ;;  %v7017_v37 = vpack.c.bf16 %v348_v31, %v330_v30  ;;  %v7209_v41 = vpack.c.bf16 %v350_v34, %v332_v33  ;;  %v510_v27 = vld [vmem:[#allocation5 + $0xc88] sm:$0xff]  ;;  %v512_v29 = vld [vmem:[#allocation5 + $0xc98] sm:$0xff]  ;;  %v509_v34 = vld [vmem:[#allocation5 + $0xc80] sm:$0xff] }
 0x124   :  { %2182 = vmatmul.mubr.f32.gmra.mrb[2].mxu0 %v95_v43  ;;  %7190 = vmatprep.subr.bf16.mxu1 %v7189_v40  ;;  %v331_v40 = vld [vmem:[#allocation5 + $0x6f0] sm:$0xff]  ;;  %v530_v30 = vld [vmem:[#allocation5 + $0xd28] sm:$0xff] }
 0x125   :  { %2449 = vmatmul.mubr.f32.gmra.mrb[2].mxu1 %v95_v43  ;;  %7000 = vmatpush1.bf16.msra.mxu0 %v6999_v44  ;;  %v366_v43 = vld [vmem:[#allocation5 + $0x808] sm:$0xff]  ;;  %v384_v44 = vld [vmem:[#allocation5 + $0x898] sm:$0xff]  ;;  %v7211_v48 = vpack.c.bf16 %v349_v42, %v331_v40 }
 0x126   :  { %7192 = vmatpush1.bf16.msra.mxu1 %v7191_v47  ;;  %2187 = vmatprep.mubr.f32.mxu0 %v102_v50  ;;  %v7019_v47 = vpack.c.bf16 %v347_v39, %v329_v38  ;;  %v7021_v49 = vpack.c.bf16 %v384_v44, %v366_v43  ;;  %v529_v38 = vld [vmem:[#allocation5 + $0xd20] sm:$0xff]  ;;  %v546_v39 = vld [vmem:[#allocation5 + $0xda8] sm:$0xff]  ;;  %v564_v40 = vld [vmem:[#allocation5 + $0xe38] sm:$0xff] }
 0x127   :  { %2454 = vmatprep.mubr.f32.mxu1 %v102_v50  ;;  %7002 = vmatprep.subr.bf16.mxu0 %v7001_v51  ;;  %v365_v50 = vld [vmem:[#allocation5 + $0x800] sm:$0xff]  ;;  %v383_v51 = vld [vmem:[#allocation5 + $0x890] sm:$0xff]  ;;  %v566_v42 = vld [vmem:[#allocation5 + $0xe48] sm:$0xff]  ;;  %v7041_v45 = vpack.c.bf16 %v564_v40, %v546_v39 }
 0x128   :  { %2188 = vmatmul.mubr.f32.gmra.mrb[4].mxu0 %v101_v54  ;;  %7194 = vmatprep.subr.bf16.mxu1 %v7193_v55  ;;  %v402_v55 = vld [vmem:[#allocation5 + $0x928] sm:$0xff] }
 0x129   :  { %2455 = vmatmul.mubr.f32.gmra.mrb[4].mxu1 %v101_v54  ;;  %7004 = vmatpush1.bf16.msra.mxu0 %v7003_v58  ;;  %v385_v54 = vld [vmem:[#allocation5 + $0x8a0] sm:$0xff]  ;;  %v422_v58 = vld [vmem:[#allocation5 + $0x9c8] sm:$0xff]  ;;  %v7025_v61 = vpack.c.bf16 %v420_v56, %v402_v55 }
 0x12a   :  { %7196 = vmatpush1.bf16.msra.mxu1 %v7195_v62  ;;  %2193 = vmatprep.mubr.f32.mxu0 %v108_v59  ;;  %v7215_v60 = vpack.c.bf16 %v385_v54, %v367_v52  ;;  %v401_v62 = vld [vmem:[#allocation5 + $0x920] sm:$0xff]  ;;  %v7217_v1 = vpack.c.bf16 %v422_v58, %v404_v57  ;;  %v600_v52 = vld [vmem:[#allocation5 + $0xf58] sm:$0xff]  ;;  %v602_v54 = vld [vmem:[#allocation5 + $0xf68] sm:$0xff] }
 0x12b   :  { %2460 = vmatprep.mubr.f32.mxu1 %v108_v59  ;;  %7006 = vmatprep.subr.bf16.mxu0 %v7005_v2  ;;  %v7023_v59 = vpack.c.bf16 %v383_v51, %v365_v50  ;;  %v421_v2 = vld [vmem:[#allocation5 + $0x9c0] sm:$0xff]  ;;  %v7027_v7 = vpack.c.bf16 %v419_v63, %v401_v62  ;;  %v582_v51 = vld [vmem:[#allocation5 + $0xec8] sm:$0xff] }
 0x12c   :  { %2194 = vmatmul.mubr.f32.gmra.mrb[6].mxu0 %v107_v9  ;;  %7198 = vmatprep.subr.bf16.mxu1 %v7197_v6  ;;  %v458_v6 = vld [vmem:[#allocation5 + $0xae8] sm:$0xff]  ;;  %v7219_v8 = vpack.c.bf16 %v421_v2, %v403_v0  ;;  %v565_v50 = vld [vmem:[#allocation5 + $0xe40] sm:$0xff]  ;;  %v7045_v57 = vpack.c.bf16 %v600_v52, %v582_v51  ;;  %v636_v0 = vld [vmem:[#allocation5 + $0x1078] sm:$0xff] }
 0x12d   :  { %2461 = vmatmul.mubr.f32.gmra.mrb[6].mxu1 %v107_v9  ;;  %7008 = vmatpush1.bf16.msra.mxu0 %v7007_v10  ;;  %v7029_v9 = vpack.c.bf16 %v456_v4, %v438_v3  ;;  %v437_v10 = vld [vmem:[#allocation5 + $0xa40] sm:$0xff]  ;;  %v7221_v13 = vpack.c.bf16 %v458_v6, %v440_v5  ;;  %v618_v63 = vld [vmem:[#allocation5 + $0xfe8] sm:$0xff] }
 0x12e   :  { %7200 = vmatpush1.bf16.msra.mxu1 %v7199_v11  ;;  %7010 = vmatprep.subr.bf16.mxu0 %v7009_v12  ;;  %v455_v11 = vld [vmem:[#allocation5 + $0xad0] sm:$0xff]  ;;  %v581_v58 = vld [vmem:[#allocation5 + $0xec0] sm:$0xff]  ;;  %v638_v2 = vld [vmem:[#allocation5 + $0x1088] sm:$0xff]  ;;  %v7049_v5 = vpack.c.bf16 %v636_v0, %v618_v63 }
 0x12f   :  { %7202 = vmatprep.subr.bf16.mxu1 %v7201_v16  ;;  %2531 = vmatprep.mubr.f32.mxu0 %v8866_v32  ;;  %v439_v12 = vld [vmem:[#allocation5 + $0xa50] sm:$0xff]  ;;  %v492_v16 = vld [vmem:[#allocation5 + $0xbf8] sm:$0xff]  ;;  %v7031_v19 = vpack.c.bf16 %v455_v11, %v437_v10  ;;  %v601_v62 = vld [vmem:[#allocation5 + $0xf60] sm:$0xff] }
 0x130   :  { %2798 = vmatprep.mubr.f32.mxu1 %v8866_v32  ;;  %v7223_v20 = vpack.c.bf16 %v457_v14, %v439_v12  ;;  %v7033_v21 = vpack.c.bf16 %v492_v16, %v474_v15  ;;  %v617_v6 = vld [vmem:[#allocation5 + $0xfe0] sm:$0xff]  ;;  %v654_v11 = vld [vmem:[#allocation5 + $0x1108] sm:$0xff]  ;;  %v672_v12 = vld [vmem:[#allocation5 + $0x1198] sm:$0xff] }
 0x131   :  { %7012 = vmatpush1.bf16.msra.mxu0 %v7011_v22  ;;  %v473_v22 = vld [vmem:[#allocation5 + $0xb60] sm:$0xff]  ;;  %v674_v14 = vld [vmem:[#allocation5 + $0x11a8] sm:$0xff]  ;;  %v7053_v17 = vpack.c.bf16 %v672_v12, %v654_v11  ;;  %v800_v63 = vld [vmem:[#allocation5 + $0x1598] sm:$0xff] }
 0x132   :  { %7204 = vmatpush1.bf16.msra.mxu1 %v7203_v23  ;;  %7014 = vmatprep.subr.bf16.mxu0 %v7013_v24  ;;  %v491_v23 = vld [vmem:[#allocation5 + $0xbf0] sm:$0xff]  ;;  %v637_v10 = vld [vmem:[#allocation5 + $0x1080] sm:$0xff]  ;;  %v782_v51 = vld [vmem:[#allocation5 + $0x1508] sm:$0xff] }
 0x133   :  { %7206 = vmatprep.subr.bf16.mxu1 %v7205_v28  ;;  %v475_v24 = vld [vmem:[#allocation5 + $0xb70] sm:$0xff]  ;;  %v528_v28 = vld [vmem:[#allocation5 + $0xd18] sm:$0xff]  ;;  %v7035_v31 = vpack.c.bf16 %v491_v23, %v473_v22  ;;  %v673_v22 = vld [vmem:[#allocation5 + $0x11a0] sm:$0xff] }
 0x134   :  { %v7227_v32 = vpack.c.bf16 %v493_v26, %v475_v24  ;;  %v7037_v33 = vpack.c.bf16 %v528_v28, %v510_v27  ;;  %v690_v23 = vld [vmem:[#allocation5 + $0x1228] sm:$0xff]  ;;  %v708_v24 = vld [vmem:[#allocation5 + $0x12b8] sm:$0xff] }
 0x135   :  { %7016 = vmatpush1.bf16.msra.mxu0 %v7015_v35  ;;  %v527_v35 = vld [vmem:[#allocation5 + $0xd10] sm:$0xff]  ;;  %v710_v26 = vld [vmem:[#allocation5 + $0x12c8] sm:$0xff]  ;;  %v852_v11 = vld [vmem:[#allocation5 + $0x1738] sm:$0xff] }
 0x136   :  { %7208 = vmatpush1.bf16.msra.mxu1 %v7207_v36  ;;  %7018 = vmatprep.subr.bf16.mxu0 %v7017_v37  ;;  %v511_v36 = vld [vmem:[#allocation5 + $0xc90] sm:$0xff]  ;;  %v7229_v37 = vpack.c.bf16 %v530_v30, %v512_v29  ;;  %v7039_v43 = vpack.c.bf16 %v527_v35, %v509_v34  ;;  %v7057_v29 = vpack.c.bf16 %v708_v24, %v690_v23  ;;  %v689_v30 = vld [vmem:[#allocation5 + $0x1220] sm:$0xff]  ;;  %v726_v35 = vld [vmem:[#allocation5 + $0x1348] sm:$0xff] }
 0x137   :  { %7210 = vmatprep.subr.bf16.mxu1 %v7209_v41  ;;  %v548_v41 = vld [vmem:[#allocation5 + $0xdb8] sm:$0xff]  ;;  %v7231_v44 = vpack.c.bf16 %v529_v38, %v511_v36  ;;  %v709_v34 = vld [vmem:[#allocation5 + $0x12c0] sm:$0xff]  ;;  %v746_v38 = vld [vmem:[#allocation5 + $0x13e8] sm:$0xff] }
 0x138   :  { %v744_v36 = vld [vmem:[#allocation5 + $0x13d8] sm:$0xff]  ;;  %v818_v0 = vld [vmem:[#allocation5 + $0x1628] sm:$0xff]  ;;  %v853_v23 = vld [vmem:[#allocation5 + $0x1740] sm:$0xff] }
 0x139   :  { %7020 = vmatpush1.bf16.msra.mxu0 %v7019_v47  ;;  %v563_v47 = vld [vmem:[#allocation5 + $0xe30] sm:$0xff]  ;;  %v8870_v12 = vld [vmem:[#allocation2 + $0x68] sm:$0xff] }
 0x13a   :  { %7212 = vmatpush1.bf16.msra.mxu1 %v7211_v48  ;;  %7022 = vmatprep.subr.bf16.mxu0 %v7021_v49  ;;  %v547_v48 = vld [vmem:[#allocation5 + $0xdb0] sm:$0xff]  ;;  %v7233_v49 = vpack.c.bf16 %v566_v42, %v548_v41  ;;  %v7043_v55 = vpack.c.bf16 %v563_v47, %v545_v46  ;;  %v7061_v41 = vpack.c.bf16 %v744_v36, %v726_v35  ;;  %v725_v42 = vld [vmem:[#allocation5 + $0x1340] sm:$0xff]  ;;  %v762_v47 = vld [vmem:[#allocation5 + $0x1468] sm:$0xff] }
 0x13b   :  { %7214 = vmatprep.subr.bf16.mxu1 %v7213_v53  ;;  %v584_v53 = vld [vmem:[#allocation5 + $0xed8] sm:$0xff]  ;;  %v7235_v56 = vpack.c.bf16 %v565_v50, %v547_v48  ;;  %v745_v46 = vld [vmem:[#allocation5 + $0x13e0] sm:$0xff]  ;;  %v870_v24 = vld [vmem:[#allocation5 + $0x17c8] sm:$0xff] }
 0x13c   :  { %v780_v48 = vld [vmem:[#allocation5 + $0x14f8] sm:$0xff]  ;;  %v871_v35 = vld [vmem:[#allocation5 + $0x17d0] sm:$0xff] }
 0x13d   :  { %7024 = vmatpush1.bf16.msra.mxu0 %v7023_v59  ;;  %v599_v59 = vld [vmem:[#allocation5 + $0xf50] sm:$0xff]  ;;  %v764_v50 = vld [vmem:[#allocation5 + $0x1478] sm:$0xff] }
 0x13e   :  { %7216 = vmatpush1.bf16.msra.mxu1 %v7215_v60  ;;  %7026 = vmatprep.subr.bf16.mxu0 %v7025_v61  ;;  %v583_v60 = vld [vmem:[#allocation5 + $0xed0] sm:$0xff]  ;;  %v7237_v61 = vpack.c.bf16 %v602_v54, %v584_v53  ;;  %v7047_v3 = vpack.c.bf16 %v599_v59, %v581_v58  ;;  %v7065_v54 = vpack.c.bf16 %v780_v48, %v762_v47  ;;  %v781_v59 = vld [vmem:[#allocation5 + $0x1500] sm:$0xff] }
 0x13f   :  { %7218 = vmatprep.subr.bf16.mxu1 %v7217_v1  ;;  %v620_v1 = vld [vmem:[#allocation5 + $0xff8] sm:$0xff]  ;;  %v7239_v4 = vpack.c.bf16 %v601_v62, %v583_v60  ;;  %v7257_v58 = vpack.c.bf16 %v782_v51, %v764_v50  ;;  %v798_v60 = vld [vmem:[#allocation5 + $0x1588] sm:$0xff]  ;;  %v923_v47 = vld [vmem:[#allocation5 + $0x1970] sm:$0xff] }
 0x140   :  { %v8868_v62 = vld [vmem:[#allocation2 + $0x38] sm:$0xff]  ;;  %v907_v48 = vld [vmem:[#allocation5 + $0x18f0] sm:$0xff]  ;;  %v925_v50 = vld [vmem:[#allocation5 + $0x1980] sm:$0xff] }
 0x141   :  { %7028 = vmatpush1.bf16.msra.mxu0 %v7027_v7  ;;  %v635_v7 = vld [vmem:[#allocation5 + $0x1070] sm:$0xff]  ;;  %v942_v51 = vld [vmem:[#allocation5 + $0x1a08] sm:$0xff] }
 0x142   :  { %7220 = vmatpush1.bf16.msra.mxu1 %v7219_v8  ;;  %7030 = vmatprep.subr.bf16.mxu0 %v7029_v9  ;;  %v619_v8 = vld [vmem:[#allocation5 + $0xff0] sm:$0xff]  ;;  %v7241_v9 = vpack.c.bf16 %v638_v2, %v620_v1  ;;  %v7051_v15 = vpack.c.bf16 %v635_v7, %v617_v6 }
 0x143   :  { %7222 = vmatprep.subr.bf16.mxu1 %v7221_v13  ;;  %v656_v13 = vld [vmem:[#allocation5 + $0x1118] sm:$0xff]  ;;  %v7243_v16 = vpack.c.bf16 %v637_v10, %v619_v8  ;;  %v8869_v1 = vld [vmem:[#allocation2 + $0x30] sm:$0xff]  ;;  %v7261_v8 = vpack.c.bf16 %v818_v0, %v800_v63  ;;  %v834_v10 = vld [vmem:[#allocation5 + $0x16a8] sm:$0xff] }
 0x144   :  { %v815_v6 = vld [vmem:[#allocation5 + $0x1610] sm:$0xff]  ;;  %v978_v63 = vld [vmem:[#allocation5 + $0x1b28] sm:$0xff]  ;;  %v996_v0 = vld [vmem:[#allocation5 + $0x1bb8] sm:$0xff] }
 0x145   :  { %7032 = vmatpush1.bf16.msra.mxu0 %v7031_v19  ;;  %v671_v19 = vld [vmem:[#allocation5 + $0x1190] sm:$0xff] }
 0x146   :  { %7224 = vmatpush1.bf16.msra.mxu1 %v7223_v20  ;;  %7034 = vmatprep.subr.bf16.mxu0 %v7033_v21  ;;  %v655_v20 = vld [vmem:[#allocation5 + $0x1110] sm:$0xff]  ;;  %v7245_v21 = vpack.c.bf16 %v674_v14, %v656_v13  ;;  %v7055_v27 = vpack.c.bf16 %v671_v19, %v653_v18  ;;  %v836_v13 = vld [vmem:[#allocation5 + $0x16b8] sm:$0xff]  ;;  %v854_v14 = vld [vmem:[#allocation5 + $0x1748] sm:$0xff]  ;;  %v7073_v18 = vpack.c.bf16 %v852_v11, %v834_v10 }
 0x147   :  { %7226 = vmatprep.subr.bf16.mxu1 %v7225_v25  ;;  %v692_v25 = vld [vmem:[#allocation5 + $0x1238] sm:$0xff]  ;;  %v7247_v28 = vpack.c.bf16 %v673_v22, %v655_v20  ;;  %v799_v7 = vld [vmem:[#allocation5 + $0x1590] sm:$0xff]  ;;  %v833_v19 = vld [vmem:[#allocation5 + $0x16a0] sm:$0xff]  ;;  %v7265_v22 = vpack.c.bf16 %v854_v14, %v836_v13 }
 0x148   :  { %v851_v20 = vld [vmem:[#allocation5 + $0x1730] sm:$0xff]  ;;  %v997_v10 = vld [vmem:[#allocation5 + $0x1bc0] sm:$0xff]  ;;  %v1014_v11 = vld [vmem:[#allocation5 + $0x1c48] sm:$0xff] }
 0x149   :  { %7036 = vmatpush1.bf16.msra.mxu0 %v7035_v31  ;;  %v707_v31 = vld [vmem:[#allocation5 + $0x12b0] sm:$0xff]  ;;  %v1016_v13 = vld [vmem:[#allocation5 + $0x1c58] sm:$0xff]  ;;  %v1034_v14 = vld [vmem:[#allocation5 + $0x1ce8] sm:$0xff] }
 0x14a   :  { %7228 = vmatpush1.bf16.msra.mxu1 %v7227_v32  ;;  %7038 = vmatprep.subr.bf16.mxu0 %v7037_v33  ;;  %v691_v32 = vld [vmem:[#allocation5 + $0x1230] sm:$0xff]  ;;  %v7249_v33 = vpack.c.bf16 %v710_v26, %v692_v25  ;;  %v7059_v39 = vpack.c.bf16 %v707_v31, %v689_v30  ;;  %v888_v25 = vld [vmem:[#allocation5 + $0x1858] sm:$0xff]  ;;  %v7075_v30 = vpack.c.bf16 %v851_v20, %v833_v19 }
 0x14b   :  { %7230 = vmatprep.subr.bf16.mxu1 %v7229_v37  ;;  %v728_v37 = vld [vmem:[#allocation5 + $0x1358] sm:$0xff]  ;;  %v7251_v40 = vpack.c.bf16 %v709_v34, %v691_v32  ;;  %v7077_v32 = vpack.c.bf16 %v888_v25, %v870_v24  ;;  %v887_v34 = vld [vmem:[#allocation5 + $0x1850] sm:$0xff] }
 0x14c   :  { %v8872_v26 = vld [vmem:[#allocation2 + $0x98] sm:$0xff]  ;;  %v1031_v19 = vld [vmem:[#allocation5 + $0x1cd0] sm:$0xff] }
 0x14d   :  { %7040 = vmatpush1.bf16.msra.mxu0 %v7039_v43  ;;  %v743_v43 = vld [vmem:[#allocation5 + $0x13d0] sm:$0xff]  ;;  %v1068_v24 = vld [vmem:[#allocation5 + $0x1df8] sm:$0xff] }
 0x14e   :  { %7232 = vmatpush1.bf16.msra.mxu1 %v7231_v44  ;;  %7042 = vmatprep.subr.bf16.mxu0 %v7041_v45  ;;  %v727_v44 = vld [vmem:[#allocation5 + $0x1350] sm:$0xff]  ;;  %v7253_v45 = vpack.c.bf16 %v746_v38, %v728_v37  ;;  %v7063_v52 = vpack.c.bf16 %v743_v43, %v725_v42  ;;  %v889_v37 = vld [vmem:[#allocation5 + $0x1860] sm:$0xff]  ;;  %v906_v38 = vld [vmem:[#allocation5 + $0x18e8] sm:$0xff] }
 0x14f   :  { %7234 = vmatprep.subr.bf16.mxu1 %v7233_v49  ;;  %v8867_v49 = vld [vmem:[#allocation2] sm:$0xff]  ;;  %v7255_v53 = vpack.c.bf16 %v745_v46, %v727_v44  ;;  %v926_v42 = vld [vmem:[#allocation5 + $0x1988] sm:$0xff]  ;;  %v7271_v44 = vpack.c.bf16 %v889_v37, %v871_v35  ;;  %v1015_v20 = vld [vmem:[#allocation5 + $0x1c50] sm:$0xff] }
 0x150   :  { %v905_v46 = vld [vmem:[#allocation5 + $0x18e0] sm:$0xff]  ;;  %v1052_v25 = vld [vmem:[#allocation5 + $0x1d78] sm:$0xff]  ;;  %v1086_v35 = vld [vmem:[#allocation5 + $0x1e88] sm:$0xff] }
 0x151   :  { %7044 = vmatpush1.bf16.msra.mxu0 %v7043_v55  ;;  %v761_v55 = vld [vmem:[#allocation5 + $0x1460] sm:$0xff]  ;;  %v1088_v37 = vld [vmem:[#allocation5 + $0x1e98] sm:$0xff] }
 0x152   :  { %7236 = vmatpush1.bf16.msra.mxu1 %v7235_v56  ;;  %7046 = vmatprep.subr.bf16.mxu0 %v7045_v57  ;;  %v779_v56 = vld [vmem:[#allocation5 + $0x14f0] sm:$0xff] }
 0x153   :  { %7238 = vmatprep.subr.bf16.mxu1 %v7237_v61  ;;  %v763_v57 = vld [vmem:[#allocation5 + $0x1470] sm:$0xff]  ;;  %v816_v61 = vld [vmem:[#allocation5 + $0x1618] sm:$0xff]  ;;  %v7067_v2 = vpack.c.bf16 %v779_v56, %v761_v55  ;;  %v7083_v55 = vpack.c.bf16 %v923_v47, %v905_v46  ;;  %v7275_v56 = vpack.c.bf16 %v925_v50, %v907_v48  ;;  %v1105_v46 = vld [vmem:[#allocation5 + $0x1f20] sm:$0xff] }
 0x154   :  { %v1122_v47 = vld [vmem:[#allocation5 + $0x1fa8] sm:$0xff]  ;;  %v1140_v48 = vld [vmem:[#allocation5 + $0x2038] sm:$0xff] }
 0x155   :  { %7048 = vmatpush1.bf16.msra.mxu0 %v7047_v3  ;;  %v7259_v3 = vpack.c.bf16 %v781_v59, %v763_v57  ;;  %v959_v59 = vld [vmem:[#allocation5 + $0x1a90] sm:$0xff]  ;;  %v1142_v50 = vld [vmem:[#allocation5 + $0x2048] sm:$0xff] }
 0x156   :  { %7240 = vmatpush1.bf16.msra.mxu1 %v7239_v4  ;;  %7050 = vmatprep.subr.bf16.mxu0 %v7049_v5  ;;  %v7069_v4 = vpack.c.bf16 %v816_v61, %v798_v60  ;;  %v797_v5 = vld [vmem:[#allocation5 + $0x1580] sm:$0xff]  ;;  %v943_v60 = vld [vmem:[#allocation5 + $0x1a10] sm:$0xff] }
 0x157   :  { %7242 = vmatprep.subr.bf16.mxu1 %v7241_v9  ;;  %v817_v9 = vld [vmem:[#allocation5 + $0x1620] sm:$0xff] }
 0x159   :  { %7052 = vmatpush1.bf16.msra.mxu0 %v7051_v15  ;;  %v8871_v15 = vld [vmem:[#allocation2 + $0x60] sm:$0xff] }
 0x15a   :  { %7244 = vmatpush1.bf16.msra.mxu1 %v7243_v16  ;;  %7054 = vmatprep.subr.bf16.mxu0 %v7053_v17  ;;  %v7071_v16 = vpack.c.bf16 %v815_v6, %v797_v5  ;;  %v7263_v17 = vpack.c.bf16 %v817_v9, %v799_v7  ;;  %v7089_v5 = vpack.c.bf16 %v996_v0, %v978_v63  ;;  %v977_v6 = vld [vmem:[#allocation5 + $0x1b20] sm:$0xff]  ;;  %v995_v7 = vld [vmem:[#allocation5 + $0x1bb0] sm:$0xff] }
 0x15b   :  { %7246 = vmatprep.subr.bf16.mxu1 %v7245_v21  ;;  %v835_v21 = vld [vmem:[#allocation5 + $0x16b0] sm:$0xff] }
 0x15c   :  { %v7267_v31 = vpack.c.bf16 %v853_v23, %v835_v21  ;;  %v7285_v21 = vpack.c.bf16 %v1034_v14, %v1016_v13  ;;  %v1050_v23 = vld [vmem:[#allocation5 + $0x1d68] sm:$0xff]  ;;  %v1193_v14 = vld [vmem:[#allocation5 + $0x21e0] sm:$0xff] }
 0x15d   :  { %7056 = vmatpush1.bf16.msra.mxu0 %v7055_v27  ;;  %v872_v27 = vld [vmem:[#allocation5 + $0x17d8] sm:$0xff] }
 0x15e   :  { %7248 = vmatpush1.bf16.msra.mxu1 %v7247_v28  ;;  %7058 = vmatprep.subr.bf16.mxu0 %v7057_v29  ;;  %v890_v28 = vld [vmem:[#allocation5 + $0x1868] sm:$0xff]  ;;  %v8873_v29 = vld [vmem:[#allocation2 + $0x90] sm:$0xff] }
 0x15f   :  { %7250 = vmatprep.subr.bf16.mxu1 %v7249_v33  ;;  %v869_v33 = vld [vmem:[#allocation5 + $0x17c0] sm:$0xff]  ;;  %v7269_v36 = vpack.c.bf16 %v890_v28, %v872_v27 }
 0x160   :  { %2532 = vmatmul.mubr.f32.vlgmr.msra.gmra.mrb[8].mxu0 %v8867_v49  ;;  %v7079_v43 = vpack.c.bf16 %v887_v34, %v869_v33  ;;  %v1069_v34 = vld [vmem:[#allocation5 + $0x1e00] sm:$0xff] }
 0x161   :  { %7060 = vmatpush1.bf16.msra.mxu0 %v7059_v39  ;;  %2799 = vmatmul.mubr.f32.vlgmr.msra.gmra.mrb[8].mxu1 %v8867_v49  ;;  %v924_v39 = vld [vmem:[#allocation5 + $0x1978] sm:$0xff] }
 0x162   :  { %7252 = vmatpush1.bf16.msra.mxu1 %v7251_v40  ;;  %7062 = vmatprep.subr.bf16.mxu0 %v7061_v41  ;;  %v8874_v40 = vld [vmem:[#allocation2 + $0x18] sm:$0xff] }
 0x163   :  { %7254 = vmatprep.subr.bf16.mxu1 %v7253_v45  ;;  %2537 = vmatprep.mubr.f32.mxu0 %v8868_v62  ;;  %v908_v41 = vld [vmem:[#allocation5 + $0x18f8] sm:$0xff]  ;;  %v7081_v45 = vpack.c.bf16 %v924_v39, %v906_v38  ;;  %v1106_v38 = vld [vmem:[#allocation5 + $0x1f28] sm:$0xff] }
 0x164   :  { %2804 = vmatprep.mubr.f32.mxu1 %v8868_v62  ;;  %2538 = vmatmul.mubr.f32.gmra.mrb[10].mxu0 %v8869_v1  ;;  %v7273_v49 = vpack.c.bf16 %v926_v42, %v908_v41  ;;  %v961_v62 = vld [vmem:[#allocation5 + $0x1aa0] sm:$0xff] }
 0x165   :  { %7064 = vmatpush1.bf16.msra.mxu0 %v7063_v52  ;;  %2805 = vmatmul.mubr.f32.gmra.mrb[10].mxu1 %v8869_v1  ;;  %v960_v52 = vld [vmem:[#allocation5 + $0x1a98] sm:$0xff]  ;;  %v1085_v42 = vld [vmem:[#allocation5 + $0x1e80] sm:$0xff] }
 0x166   :  { %7256 = vmatpush1.bf16.msra.mxu1 %v7255_v53  ;;  %7066 = vmatprep.subr.bf16.mxu0 %v7065_v54  ;;  %v944_v53 = vld [vmem:[#allocation5 + $0x1a18] sm:$0xff]  ;;  %v962_v54 = vld [vmem:[#allocation5 + $0x1aa8] sm:$0xff]  ;;  %v7085_v57 = vpack.c.bf16 %v960_v52, %v942_v51 }
 0x167   :  { %7258 = vmatprep.subr.bf16.mxu1 %v7257_v58  ;;  %2543 = vmatprep.mubr.f32.mxu0 %v8870_v12  ;;  %v941_v58 = vld [vmem:[#allocation5 + $0x1a00] sm:$0xff]  ;;  %v7277_v61 = vpack.c.bf16 %v962_v54, %v944_v53  ;;  %v980_v1 = vld [vmem:[#allocation5 + $0x1b38] sm:$0xff]  ;;  %v7105_v53 = vpack.c.bf16 %v1140_v48, %v1122_v47 }
 0x168   :  { %2810 = vmatprep.mubr.f32.mxu1 %v8870_v12  ;;  %2544 = vmatmul.mubr.f32.gmra.mrb[12].mxu0 %v8871_v15  ;;  %v1032_v12 = vld [vmem:[#allocation5 + $0x1cd8] sm:$0xff]  ;;  %v1121_v54 = vld [vmem:[#allocation5 + $0x1fa0] sm:$0xff] }
 0x169   :  { %7068 = vmatpush1.bf16.msra.mxu0 %v7067_v2  ;;  %2811 = vmatmul.mubr.f32.gmra.mrb[12].mxu1 %v8871_v15  ;;  %v998_v2 = vld [vmem:[#allocation5 + $0x1bc8] sm:$0xff]  ;;  %v7091_v15 = vpack.c.bf16 %v995_v7, %v977_v6  ;;  %v1177_v6 = vld [vmem:[#allocation5 + $0x2160] sm:$0xff] }
 0x16a   :  { %7260 = vmatpush1.bf16.msra.mxu1 %v7259_v3  ;;  %7070 = vmatprep.subr.bf16.mxu0 %v7069_v4  ;;  %v7087_v3 = vpack.c.bf16 %v959_v59, %v941_v58  ;;  %v7279_v4 = vpack.c.bf16 %v961_v62, %v943_v60  ;;  %v7281_v9 = vpack.c.bf16 %v998_v2, %v980_v1  ;;  %v1141_v58 = vld [vmem:[#allocation5 + $0x2040] sm:$0xff]  ;;  %v1158_v59 = vld [vmem:[#allocation5 + $0x20c8] sm:$0xff]  ;;  %v1176_v60 = vld [vmem:[#allocation5 + $0x2158] sm:$0xff] }
 0x16b   :  { %7262 = vmatprep.subr.bf16.mxu1 %v7261_v8  ;;  %2549 = vmatprep.mubr.f32.mxu0 %v8872_v26  ;;  %v979_v8 = vld [vmem:[#allocation5 + $0x1b30] sm:$0xff]  ;;  %v1178_v62 = vld [vmem:[#allocation5 + $0x2168] sm:$0xff]  ;;  %v7109_v1 = vpack.c.bf16 %v1176_v60, %v1158_v59  ;;  %v1157_v2 = vld [vmem:[#allocation5 + $0x20c0] sm:$0xff] }
 0x16c   :  { %2816 = vmatprep.mubr.f32.mxu1 %v8872_v26  ;;  %2550 = vmatmul.mubr.f32.gmra.mrb[14].mxu0 %v8873_v29  ;;  %v1070_v26 = vld [vmem:[#allocation5 + $0x1e08] sm:$0xff] }
 0x16d   :  { %7072 = vmatpush1.bf16.msra.mxu0 %v7071_v16  ;;  %2817 = vmatmul.mubr.f32.gmra.mrb[14].mxu1 %v8873_v29  ;;  %v7283_v16 = vpack.c.bf16 %v997_v10, %v979_v8  ;;  %v7097_v29 = vpack.c.bf16 %v1068_v24, %v1050_v23  ;;  %v7289_v33 = vpack.c.bf16 %v1070_v26, %v1052_v25  ;;  %v1194_v7 = vld [vmem:[#allocation5 + $0x21e8] sm:$0xff]  ;;  %v1212_v8 = vld [vmem:[#allocation5 + $0x2278] sm:$0xff]  ;;  %v1229_v26 = vld [vmem:[#allocation5 + $0x2300] sm:$0xff] }
 0x16e   :  { %7264 = vmatpush1.bf16.msra.mxu1 %v7263_v17  ;;  %7074 = vmatprep.subr.bf16.mxu0 %v7073_v18  ;;  %v7093_v17 = vpack.c.bf16 %v1032_v12, %v1014_v11  ;;  %v1013_v18 = vld [vmem:[#allocation5 + $0x1c40] sm:$0xff]  ;;  %v1214_v10 = vld [vmem:[#allocation5 + $0x2288] sm:$0xff]  ;;  %v7113_v13 = vpack.c.bf16 %v1212_v8, %v1194_v7  ;;  %v1376_v7 = vld [vmem:[#allocation5 + $0x2798] sm:$0xff] }
 0x16f   :  { %7266 = vmatprep.subr.bf16.mxu1 %v7265_v22  ;;  %2620 = vmatprep.mubr.f32.mxu0 %v8874_v40  ;;  %v1033_v22 = vld [vmem:[#allocation5 + $0x1ce0] sm:$0xff]  ;;  %v7095_v27 = vpack.c.bf16 %v1031_v19, %v1013_v18  ;;  %v1230_v19 = vld [vmem:[#allocation5 + $0x2308] sm:$0xff] }
 0x170   :  { %2887 = vmatprep.mubr.f32.mxu1 %v8874_v40  ;;  %v7287_v28 = vpack.c.bf16 %v1033_v22, %v1015_v20  ;;  %v1213_v18 = vld [vmem:[#allocation5 + $0x2280] sm:$0xff]  ;;  %v1248_v20 = vld [vmem:[#allocation5 + $0x2398] sm:$0xff]  ;;  %v1250_v22 = vld [vmem:[#allocation5 + $0x23a8] sm:$0xff] }
 0x171   :  { %7076 = vmatpush1.bf16.msra.mxu0 %v7075_v30  ;;  %v1049_v30 = vld [vmem:[#allocation5 + $0x1d60] sm:$0xff]  ;;  %v7117_v25 = vpack.c.bf16 %v1248_v20, %v1230_v19  ;;  %v1358_v59 = vld [vmem:[#allocation5 + $0x2708] sm:$0xff]  ;;  %v1428_v19 = vld [vmem:[#allocation5 + $0x2938] sm:$0xff] }
 0x172   :  { %7268 = vmatpush1.bf16.msra.mxu1 %v7267_v31  ;;  %7078 = vmatprep.subr.bf16.mxu0 %v7077_v32  ;;  %v1067_v31 = vld [vmem:[#allocation5 + $0x1df0] sm:$0xff]  ;;  %v1394_v8 = vld [vmem:[#allocation5 + $0x2828] sm:$0xff]  ;;  %v8878_v20 = vld [vmem:[#allocation2 + $0x78] sm:$0xff] }
 0x173   :  { %7270 = vmatprep.subr.bf16.mxu1 %v7269_v36  ;;  %v1051_v32 = vld [vmem:[#allocation5 + $0x1d70] sm:$0xff]  ;;  %v1104_v36 = vld [vmem:[#allocation5 + $0x1f18] sm:$0xff]  ;;  %v7099_v39 = vpack.c.bf16 %v1067_v31, %v1049_v30  ;;  %v1249_v30 = vld [vmem:[#allocation5 + $0x23a0] sm:$0xff] }
 0x174   :  { %v7291_v40 = vpack.c.bf16 %v1069_v34, %v1051_v32  ;;  %v7101_v41 = vpack.c.bf16 %v1104_v36, %v1086_v35  ;;  %v1266_v31 = vld [vmem:[#allocation5 + $0x2428] sm:$0xff]  ;;  %v1284_v32 = vld [vmem:[#allocation5 + $0x24b8] sm:$0xff] }
 0x175   :  { %7080 = vmatpush1.bf16.msra.mxu0 %v7079_v43  ;;  %v1103_v43 = vld [vmem:[#allocation5 + $0x1f10] sm:$0xff]  ;;  %v1286_v34 = vld [vmem:[#allocation5 + $0x24c8] sm:$0xff] }
 0x176   :  { %7272 = vmatpush1.bf16.msra.mxu1 %v7271_v44  ;;  %7082 = vmatprep.subr.bf16.mxu0 %v7081_v45  ;;  %v1087_v44 = vld [vmem:[#allocation5 + $0x1e90] sm:$0xff]  ;;  %v7293_v45 = vpack.c.bf16 %v1106_v38, %v1088_v37  ;;  %v7103_v51 = vpack.c.bf16 %v1103_v43, %v1085_v42  ;;  %v7121_v37 = vpack.c.bf16 %v1284_v32, %v1266_v31  ;;  %v1265_v38 = vld [vmem:[#allocation5 + $0x2420] sm:$0xff]  ;;  %v1302_v43 = vld [vmem:[#allocation5 + $0x2548] sm:$0xff] }
 0x177   :  { %7274 = vmatprep.subr.bf16.mxu1 %v7273_v49  ;;  %v1124_v49 = vld [vmem:[#allocation5 + $0x1fb8] sm:$0xff]  ;;  %v7295_v52 = vpack.c.bf16 %v1105_v46, %v1087_v44  ;;  %v1285_v42 = vld [vmem:[#allocation5 + $0x24c0] sm:$0xff]  ;;  %v1322_v46 = vld [vmem:[#allocation5 + $0x25e8] sm:$0xff] }
 0x178   :  { %v1320_v44 = vld [vmem:[#allocation5 + $0x25d8] sm:$0xff]  ;;  %v1429_v31 = vld [vmem:[#allocation5 + $0x2940] sm:$0xff]  ;;  %v1446_v32 = vld [vmem:[#allocation5 + $0x29c8] sm:$0xff] }
 0x179   :  { %7084 = vmatpush1.bf16.msra.mxu0 %v7083_v55  ;;  %v1139_v55 = vld [vmem:[#allocation5 + $0x2030] sm:$0xff] }
 0x17a   :  { %7276 = vmatpush1.bf16.msra.mxu1 %v7275_v56  ;;  %7086 = vmatprep.subr.bf16.mxu0 %v7085_v57  ;;  %v1123_v56 = vld [vmem:[#allocation5 + $0x1fb0] sm:$0xff]  ;;  %v7297_v57 = vpack.c.bf16 %v1142_v50, %v1124_v49  ;;  %v7107_v63 = vpack.c.bf16 %v1139_v55, %v1121_v54  ;;  %v7125_v49 = vpack.c.bf16 %v1320_v44, %v1302_v43  ;;  %v1301_v50 = vld [vmem:[#allocation5 + $0x2540] sm:$0xff]  ;;  %v1338_v55 = vld [vmem:[#allocation5 + $0x2668] sm:$0xff] }
 0x17b   :  { %7278 = vmatprep.subr.bf16.mxu1 %v7277_v61  ;;  %v1160_v61 = vld [vmem:[#allocation5 + $0x20d8] sm:$0xff]  ;;  %v7299_v0 = vpack.c.bf16 %v1141_v58, %v1123_v56  ;;  %v1321_v54 = vld [vmem:[#allocation5 + $0x25e0] sm:$0xff]  ;;  %v1447_v43 = vld [vmem:[#allocation5 + $0x29d0] sm:$0xff] }
 0x17c   :  { %v1356_v56 = vld [vmem:[#allocation5 + $0x26f8] sm:$0xff] }
 0x17d   :  { %7088 = vmatpush1.bf16.msra.mxu0 %v7087_v3  ;;  %v1175_v3 = vld [vmem:[#allocation5 + $0x2150] sm:$0xff]  ;;  %v1340_v58 = vld [vmem:[#allocation5 + $0x2678] sm:$0xff] }
 0x17e   :  { %7280 = vmatpush1.bf16.msra.mxu1 %v7279_v4  ;;  %7090 = vmatprep.subr.bf16.mxu0 %v7089_v5  ;;  %v1159_v4 = vld [vmem:[#allocation5 + $0x20d0] sm:$0xff]  ;;  %v7301_v5 = vpack.c.bf16 %v1178_v62, %v1160_v61  ;;  %v7111_v11 = vpack.c.bf16 %v1175_v3, %v1157_v2  ;;  %v7129_v62 = vpack.c.bf16 %v1356_v56, %v1338_v55  ;;  %v1357_v3 = vld [vmem:[#allocation5 + $0x2700] sm:$0xff] }
 0x17f   :  { %7282 = vmatprep.subr.bf16.mxu1 %v7281_v9  ;;  %v1196_v9 = vld [vmem:[#allocation5 + $0x21f8] sm:$0xff]  ;;  %v7303_v12 = vpack.c.bf16 %v1177_v6, %v1159_v4  ;;  %v7321_v2 = vpack.c.bf16 %v1358_v59, %v1340_v58  ;;  %v1374_v4 = vld [vmem:[#allocation5 + $0x2788] sm:$0xff]  ;;  %v1499_v55 = vld [vmem:[#allocation5 + $0x2b70] sm:$0xff] }
 0x180   :  { %v8876_v6 = vld [vmem:[#allocation2 + $0x48] sm:$0xff]  ;;  %v1483_v56 = vld [vmem:[#allocation5 + $0x2af0] sm:$0xff]  ;;  %v1501_v58 = vld [vmem:[#allocation5 + $0x2b80] sm:$0xff] }
 0x181   :  { %7092 = vmatpush1.bf16.msra.mxu0 %v7091_v15  ;;  %v1211_v15 = vld [vmem:[#allocation5 + $0x2270] sm:$0xff]  ;;  %v1518_v59 = vld [vmem:[#allocation5 + $0x2c08] sm:$0xff] }
 0x182   :  { %7284 = vmatpush1.bf16.msra.mxu1 %v7283_v16  ;;  %7094 = vmatprep.subr.bf16.mxu0 %v7093_v17  ;;  %v1195_v16 = vld [vmem:[#allocation5 + $0x21f0] sm:$0xff]  ;;  %v7305_v17 = vpack.c.bf16 %v1214_v10, %v1196_v9  ;;  %v7115_v23 = vpack.c.bf16 %v1211_v15, %v1193_v14  ;;  %v8877_v9 = vld [vmem:[#allocation2 + $0x40] sm:$0xff] }
 0x183   :  { %7286 = vmatprep.subr.bf16.mxu1 %v7285_v21  ;;  %v1232_v21 = vld [vmem:[#allocation5 + $0x2318] sm:$0xff]  ;;  %v7307_v24 = vpack.c.bf16 %v1213_v18, %v1195_v16  ;;  %v1391_v14 = vld [vmem:[#allocation5 + $0x2810] sm:$0xff]  ;;  %v7325_v16 = vpack.c.bf16 %v1394_v8, %v1376_v7  ;;  %v1410_v18 = vld [vmem:[#allocation5 + $0x28a8] sm:$0xff] }
 0x184   :  { %v1375_v15 = vld [vmem:[#allocation5 + $0x2790] sm:$0xff]  ;;  %v1554_v7 = vld [vmem:[#allocation5 + $0x2d28] sm:$0xff]  ;;  %v1572_v8 = vld [vmem:[#allocation5 + $0x2db8] sm:$0xff] }
 0x185   :  { %7096 = vmatpush1.bf16.msra.mxu0 %v7095_v27  ;;  %v1247_v27 = vld [vmem:[#allocation5 + $0x2390] sm:$0xff] }
 0x186   :  { %7288 = vmatpush1.bf16.msra.mxu1 %v7287_v28  ;;  %7098 = vmatprep.subr.bf16.mxu0 %v7097_v29  ;;  %v1231_v28 = vld [vmem:[#allocation5 + $0x2310] sm:$0xff]  ;;  %v7309_v29 = vpack.c.bf16 %v1250_v22, %v1232_v21  ;;  %v7119_v35 = vpack.c.bf16 %v1247_v27, %v1229_v26  ;;  %v1412_v21 = vld [vmem:[#allocation5 + $0x28b8] sm:$0xff]  ;;  %v1430_v22 = vld [vmem:[#allocation5 + $0x2948] sm:$0xff]  ;;  %v7137_v26 = vpack.c.bf16 %v1428_v19, %v1410_v18 }
 0x187   :  { %7290 = vmatprep.subr.bf16.mxu1 %v7289_v33  ;;  %v1268_v33 = vld [vmem:[#allocation5 + $0x2438] sm:$0xff]  ;;  %v7311_v36 = vpack.c.bf16 %v1249_v30, %v1231_v28  ;;  %v1409_v27 = vld [vmem:[#allocation5 + $0x28a0] sm:$0xff]  ;;  %v1427_v28 = vld [vmem:[#allocation5 + $0x2930] sm:$0xff]  ;;  %v7329_v30 = vpack.c.bf16 %v1430_v22, %v1412_v21 }
 0x188   :  { %v1573_v18 = vld [vmem:[#allocation5 + $0x2dc0] sm:$0xff]  ;;  %v1590_v19 = vld [vmem:[#allocation5 + $0x2e48] sm:$0xff]  ;;  %v1592_v21 = vld [vmem:[#allocation5 + $0x2e58] sm:$0xff] }
 0x189   :  { %7100 = vmatpush1.bf16.msra.mxu0 %v7099_v39  ;;  %v1283_v39 = vld [vmem:[#allocation5 + $0x24b0] sm:$0xff]  ;;  %v1610_v22 = vld [vmem:[#allocation5 + $0x2ee8] sm:$0xff] }
 0x18a   :  { %7292 = vmatpush1.bf16.msra.mxu1 %v7291_v40  ;;  %7102 = vmatprep.subr.bf16.mxu0 %v7101_v41  ;;  %v1267_v40 = vld [vmem:[#allocation5 + $0x2430] sm:$0xff]  ;;  %v7313_v41 = vpack.c.bf16 %v1286_v34, %v1268_v33  ;;  %v7123_v47 = vpack.c.bf16 %v1283_v39, %v1265_v38  ;;  %v1464_v33 = vld [vmem:[#allocation5 + $0x2a58] sm:$0xff]  ;;  %v8880_v34 = vld [vmem:[#allocation2 + $0xa8] sm:$0xff]  ;;  %v7139_v38 = vpack.c.bf16 %v1427_v28, %v1409_v27 }
 0x18b   :  { %7294 = vmatprep.subr.bf16.mxu1 %v7293_v45  ;;  %v1304_v45 = vld [vmem:[#allocation5 + $0x2558] sm:$0xff]  ;;  %v7315_v48 = vpack.c.bf16 %v1285_v42, %v1267_v40  ;;  %v7141_v40 = vpack.c.bf16 %v1464_v33, %v1446_v32  ;;  %v1463_v42 = vld [vmem:[#allocation5 + $0x2a50] sm:$0xff] }
 0x18c   :  { %v1607_v27 = vld [vmem:[#allocation5 + $0x2ed0] sm:$0xff]  ;;  %v1644_v32 = vld [vmem:[#allocation5 + $0x2ff8] sm:$0xff] }
 0x18d   :  { %7104 = vmatpush1.bf16.msra.mxu0 %v7103_v51  ;;  %v1319_v51 = vld [vmem:[#allocation5 + $0x25d0] sm:$0xff]  ;;  %v1628_v33 = vld [vmem:[#allocation5 + $0x2f78] sm:$0xff] }
 0x18e   :  { %7296 = vmatpush1.bf16.msra.mxu1 %v7295_v52  ;;  %7106 = vmatprep.subr.bf16.mxu0 %v7105_v53  ;;  %v1303_v52 = vld [vmem:[#allocation5 + $0x2550] sm:$0xff]  ;;  %v7317_v53 = vpack.c.bf16 %v1322_v46, %v1304_v45  ;;  %v7127_v60 = vpack.c.bf16 %v1319_v51, %v1301_v50  ;;  %v1465_v45 = vld [vmem:[#allocation5 + $0x2a60] sm:$0xff]  ;;  %v1482_v46 = vld [vmem:[#allocation5 + $0x2ae8] sm:$0xff] }
 0x18f   :  { %7298 = vmatprep.subr.bf16.mxu1 %v7297_v57  ;;  %v8875_v57 = vld [vmem:[#allocation2 + $0x10] sm:$0xff]  ;;  %v7319_v61 = vpack.c.bf16 %v1321_v54, %v1303_v52  ;;  %v1502_v50 = vld [vmem:[#allocation5 + $0x2b88] sm:$0xff]  ;;  %v7335_v52 = vpack.c.bf16 %v1465_v45, %v1447_v43  ;;  %v1481_v54 = vld [vmem:[#allocation5 + $0x2ae0] sm:$0xff] }
 0x190   :  { %v1591_v28 = vld [vmem:[#allocation5 + $0x2e50] sm:$0xff]  ;;  %v1662_v43 = vld [vmem:[#allocation5 + $0x3088] sm:$0xff]  ;;  %v1664_v45 = vld [vmem:[#allocation5 + $0x3098] sm:$0xff] }
 0x191   :  { %7108 = vmatpush1.bf16.msra.mxu0 %v7107_v63  ;;  %v1337_v63 = vld [vmem:[#allocation5 + $0x2660] sm:$0xff] }
 0x192   :  { %7300 = vmatpush1.bf16.msra.mxu1 %v7299_v0  ;;  %7110 = vmatprep.subr.bf16.mxu0 %v7109_v1  ;;  %v1355_v0 = vld [vmem:[#allocation5 + $0x26f0] sm:$0xff] }
 0x193   :  { %7302 = vmatprep.subr.bf16.mxu1 %v7301_v5  ;;  %v1339_v1 = vld [vmem:[#allocation5 + $0x2670] sm:$0xff]  ;;  %v1392_v5 = vld [vmem:[#allocation5 + $0x2818] sm:$0xff]  ;;  %v7131_v10 = vpack.c.bf16 %v1355_v0, %v1337_v63  ;;  %v7147_v63 = vpack.c.bf16 %v1499_v55, %v1481_v54  ;;  %v7339_v0 = vpack.c.bf16 %v1501_v58, %v1483_v56  ;;  %v1681_v54 = vld [vmem:[#allocation5 + $0x3120] sm:$0xff] }
 0x194   :  { %v1698_v55 = vld [vmem:[#allocation5 + $0x31a8] sm:$0xff]  ;;  %v1716_v56 = vld [vmem:[#allocation5 + $0x3238] sm:$0xff] }
 0x195   :  { %7112 = vmatpush1.bf16.msra.mxu0 %v7111_v11  ;;  %v7323_v11 = vpack.c.bf16 %v1357_v3, %v1339_v1  ;;  %v1535_v3 = vld [vmem:[#allocation5 + $0x2c90] sm:$0xff]  ;;  %v1718_v58 = vld [vmem:[#allocation5 + $0x3248] sm:$0xff] }
 0x196   :  { %7304 = vmatpush1.bf16.msra.mxu1 %v7303_v12  ;;  %7114 = vmatprep.subr.bf16.mxu0 %v7113_v13  ;;  %v7133_v12 = vpack.c.bf16 %v1392_v5, %v1374_v4  ;;  %v1373_v13 = vld [vmem:[#allocation5 + $0x2780] sm:$0xff]  ;;  %v1519_v4 = vld [vmem:[#allocation5 + $0x2c10] sm:$0xff] }
 0x197   :  { %7306 = vmatprep.subr.bf16.mxu1 %v7305_v17  ;;  %v1393_v17 = vld [vmem:[#allocation5 + $0x2820] sm:$0xff] }
 0x199   :  { %7116 = vmatpush1.bf16.msra.mxu0 %v7115_v23  ;;  %v8879_v23 = vld [vmem:[#allocation2 + $0x70] sm:$0xff] }
 0x19a   :  { %7308 = vmatpush1.bf16.msra.mxu1 %v7307_v24  ;;  %7118 = vmatprep.subr.bf16.mxu0 %v7117_v25  ;;  %v7135_v24 = vpack.c.bf16 %v1391_v14, %v1373_v13  ;;  %v7327_v25 = vpack.c.bf16 %v1393_v17, %v1375_v15  ;;  %v7153_v13 = vpack.c.bf16 %v1572_v8, %v1554_v7  ;;  %v1553_v14 = vld [vmem:[#allocation5 + $0x2d20] sm:$0xff]  ;;  %v1571_v15 = vld [vmem:[#allocation5 + $0x2db0] sm:$0xff] }
 0x19b   :  { %7310 = vmatprep.subr.bf16.mxu1 %v7309_v29  ;;  %v1411_v29 = vld [vmem:[#allocation5 + $0x28b0] sm:$0xff] }
 0x19c   :  { %v7331_v39 = vpack.c.bf16 %v1429_v31, %v1411_v29  ;;  %v7349_v29 = vpack.c.bf16 %v1610_v22, %v1592_v21  ;;  %v1626_v31 = vld [vmem:[#allocation5 + $0x2f68] sm:$0xff]  ;;  %v1769_v22 = vld [vmem:[#allocation5 + $0x33e0] sm:$0xff] }
 0x19d   :  { %7120 = vmatpush1.bf16.msra.mxu0 %v7119_v35  ;;  %v1448_v35 = vld [vmem:[#allocation5 + $0x29d8] sm:$0xff] }
 0x19e   :  { %7312 = vmatpush1.bf16.msra.mxu1 %v7311_v36  ;;  %7122 = vmatprep.subr.bf16.mxu0 %v7121_v37  ;;  %v1466_v36 = vld [vmem:[#allocation5 + $0x2a68] sm:$0xff]  ;;  %v8881_v37 = vld [vmem:[#allocation2 + $0xa0] sm:$0xff] }
 0x19f   :  { %7314 = vmatprep.subr.bf16.mxu1 %v7313_v41  ;;  %v1445_v41 = vld [vmem:[#allocation5 + $0x29c0] sm:$0xff]  ;;  %v7333_v44 = vpack.c.bf16 %v1466_v36, %v1448_v35 }
 0x1a0   :  { %2621 = vmatmul.mubr.f32.vlgmr.msra.gmra.mrb[8].mxu0 %v8875_v57  ;;  %v7143_v51 = vpack.c.bf16 %v1463_v42, %v1445_v41  ;;  %v1645_v42 = vld [vmem:[#allocation5 + $0x3000] sm:$0xff] }
 0x1a1   :  { %7124 = vmatpush1.bf16.msra.mxu0 %v7123_v47  ;;  %2888 = vmatmul.mubr.f32.vlgmr.msra.gmra.mrb[8].mxu1 %v8875_v57  ;;  %v1500_v47 = vld [vmem:[#allocation5 + $0x2b78] sm:$0xff] }
 0x1a2   :  { %7316 = vmatpush1.bf16.msra.mxu1 %v7315_v48  ;;  %7126 = vmatprep.subr.bf16.mxu0 %v7125_v49  ;;  %v8882_v48 = vld [vmem:[#allocation2 + $0x28] sm:$0xff]  ;;  %v1484_v49 = vld [vmem:[#allocation5 + $0x2af8] sm:$0xff] }
 0x1a3   :  { %7318 = vmatprep.subr.bf16.mxu1 %v7317_v53  ;;  %2626 = vmatprep.mubr.f32.mxu0 %v8876_v6  ;;  %v7145_v53 = vpack.c.bf16 %v1500_v47, %v1482_v46  ;;  %v7337_v57 = vpack.c.bf16 %v1502_v50, %v1484_v49  ;;  %v1682_v46 = vld [vmem:[#allocation5 + $0x3128] sm:$0xff]  ;;  %v1661_v50 = vld [vmem:[#allocation5 + $0x3080] sm:$0xff] }
 0x1a4   :  { %2893 = vmatprep.mubr.f32.mxu1 %v8876_v6  ;;  %2627 = vmatmul.mubr.f32.gmra.mrb[10].mxu0 %v8877_v9  ;;  %v1537_v6 = vld [vmem:[#allocation5 + $0x2ca0] sm:$0xff] }
 0x1a5   :  { %7128 = vmatpush1.bf16.msra.mxu0 %v7127_v60  ;;  %2894 = vmatmul.mubr.f32.gmra.mrb[10].mxu1 %v8877_v9  ;;  %v1536_v60 = vld [vmem:[#allocation5 + $0x2c98] sm:$0xff] }
 0x1a6   :  { %7320 = vmatpush1.bf16.msra.mxu1 %v7319_v61  ;;  %7130 = vmatprep.subr.bf16.mxu0 %v7129_v62  ;;  %v1520_v61 = vld [vmem:[#allocation5 + $0x2c18] sm:$0xff]  ;;  %v1538_v62 = vld [vmem:[#allocation5 + $0x2ca8] sm:$0xff]  ;;  %v7149_v1 = vpack.c.bf16 %v1536_v60, %v1518_v59 }
 0x1a7   :  { %7322 = vmatprep.subr.bf16.mxu1 %v7321_v2  ;;  %2632 = vmatprep.mubr.f32.mxu0 %v8878_v20  ;;  %v1517_v2 = vld [vmem:[#allocation5 + $0x2c00] sm:$0xff]  ;;  %v7341_v5 = vpack.c.bf16 %v1538_v62, %v1520_v61  ;;  %v1556_v9 = vld [vmem:[#allocation5 + $0x2d38] sm:$0xff]  ;;  %v7169_v61 = vpack.c.bf16 %v1716_v56, %v1698_v55  ;;  %v174_v55 = vld [vmem:[#allocation5 + $0x208] sm:$0xff] }
 0x1a8   :  { %2899 = vmatprep.mubr.f32.mxu1 %v8878_v20  ;;  %2633 = vmatmul.mubr.f32.gmra.mrb[12].mxu0 %v8879_v23  ;;  %v1608_v20 = vld [vmem:[#allocation5 + $0x2ed8] sm:$0xff]  ;;  %v1697_v62 = vld [vmem:[#allocation5 + $0x31a0] sm:$0xff] }
 0x1a9   :  { %7132 = vmatpush1.bf16.msra.mxu0 %v7131_v10  ;;  %2900 = vmatmul.mubr.f32.gmra.mrb[12].mxu1 %v8879_v23  ;;  %v1574_v10 = vld [vmem:[#allocation5 + $0x2dc8] sm:$0xff]  ;;  %v7155_v23 = vpack.c.bf16 %v1571_v15, %v1553_v14  ;;  %v1753_v14 = vld [vmem:[#allocation5 + $0x3360] sm:$0xff] }
 0x1aa   :  { %7324 = vmatpush1.bf16.msra.mxu1 %v7323_v11  ;;  %7134 = vmatprep.subr.bf16.mxu0 %v7133_v12  ;;  %v7151_v11 = vpack.c.bf16 %v1535_v3, %v1517_v2  ;;  %v7343_v12 = vpack.c.bf16 %v1537_v6, %v1519_v4  ;;  %v7345_v17 = vpack.c.bf16 %v1574_v10, %v1556_v9  ;;  %v1717_v2 = vld [vmem:[#allocation5 + $0x3240] sm:$0xff]  ;;  %v1734_v3 = vld [vmem:[#allocation5 + $0x32c8] sm:$0xff]  ;;  %v1752_v4 = vld [vmem:[#allocation5 + $0x3358] sm:$0xff] }
 0x1ab   :  { %7326 = vmatprep.subr.bf16.mxu1 %v7325_v16  ;;  %2638 = vmatprep.mubr.f32.mxu0 %v8880_v34  ;;  %v1555_v16 = vld [vmem:[#allocation5 + $0x2d30] sm:$0xff]  ;;  %v1754_v6 = vld [vmem:[#allocation5 + $0x3368] sm:$0xff]  ;;  %v7173_v9 = vpack.c.bf16 %v1752_v4, %v1734_v3  ;;  %v1733_v10 = vld [vmem:[#allocation5 + $0x32c0] sm:$0xff] }
 0x1ac   :  { %2905 = vmatprep.mubr.f32.mxu1 %v8880_v34  ;;  %2639 = vmatmul.mubr.f32.gmra.mrb[14].mxu0 %v8881_v37  ;;  %v1646_v34 = vld [vmem:[#allocation5 + $0x3008] sm:$0xff]  ;;  %v192_v3 = vld [vmem:[#allocation5 + $0x298] sm:$0xff] }
 0x1ad   :  { %7136 = vmatpush1.bf16.msra.mxu0 %v7135_v24  ;;  %2906 = vmatmul.mubr.f32.gmra.mrb[14].mxu1 %v8881_v37  ;;  %v7347_v24 = vpack.c.bf16 %v1573_v18, %v1555_v16  ;;  %v7161_v37 = vpack.c.bf16 %v1644_v32, %v1626_v31  ;;  %v7353_v41 = vpack.c.bf16 %v1646_v34, %v1628_v33  ;;  %v1770_v15 = vld [vmem:[#allocation5 + $0x33e8] sm:$0xff]  ;;  %v1788_v16 = vld [vmem:[#allocation5 + $0x3478] sm:$0xff]  ;;  %v1805_v34 = vld [vmem:[#allocation5 + $0x3500] sm:$0xff] }
 0x1ae   :  { %7328 = vmatpush1.bf16.msra.mxu1 %v7327_v25  ;;  %7138 = vmatprep.subr.bf16.mxu0 %v7137_v26  ;;  %v7157_v25 = vpack.c.bf16 %v1608_v20, %v1590_v19  ;;  %v1589_v26 = vld [vmem:[#allocation5 + $0x2e40] sm:$0xff]  ;;  %v1790_v18 = vld [vmem:[#allocation5 + $0x3488] sm:$0xff]  ;;  %v7177_v21 = vpack.c.bf16 %v1788_v16, %v1770_v15  ;;  %v244_v15 = vld [vmem:[#allocation5 + $0x438] sm:$0xff] }
 0x1af   :  { %7330 = vmatprep.subr.bf16.mxu1 %v7329_v30  ;;  %2709 = vmatprep.mubr.f32.mxu0 %v8882_v48  ;;  %v1609_v30 = vld [vmem:[#allocation5 + $0x2ee0] sm:$0xff]  ;;  %v7159_v35 = vpack.c.bf16 %v1607_v27, %v1589_v26  ;;  %v1806_v27 = vld [vmem:[#allocation5 + $0x3508] sm:$0xff] }
 0x1b0   :  { %2976 = vmatprep.mubr.f32.mxu1 %v8882_v48  ;;  %v7351_v36 = vpack.c.bf16 %v1609_v30, %v1591_v28  ;;  %v1789_v26 = vld [vmem:[#allocation5 + $0x3480] sm:$0xff]  ;;  %v1824_v28 = vld [vmem:[#allocation5 + $0x3598] sm:$0xff]  ;;  %v1826_v30 = vld [vmem:[#allocation5 + $0x35a8] sm:$0xff] }
 0x1b1   :  { %7140 = vmatpush1.bf16.msra.mxu0 %v7139_v38  ;;  %v1625_v38 = vld [vmem:[#allocation5 + $0x2f60] sm:$0xff]  ;;  %v7181_v33 = vpack.c.bf16 %v1824_v28, %v1806_v27  ;;  %v210_v4 = vld [vmem:[#allocation5 + $0x328] sm:$0xff]  ;;  %v280_v27 = vld [vmem:[#allocation5 + $0x558] sm:$0xff] }
 0x1b2   :  { %7332 = vmatpush1.bf16.msra.mxu1 %v7331_v39  ;;  %7142 = vmatprep.subr.bf16.mxu0 %v7141_v40  ;;  %v1643_v39 = vld [vmem:[#allocation5 + $0x2ff0] sm:$0xff]  ;;  %v8887_v28 = vld [vmem:[#allocation2 + $0x80] sm:$0xff] }
 0x1b3   :  { %7334 = vmatprep.subr.bf16.mxu1 %v7333_v44  ;;  %v1627_v40 = vld [vmem:[#allocation5 + $0x2f70] sm:$0xff]  ;;  %v1680_v44 = vld [vmem:[#allocation5 + $0x3118] sm:$0xff]  ;;  %v7163_v47 = vpack.c.bf16 %v1643_v39, %v1625_v38  ;;  %v1825_v38 = vld [vmem:[#allocation5 + $0x35a0] sm:$0xff] }
 0x1b4   :  { %v7355_v48 = vpack.c.bf16 %v1645_v42, %v1627_v40  ;;  %v7165_v49 = vpack.c.bf16 %v1680_v44, %v1662_v43  ;;  %v118_v39 = vld [vmem:[#allocation5 + $0x48] sm:$0xff]  ;;  %v136_v40 = vld [vmem:[#allocation5 + $0xd8] sm:$0xff] }
 0x1b5   :  { %7144 = vmatpush1.bf16.msra.mxu0 %v7143_v51  ;;  %v1679_v51 = vld [vmem:[#allocation5 + $0x3110] sm:$0xff]  ;;  %v138_v42 = vld [vmem:[#allocation5 + $0xe8] sm:$0xff] }
 0x1b6   :  { %7336 = vmatpush1.bf16.msra.mxu1 %v7335_v52  ;;  %7146 = vmatprep.subr.bf16.mxu0 %v7145_v53  ;;  %v1663_v52 = vld [vmem:[#allocation5 + $0x3090] sm:$0xff]  ;;  %v7357_v53 = vpack.c.bf16 %v1682_v46, %v1664_v45  ;;  %v7167_v59 = vpack.c.bf16 %v1679_v51, %v1661_v50  ;;  %v7377_v45 = vpack.c.bf16 %v136_v40, %v118_v39  ;;  %v117_v46 = vld [vmem:[#allocation5 + $0x40] sm:$0xff]  ;;  %v154_v51 = vld [vmem:[#allocation5 + $0x168] sm:$0xff] }
 0x1b7   :  { %7338 = vmatprep.subr.bf16.mxu1 %v7337_v57  ;;  %v1700_v57 = vld [vmem:[#allocation5 + $0x31b8] sm:$0xff]  ;;  %v7359_v60 = vpack.c.bf16 %v1681_v54, %v1663_v52  ;;  %v137_v50 = vld [vmem:[#allocation5 + $0xe0] sm:$0xff] }
 0x1b8   :  { %v172_v52 = vld [vmem:[#allocation5 + $0x1f8] sm:$0xff]  ;;  %v281_v40 = vld [vmem:[#allocation5 + $0x560] sm:$0xff] }
 0x1b9   :  { %7148 = vmatpush1.bf16.msra.mxu0 %v7147_v63  ;;  %v1715_v63 = vld [vmem:[#allocation5 + $0x3230] sm:$0xff]  ;;  %v156_v54 = vld [vmem:[#allocation5 + $0x178] sm:$0xff] }
 0x1ba   :  { %7340 = vmatpush1.bf16.msra.mxu1 %v7339_v0  ;;  %7150 = vmatprep.subr.bf16.mxu0 %v7149_v1  ;;  %v1699_v0 = vld [vmem:[#allocation5 + $0x31b0] sm:$0xff]  ;;  %v7361_v1 = vpack.c.bf16 %v1718_v58, %v1700_v57  ;;  %v7171_v7 = vpack.c.bf16 %v1715_v63, %v1697_v62  ;;  %v153_v57 = vld [vmem:[#allocation5 + $0x160] sm:$0xff]  ;;  %v7573_v63 = vpack.c.bf16 %v174_v55, %v156_v54  ;;  %v334_v54 = vld [vmem:[#allocation5 + $0x708] sm:$0xff] }
 0x1bb   :  { %7342 = vmatprep.subr.bf16.mxu1 %v7341_v5  ;;  %v1736_v5 = vld [vmem:[#allocation5 + $0x32d8] sm:$0xff]  ;;  %v7363_v8 = vpack.c.bf16 %v1717_v2, %v1699_v0  ;;  %v171_v58 = vld [vmem:[#allocation5 + $0x1f0] sm:$0xff]  ;;  %v8883_v62 = vld [vmem:[#allocation2 + $0x20] sm:$0xff] }
 0x1bc   :  { %v190_v0 = vld [vmem:[#allocation5 + $0x288] sm:$0xff]  ;;  %v7383_v2 = vpack.c.bf16 %v171_v58, %v153_v57  ;;  %v352_v55 = vld [vmem:[#allocation5 + $0x798] sm:$0xff] }
 0x1bd   :  { %7152 = vmatpush1.bf16.msra.mxu0 %v7151_v11  ;;  %v1751_v11 = vld [vmem:[#allocation5 + $0x3350] sm:$0xff]  ;;  %v336_v57 = vld [vmem:[#allocation5 + $0x718] sm:$0xff]  ;;  %v354_v58 = vld [vmem:[#allocation5 + $0x7a8] sm:$0xff] }
 0x1be   :  { %7344 = vmatpush1.bf16.msra.mxu1 %v7343_v12  ;;  %7154 = vmatprep.subr.bf16.mxu0 %v7153_v13  ;;  %v1735_v12 = vld [vmem:[#allocation5 + $0x32d0] sm:$0xff]  ;;  %v7365_v13 = vpack.c.bf16 %v1754_v6, %v1736_v5  ;;  %v7175_v19 = vpack.c.bf16 %v1751_v11, %v1733_v10  ;;  %v8884_v5 = vld [vmem:[#allocation2 + $0x58] sm:$0xff]  ;;  %v209_v11 = vld [vmem:[#allocation5 + $0x320] sm:$0xff] }
 0x1bf   :  { %7346 = vmatprep.subr.bf16.mxu1 %v7345_v17  ;;  %v1772_v17 = vld [vmem:[#allocation5 + $0x33f8] sm:$0xff]  ;;  %v7367_v20 = vpack.c.bf16 %v1753_v14, %v1735_v12  ;;  %v191_v10 = vld [vmem:[#allocation5 + $0x290] sm:$0xff]  ;;  %v226_v14 = vld [vmem:[#allocation5 + $0x3a8] sm:$0xff] }
 0x1c0   :  { %v8885_v12 = vld [vmem:[#allocation2 + $0x50] sm:$0xff] }
 0x1c1   :  { %7156 = vmatpush1.bf16.msra.mxu0 %v7155_v23  ;;  %v1787_v23 = vld [vmem:[#allocation5 + $0x3470] sm:$0xff] }
 0x1c2   :  { %7348 = vmatpush1.bf16.msra.mxu1 %v7347_v24  ;;  %7158 = vmatprep.subr.bf16.mxu0 %v7157_v25  ;;  %v1771_v24 = vld [vmem:[#allocation5 + $0x33f0] sm:$0xff]  ;;  %v7369_v25 = vpack.c.bf16 %v1790_v18, %v1772_v17  ;;  %v7179_v31 = vpack.c.bf16 %v1787_v23, %v1769_v22  ;;  %v228_v17 = vld [vmem:[#allocation5 + $0x3b8] sm:$0xff]  ;;  %v246_v18 = vld [vmem:[#allocation5 + $0x448] sm:$0xff] }
 0x1c3   :  { %7350 = vmatprep.subr.bf16.mxu1 %v7349_v29  ;;  %v1808_v29 = vld [vmem:[#allocation5 + $0x3518] sm:$0xff]  ;;  %v7371_v32 = vpack.c.bf16 %v1789_v26, %v1771_v24  ;;  %v243_v22 = vld [vmem:[#allocation5 + $0x430] sm:$0xff]  ;;  %v7389_v24 = vpack.c.bf16 %v244_v15, %v226_v14  ;;  %v262_v26 = vld [vmem:[#allocation5 + $0x4c8] sm:$0xff] }
 0x1c4   :  { %v227_v23 = vld [vmem:[#allocation5 + $0x3b0] sm:$0xff]  ;;  %v369_v14 = vld [vmem:[#allocation5 + $0x820] sm:$0xff] }
 0x1c5   :  { %7160 = vmatpush1.bf16.msra.mxu0 %v7159_v35  ;;  %v1823_v35 = vld [vmem:[#allocation5 + $0x3590] sm:$0xff] }
 0x1c6   :  { %7352 = vmatpush1.bf16.msra.mxu1 %v7351_v36  ;;  %7162 = vmatprep.subr.bf16.mxu0 %v7161_v37  ;;  %v1807_v36 = vld [vmem:[#allocation5 + $0x3510] sm:$0xff]  ;;  %v7373_v37 = vpack.c.bf16 %v1826_v30, %v1808_v29  ;;  %v7183_v43 = vpack.c.bf16 %v1823_v35, %v1805_v34  ;;  %v7581_v29 = vpack.c.bf16 %v246_v18, %v228_v17  ;;  %v264_v30 = vld [vmem:[#allocation5 + $0x4d8] sm:$0xff] }
 0x1c7   :  { %7354 = vmatprep.subr.bf16.mxu1 %v7353_v41  ;;  %v120_v41 = vld [vmem:[#allocation5 + $0x58] sm:$0xff]  ;;  %v7375_v44 = vpack.c.bf16 %v1825_v38, %v1807_v36  ;;  %v7393_v35 = vpack.c.bf16 %v280_v27, %v262_v26  ;;  %v261_v36 = vld [vmem:[#allocation5 + $0x4c0] sm:$0xff]  ;;  %v263_v38 = vld [vmem:[#allocation5 + $0x4d0] sm:$0xff] }
 0x1c8   :  { %v387_v15 = vld [vmem:[#allocation5 + $0x8b0] sm:$0xff] }
 0x1c9   :  { %7164 = vmatpush1.bf16.msra.mxu0 %v7163_v47  ;;  %v135_v47 = vld [vmem:[#allocation5 + $0xd0] sm:$0xff]  ;;  %v7407_v27 = vpack.c.bf16 %v387_v15, %v369_v14  ;;  %v513_v14 = vld [vmem:[#allocation5 + $0xca0] sm:$0xff] }
 0x1ca   :  { %7356 = vmatpush1.bf16.msra.mxu1 %v7355_v48  ;;  %7166 = vmatprep.subr.bf16.mxu0 %v7165_v49  ;;  %v7569_v48 = vpack.c.bf16 %v138_v42, %v120_v41  ;;  %v119_v49 = vld [vmem:[#allocation5 + $0x50] sm:$0xff]  ;;  %v298_v41 = vld [vmem:[#allocation5 + $0x5e8] sm:$0xff]  ;;  %v316_v42 = vld [vmem:[#allocation5 + $0x678] sm:$0xff] }
 0x1cb   :  { %7358 = vmatprep.subr.bf16.mxu1 %v7357_v53  ;;  %v7379_v53 = vpack.c.bf16 %v135_v47, %v117_v46  ;;  %v7571_v56 = vpack.c.bf16 %v137_v50, %v119_v49  ;;  %v7587_v47 = vpack.c.bf16 %v281_v40, %v263_v38  ;;  %v297_v49 = vld [vmem:[#allocation5 + $0x5e0] sm:$0xff]  ;;  %v315_v50 = vld [vmem:[#allocation5 + $0x670] sm:$0xff]  ;;  %v444_v40 = vld [vmem:[#allocation5 + $0xa78] sm:$0xff] }
 0x1cc   :  { %v531_v15 = vld [vmem:[#allocation5 + $0xd30] sm:$0xff] }
 0x1cd   :  { %7168 = vmatpush1.bf16.msra.mxu0 %v7167_v59  ;;  %v7381_v59 = vpack.c.bf16 %v172_v52, %v154_v51  ;;  %v299_v51 = vld [vmem:[#allocation5 + $0x5f0] sm:$0xff] }
 0x1ce   :  { %7360 = vmatpush1.bf16.msra.mxu1 %v7359_v60  ;;  %7170 = vmatprep.subr.bf16.mxu0 %v7169_v61  ;;  %v155_v60 = vld [vmem:[#allocation5 + $0x170] sm:$0xff]  ;;  %v173_v61 = vld [vmem:[#allocation5 + $0x200] sm:$0xff] }
 0x1cf   :  { %7362 = vmatprep.subr.bf16.mxu1 %v7361_v1  ;;  %v208_v1 = vld [vmem:[#allocation5 + $0x318] sm:$0xff]  ;;  %v7575_v6 = vpack.c.bf16 %v173_v61, %v155_v60  ;;  %v7401_v61 = vpack.c.bf16 %v352_v55, %v334_v54 }
 0x1d1   :  { %7172 = vmatpush1.bf16.msra.mxu0 %v7171_v7  ;;  %v189_v7 = vld [vmem:[#allocation5 + $0x280] sm:$0xff] }
 0x1d2   :  { %7364 = vmatpush1.bf16.msra.mxu1 %v7363_v8  ;;  %7174 = vmatprep.subr.bf16.mxu0 %v7173_v9  ;;  %v207_v8 = vld [vmem:[#allocation5 + $0x310] sm:$0xff]  ;;  %v7385_v9 = vpack.c.bf16 %v208_v1, %v190_v0 }
 0x1d3   :  { %7366 = vmatprep.subr.bf16.mxu1 %v7365_v13  ;;  %v7577_v13 = vpack.c.bf16 %v210_v4, %v192_v3  ;;  %v7387_v16 = vpack.c.bf16 %v207_v8, %v189_v7  ;;  %v335_v0 = vld [vmem:[#allocation5 + $0x710] sm:$0xff]  ;;  %v353_v3 = vld [vmem:[#allocation5 + $0x7a0] sm:$0xff]  ;;  %v370_v4 = vld [vmem:[#allocation5 + $0x828] sm:$0xff] }
 0x1d4   :  { %v372_v8 = vld [vmem:[#allocation5 + $0x838] sm:$0xff] }
 0x1d5   :  { %7176 = vmatpush1.bf16.msra.mxu0 %v7175_v19  ;;  %v8886_v19 = vld [vmem:[#allocation2 + $0x88] sm:$0xff] }
 0x1d6   :  { %7368 = vmatpush1.bf16.msra.mxu1 %v7367_v20  ;;  %7178 = vmatprep.subr.bf16.mxu0 %v7177_v21  ;;  %v7579_v20 = vpack.c.bf16 %v209_v11, %v191_v10  ;;  %v225_v21 = vld [vmem:[#allocation5 + $0x3a0] sm:$0xff] }
 0x1d7   :  { %7370 = vmatprep.subr.bf16.mxu1 %v7369_v25  ;;  %v245_v25 = vld [vmem:[#allocation5 + $0x440] sm:$0xff] }
 0x1d8   :  { %v7583_v34 = vpack.c.bf16 %v245_v25, %v227_v23  ;;  %v426_v25 = vld [vmem:[#allocation5 + $0x9e8] sm:$0xff] }
 0x1d9   :  { %7180 = vmatpush1.bf16.msra.mxu0 %v7179_v31  ;;  %v282_v31 = vld [vmem:[#allocation5 + $0x568] sm:$0xff] }
 0x1da   :  { %7372 = vmatpush1.bf16.msra.mxu1 %v7371_v32  ;;  %7182 = vmatprep.subr.bf16.mxu0 %v7181_v33  ;;  %v7391_v32 = vpack.c.bf16 %v243_v22, %v225_v21  ;;  %v8888_v33 = vld [vmem:[#allocation2 + $0xb8] sm:$0xff]  ;;  %v7585_v39 = vpack.c.bf16 %v282_v31, %v264_v30  ;;  %v405_v30 = vld [vmem:[#allocation5 + $0x940] sm:$0xff]  ;;  %v423_v31 = vld [vmem:[#allocation5 + $0x9d0] sm:$0xff] }
 0x1db   :  { %7374 = vmatprep.subr.bf16.mxu1 %v7373_v37  ;;  %v279_v37 = vld [vmem:[#allocation5 + $0x550] sm:$0xff]  ;;  %v424_v21 = vld [vmem:[#allocation5 + $0x9d8] sm:$0xff] }
 0x1dc   :  { %v7395_v46 = vpack.c.bf16 %v279_v37, %v261_v36  ;;  %v442_v36 = vld [vmem:[#allocation5 + $0xa68] sm:$0xff]  ;;  %v460_v37 = vld [vmem:[#allocation5 + $0xaf8] sm:$0xff] }
 0x1dd   :  { %7184 = vmatpush1.bf16.msra.mxu0 %v7183_v43  ;;  %v8889_v43 = vld [vmem:[#allocation2 + $0xb0] sm:$0xff] }
 0x1de   :  { %7376 = vmatpush1.bf16.msra.mxu1 %v7375_v44  ;;  %7378 = vmatprep.subr.bf16.mxu0 %v7377_v45  ;;  %v300_v44 = vld [vmem:[#allocation5 + $0x5f8] sm:$0xff]  ;;  %v318_v45 = vld [vmem:[#allocation5 + $0x688] sm:$0xff] }
 0x1df   :  { %7570 = vmatprep.subr.bf16.mxu1 %v7569_v48  ;;  %v7397_v48 = vpack.c.bf16 %v316_v42, %v298_v41  ;;  %v7589_v52 = vpack.c.bf16 %v318_v45, %v300_v44  ;;  %v462_v41 = vld [vmem:[#allocation5 + $0xb08] sm:$0xff]  ;;  %v7413_v45 = vpack.c.bf16 %v460_v37, %v442_v36  ;;  %v604_v37 = vld [vmem:[#allocation5 + $0xf78] sm:$0xff] }
 0x1e0   :  { %2710 = vmatmul.mubr.f32.vlgmr.msra.gmra.mrb[8].mxu0 %v8883_v62  ;;  %v586_v36 = vld [vmem:[#allocation5 + $0xee8] sm:$0xff] }
 0x1e1   :  { %2977 = vmatmul.mubr.f32.vlgmr.msra.gmra.mrb[8].mxu1 %v8883_v62  ;;  %7380 = vmatpush1.bf16.msra.mxu0 %v7379_v53  ;;  %v317_v53 = vld [vmem:[#allocation5 + $0x680] sm:$0xff] }
 0x1e2   :  { %7572 = vmatpush1.bf16.msra.mxu1 %v7571_v56  ;;  %2715 = vmatprep.mubr.f32.mxu0 %v8884_v5  ;;  %v8890_v56 = vld [vmem:[#allocation2 + $0x8] sm:$0xff]  ;;  %v7591_v60 = vpack.c.bf16 %v317_v53, %v299_v51  ;;  %v333_v62 = vld [vmem:[#allocation5 + $0x700] sm:$0xff]  ;;  %v496_v53 = vld [vmem:[#allocation5 + $0xc18] sm:$0xff] }
 0x1e3   :  { %2982 = vmatprep.mubr.f32.mxu1 %v8884_v5  ;;  %7382 = vmatprep.subr.bf16.mxu0 %v7381_v59  ;;  %v7399_v59 = vpack.c.bf16 %v315_v50, %v297_v49  ;;  %v388_v5 = vld [vmem:[#allocation5 + $0x8b8] sm:$0xff]  ;;  %v7605_v50 = vpack.c.bf16 %v462_v41, %v444_v40  ;;  %v461_v51 = vld [vmem:[#allocation5 + $0xb00] sm:$0xff]  ;;  %v606_v41 = vld [vmem:[#allocation5 + $0xf88] sm:$0xff] }
 0x1e4   :  { %2716 = vmatmul.mubr.f32.gmra.mrb[10].mxu0 %v8885_v12  ;;  %7574 = vmatprep.subr.bf16.mxu1 %v7573_v63  ;;  %v351_v63 = vld [vmem:[#allocation5 + $0x790] sm:$0xff]  ;;  %v588_v40 = vld [vmem:[#allocation5 + $0xef8] sm:$0xff] }
 0x1e5   :  { %2983 = vmatmul.mubr.f32.gmra.mrb[10].mxu1 %v8885_v12  ;;  %7384 = vmatpush1.bf16.msra.mxu0 %v7383_v2  ;;  %v7593_v2 = vpack.c.bf16 %v354_v58, %v336_v57  ;;  %v7403_v11 = vpack.c.bf16 %v351_v63, %v333_v62  ;;  %v7595_v12 = vpack.c.bf16 %v353_v3, %v335_v0  ;;  %v498_v57 = vld [vmem:[#allocation5 + $0xc28] sm:$0xff]  ;;  %v477_v62 = vld [vmem:[#allocation5 + $0xb80] sm:$0xff]  ;;  %v495_v63 = vld [vmem:[#allocation5 + $0xc10] sm:$0xff] }
 0x1e6   :  { %7576 = vmatpush1.bf16.msra.mxu1 %v7575_v6  ;;  %2721 = vmatprep.mubr.f32.mxu0 %v8886_v19  ;;  %v479_v0 = vld [vmem:[#allocation5 + $0xb90] sm:$0xff]  ;;  %v497_v3 = vld [vmem:[#allocation5 + $0xc20] sm:$0xff] }
 0x1e7   :  { %2988 = vmatprep.mubr.f32.mxu1 %v8886_v19  ;;  %7386 = vmatprep.subr.bf16.mxu0 %v7385_v9  ;;  %v390_v9 = vld [vmem:[#allocation5 + $0x8c8] sm:$0xff]  ;;  %v389_v19 = vld [vmem:[#allocation5 + $0x8c0] sm:$0xff] }
 0x1e8   :  { %2722 = vmatmul.mubr.f32.gmra.mrb[12].mxu0 %v8887_v28  ;;  %7578 = vmatprep.subr.bf16.mxu1 %v7577_v13  ;;  %v7405_v13 = vpack.c.bf16 %v388_v5, %v370_v4  ;;  %v7597_v18 = vpack.c.bf16 %v390_v9, %v372_v8  ;;  %v514_v4 = vld [vmem:[#allocation5 + $0xca8] sm:$0xff]  ;;  %v532_v5 = vld [vmem:[#allocation5 + $0xd38] sm:$0xff] }
 0x1e9   :  { %2989 = vmatmul.mubr.f32.gmra.mrb[12].mxu1 %v8887_v28  ;;  %7388 = vmatpush1.bf16.msra.mxu0 %v7387_v16  ;;  %v371_v16 = vld [vmem:[#allocation5 + $0x830] sm:$0xff]  ;;  %v516_v8 = vld [vmem:[#allocation5 + $0xcb8] sm:$0xff]  ;;  %v534_v9 = vld [vmem:[#allocation5 + $0xd48] sm:$0xff] }
 0x1ea   :  { %7580 = vmatpush1.bf16.msra.mxu1 %v7579_v20  ;;  %2727 = vmatprep.mubr.f32.mxu0 %v8888_v33  ;;  %v406_v20 = vld [vmem:[#allocation5 + $0x948] sm:$0xff]  ;;  %v7599_v28 = vpack.c.bf16 %v389_v19, %v371_v16  ;;  %v515_v16 = vld [vmem:[#allocation5 + $0xcb0] sm:$0xff]  ;;  %v533_v19 = vld [vmem:[#allocation5 + $0xd40] sm:$0xff] }
 0x1eb   :  { %2994 = vmatprep.mubr.f32.mxu1 %v8888_v33  ;;  %7390 = vmatprep.subr.bf16.mxu0 %v7389_v24  ;;  %v408_v24 = vld [vmem:[#allocation5 + $0x958] sm:$0xff] }
 0x1ec   :  { %2728 = vmatmul.mubr.f32.gmra.mrb[14].mxu0 %v8889_v43  ;;  %7582 = vmatprep.subr.bf16.mxu1 %v7581_v29  ;;  %v7409_v29 = vpack.c.bf16 %v424_v21, %v406_v20  ;;  %v550_v20 = vld [vmem:[#allocation5 + $0xdc8] sm:$0xff]  ;;  %v568_v21 = vld [vmem:[#allocation5 + $0xe58] sm:$0xff] }
 0x1ed   :  { %2995 = vmatmul.mubr.f32.gmra.mrb[14].mxu1 %v8889_v43  ;;  %7392 = vmatpush1.bf16.msra.mxu0 %v7391_v32  ;;  %v407_v32 = vld [vmem:[#allocation5 + $0x950] sm:$0xff]  ;;  %v7411_v43 = vpack.c.bf16 %v423_v31, %v405_v30  ;;  %v549_v30 = vld [vmem:[#allocation5 + $0xdc0] sm:$0xff] }
 0x1ee   :  { %7584 = vmatpush1.bf16.msra.mxu1 %v7583_v34  ;;  %7394 = vmatprep.subr.bf16.mxu0 %v7393_v35  ;;  %v7601_v34 = vpack.c.bf16 %v426_v25, %v408_v24  ;;  %v425_v35 = vld [vmem:[#allocation5 + $0x9e0] sm:$0xff]  ;;  %v552_v24 = vld [vmem:[#allocation5 + $0xdd8] sm:$0xff]  ;;  %v570_v25 = vld [vmem:[#allocation5 + $0xe68] sm:$0xff] }
 0x1ef   :  { %7586 = vmatprep.subr.bf16.mxu1 %v7585_v39  ;;  %3065 = vmatprep.mubr.f32.mxu0 %v8890_v56  ;;  %v7603_v44 = vpack.c.bf16 %v425_v35, %v407_v32  ;;  %v567_v31 = vld [vmem:[#allocation5 + $0xe50] sm:$0xff]  ;;  %v569_v35 = vld [vmem:[#allocation5 + $0xe60] sm:$0xff] }
 0x1f0   :  { %3332 = vmatprep.mubr.f32.mxu1 %v8890_v56  ;;  %v480_v56 = vld [vmem:[#allocation5 + $0xb98] sm:$0xff]  ;;  %v551_v32 = vld [vmem:[#allocation5 + $0xdd0] sm:$0xff] }
 0x1f1   :  { %7396 = vmatpush1.bf16.msra.mxu0 %v7395_v46  ;;  %v441_v46 = vld [vmem:[#allocation5 + $0xa60] sm:$0xff] }
 0x1f2   :  { %7588 = vmatpush1.bf16.msra.mxu1 %v7587_v47  ;;  %7398 = vmatprep.subr.bf16.mxu0 %v7397_v48  ;;  %v459_v47 = vld [vmem:[#allocation5 + $0xaf0] sm:$0xff] }
 0x1f3   :  { %v9201_v1 = vpop.f32.mrb[0].mxu0  ;;  %7590 = vmatprep.subr.bf16.mxu1 %v7589_v52  ;;  %v443_v48 = vld [vmem:[#allocation5 + $0xa70] sm:$0xff]  ;;  %v478_v52 = vld [vmem:[#allocation5 + $0xb88] sm:$0xff] }
 0x1f4   :  { %v9203_v6 = vpop.f32.mrb[0].mxu1  ;;  %v9205_v7 = vpop.f32.mrb[1].mxu0 }
 0x1f5   :  { %v9207_v10 = vpop.f32.mrb[1].mxu1  ;;  %7400 = vmatpush1.bf16.msra.mxu0 %v7399_v59  ;;  %v7415_v59 = vpack.c.bf16 %v459_v47, %v441_v46  ;;  %v585_v46 = vld [vmem:[#allocation5 + $0xee0] sm:$0xff]  ;;  %v603_v47 = vld [vmem:[#allocation5 + $0xf70] sm:$0xff] }
 0x1f6   :  { %7592 = vmatpush1.bf16.msra.mxu1 %v7591_v60  ;;  %7402 = vmatprep.subr.bf16.mxu0 %v7401_v61  ;;  %v7607_v60 = vpack.c.bf16 %v461_v51, %v443_v48  ;;  %v7417_v61 = vpack.c.bf16 %v496_v53, %v478_v52  ;;  %v587_v48 = vld [vmem:[#allocation5 + $0xef0] sm:$0xff]  ;;  %v605_v51 = vld [vmem:[#allocation5 + $0xf80] sm:$0xff]  ;;  %v622_v52 = vld [vmem:[#allocation5 + $0x1008] sm:$0xff] }
 0x1f7   :  { %v9209_v17 = vpop.f32.mrb[2].mxu0  ;;  %7594 = vmatprep.subr.bf16.mxu1 %v7593_v2  ;;  %v7609_v2 = vpack.c.bf16 %v498_v57, %v480_v56  ;;  %v640_v53 = vld [vmem:[#allocation5 + $0x1098] sm:$0xff]  ;;  %v642_v57 = vld [vmem:[#allocation5 + $0x10a8] sm:$0xff] }
 0x1f8   :  { %v9211_v22 = vpop.f32.mrb[2].mxu1  ;;  %v9213_v23 = vpop.f32.mrb[3].mxu0  ;;  %v624_v56 = vld [vmem:[#allocation5 + $0x1018] sm:$0xff] }
 0x1f9   :  { %v9215_v26 = vpop.f32.mrb[3].mxu1  ;;  %7404 = vmatpush1.bf16.msra.mxu0 %v7403_v11  ;;  %v7419_v11 = vpack.c.bf16 %v495_v63, %v477_v62  ;;  %v621_v62 = vld [vmem:[#allocation5 + $0x1000] sm:$0xff]  ;;  %v639_v63 = vld [vmem:[#allocation5 + $0x1090] sm:$0xff] }
 0x1fa   :  { %7596 = vmatpush1.bf16.msra.mxu1 %v7595_v12  ;;  %7406 = vmatprep.subr.bf16.mxu0 %v7405_v13  ;;  %v7611_v12 = vpack.c.bf16 %v497_v3, %v479_v0  ;;  %v7421_v13 = vpack.c.bf16 %v532_v5, %v514_v4  ;;  %v623_v0 = vld [vmem:[#allocation5 + $0x1010] sm:$0xff]  ;;  %v641_v3 = vld [vmem:[#allocation5 + $0x10a0] sm:$0xff]  ;;  %v658_v4 = vld [vmem:[#allocation5 + $0x1128] sm:$0xff] }
 0x1fb   :  { %v9217_v33 = vpop.f32.mrb[4].mxu0  ;;  %7598 = vmatprep.subr.bf16.mxu1 %v7597_v18  ;;  %v7613_v18 = vpack.c.bf16 %v534_v9, %v516_v8  ;;  %v676_v5 = vld [vmem:[#allocation5 + $0x11b8] sm:$0xff]  ;;  %v678_v9 = vld [vmem:[#allocation5 + $0x11c8] sm:$0xff] }
 0x1fc   :  { %v9219_v38 = vpop.f32.mrb[4].mxu1  ;;  %v9221_v39 = vpop.f32.mrb[5].mxu0  ;;  %v660_v8 = vld [vmem:[#allocation5 + $0x1138] sm:$0xff] }
 0x1fd   :  { %v9223_v42 = vpop.f32.mrb[5].mxu1  ;;  %7408 = vmatpush1.bf16.msra.mxu0 %v7407_v27  ;;  %v7423_v27 = vpack.c.bf16 %v531_v15, %v513_v14  ;;  %v657_v14 = vld [vmem:[#allocation5 + $0x1120] sm:$0xff]  ;;  %v675_v15 = vld [vmem:[#allocation5 + $0x11b0] sm:$0xff] }
 0x1fe   :  { %7600 = vmatpush1.bf16.msra.mxu1 %v7599_v28  ;;  %7410 = vmatprep.subr.bf16.mxu0 %v7409_v29  ;;  %v7615_v28 = vpack.c.bf16 %v533_v19, %v515_v16  ;;  %v7425_v29 = vpack.c.bf16 %v568_v21, %v550_v20  ;;  %v659_v16 = vld [vmem:[#allocation5 + $0x1130] sm:$0xff]  ;;  %v677_v19 = vld [vmem:[#allocation5 + $0x11c0] sm:$0xff]  ;;  %v694_v20 = vld [vmem:[#allocation5 + $0x1248] sm:$0xff] }
 0x1ff   :  { %v9225_v49 = vpop.f32.mrb[6].mxu0  ;;  %7602 = vmatprep.subr.bf16.mxu1 %v7601_v34  ;;  %v7617_v34 = vpack.c.bf16 %v570_v25, %v552_v24  ;;  %v712_v21 = vld [vmem:[#allocation5 + $0x12d8] sm:$0xff]  ;;  %v714_v25 = vld [vmem:[#allocation5 + $0x12e8] sm:$0xff] }
 0x200   :  { %v9227_v54 = vpop.f32.mrb[6].mxu1  ;;  %v9229_v55 = vpop.f32.mrb[7].mxu0  ;;  %v696_v24 = vld [vmem:[#allocation5 + $0x1258] sm:$0xff] }
 0x201   :  { %v9231_v58 = vpop.f32.mrb[7].mxu1  ;;  %7412 = vmatpush1.bf16.msra.mxu0 %v7411_v43  ;;  %v7427_v43 = vpack.c.bf16 %v567_v31, %v549_v30  ;;  %v693_v30 = vld [vmem:[#allocation5 + $0x1240] sm:$0xff]  ;;  %v711_v31 = vld [vmem:[#allocation5 + $0x12d0] sm:$0xff] }
 0x202   :  { %7604 = vmatpush1.bf16.msra.mxu1 %v7603_v44  ;;  %7414 = vmatprep.subr.bf16.mxu0 %v7413_v45  ;;  %v7619_v44 = vpack.c.bf16 %v569_v35, %v551_v32  ;;  %v7429_v45 = vpack.c.bf16 %v604_v37, %v586_v36  ;;  %v695_v32 = vld [vmem:[#allocation5 + $0x1250] sm:$0xff]  ;;  %v713_v35 = vld [vmem:[#allocation5 + $0x12e0] sm:$0xff]  ;;  %v730_v36 = vld [vmem:[#allocation5 + $0x1368] sm:$0xff] }
 0x203   :  { %7606 = vmatprep.subr.bf16.mxu1 %v7605_v50  ;;  %v7621_v50 = vpack.c.bf16 %v606_v41, %v588_v40  ;;  %v748_v37 = vld [vmem:[#allocation5 + $0x13f8] sm:$0xff]  ;;  %v750_v41 = vld [vmem:[#allocation5 + $0x1408] sm:$0xff] }
 0x204   :  { %v732_v40 = vld [vmem:[#allocation5 + $0x1378] sm:$0xff] }
 0x205   :  { %7416 = vmatpush1.bf16.msra.mxu0 %v7415_v59  ;;  %v7431_v59 = vpack.c.bf16 %v603_v47, %v585_v46  ;;  %v729_v46 = vld [vmem:[#allocation5 + $0x1360] sm:$0xff]  ;;  %v747_v47 = vld [vmem:[#allocation5 + $0x13f0] sm:$0xff] }
 0x206   :  { %7608 = vmatpush1.bf16.msra.mxu1 %v7607_v60  ;;  %7418 = vmatprep.subr.bf16.mxu0 %v7417_v61  ;;  %v7623_v60 = vpack.c.bf16 %v605_v51, %v587_v48  ;;  %v7433_v61 = vpack.c.bf16 %v640_v53, %v622_v52  ;;  %v731_v48 = vld [vmem:[#allocation5 + $0x1370] sm:$0xff]  ;;  %v749_v51 = vld [vmem:[#allocation5 + $0x1400] sm:$0xff]  ;;  %v766_v52 = vld [vmem:[#allocation5 + $0x1488] sm:$0xff] }
 0x207   :  { %7610 = vmatprep.subr.bf16.mxu1 %v7609_v2  ;;  %v7625_v2 = vpack.c.bf16 %v642_v57, %v624_v56  ;;  %v784_v53 = vld [vmem:[#allocation5 + $0x1518] sm:$0xff]  ;;  %v8891_v56 = vld [vmem:[#allocation2] sm:$0xff] }
 0x208   :  { %v768_v57 = vld [vmem:[#allocation5 + $0x1498] sm:$0xff] }
 0x209   :  { %7420 = vmatpush1.bf16.msra.mxu0 %v7419_v11  ;;  %v7435_v11 = vpack.c.bf16 %v639_v63, %v621_v62  ;;  %v7449_v62 = vpack.c.bf16 %v784_v53, %v766_v52  ;;  %v765_v63 = vld [vmem:[#allocation5 + $0x1480] sm:$0xff] }
 0x20a   :  { %7612 = vmatpush1.bf16.msra.mxu1 %v7611_v12  ;;  %7422 = vmatprep.subr.bf16.mxu0 %v7421_v13  ;;  %v7627_v12 = vpack.c.bf16 %v641_v3, %v623_v0  ;;  %v7437_v13 = vpack.c.bf16 %v676_v5, %v658_v4  ;;  %v783_v0 = vld [vmem:[#allocation5 + $0x1510] sm:$0xff]  ;;  %v785_v4 = vld [vmem:[#allocation5 + $0x1520] sm:$0xff]  ;;  %v802_v5 = vld [vmem:[#allocation5 + $0x15a8] sm:$0xff] }
 0x20b   :  { %7614 = vmatprep.subr.bf16.mxu1 %v7613_v18  ;;  %v7629_v18 = vpack.c.bf16 %v678_v9, %v660_v8  ;;  %v820_v8 = vld [vmem:[#allocation5 + $0x1638] sm:$0xff] }
 0x20c   :  { %v8892_v9 = vld [vmem:[#allocation2 + $0x38] sm:$0xff] }
 0x20d   :  { %7424 = vmatpush1.bf16.msra.mxu0 %v7423_v27  ;;  %v7439_v27 = vpack.c.bf16 %v675_v15, %v657_v14  ;;  %v7451_v14 = vpack.c.bf16 %v783_v0, %v765_v63  ;;  %v928_v63 = vld [vmem:[#allocation5 + $0x1998] sm:$0xff] }
 0x20e   :  { %7616 = vmatpush1.bf16.msra.mxu1 %v7615_v28  ;;  %7426 = vmatprep.subr.bf16.mxu0 %v7425_v29  ;;  %v7631_v28 = vpack.c.bf16 %v677_v19, %v659_v16  ;;  %v7441_v29 = vpack.c.bf16 %v712_v21, %v694_v20  ;;  %v7453_v16 = vpack.c.bf16 %v820_v8, %v802_v5  ;;  %v819_v19 = vld [vmem:[#allocation5 + $0x1630] sm:$0xff]  ;;  %v8898_v0 = vld [vmem:[#allocation2 + $0x18] sm:$0xff] }
 0x20f   :  { %7618 = vmatprep.subr.bf16.mxu1 %v7617_v34  ;;  %v7633_v34 = vpack.c.bf16 %v714_v25, %v696_v24  ;;  %v803_v20 = vld [vmem:[#allocation5 + $0x15b0] sm:$0xff]  ;;  %v821_v24 = vld [vmem:[#allocation5 + $0x1640] sm:$0xff]  ;;  %v838_v25 = vld [vmem:[#allocation5 + $0x16c8] sm:$0xff] }
 0x211   :  { %7428 = vmatpush1.bf16.msra.mxu0 %v7427_v43  ;;  %v7443_v43 = vpack.c.bf16 %v711_v31, %v693_v30  ;;  %v858_v30 = vld [vmem:[#allocation5 + $0x1768] sm:$0xff]  ;;  %v8895_v31 = vld [vmem:[#allocation2 + $0x60] sm:$0xff] }
 0x212   :  { %7620 = vmatpush1.bf16.msra.mxu1 %v7619_v44  ;;  %7430 = vmatprep.subr.bf16.mxu0 %v7429_v45  ;;  %v7635_v44 = vpack.c.bf16 %v713_v35, %v695_v32  ;;  %v7445_v45 = vpack.c.bf16 %v748_v37, %v730_v36  ;;  %v837_v36 = vld [vmem:[#allocation5 + $0x16c0] sm:$0xff]  ;;  %v855_v37 = vld [vmem:[#allocation5 + $0x1750] sm:$0xff] }
 0x213   :  { %7622 = vmatprep.subr.bf16.mxu1 %v7621_v50  ;;  %v7637_v50 = vpack.c.bf16 %v750_v41, %v732_v40  ;;  %v839_v40 = vld [vmem:[#allocation5 + $0x16d0] sm:$0xff] }
 0x215   :  { %7432 = vmatpush1.bf16.msra.mxu0 %v7431_v59  ;;  %v786_v59 = vld [vmem:[#allocation5 + $0x1528] sm:$0xff] }
 0x216   :  { %7624 = vmatpush1.bf16.msra.mxu1 %v7623_v60  ;;  %7434 = vmatprep.subr.bf16.mxu0 %v7433_v61  ;;  %v7447_v60 = vpack.c.bf16 %v747_v47, %v729_v46  ;;  %v7639_v61 = vpack.c.bf16 %v749_v51, %v731_v48  ;;  %v7641_v3 = vpack.c.bf16 %v786_v59, %v768_v57  ;;  %v8896_v46 = vld [vmem:[#allocation2 + $0x98] sm:$0xff]  ;;  %v894_v48 = vld [vmem:[#allocation5 + $0x1888] sm:$0xff]  ;;  %v891_v57 = vld [vmem:[#allocation5 + $0x1870] sm:$0xff] }
 0x217   :  { %7626 = vmatprep.subr.bf16.mxu1 %v7625_v2  ;;  %v767_v2 = vld [vmem:[#allocation5 + $0x1490] sm:$0xff]  ;;  %v876_v47 = vld [vmem:[#allocation5 + $0x17f8] sm:$0xff]  ;;  %v7459_v51 = vpack.c.bf16 %v855_v37, %v837_v36 }
 0x218   :  { %v7643_v15 = vpack.c.bf16 %v785_v4, %v767_v2  ;;  %v875_v59 = vld [vmem:[#allocation5 + $0x17f0] sm:$0xff]  ;;  %v912_v2 = vld [vmem:[#allocation5 + $0x1918] sm:$0xff] }
 0x219   :  { %7436 = vmatpush1.bf16.msra.mxu0 %v7435_v11  ;;  %v804_v11 = vld [vmem:[#allocation5 + $0x15b8] sm:$0xff] }
 0x21a   :  { %7628 = vmatpush1.bf16.msra.mxu1 %v7627_v12  ;;  %7438 = vmatprep.subr.bf16.mxu0 %v7437_v13  ;;  %v822_v12 = vld [vmem:[#allocation5 + $0x1648] sm:$0xff]  ;;  %v8893_v13 = vld [vmem:[#allocation2 + $0x30] sm:$0xff] }
 0x21b   :  { %7630 = vmatprep.subr.bf16.mxu1 %v7629_v18  ;;  %v801_v18 = vld [vmem:[#allocation5 + $0x15a0] sm:$0xff]  ;;  %v7645_v21 = vpack.c.bf16 %v822_v12, %v804_v11  ;;  %v927_v11 = vld [vmem:[#allocation5 + $0x1990] sm:$0xff] }
 0x21c   :  { %v7455_v32 = vpack.c.bf16 %v819_v19, %v801_v18  ;;  %v911_v12 = vld [vmem:[#allocation5 + $0x1910] sm:$0xff]  ;;  %v948_v18 = vld [vmem:[#allocation5 + $0x1a38] sm:$0xff]  ;;  %v966_v19 = vld [vmem:[#allocation5 + $0x1ac8] sm:$0xff] }
 0x21d   :  { %7440 = vmatpush1.bf16.msra.mxu0 %v7439_v27  ;;  %v856_v27 = vld [vmem:[#allocation5 + $0x1758] sm:$0xff] }
 0x21e   :  { %7632 = vmatpush1.bf16.msra.mxu1 %v7631_v28  ;;  %7442 = vmatprep.subr.bf16.mxu0 %v7441_v29  ;;  %v8894_v28 = vld [vmem:[#allocation2 + $0x68] sm:$0xff]  ;;  %v840_v29 = vld [vmem:[#allocation5 + $0x16d8] sm:$0xff]  ;;  %v7457_v35 = vpack.c.bf16 %v856_v27, %v838_v25  ;;  %v945_v25 = vld [vmem:[#allocation5 + $0x1a20] sm:$0xff] }
 0x21f   :  { %7634 = vmatprep.subr.bf16.mxu1 %v7633_v34  ;;  %v7647_v34 = vpack.c.bf16 %v821_v24, %v803_v20  ;;  %v7649_v41 = vpack.c.bf16 %v858_v30, %v840_v29  ;;  %v963_v27 = vld [vmem:[#allocation5 + $0x1ab0] sm:$0xff]  ;;  %v7661_v29 = vpack.c.bf16 %v966_v19, %v948_v18  ;;  %v965_v30 = vld [vmem:[#allocation5 + $0x1ac0] sm:$0xff]  ;;  %v1092_v18 = vld [vmem:[#allocation5 + $0x1eb8] sm:$0xff] }
 0x220   :  { %3066 = vmatmul.mubr.f32.vlgmr.msra.gmra.mrb[16].mxu0 %v8891_v56  ;;  %v7471_v36 = vpack.c.bf16 %v963_v27, %v945_v25  ;;  %v1110_v19 = vld [vmem:[#allocation5 + $0x1f48] sm:$0xff]  ;;  %v1089_v25 = vld [vmem:[#allocation5 + $0x1ea0] sm:$0xff]  ;;  %v1107_v27 = vld [vmem:[#allocation5 + $0x1f30] sm:$0xff] }
 0x221   :  { %7444 = vmatpush1.bf16.msra.mxu0 %v7443_v43  ;;  %3333 = vmatmul.mubr.f32.vlgmr.msra.gmra.mrb[16].mxu1 %v8891_v56  ;;  %v857_v43 = vld [vmem:[#allocation5 + $0x1760] sm:$0xff] }
 0x222   :  { %7636 = vmatpush1.bf16.msra.mxu1 %v7635_v44  ;;  %7446 = vmatprep.subr.bf16.mxu0 %v7445_v45  ;;  %v874_v44 = vld [vmem:[#allocation5 + $0x17e8] sm:$0xff]  ;;  %v892_v45 = vld [vmem:[#allocation5 + $0x1878] sm:$0xff]  ;;  %v7651_v52 = vpack.c.bf16 %v857_v43, %v839_v40  ;;  %v873_v56 = vld [vmem:[#allocation5 + $0x17e0] sm:$0xff] }
 0x223   :  { %7638 = vmatprep.subr.bf16.mxu1 %v7637_v50  ;;  %3071 = vmatprep.mubr.f32.mxu0 %v8892_v9  ;;  %v8897_v50 = vld [vmem:[#allocation2 + $0x90] sm:$0xff]  ;;  %v7461_v53 = vpack.c.bf16 %v892_v45, %v874_v44  ;;  %v7463_v4 = vpack.c.bf16 %v891_v57, %v873_v56  ;;  %v1017_v57 = vld [vmem:[#allocation5 + $0x1c60] sm:$0xff] }
 0x224   :  { %3338 = vmatprep.mubr.f32.mxu1 %v8892_v9  ;;  %3072 = vmatmul.mubr.f32.gmra.mrb[18].mxu0 %v8893_v13  ;;  %v909_v9 = vld [vmem:[#allocation5 + $0x1900] sm:$0xff]  ;;  %v999_v43 = vld [vmem:[#allocation5 + $0x1bd0] sm:$0xff] }
 0x225   :  { %7448 = vmatpush1.bf16.msra.mxu0 %v7447_v60  ;;  %3339 = vmatmul.mubr.f32.gmra.mrb[18].mxu1 %v8893_v13  ;;  %v7653_v60 = vpack.c.bf16 %v894_v48, %v876_v47  ;;  %v7467_v20 = vpack.c.bf16 %v927_v11, %v909_v9  ;;  %v983_v44 = vld [vmem:[#allocation5 + $0x1b50] sm:$0xff]  ;;  %v1018_v47 = vld [vmem:[#allocation5 + $0x1c68] sm:$0xff]  ;;  %v1036_v48 = vld [vmem:[#allocation5 + $0x1cf8] sm:$0xff] }
 0x226   :  { %7640 = vmatpush1.bf16.msra.mxu1 %v7639_v61  ;;  %7450 = vmatprep.subr.bf16.mxu0 %v7449_v62  ;;  %v893_v61 = vld [vmem:[#allocation5 + $0x1880] sm:$0xff]  ;;  %v910_v62 = vld [vmem:[#allocation5 + $0x1908] sm:$0xff]  ;;  %v7477_v56 = vpack.c.bf16 %v1036_v48, %v1018_v47  ;;  %v1071_v11 = vld [vmem:[#allocation5 + $0x1e10] sm:$0xff] }
 0x227   :  { %7642 = vmatprep.subr.bf16.mxu1 %v7641_v3  ;;  %3077 = vmatprep.mubr.f32.mxu0 %v8894_v28  ;;  %v930_v3 = vld [vmem:[#allocation5 + $0x19a8] sm:$0xff]  ;;  %v7655_v5 = vpack.c.bf16 %v893_v61, %v875_v59  ;;  %v7465_v8 = vpack.c.bf16 %v928_v63, %v910_v62  ;;  %v1035_v59 = vld [vmem:[#allocation5 + $0x1cf0] sm:$0xff]  ;;  %v1037_v62 = vld [vmem:[#allocation5 + $0x1d00] sm:$0xff] }
 0x228   :  { %3344 = vmatprep.mubr.f32.mxu1 %v8894_v28  ;;  %3078 = vmatmul.mubr.f32.gmra.mrb[20].mxu0 %v8895_v31  ;;  %v7657_v13 = vpack.c.bf16 %v930_v3, %v912_v2  ;;  %v947_v28 = vld [vmem:[#allocation5 + $0x1a30] sm:$0xff]  ;;  %v1054_v63 = vld [vmem:[#allocation5 + $0x1d88] sm:$0xff]  ;;  %v1056_v2 = vld [vmem:[#allocation5 + $0x1d98] sm:$0xff] }
 0x229   :  { %7452 = vmatpush1.bf16.msra.mxu0 %v7451_v14  ;;  %3345 = vmatmul.mubr.f32.gmra.mrb[20].mxu1 %v8895_v31  ;;  %v929_v14 = vld [vmem:[#allocation5 + $0x19a0] sm:$0xff]  ;;  %v982_v31 = vld [vmem:[#allocation5 + $0x1b48] sm:$0xff]  ;;  %v7663_v37 = vpack.c.bf16 %v965_v30, %v947_v28  ;;  %v1091_v28 = vld [vmem:[#allocation5 + $0x1eb0] sm:$0xff] }
 0x22a   :  { %7644 = vmatpush1.bf16.msra.mxu1 %v7643_v15  ;;  %7454 = vmatprep.subr.bf16.mxu0 %v7453_v16  ;;  %v946_v15 = vld [vmem:[#allocation5 + $0x1a28] sm:$0xff]  ;;  %v964_v16 = vld [vmem:[#allocation5 + $0x1ab8] sm:$0xff]  ;;  %v1053_v9 = vld [vmem:[#allocation5 + $0x1d80] sm:$0xff] }
 0x22b   :  { %7646 = vmatprep.subr.bf16.mxu1 %v7645_v21  ;;  %3083 = vmatprep.mubr.f32.mxu0 %v8896_v46  ;;  %v7659_v21 = vpack.c.bf16 %v929_v14, %v911_v12  ;;  %v7469_v24 = vpack.c.bf16 %v964_v16, %v946_v15  ;;  %v1074_v3 = vld [vmem:[#allocation5 + $0x1e28] sm:$0xff]  ;;  %v1055_v12 = vld [vmem:[#allocation5 + $0x1d90] sm:$0xff]  ;;  %v1073_v14 = vld [vmem:[#allocation5 + $0x1e20] sm:$0xff] }
 0x22c   :  { %3350 = vmatprep.mubr.f32.mxu1 %v8896_v46  ;;  %3084 = vmatmul.mubr.f32.gmra.mrb[22].mxu0 %v8897_v50  ;;  %v1001_v46 = vld [vmem:[#allocation5 + $0x1be0] sm:$0xff]  ;;  %v1090_v15 = vld [vmem:[#allocation5 + $0x1ea8] sm:$0xff]  ;;  %v1108_v16 = vld [vmem:[#allocation5 + $0x1f38] sm:$0xff] }
 0x22d   :  { %7456 = vmatpush1.bf16.msra.mxu0 %v7455_v32  ;;  %3351 = vmatmul.mubr.f32.gmra.mrb[22].mxu1 %v8897_v50  ;;  %v1000_v32 = vld [vmem:[#allocation5 + $0x1bd8] sm:$0xff]  ;;  %v1109_v30 = vld [vmem:[#allocation5 + $0x1f40] sm:$0xff]  ;;  %v1162_v47 = vld [vmem:[#allocation5 + $0x20e8] sm:$0xff] }
 0x22e   :  { %7648 = vmatpush1.bf16.msra.mxu1 %v7647_v34  ;;  %7458 = vmatprep.subr.bf16.mxu0 %v7457_v35  ;;  %v984_v34 = vld [vmem:[#allocation5 + $0x1b58] sm:$0xff]  ;;  %v1002_v35 = vld [vmem:[#allocation5 + $0x1be8] sm:$0xff]  ;;  %v7473_v40 = vpack.c.bf16 %v1000_v32, %v982_v31 }
 0x22f   :  { %7650 = vmatprep.subr.bf16.mxu1 %v7649_v41  ;;  %3154 = vmatprep.mubr.f32.mxu0 %v8898_v0  ;;  %v981_v41 = vld [vmem:[#allocation5 + $0x1b40] sm:$0xff]  ;;  %v7665_v45 = vpack.c.bf16 %v1002_v35, %v984_v34  ;;  %v1020_v50 = vld [vmem:[#allocation5 + $0x1c78] sm:$0xff]  ;;  %v1126_v31 = vld [vmem:[#allocation5 + $0x1fc8] sm:$0xff] }
 0x230   :  { %3421 = vmatprep.mubr.f32.mxu1 %v8898_v0  ;;  %v1072_v0 = vld [vmem:[#allocation5 + $0x1e18] sm:$0xff]  ;;  %v1146_v35 = vld [vmem:[#allocation5 + $0x2068] sm:$0xff] }
 0x231   :  { %7460 = vmatpush1.bf16.msra.mxu0 %v7459_v51  ;;  %v1038_v51 = vld [vmem:[#allocation5 + $0x1d08] sm:$0xff]  ;;  %v1144_v32 = vld [vmem:[#allocation5 + $0x2058] sm:$0xff] }
 0x232   :  { %7652 = vmatpush1.bf16.msra.mxu1 %v7651_v52  ;;  %7462 = vmatprep.subr.bf16.mxu0 %v7461_v53  ;;  %v7475_v52 = vpack.c.bf16 %v999_v43, %v981_v41  ;;  %v7667_v53 = vpack.c.bf16 %v1001_v46, %v983_v44  ;;  %v7669_v61 = vpack.c.bf16 %v1038_v51, %v1020_v50  ;;  %v1128_v34 = vld [vmem:[#allocation5 + $0x1fd8] sm:$0xff]  ;;  %v1125_v41 = vld [vmem:[#allocation5 + $0x1fc0] sm:$0xff]  ;;  %v1143_v43 = vld [vmem:[#allocation5 + $0x2050] sm:$0xff] }
 0x233   :  { %7654 = vmatprep.subr.bf16.mxu1 %v7653_v60  ;;  %v1019_v60 = vld [vmem:[#allocation5 + $0x1c70] sm:$0xff]  ;;  %v1145_v46 = vld [vmem:[#allocation5 + $0x2060] sm:$0xff]  ;;  %v1180_v48 = vld [vmem:[#allocation5 + $0x2178] sm:$0xff] }
 0x234   :  { %v1127_v44 = vld [vmem:[#allocation5 + $0x1fd0] sm:$0xff]  ;;  %v1164_v50 = vld [vmem:[#allocation5 + $0x20f8] sm:$0xff]  ;;  %v1182_v51 = vld [vmem:[#allocation5 + $0x2188] sm:$0xff] }
 0x235   :  { %7464 = vmatpush1.bf16.msra.mxu0 %v7463_v4  ;;  %v7479_v4 = vpack.c.bf16 %v1035_v59, %v1017_v57  ;;  %v1161_v57 = vld [vmem:[#allocation5 + $0x20e0] sm:$0xff]  ;;  %v1179_v59 = vld [vmem:[#allocation5 + $0x2170] sm:$0xff] }
 0x236   :  { %7656 = vmatpush1.bf16.msra.mxu1 %v7655_v5  ;;  %7466 = vmatprep.subr.bf16.mxu0 %v7465_v8  ;;  %v7671_v5 = vpack.c.bf16 %v1037_v62, %v1019_v60  ;;  %v7481_v8 = vpack.c.bf16 %v1072_v0, %v1054_v63  ;;  %v1163_v60 = vld [vmem:[#allocation5 + $0x20f0] sm:$0xff]  ;;  %v1181_v62 = vld [vmem:[#allocation5 + $0x2180] sm:$0xff]  ;;  %v1198_v63 = vld [vmem:[#allocation5 + $0x2208] sm:$0xff] }
 0x237   :  { %7658 = vmatprep.subr.bf16.mxu1 %v7657_v13  ;;  %v7673_v13 = vpack.c.bf16 %v1074_v3, %v1056_v2  ;;  %v1216_v0 = vld [vmem:[#allocation5 + $0x2298] sm:$0xff]  ;;  %v1218_v3 = vld [vmem:[#allocation5 + $0x22a8] sm:$0xff] }
 0x238   :  { %v1200_v2 = vld [vmem:[#allocation5 + $0x2218] sm:$0xff] }
 0x239   :  { %7468 = vmatpush1.bf16.msra.mxu0 %v7467_v20  ;;  %v7483_v20 = vpack.c.bf16 %v1071_v11, %v1053_v9  ;;  %v1197_v9 = vld [vmem:[#allocation5 + $0x2200] sm:$0xff]  ;;  %v1215_v11 = vld [vmem:[#allocation5 + $0x2290] sm:$0xff] }
 0x23a   :  { %7660 = vmatpush1.bf16.msra.mxu1 %v7659_v21  ;;  %7470 = vmatprep.subr.bf16.mxu0 %v7469_v24  ;;  %v7675_v21 = vpack.c.bf16 %v1073_v14, %v1055_v12  ;;  %v7485_v24 = vpack.c.bf16 %v1108_v16, %v1090_v15  ;;  %v1199_v12 = vld [vmem:[#allocation5 + $0x2210] sm:$0xff]  ;;  %v1217_v14 = vld [vmem:[#allocation5 + $0x22a0] sm:$0xff]  ;;  %v1234_v15 = vld [vmem:[#allocation5 + $0x2328] sm:$0xff] }
 0x23b   :  { %7662 = vmatprep.subr.bf16.mxu1 %v7661_v29  ;;  %v7677_v29 = vpack.c.bf16 %v1110_v19, %v1092_v18  ;;  %v1252_v16 = vld [vmem:[#allocation5 + $0x23b8] sm:$0xff]  ;;  %v1254_v19 = vld [vmem:[#allocation5 + $0x23c8] sm:$0xff] }
 0x23c   :  { %v1236_v18 = vld [vmem:[#allocation5 + $0x2338] sm:$0xff] }
 0x23d   :  { %7472 = vmatpush1.bf16.msra.mxu0 %v7471_v36  ;;  %v7487_v36 = vpack.c.bf16 %v1107_v27, %v1089_v25  ;;  %v1233_v25 = vld [vmem:[#allocation5 + $0x2320] sm:$0xff]  ;;  %v1251_v27 = vld [vmem:[#allocation5 + $0x23b0] sm:$0xff] }
 0x23e   :  { %7664 = vmatpush1.bf16.msra.mxu1 %v7663_v37  ;;  %7474 = vmatprep.subr.bf16.mxu0 %v7473_v40  ;;  %v7679_v37 = vpack.c.bf16 %v1109_v30, %v1091_v28  ;;  %v7489_v40 = vpack.c.bf16 %v1144_v32, %v1126_v31  ;;  %v1235_v28 = vld [vmem:[#allocation5 + $0x2330] sm:$0xff]  ;;  %v1253_v30 = vld [vmem:[#allocation5 + $0x23c0] sm:$0xff]  ;;  %v1270_v31 = vld [vmem:[#allocation5 + $0x2448] sm:$0xff] }
 0x23f   :  { %7666 = vmatprep.subr.bf16.mxu1 %v7665_v45  ;;  %v7681_v45 = vpack.c.bf16 %v1146_v35, %v1128_v34  ;;  %v1288_v32 = vld [vmem:[#allocation5 + $0x24d8] sm:$0xff]  ;;  %v1290_v35 = vld [vmem:[#allocation5 + $0x24e8] sm:$0xff] }
 0x240   :  { %v1272_v34 = vld [vmem:[#allocation5 + $0x2458] sm:$0xff] }
 0x241   :  { %7476 = vmatpush1.bf16.msra.mxu0 %v7475_v52  ;;  %v7491_v52 = vpack.c.bf16 %v1143_v43, %v1125_v41  ;;  %v1269_v41 = vld [vmem:[#allocation5 + $0x2440] sm:$0xff]  ;;  %v1287_v43 = vld [vmem:[#allocation5 + $0x24d0] sm:$0xff] }
 0x242   :  { %7668 = vmatpush1.bf16.msra.mxu1 %v7667_v53  ;;  %7478 = vmatprep.subr.bf16.mxu0 %v7477_v56  ;;  %v7683_v53 = vpack.c.bf16 %v1145_v46, %v1127_v44  ;;  %v7493_v56 = vpack.c.bf16 %v1180_v48, %v1162_v47  ;;  %v1271_v44 = vld [vmem:[#allocation5 + $0x2450] sm:$0xff]  ;;  %v1289_v46 = vld [vmem:[#allocation5 + $0x24e0] sm:$0xff]  ;;  %v1306_v47 = vld [vmem:[#allocation5 + $0x2568] sm:$0xff] }
 0x243   :  { %7670 = vmatprep.subr.bf16.mxu1 %v7669_v61  ;;  %v7685_v61 = vpack.c.bf16 %v1182_v51, %v1164_v50  ;;  %v1324_v48 = vld [vmem:[#allocation5 + $0x25f8] sm:$0xff]  ;;  %v1326_v51 = vld [vmem:[#allocation5 + $0x2608] sm:$0xff] }
 0x244   :  { %v1308_v50 = vld [vmem:[#allocation5 + $0x2578] sm:$0xff] }
 0x245   :  { %7480 = vmatpush1.bf16.msra.mxu0 %v7479_v4  ;;  %v7495_v4 = vpack.c.bf16 %v1179_v59, %v1161_v57  ;;  %v1305_v57 = vld [vmem:[#allocation5 + $0x2560] sm:$0xff]  ;;  %v1323_v59 = vld [vmem:[#allocation5 + $0x25f0] sm:$0xff] }
 0x246   :  { %7672 = vmatpush1.bf16.msra.mxu1 %v7671_v5  ;;  %7482 = vmatprep.subr.bf16.mxu0 %v7481_v8  ;;  %v7687_v5 = vpack.c.bf16 %v1181_v62, %v1163_v60  ;;  %v7497_v8 = vpack.c.bf16 %v1216_v0, %v1198_v63  ;;  %v1307_v60 = vld [vmem:[#allocation5 + $0x2570] sm:$0xff]  ;;  %v1325_v62 = vld [vmem:[#allocation5 + $0x2600] sm:$0xff]  ;;  %v1342_v63 = vld [vmem:[#allocation5 + $0x2688] sm:$0xff] }
 0x247   :  { %7674 = vmatprep.subr.bf16.mxu1 %v7673_v13  ;;  %v7689_v13 = vpack.c.bf16 %v1218_v3, %v1200_v2  ;;  %v1360_v0 = vld [vmem:[#allocation5 + $0x2718] sm:$0xff]  ;;  %v8899_v2 = vld [vmem:[#allocation2 + $0x10] sm:$0xff] }
 0x248   :  { %v1344_v3 = vld [vmem:[#allocation5 + $0x2698] sm:$0xff] }
 0x249   :  { %7484 = vmatpush1.bf16.msra.mxu0 %v7483_v20  ;;  %v7499_v20 = vpack.c.bf16 %v1215_v11, %v1197_v9  ;;  %v7513_v9 = vpack.c.bf16 %v1360_v0, %v1342_v63  ;;  %v1341_v11 = vld [vmem:[#allocation5 + $0x2680] sm:$0xff] }
 0x24a   :  { %7676 = vmatpush1.bf16.msra.mxu1 %v7675_v21  ;;  %7486 = vmatprep.subr.bf16.mxu0 %v7485_v24  ;;  %v7691_v21 = vpack.c.bf16 %v1217_v14, %v1199_v12  ;;  %v7501_v24 = vpack.c.bf16 %v1252_v16, %v1234_v15  ;;  %v1359_v12 = vld [vmem:[#allocation5 + $0x2710] sm:$0xff]  ;;  %v1361_v15 = vld [vmem:[#allocation5 + $0x2720] sm:$0xff]  ;;  %v1378_v16 = vld [vmem:[#allocation5 + $0x27a8] sm:$0xff] }
 0x24b   :  { %7678 = vmatprep.subr.bf16.mxu1 %v7677_v29  ;;  %v7693_v29 = vpack.c.bf16 %v1254_v19, %v1236_v18  ;;  %v1396_v18 = vld [vmem:[#allocation5 + $0x2838] sm:$0xff]  ;;  %v8900_v19 = vld [vmem:[#allocation2 + $0x48] sm:$0xff] }
 0x24d   :  { %7488 = vmatpush1.bf16.msra.mxu0 %v7487_v36  ;;  %v7503_v36 = vpack.c.bf16 %v1251_v27, %v1233_v25  ;;  %v7515_v25 = vpack.c.bf16 %v1359_v12, %v1341_v11  ;;  %v1504_v11 = vld [vmem:[#allocation5 + $0x2b98] sm:$0xff]  ;;  %v8906_v12 = vld [vmem:[#allocation2 + $0x28] sm:$0xff] }
 0x24e   :  { %7680 = vmatpush1.bf16.msra.mxu1 %v7679_v37  ;;  %7490 = vmatprep.subr.bf16.mxu0 %v7489_v40  ;;  %v7695_v37 = vpack.c.bf16 %v1253_v30, %v1235_v28  ;;  %v7505_v40 = vpack.c.bf16 %v1288_v32, %v1270_v31  ;;  %v7517_v28 = vpack.c.bf16 %v1396_v18, %v1378_v16  ;;  %v1395_v30 = vld [vmem:[#allocation5 + $0x2830] sm:$0xff] }
 0x24f   :  { %7682 = vmatprep.subr.bf16.mxu1 %v7681_v45  ;;  %v7697_v45 = vpack.c.bf16 %v1290_v35, %v1272_v34  ;;  %v1379_v31 = vld [vmem:[#allocation5 + $0x27b0] sm:$0xff]  ;;  %v1397_v34 = vld [vmem:[#allocation5 + $0x2840] sm:$0xff]  ;;  %v1414_v35 = vld [vmem:[#allocation5 + $0x28c8] sm:$0xff] }
 0x251   :  { %7492 = vmatpush1.bf16.msra.mxu0 %v7491_v52  ;;  %v7507_v52 = vpack.c.bf16 %v1287_v43, %v1269_v41  ;;  %v1434_v41 = vld [vmem:[#allocation5 + $0x2968] sm:$0xff]  ;;  %v8903_v43 = vld [vmem:[#allocation2 + $0x70] sm:$0xff] }
 0x252   :  { %7684 = vmatpush1.bf16.msra.mxu1 %v7683_v53  ;;  %7494 = vmatprep.subr.bf16.mxu0 %v7493_v56  ;;  %v7699_v53 = vpack.c.bf16 %v1289_v46, %v1271_v44  ;;  %v7509_v56 = vpack.c.bf16 %v1324_v48, %v1306_v47  ;;  %v1413_v47 = vld [vmem:[#allocation5 + $0x28c0] sm:$0xff]  ;;  %v1431_v48 = vld [vmem:[#allocation5 + $0x2950] sm:$0xff] }
 0x253   :  { %7686 = vmatprep.subr.bf16.mxu1 %v7685_v61  ;;  %v7701_v61 = vpack.c.bf16 %v1326_v51, %v1308_v50  ;;  %v1415_v50 = vld [vmem:[#allocation5 + $0x28d0] sm:$0xff] }
 0x255   :  { %7496 = vmatpush1.bf16.msra.mxu0 %v7495_v4  ;;  %v1362_v4 = vld [vmem:[#allocation5 + $0x2728] sm:$0xff] }
 0x256   :  { %7688 = vmatpush1.bf16.msra.mxu1 %v7687_v5  ;;  %7498 = vmatprep.subr.bf16.mxu0 %v7497_v8  ;;  %v7511_v5 = vpack.c.bf16 %v1323_v59, %v1305_v57  ;;  %v7703_v8 = vpack.c.bf16 %v1325_v62, %v1307_v60  ;;  %v7705_v14 = vpack.c.bf16 %v1362_v4, %v1344_v3  ;;  %v8904_v57 = vld [vmem:[#allocation2 + $0xa8] sm:$0xff]  ;;  %v1452_v59 = vld [vmem:[#allocation5 + $0x29f8] sm:$0xff]  ;;  %v1467_v3 = vld [vmem:[#allocation5 + $0x2a70] sm:$0xff] }
 0x257   :  { %7690 = vmatprep.subr.bf16.mxu1 %v7689_v13  ;;  %v1343_v13 = vld [vmem:[#allocation5 + $0x2690] sm:$0xff]  ;;  %v1470_v60 = vld [vmem:[#allocation5 + $0x2a88] sm:$0xff]  ;;  %v7523_v62 = vpack.c.bf16 %v1431_v48, %v1413_v47 }
 0x258   :  { %v7707_v27 = vpack.c.bf16 %v1361_v15, %v1343_v13  ;;  %v1451_v4 = vld [vmem:[#allocation5 + $0x29f0] sm:$0xff]  ;;  %v1488_v13 = vld [vmem:[#allocation5 + $0x2b18] sm:$0xff] }
 0x259   :  { %7500 = vmatpush1.bf16.msra.mxu0 %v7499_v20  ;;  %v1380_v20 = vld [vmem:[#allocation5 + $0x27b8] sm:$0xff] }
 0x25a   :  { %7692 = vmatpush1.bf16.msra.mxu1 %v7691_v21  ;;  %7502 = vmatprep.subr.bf16.mxu0 %v7501_v24  ;;  %v1398_v21 = vld [vmem:[#allocation5 + $0x2848] sm:$0xff]  ;;  %v8901_v24 = vld [vmem:[#allocation2 + $0x40] sm:$0xff] }
 0x25b   :  { %7694 = vmatprep.subr.bf16.mxu1 %v7693_v29  ;;  %v1377_v29 = vld [vmem:[#allocation5 + $0x27a0] sm:$0xff]  ;;  %v7709_v32 = vpack.c.bf16 %v1398_v21, %v1380_v20  ;;  %v1503_v20 = vld [vmem:[#allocation5 + $0x2b90] sm:$0xff] }
 0x25c   :  { %v7519_v44 = vpack.c.bf16 %v1395_v30, %v1377_v29  ;;  %v1487_v21 = vld [vmem:[#allocation5 + $0x2b10] sm:$0xff]  ;;  %v1524_v29 = vld [vmem:[#allocation5 + $0x2c38] sm:$0xff]  ;;  %v1542_v30 = vld [vmem:[#allocation5 + $0x2cc8] sm:$0xff] }
 0x25d   :  { %7504 = vmatpush1.bf16.msra.mxu0 %v7503_v36  ;;  %v1432_v36 = vld [vmem:[#allocation5 + $0x2958] sm:$0xff] }
 0x25e   :  { %7696 = vmatpush1.bf16.msra.mxu1 %v7695_v37  ;;  %7506 = vmatprep.subr.bf16.mxu0 %v7505_v40  ;;  %v8902_v37 = vld [vmem:[#allocation2 + $0x78] sm:$0xff]  ;;  %v7521_v46 = vpack.c.bf16 %v1432_v36, %v1414_v35  ;;  %v1521_v35 = vld [vmem:[#allocation5 + $0x2c20] sm:$0xff]  ;;  %v1539_v36 = vld [vmem:[#allocation5 + $0x2cb0] sm:$0xff] }
 0x25f   :  { %7698 = vmatprep.subr.bf16.mxu1 %v7697_v45  ;;  %v1416_v40 = vld [vmem:[#allocation5 + $0x28d8] sm:$0xff]  ;;  %v7711_v45 = vpack.c.bf16 %v1397_v34, %v1379_v31  ;;  %v7535_v47 = vpack.c.bf16 %v1539_v36, %v1521_v35  ;;  %v1665_v35 = vld [vmem:[#allocation5 + $0x30a0] sm:$0xff]  ;;  %v1683_v36 = vld [vmem:[#allocation5 + $0x3130] sm:$0xff] }
 0x260   :  { %3155 = vmatmul.mubr.f32.vlgmr.msra.gmra.mrb[16].mxu0 %v8899_v2  ;;  %v7713_v51 = vpack.c.bf16 %v1434_v41, %v1416_v40  ;;  %v7725_v40 = vpack.c.bf16 %v1542_v30, %v1524_v29  ;;  %v1541_v41 = vld [vmem:[#allocation5 + $0x2cc0] sm:$0xff]  ;;  %v1668_v29 = vld [vmem:[#allocation5 + $0x30b8] sm:$0xff]  ;;  %v1686_v30 = vld [vmem:[#allocation5 + $0x3148] sm:$0xff] }
 0x261   :  { %7508 = vmatpush1.bf16.msra.mxu0 %v7507_v52  ;;  %3422 = vmatmul.mubr.f32.vlgmr.msra.gmra.mrb[16].mxu1 %v8899_v2  ;;  %v1433_v52 = vld [vmem:[#allocation5 + $0x2960] sm:$0xff] }
 0x262   :  { %7700 = vmatpush1.bf16.msra.mxu1 %v7699_v53  ;;  %7510 = vmatprep.subr.bf16.mxu0 %v7509_v56  ;;  %v1450_v53 = vld [vmem:[#allocation5 + $0x29e8] sm:$0xff]  ;;  %v1468_v56 = vld [vmem:[#allocation5 + $0x2a78] sm:$0xff]  ;;  %v7715_v63 = vpack.c.bf16 %v1433_v52, %v1415_v50  ;;  %v1449_v2 = vld [vmem:[#allocation5 + $0x29e0] sm:$0xff] }
 0x263   :  { %7702 = vmatprep.subr.bf16.mxu1 %v7701_v61  ;;  %3160 = vmatprep.mubr.f32.mxu0 %v8900_v19  ;;  %v8905_v61 = vld [vmem:[#allocation2 + $0xa0] sm:$0xff]  ;;  %v7525_v0 = vpack.c.bf16 %v1468_v56, %v1450_v53  ;;  %v7527_v15 = vpack.c.bf16 %v1467_v3, %v1449_v2  ;;  %v1575_v52 = vld [vmem:[#allocation5 + $0x2dd0] sm:$0xff] }
 0x264   :  { %3427 = vmatprep.mubr.f32.mxu1 %v8900_v19  ;;  %3161 = vmatmul.mubr.f32.gmra.mrb[18].mxu0 %v8901_v24  ;;  %v1485_v19 = vld [vmem:[#allocation5 + $0x2b00] sm:$0xff]  ;;  %v1559_v53 = vld [vmem:[#allocation5 + $0x2d50] sm:$0xff] }
 0x265   :  { %7512 = vmatpush1.bf16.msra.mxu0 %v7511_v5  ;;  %3428 = vmatmul.mubr.f32.gmra.mrb[18].mxu1 %v8901_v24  ;;  %v7717_v5 = vpack.c.bf16 %v1470_v60, %v1452_v59  ;;  %v7531_v31 = vpack.c.bf16 %v1503_v20, %v1485_v19  ;;  %v1594_v59 = vld [vmem:[#allocation5 + $0x2e68] sm:$0xff]  ;;  %v1612_v60 = vld [vmem:[#allocation5 + $0x2ef8] sm:$0xff]  ;;  %v1593_v3 = vld [vmem:[#allocation5 + $0x2e60] sm:$0xff] }
 0x266   :  { %7704 = vmatpush1.bf16.msra.mxu1 %v7703_v8  ;;  %7514 = vmatprep.subr.bf16.mxu0 %v7513_v9  ;;  %v1469_v8 = vld [vmem:[#allocation5 + $0x2a80] sm:$0xff]  ;;  %v1486_v9 = vld [vmem:[#allocation5 + $0x2b08] sm:$0xff]  ;;  %v7541_v2 = vpack.c.bf16 %v1612_v60, %v1594_v59  ;;  %v1647_v20 = vld [vmem:[#allocation5 + $0x3010] sm:$0xff] }
 0x267   :  { %7706 = vmatprep.subr.bf16.mxu1 %v7705_v14  ;;  %3166 = vmatprep.mubr.f32.mxu0 %v8902_v37  ;;  %v1506_v14 = vld [vmem:[#allocation5 + $0x2ba8] sm:$0xff]  ;;  %v7719_v16 = vpack.c.bf16 %v1469_v8, %v1451_v4  ;;  %v7529_v18 = vpack.c.bf16 %v1504_v11, %v1486_v9  ;;  %v1611_v4 = vld [vmem:[#allocation5 + $0x2ef0] sm:$0xff]  ;;  %v1613_v9 = vld [vmem:[#allocation5 + $0x2f00] sm:$0xff] }
 0x268   :  { %3433 = vmatprep.mubr.f32.mxu1 %v8902_v37  ;;  %3167 = vmatmul.mubr.f32.gmra.mrb[20].mxu0 %v8903_v43  ;;  %v7721_v24 = vpack.c.bf16 %v1506_v14, %v1488_v13  ;;  %v1523_v37 = vld [vmem:[#allocation5 + $0x2c30] sm:$0xff]  ;;  %v1630_v11 = vld [vmem:[#allocation5 + $0x2f88] sm:$0xff]  ;;  %v1632_v13 = vld [vmem:[#allocation5 + $0x2f98] sm:$0xff] }
 0x269   :  { %7516 = vmatpush1.bf16.msra.mxu0 %v7515_v25  ;;  %3434 = vmatmul.mubr.f32.gmra.mrb[20].mxu1 %v8903_v43  ;;  %v1505_v25 = vld [vmem:[#allocation5 + $0x2ba0] sm:$0xff]  ;;  %v1558_v43 = vld [vmem:[#allocation5 + $0x2d48] sm:$0xff]  ;;  %v7727_v48 = vpack.c.bf16 %v1541_v41, %v1523_v37  ;;  %v1667_v37 = vld [vmem:[#allocation5 + $0x30b0] sm:$0xff] }
 0x26a   :  { %7708 = vmatpush1.bf16.msra.mxu1 %v7707_v27  ;;  %7518 = vmatprep.subr.bf16.mxu0 %v7517_v28  ;;  %v1522_v27 = vld [vmem:[#allocation5 + $0x2c28] sm:$0xff]  ;;  %v1540_v28 = vld [vmem:[#allocation5 + $0x2cb8] sm:$0xff]  ;;  %v1629_v19 = vld [vmem:[#allocation5 + $0x2f80] sm:$0xff] }
 0x26b   :  { %7710 = vmatprep.subr.bf16.mxu1 %v7709_v32  ;;  %3172 = vmatprep.mubr.f32.mxu0 %v8904_v57  ;;  %v7723_v32 = vpack.c.bf16 %v1505_v25, %v1487_v21  ;;  %v7533_v34 = vpack.c.bf16 %v1540_v28, %v1522_v27  ;;  %v1650_v14 = vld [vmem:[#allocation5 + $0x3028] sm:$0xff]  ;;  %v1631_v21 = vld [vmem:[#allocation5 + $0x2f90] sm:$0xff]  ;;  %v1649_v25 = vld [vmem:[#allocation5 + $0x3020] sm:$0xff] }
 0x26c   :  { %3439 = vmatprep.mubr.f32.mxu1 %v8904_v57  ;;  %3173 = vmatmul.mubr.f32.gmra.mrb[22].mxu0 %v8905_v61  ;;  %v1577_v57 = vld [vmem:[#allocation5 + $0x2de0] sm:$0xff]  ;;  %v1666_v27 = vld [vmem:[#allocation5 + $0x30a8] sm:$0xff]  ;;  %v1684_v28 = vld [vmem:[#allocation5 + $0x3138] sm:$0xff] }
 0x26d   :  { %7520 = vmatpush1.bf16.msra.mxu0 %v7519_v44  ;;  %3440 = vmatmul.mubr.f32.gmra.mrb[22].mxu1 %v8905_v61  ;;  %v1576_v44 = vld [vmem:[#allocation5 + $0x2dd8] sm:$0xff]  ;;  %v1685_v41 = vld [vmem:[#allocation5 + $0x3140] sm:$0xff]  ;;  %v1738_v59 = vld [vmem:[#allocation5 + $0x32e8] sm:$0xff] }
 0x26e   :  { %7712 = vmatpush1.bf16.msra.mxu1 %v7711_v45  ;;  %7522 = vmatprep.subr.bf16.mxu0 %v7521_v46  ;;  %v1560_v45 = vld [vmem:[#allocation5 + $0x2d58] sm:$0xff]  ;;  %v1578_v46 = vld [vmem:[#allocation5 + $0x2de8] sm:$0xff]  ;;  %v7537_v50 = vpack.c.bf16 %v1576_v44, %v1558_v43 }
 0x26f   :  { %7714 = vmatprep.subr.bf16.mxu1 %v7713_v51  ;;  %3243 = vmatprep.mubr.f32.mxu0 %v8906_v12  ;;  %v1557_v51 = vld [vmem:[#allocation5 + $0x2d40] sm:$0xff]  ;;  %v7729_v56 = vpack.c.bf16 %v1578_v46, %v1560_v45  ;;  %v1596_v61 = vld [vmem:[#allocation5 + $0x2e78] sm:$0xff]  ;;  %v1702_v43 = vld [vmem:[#allocation5 + $0x31c8] sm:$0xff] }
 0x270   :  { %3510 = vmatprep.mubr.f32.mxu1 %v8906_v12  ;;  %v1648_v12 = vld [vmem:[#allocation5 + $0x3018] sm:$0xff]  ;;  %v1722_v46 = vld [vmem:[#allocation5 + $0x3268] sm:$0xff] }
 0x271   :  { %7524 = vmatpush1.bf16.msra.mxu0 %v7523_v62  ;;  %v1614_v62 = vld [vmem:[#allocation5 + $0x2f08] sm:$0xff]  ;;  %v1720_v44 = vld [vmem:[#allocation5 + $0x3258] sm:$0xff] }
 0x272   :  { %7716 = vmatpush1.bf16.msra.mxu1 %v7715_v63  ;;  %7526 = vmatprep.subr.bf16.mxu0 %v7525_v0  ;;  %v7539_v63 = vpack.c.bf16 %v1575_v52, %v1557_v51  ;;  %v7731_v0 = vpack.c.bf16 %v1577_v57, %v1559_v53  ;;  %v7733_v8 = vpack.c.bf16 %v1614_v62, %v1596_v61  ;;  %v1704_v45 = vld [vmem:[#allocation5 + $0x31d8] sm:$0xff]  ;;  %v1701_v51 = vld [vmem:[#allocation5 + $0x31c0] sm:$0xff]  ;;  %v1719_v52 = vld [vmem:[#allocation5 + $0x3250] sm:$0xff] }
 0x273   :  { %7718 = vmatprep.subr.bf16.mxu1 %v7717_v5  ;;  %v1595_v5 = vld [vmem:[#allocation5 + $0x2e70] sm:$0xff]  ;;  %v1721_v57 = vld [vmem:[#allocation5 + $0x3260] sm:$0xff]  ;;  %v1756_v60 = vld [vmem:[#allocation5 + $0x3378] sm:$0xff] }
 0x274   :  { %v1703_v53 = vld [vmem:[#allocation5 + $0x31d0] sm:$0xff]  ;;  %v1740_v61 = vld [vmem:[#allocation5 + $0x32f8] sm:$0xff]  ;;  %v1758_v62 = vld [vmem:[#allocation5 + $0x3388] sm:$0xff] }
 0x275   :  { %7528 = vmatpush1.bf16.msra.mxu0 %v7527_v15  ;;  %v7543_v15 = vpack.c.bf16 %v1611_v4, %v1593_v3  ;;  %v1737_v3 = vld [vmem:[#allocation5 + $0x32e0] sm:$0xff]  ;;  %v1755_v4 = vld [vmem:[#allocation5 + $0x3370] sm:$0xff] }
 0x276   :  { %7720 = vmatpush1.bf16.msra.mxu1 %v7719_v16  ;;  %7530 = vmatprep.subr.bf16.mxu0 %v7529_v18  ;;  %v7735_v16 = vpack.c.bf16 %v1613_v9, %v1595_v5  ;;  %v7545_v18 = vpack.c.bf16 %v1648_v12, %v1630_v11  ;;  %v1739_v5 = vld [vmem:[#allocation5 + $0x32f0] sm:$0xff]  ;;  %v1757_v9 = vld [vmem:[#allocation5 + $0x3380] sm:$0xff]  ;;  %v1774_v11 = vld [vmem:[#allocation5 + $0x3408] sm:$0xff] }
 0x277   :  { %7722 = vmatprep.subr.bf16.mxu1 %v7721_v24  ;;  %v7737_v24 = vpack.c.bf16 %v1650_v14, %v1632_v13  ;;  %v1792_v12 = vld [vmem:[#allocation5 + $0x3498] sm:$0xff]  ;;  %v1794_v14 = vld [vmem:[#allocation5 + $0x34a8] sm:$0xff] }
 0x278   :  { %v1776_v13 = vld [vmem:[#allocation5 + $0x3418] sm:$0xff] }
 0x279   :  { %7532 = vmatpush1.bf16.msra.mxu0 %v7531_v31  ;;  %v7547_v31 = vpack.c.bf16 %v1647_v20, %v1629_v19  ;;  %v1773_v19 = vld [vmem:[#allocation5 + $0x3400] sm:$0xff]  ;;  %v1791_v20 = vld [vmem:[#allocation5 + $0x3490] sm:$0xff] }
 0x27a   :  { %7724 = vmatpush1.bf16.msra.mxu1 %v7723_v32  ;;  %7534 = vmatprep.subr.bf16.mxu0 %v7533_v34  ;;  %v7739_v32 = vpack.c.bf16 %v1649_v25, %v1631_v21  ;;  %v7549_v34 = vpack.c.bf16 %v1684_v28, %v1666_v27  ;;  %v1775_v21 = vld [vmem:[#allocation5 + $0x3410] sm:$0xff]  ;;  %v1793_v25 = vld [vmem:[#allocation5 + $0x34a0] sm:$0xff]  ;;  %v1810_v27 = vld [vmem:[#allocation5 + $0x3528] sm:$0xff] }
 0x27b   :  { %7726 = vmatprep.subr.bf16.mxu1 %v7725_v40  ;;  %v7741_v40 = vpack.c.bf16 %v1686_v30, %v1668_v29  ;;  %v1828_v28 = vld [vmem:[#allocation5 + $0x35b8] sm:$0xff]  ;;  %v1830_v30 = vld [vmem:[#allocation5 + $0x35c8] sm:$0xff] }
 0x27c   :  { %v1812_v29 = vld [vmem:[#allocation5 + $0x3538] sm:$0xff] }
 0x27d   :  { %7536 = vmatpush1.bf16.msra.mxu0 %v7535_v47  ;;  %v7551_v47 = vpack.c.bf16 %v1683_v36, %v1665_v35  ;;  %v1809_v35 = vld [vmem:[#allocation5 + $0x3520] sm:$0xff]  ;;  %v1827_v36 = vld [vmem:[#allocation5 + $0x35b0] sm:$0xff] }
 0x27e   :  { %7728 = vmatpush1.bf16.msra.mxu1 %v7727_v48  ;;  %7538 = vmatprep.subr.bf16.mxu0 %v7537_v50  ;;  %v7743_v48 = vpack.c.bf16 %v1685_v41, %v1667_v37  ;;  %v7553_v50 = vpack.c.bf16 %v1720_v44, %v1702_v43  ;;  %v1811_v37 = vld [vmem:[#allocation5 + $0x3530] sm:$0xff]  ;;  %v1829_v41 = vld [vmem:[#allocation5 + $0x35c0] sm:$0xff]  ;;  %v122_v43 = vld [vmem:[#allocation5 + $0x68] sm:$0xff] }
 0x27f   :  { %7730 = vmatprep.subr.bf16.mxu1 %v7729_v56  ;;  %v7745_v56 = vpack.c.bf16 %v1722_v46, %v1704_v45  ;;  %v140_v44 = vld [vmem:[#allocation5 + $0xf8] sm:$0xff]  ;;  %v142_v46 = vld [vmem:[#allocation5 + $0x108] sm:$0xff] }
 0x280   :  { %v124_v45 = vld [vmem:[#allocation5 + $0x78] sm:$0xff] }
 0x281   :  { %7540 = vmatpush1.bf16.msra.mxu0 %v7539_v63  ;;  %v7555_v63 = vpack.c.bf16 %v1719_v52, %v1701_v51  ;;  %v121_v51 = vld [vmem:[#allocation5 + $0x60] sm:$0xff]  ;;  %v139_v52 = vld [vmem:[#allocation5 + $0xf0] sm:$0xff] }
 0x282   :  { %7732 = vmatpush1.bf16.msra.mxu1 %v7731_v0  ;;  %7542 = vmatprep.subr.bf16.mxu0 %v7541_v2  ;;  %v7747_v0 = vpack.c.bf16 %v1721_v57, %v1703_v53  ;;  %v7557_v2 = vpack.c.bf16 %v1756_v60, %v1738_v59  ;;  %v7953_v53 = vpack.c.bf16 %v142_v46, %v124_v45  ;;  %v141_v57 = vld [vmem:[#allocation5 + $0x100] sm:$0xff]  ;;  %v158_v59 = vld [vmem:[#allocation5 + $0x188] sm:$0xff]  ;;  %v176_v60 = vld [vmem:[#allocation5 + $0x218] sm:$0xff] }
 0x283   :  { %7734 = vmatprep.subr.bf16.mxu1 %v7733_v8  ;;  %v7749_v8 = vpack.c.bf16 %v1758_v62, %v1740_v61  ;;  %v7763_v61 = vpack.c.bf16 %v139_v52, %v121_v51  ;;  %v160_v62 = vld [vmem:[#allocation5 + $0x198] sm:$0xff]  ;;  %v249_v45 = vld [vmem:[#allocation5 + $0x460] sm:$0xff]  ;;  %v266_v46 = vld [vmem:[#allocation5 + $0x4e8] sm:$0xff] }
 0x284   :  { %v268_v51 = vld [vmem:[#allocation5 + $0x4f8] sm:$0xff]  ;;  %v286_v52 = vld [vmem:[#allocation5 + $0x588] sm:$0xff] }
 0x285   :  { %7544 = vmatpush1.bf16.msra.mxu0 %v7543_v15  ;;  %v7559_v15 = vpack.c.bf16 %v1755_v4, %v1737_v3  ;;  %v175_v3 = vld [vmem:[#allocation5 + $0x210] sm:$0xff]  ;;  %v7765_v4 = vpack.c.bf16 %v176_v60, %v158_v59  ;;  %v265_v60 = vld [vmem:[#allocation5 + $0x4e0] sm:$0xff] }
 0x286   :  { %7736 = vmatpush1.bf16.msra.mxu1 %v7735_v16  ;;  %7546 = vmatprep.subr.bf16.mxu0 %v7545_v18  ;;  %v7751_v16 = vpack.c.bf16 %v1757_v9, %v1739_v5  ;;  %v7561_v18 = vpack.c.bf16 %v1792_v12, %v1774_v11  ;;  %v159_v5 = vld [vmem:[#allocation5 + $0x190] sm:$0xff]  ;;  %v8907_v9 = vld [vmem:[#allocation2 + $0x20] sm:$0xff]  ;;  %v194_v12 = vld [vmem:[#allocation5 + $0x2a8] sm:$0xff] }
 0x287   :  { %7738 = vmatprep.subr.bf16.mxu1 %v7737_v24  ;;  %v7753_v24 = vpack.c.bf16 %v1794_v14, %v1776_v13  ;;  %v212_v13 = vld [vmem:[#allocation5 + $0x338] sm:$0xff] }
 0x289   :  { %7548 = vmatpush1.bf16.msra.mxu0 %v7547_v31  ;;  %v7563_v31 = vpack.c.bf16 %v1791_v20, %v1773_v19  ;;  %v193_v20 = vld [vmem:[#allocation5 + $0x2a0] sm:$0xff] }
 0x28a   :  { %7740 = vmatpush1.bf16.msra.mxu1 %v7739_v32  ;;  %7550 = vmatprep.subr.bf16.mxu0 %v7549_v34  ;;  %v7755_v32 = vpack.c.bf16 %v1793_v25, %v1775_v21  ;;  %v7565_v34 = vpack.c.bf16 %v1828_v28, %v1810_v27  ;;  %v211_v21 = vld [vmem:[#allocation5 + $0x330] sm:$0xff]  ;;  %v213_v27 = vld [vmem:[#allocation5 + $0x340] sm:$0xff] }
 0x28b   :  { %7742 = vmatprep.subr.bf16.mxu1 %v7741_v40  ;;  %v7757_v40 = vpack.c.bf16 %v1830_v30, %v1812_v29  ;;  %v195_v25 = vld [vmem:[#allocation5 + $0x2b0] sm:$0xff]  ;;  %v230_v30 = vld [vmem:[#allocation5 + $0x3c8] sm:$0xff] }
 0x28c   :  { %v8909_v28 = vld [vmem:[#allocation2 + $0x50] sm:$0xff] }
 0x28d   :  { %7552 = vmatpush1.bf16.msra.mxu0 %v7551_v47  ;;  %v7567_v47 = vpack.c.bf16 %v1827_v36, %v1809_v35  ;;  %v250_v35 = vld [vmem:[#allocation5 + $0x468] sm:$0xff] }
 0x28e   :  { %7744 = vmatpush1.bf16.msra.mxu1 %v7743_v48  ;;  %7554 = vmatprep.subr.bf16.mxu0 %v7553_v50  ;;  %v7759_v48 = vpack.c.bf16 %v1829_v41, %v1811_v37  ;;  %v7761_v50 = vpack.c.bf16 %v140_v44, %v122_v43  ;;  %v8910_v36 = vld [vmem:[#allocation2 + $0x88] sm:$0xff]  ;;  %v7963_v37 = vpack.c.bf16 %v213_v27, %v195_v25  ;;  %v247_v41 = vld [vmem:[#allocation5 + $0x450] sm:$0xff]  ;;  %v340_v27 = vld [vmem:[#allocation5 + $0x738] sm:$0xff] }
 0x28f   :  { %7746 = vmatprep.subr.bf16.mxu1 %v7745_v56  ;;  %v123_v56 = vld [vmem:[#allocation5 + $0x70] sm:$0xff]  ;;  %v8914_v25 = vld [vmem:[#allocation2 + $0x8] sm:$0xff] }
 0x290   :  { %v231_v43 = vld [vmem:[#allocation5 + $0x3d0] sm:$0xff] }
 0x291   :  { %7556 = vmatpush1.bf16.msra.mxu0 %v7555_v63  ;;  %v178_v63 = vld [vmem:[#allocation5 + $0x228] sm:$0xff] }
 0x292   :  { %7748 = vmatpush1.bf16.msra.mxu1 %v7747_v0  ;;  %7558 = vmatprep.subr.bf16.mxu0 %v7557_v2  ;;  %v7955_v0 = vpack.c.bf16 %v141_v57, %v123_v56  ;;  %v157_v2 = vld [vmem:[#allocation5 + $0x180] sm:$0xff]  ;;  %v7957_v11 = vpack.c.bf16 %v178_v63, %v160_v62  ;;  %v8912_v56 = vld [vmem:[#allocation2 + $0xb8] sm:$0xff]  ;;  %v7967_v57 = vpack.c.bf16 %v249_v45, %v231_v43  ;;  %v267_v62 = vld [vmem:[#allocation5 + $0x4f0] sm:$0xff]  ;;  %v10142_v63 = vlaneseq }
 0x293   :  { %7750 = vmatprep.subr.bf16.mxu1 %v7749_v8  ;;  %v177_v8 = vld [vmem:[#allocation5 + $0x220] sm:$0xff]  ;;  %v7767_v14 = vpack.c.bf16 %v175_v3, %v157_v2  ;;  %v302_v3 = vld [vmem:[#allocation5 + $0x608] sm:$0xff]  ;;  %v392_v45 = vld [vmem:[#allocation5 + $0x8d8] sm:$0xff] }
 0x294   :  { %v7959_v19 = vpack.c.bf16 %v177_v8, %v159_v5  ;;  %v285_v2 = vld [vmem:[#allocation5 + $0x580] sm:$0xff]  ;;  %v8913_v5 = vld [vmem:[#allocation2 + $0xb0] sm:$0xff]  ;;  %v304_v8 = vld [vmem:[#allocation5 + $0x618] sm:$0xff] }
 0x295   :  { %7560 = vmatpush1.bf16.msra.mxu0 %v7559_v15  ;;  %v196_v15 = vld [vmem:[#allocation5 + $0x2b8] sm:$0xff]  ;;  %v357_v43 = vld [vmem:[#allocation5 + $0x7c0] sm:$0xff] }
 0x296   :  { %7752 = vmatpush1.bf16.msra.mxu1 %v7751_v16  ;;  %7562 = vmatprep.subr.bf16.mxu0 %v7561_v18  ;;  %v214_v16 = vld [vmem:[#allocation5 + $0x348] sm:$0xff]  ;;  %v8908_v18 = vld [vmem:[#allocation2 + $0x58] sm:$0xff] }
 0x297   :  { %7754 = vmatprep.subr.bf16.mxu1 %v7753_v24  ;;  %v7769_v24 = vpack.c.bf16 %v212_v13, %v194_v12  ;;  %v7961_v29 = vpack.c.bf16 %v214_v16, %v196_v15  ;;  %v7971_v12 = vpack.c.bf16 %v285_v2, %v267_v62  ;;  %v319_v15 = vld [vmem:[#allocation5 + $0x690] sm:$0xff]  ;;  %v393_v2 = vld [vmem:[#allocation5 + $0x8e0] sm:$0xff] }
 0x298   :  { %v303_v16 = vld [vmem:[#allocation5 + $0x610] sm:$0xff] }
 0x299   :  { %7564 = vmatpush1.bf16.msra.mxu0 %v7563_v31  ;;  %v248_v31 = vld [vmem:[#allocation5 + $0x458] sm:$0xff]  ;;  %v391_v62 = vld [vmem:[#allocation5 + $0x8d0] sm:$0xff] }
 0x29a   :  { %7756 = vmatpush1.bf16.msra.mxu1 %v7755_v32  ;;  %7566 = vmatprep.subr.bf16.mxu0 %v7565_v34  ;;  %v7771_v32 = vpack.c.bf16 %v211_v21, %v193_v20  ;;  %v232_v34 = vld [vmem:[#allocation5 + $0x3d8] sm:$0xff]  ;;  %v7773_v44 = vpack.c.bf16 %v248_v31, %v230_v30  ;;  %v321_v20 = vld [vmem:[#allocation5 + $0x6a0] sm:$0xff]  ;;  %v338_v21 = vld [vmem:[#allocation5 + $0x728] sm:$0xff] }
 0x29b   :  { %7758 = vmatprep.subr.bf16.mxu1 %v7757_v40  ;;  %v229_v40 = vld [vmem:[#allocation5 + $0x3c0] sm:$0xff] }
 0x29d   :  { %7568 = vmatpush1.bf16.msra.mxu0 %v7567_v47  ;;  %v284_v47 = vld [vmem:[#allocation5 + $0x578] sm:$0xff] }
 0x29e   :  { %7760 = vmatpush1.bf16.msra.mxu1 %v7759_v48  ;;  %7762 = vmatprep.subr.bf16.mxu0 %v7761_v50  ;;  %v8911_v48 = vld [vmem:[#allocation2 + $0x80] sm:$0xff]  ;;  %v7965_v50 = vpack.c.bf16 %v250_v35, %v232_v34  ;;  %v7777_v59 = vpack.c.bf16 %v284_v47, %v266_v46 }
 0x29f   :  { %7954 = vmatprep.subr.bf16.mxu1 %v7953_v53  ;;  %v7775_v53 = vpack.c.bf16 %v247_v41, %v229_v40  ;;  %v337_v35 = vld [vmem:[#allocation5 + $0x720] sm:$0xff] }
 0x2a0   :  { %3244 = vmatmul.mubr.f32.vlgmr.msra.gmra.mrb[16].mxu0 %v8907_v9  ;;  %v1837_v46 = vld [vmem:[#allocation7] sm:$0xff] }
 0x2a1   :  { %3511 = vmatmul.mubr.f32.vlgmr.msra.gmra.mrb[16].mxu1 %v8907_v9  ;;  %7764 = vmatpush1.bf16.msra.mxu0 %v7763_v61  ;;  %v283_v61 = vld [vmem:[#allocation5 + $0x570] sm:$0xff]  ;;  %v322_v9 = vld [vmem:[#allocation5 + $0x6a8] sm:$0xff] }
 0x2a2   :  { %7956 = vmatpush1.bf16.msra.mxu1 %v7955_v0  ;;  %3249 = vmatprep.mubr.f32.mxu0 %v8908_v18  ;;  %v7969_v0 = vpack.c.bf16 %v286_v52, %v268_v51  ;;  %v394_v51 = vld [vmem:[#allocation5 + $0x8e8] sm:$0xff] }
 0x2a3   :  { %3516 = vmatprep.mubr.f32.mxu1 %v8908_v18  ;;  %7766 = vmatprep.subr.bf16.mxu0 %v7765_v4  ;;  %v320_v4 = vld [vmem:[#allocation5 + $0x698] sm:$0xff]  ;;  %v9234_v18 = vshrl.u32 %v10142_v63, 7 }
 0x2a4   :  { %3250 = vmatmul.mubr.f32.gmra.mrb[18].mxu0 %v8909_v28  ;;  %7958 = vmatprep.subr.bf16.mxu1 %v7957_v11  ;;  %v7779_v11 = vpack.c.bf16 %v283_v61, %v265_v60  ;;  %v7781_v13 = vpack.c.bf16 %v320_v4, %v302_v3 }
 0x2a5   :  { %3517 = vmatmul.mubr.f32.gmra.mrb[18].mxu1 %v8909_v28  ;;  %7768 = vmatpush1.bf16.msra.mxu0 %v7767_v14  ;;  %v301_v14 = vld [vmem:[#allocation5 + $0x600] sm:$0xff]  ;;  %v358_v28 = vld [vmem:[#allocation5 + $0x7c8] sm:$0xff]  ;;  %v10143_v31 = vsub.s32 7, %v9234_v18 }
 0x2a6   :  { %7960 = vmatpush1.bf16.msra.mxu1 %v7959_v19  ;;  %3255 = vmatprep.mubr.f32.mxu0 %v8910_v36  ;;  %v7973_v19 = vpack.c.bf16 %v322_v9, %v304_v8  ;;  %v7783_v30 = vpack.c.bf16 %v319_v15, %v301_v14  ;;  %v7977_v41 = vpack.c.bf16 %v358_v28, %v340_v27  ;;  %v428_v8 = vld [vmem:[#allocation5 + $0x9f8] sm:$0xff]  ;;  %v409_v27 = vld [vmem:[#allocation5 + $0x960] sm:$0xff]  ;;  %v427_v28 = vld [vmem:[#allocation5 + $0x9f0] sm:$0xff] }
 0x2a7   :  { %3522 = vmatprep.mubr.f32.mxu1 %v8910_v36  ;;  %7770 = vmatprep.subr.bf16.mxu0 %v7769_v24  ;;  %v356_v24 = vld [vmem:[#allocation5 + $0x7b8] sm:$0xff]  ;;  %v355_v36 = vld [vmem:[#allocation5 + $0x7b0] sm:$0xff] }
 0x2a8   :  { %3256 = vmatmul.mubr.f32.gmra.mrb[20].mxu0 %v8911_v48  ;;  %7962 = vmatprep.subr.bf16.mxu1 %v7961_v29  ;;  %v10144_v29 = vsub.s32 6, %v9234_v18  ;;  %v7785_v34 = vpack.c.bf16 %v356_v24, %v338_v21 }
 0x2a9   :  { %3523 = vmatmul.mubr.f32.gmra.mrb[20].mxu1 %v8911_v48  ;;  %7772 = vmatpush1.bf16.msra.mxu0 %v7771_v32  ;;  %v7975_v32 = vpack.c.bf16 %v321_v20, %v303_v16 }
 0x2aa   :  { %7964 = vmatpush1.bf16.msra.mxu1 %v7963_v37  ;;  %3261 = vmatprep.mubr.f32.mxu0 %v8912_v56  ;;  %v339_v37 = vld [vmem:[#allocation5 + $0x730] sm:$0xff]  ;;  %v9244_v52 = vrot.slane %v1837_v46, %v10144_v29 }
 0x2ab   :  { %3528 = vmatprep.mubr.f32.mxu1 %v8912_v56  ;;  %7774 = vmatprep.subr.bf16.mxu0 %v7773_v44  ;;  %v374_v44 = vld [vmem:[#allocation5 + $0x848] sm:$0xff]  ;;  %v7787_v56 = vpack.c.bf16 %v355_v36, %v337_v35  ;;  %v7979_v60 = vpack.c.bf16 %v357_v43, %v339_v37  ;;  %v429_v36 = vld [vmem:[#allocation5 + $0xa00] sm:$0xff] }
 0x2ac   :  { %3262 = vmatmul.mubr.f32.gmra.mrb[22].mxu0 %v8913_v5  ;;  %7966 = vmatprep.subr.bf16.mxu1 %v7965_v50  ;;  %v376_v50 = vld [vmem:[#allocation5 + $0x858] sm:$0xff]  ;;  %v7789_v61 = vpack.c.bf16 %v392_v45, %v374_v44  ;;  %v446_v37 = vld [vmem:[#allocation5 + $0xa88] sm:$0xff] }
 0x2ad   :  { %3529 = vmatmul.mubr.f32.gmra.mrb[22].mxu1 %v8913_v5  ;;  %7776 = vmatpush1.bf16.msra.mxu0 %v7775_v53  ;;  %v7981_v4 = vpack.c.bf16 %v394_v51, %v376_v50  ;;  %v410_v5 = vld [vmem:[#allocation5 + $0x968] sm:$0xff]  ;;  %v7795_v51 = vpack.c.bf16 %v427_v28, %v409_v27 }
 0x2ae   :  { %7968 = vmatpush1.bf16.msra.mxu1 %v7967_v57  ;;  %7778 = vmatprep.subr.bf16.mxu0 %v7777_v59  ;;  %v373_v57 = vld [vmem:[#allocation5 + $0x840] sm:$0xff]  ;;  %v9248_v59 = vrot.slane %v1837_v46, %v10143_v31  ;;  %v448_v46 = vld [vmem:[#allocation5 + $0xa98] sm:$0xff]  ;;  %v826_v31 = vld [vmem:[#allocation5 + $0x1668] sm:$0xff] }
 0x2af   :  { %7970 = vmatprep.subr.bf16.mxu1 %v7969_v0  ;;  %3599 = vmatprep.mubr.f32.mxu0 %v8914_v25  ;;  %v375_v0 = vld [vmem:[#allocation5 + $0x850] sm:$0xff] }
 0x2b0   :  { %3866 = vmatprep.mubr.f32.mxu1 %v8914_v25  ;;  %v7983_v20 = vpack.c.bf16 %v393_v2, %v375_v0  ;;  %v7793_v25 = vpack.c.bf16 %v428_v8, %v410_v5  ;;  %v500_v5 = vld [vmem:[#allocation5 + $0xc38] sm:$0xff] }
 0x2b1   :  { %7780 = vmatpush1.bf16.msra.mxu0 %v7779_v11 }
 0x2b2   :  { %7972 = vmatpush1.bf16.msra.mxu1 %v7971_v12  ;;  %7782 = vmatprep.subr.bf16.mxu0 %v7781_v13  ;;  %v412_v12 = vld [vmem:[#allocation5 + $0x978] sm:$0xff]  ;;  %v430_v13 = vld [vmem:[#allocation5 + $0xa08] sm:$0xff] }
 0x2b3   :  { %v9238_v40 = vpop.f32.mrb[8].mxu0  ;;  %7974 = vmatprep.subr.bf16.mxu1 %v7973_v19  ;;  %v7791_v19 = vpack.c.bf16 %v391_v62, %v373_v57  ;;  %v7985_v35 = vpack.c.bf16 %v430_v13, %v412_v12  ;;  %v465_v62 = vld [vmem:[#allocation5 + $0xb20] sm:$0xff]  ;;  %v484_v12 = vld [vmem:[#allocation5 + $0xbb8] sm:$0xff]  ;;  %v502_v13 = vld [vmem:[#allocation5 + $0xc48] sm:$0xff] }
 0x2b4   :  { %v2978_v47 = vpop.f32.mrb[8].mxu1  ;;  %v9240_v48 = vpop.f32.mrb[9].mxu0 }
 0x2b5   :  { %v2980_v53 = vpop.f32.mrb[9].mxu1  ;;  %7784 = vmatpush1.bf16.msra.mxu0 %v7783_v30  ;;  %v9255_v14 = vadd.f32 %v2978_v47, %v9244_v52  ;;  %v411_v30 = vld [vmem:[#allocation5 + $0x970] sm:$0xff]  ;;  %v466_v47 = vld [vmem:[#allocation5 + $0xb28] sm:$0xff] }
 0x2b6   :  { %7976 = vmatpush1.bf16.msra.mxu1 %v7975_v32  ;;  %7786 = vmatprep.subr.bf16.mxu0 %v7785_v34  ;;  %v9261_v21 = vadd.f32 %v2980_v53, %v9248_v59  ;;  %v445_v53 = vld [vmem:[#allocation5 + $0xa80] sm:$0xff]  ;;  %v7989_v2 = vpack.c.bf16 %v466_v47, %v448_v46  ;;  %v518_v47 = vld [vmem:[#allocation5 + $0xcc8] sm:$0xff] }
 0x2b7   :  { %v9250_v3 = vpop.f32.mrb[10].mxu0  ;;  %7978 = vmatprep.subr.bf16.mxu1 %v7977_v41  ;;  %v464_v41 = vld [vmem:[#allocation5 + $0xb18] sm:$0xff]  ;;  %v501_v46 = vld [vmem:[#allocation5 + $0xc40] sm:$0xff] }
 0x2b8   :  { %v2984_v9 = vpop.f32.mrb[10].mxu1  ;;  %v9252_v11 = vpop.f32.mrb[11].mxu0  ;;  %v7797_v57 = vpack.c.bf16 %v464_v41, %v446_v37  ;;  %v499_v37 = vld [vmem:[#allocation5 + $0xc30] sm:$0xff] }
 0x2b9   :  { %v9258_v15 = vadd.f32 %v2984_v9, %v9244_v52  ;;  %v2986_v16 = vpop.f32.mrb[11].mxu1  ;;  %7788 = vmatpush1.bf16.msra.mxu0 %v7787_v56  ;;  %v7987_v56 = vpack.c.bf16 %v429_v36, %v411_v30  ;;  %v481_v36 = vld [vmem:[#allocation5 + $0xba0] sm:$0xff]  ;;  %v483_v41 = vld [vmem:[#allocation5 + $0xbb0] sm:$0xff] }
 0x2ba   :  { %v9264_v24 = vadd.f32 %v2986_v16, %v9248_v59  ;;  %7980 = vmatpush1.bf16.msra.mxu1 %v7979_v60  ;;  %7790 = vmatprep.subr.bf16.mxu0 %v7789_v61  ;;  %v463_v60 = vld [vmem:[#allocation5 + $0xb10] sm:$0xff] }
 0x2bb   :  { %v8339_v32 = vpack.c.bf16 %v9258_v15, %v9255_v14  ;;  %v9268_v34 = vpop.f32.mrb[12].mxu0  ;;  %7982 = vmatprep.subr.bf16.mxu1 %v7981_v4  ;;  %v447_v61 = vld [vmem:[#allocation5 + $0xa90] sm:$0xff]  ;;  %v482_v4 = vld [vmem:[#allocation5 + $0xba8] sm:$0xff]  ;;  %v9324_v14 = vld [vmem:[#allocation2 + $0xb8] sm:$0xff] }
 0x2bc   :  { %v8337_v43 = vpack.c.bf16 %v9264_v24, %v9261_v21  ;;  %v2990_v44 = vpop.f32.mrb[12].mxu1  ;;  %v9272_v45 = vpop.f32.mrb[13].mxu0  ;;  %v7991_v27 = vpack.c.bf16 %v465_v62, %v447_v61  ;;  %v517_v61 = vld [vmem:[#allocation5 + $0xcc0] sm:$0xff]  ;;  %v535_v62 = vld [vmem:[#allocation5 + $0xd50] sm:$0xff]  ;;  %v9298_v21 = vsub.s32 1, %v9234_v18  ;;  %10171 = vst [vmem:[#allocation19_spill] sm:$0xff] %v9324_v14 }
 0x2bd   :  { %v2992_v50 = vpop.f32.mrb[13].mxu1  ;;  %7792 = vmatpush1.bf16.msra.mxu0 %v7791_v19  ;;  %v9279_v16 = vadd.f32 %v2990_v44, %v9244_v52  ;;  %v7993_v44 = vpack.c.bf16 %v502_v13, %v484_v12  ;;  %v572_v12 = vld [vmem:[#allocation5 + $0xe78] sm:$0xff]  ;;  %v7807_v63 = vpack.c.bf16 %v535_v62, %v517_v61  ;;  %v591_v62 = vld [vmem:[#allocation5 + $0xf10] sm:$0xff] }
 0x2be   :  { %7984 = vmatpush1.bf16.msra.mxu1 %v7983_v20  ;;  %7794 = vmatprep.subr.bf16.mxu0 %v7793_v25  ;;  %v7799_v25 = vpack.c.bf16 %v463_v60, %v445_v53  ;;  %v9285_v28 = vadd.f32 %v2992_v50, %v9248_v59  ;;  %v520_v53 = vld [vmem:[#allocation5 + $0xcd8] sm:$0xff]  ;;  %10168 = vst [vmem:[#allocation16_spill] sm:$0xff] %v9298_v21  ;;  %v9300_v24 = vld [vmem:[#allocation2 + $0x50] sm:$0xff]  ;;  %v414_v50 = vld [vmem:[#allocation5 + $0x988] sm:$0xff] }
 0x2bf   :  { %v9274_v0 = vpop.f32.mrb[14].mxu0  ;;  %7986 = vmatprep.subr.bf16.mxu1 %v7985_v35  ;;  %v7801_v35 = vpack.c.bf16 %v500_v5, %v482_v4  ;;  %v519_v4 = vld [vmem:[#allocation5 + $0xcd0] sm:$0xff]  ;;  %v537_v5 = vld [vmem:[#allocation5 + $0xd60] sm:$0xff]  ;;  %v556_v13 = vld [vmem:[#allocation5 + $0xdf8] sm:$0xff] }
 0x2c0   :  { %v2996_v8 = vpop.f32.mrb[14].mxu1  ;;  %v9276_v9 = vpop.f32.mrb[15].mxu0 }
 0x2c1   :  { %v9282_v19 = vadd.f32 %v2996_v8, %v9244_v52  ;;  %v2998_v20 = vpop.f32.mrb[15].mxu1  ;;  %7796 = vmatpush1.bf16.msra.mxu0 %v7795_v51  ;;  %v536_v51 = vld [vmem:[#allocation5 + $0xd58] sm:$0xff]  ;;  %v554_v8 = vld [vmem:[#allocation5 + $0xde8] sm:$0xff] }
 0x2c2   :  { %v9288_v30 = vadd.f32 %v2998_v20, %v9248_v59  ;;  %7988 = vmatpush1.bf16.msra.mxu1 %v7987_v56  ;;  %7798 = vmatprep.subr.bf16.mxu0 %v7797_v57  ;;  %v538_v59 = vld [vmem:[#allocation5 + $0xd68] sm:$0xff]  ;;  %v7803_v56 = vpack.c.bf16 %v499_v37, %v481_v36  ;;  %v7995_v57 = vpack.c.bf16 %v501_v46, %v483_v41  ;;  %v555_v37 = vld [vmem:[#allocation5 + $0xdf0] sm:$0xff]  ;;  %v573_v46 = vld [vmem:[#allocation5 + $0xe80] sm:$0xff] }
 0x2c3   :  { %7990 = vmatprep.subr.bf16.mxu1 %v7989_v2  ;;  %v7805_v60 = vpack.c.bf16 %v536_v51, %v518_v47  ;;  %v7997_v2 = vpack.c.bf16 %v538_v59, %v520_v53  ;;  %v574_v20 = vld [vmem:[#allocation5 + $0xe88] sm:$0xff]  ;;  %v7809_v36 = vpack.c.bf16 %v572_v12, %v554_v8  ;;  %v592_v51 = vld [vmem:[#allocation5 + $0xf18] sm:$0xff] }
 0x2c4   :  { %v8001_v41 = vpack.c.bf16 %v574_v20, %v556_v13  ;;  %v590_v47 = vld [vmem:[#allocation5 + $0xf08] sm:$0xff]  ;;  %v628_v12 = vld [vmem:[#allocation5 + $0x1038] sm:$0xff] }
 0x2c5   :  { %7800 = vmatpush1.bf16.msra.mxu0 %v7799_v25  ;;  %v7999_v25 = vpack.c.bf16 %v537_v5, %v519_v4  ;;  %v610_v53 = vld [vmem:[#allocation5 + $0xfa8] sm:$0xff]  ;;  %v609_v5 = vld [vmem:[#allocation5 + $0xfa0] sm:$0xff] }
 0x2c6   :  { %7992 = vmatpush1.bf16.msra.mxu1 %v7991_v27  ;;  %7802 = vmatprep.subr.bf16.mxu0 %v7801_v35  ;;  %v553_v27 = vld [vmem:[#allocation5 + $0xde0] sm:$0xff]  ;;  %v571_v35 = vld [vmem:[#allocation5 + $0xe70] sm:$0xff]  ;;  %v8005_v4 = vpack.c.bf16 %v610_v53, %v592_v51  ;;  %v626_v8 = vld [vmem:[#allocation5 + $0x1028] sm:$0xff] }
 0x2c7   :  { %7994 = vmatprep.subr.bf16.mxu1 %v7993_v44  ;;  %v608_v44 = vld [vmem:[#allocation5 + $0xf98] sm:$0xff]  ;;  %v7811_v59 = vpack.c.bf16 %v571_v35, %v553_v27  ;;  %v646_v13 = vld [vmem:[#allocation5 + $0x10c8] sm:$0xff]  ;;  %v627_v35 = vld [vmem:[#allocation5 + $0x1030] sm:$0xff] }
 0x2c8   :  { %v7813_v61 = vpack.c.bf16 %v608_v44, %v590_v47  ;;  %v662_v47 = vld [vmem:[#allocation5 + $0x1148] sm:$0xff]  ;;  %v664_v44 = vld [vmem:[#allocation5 + $0x1158] sm:$0xff] }
 0x2c9   :  { %7804 = vmatpush1.bf16.msra.mxu0 %v7803_v56  ;;  %v8003_v56 = vpack.c.bf16 %v573_v46, %v555_v37  ;;  %v8009_v37 = vpack.c.bf16 %v646_v13, %v628_v12  ;;  %v645_v46 = vld [vmem:[#allocation5 + $0x10c0] sm:$0xff]  ;;  %v682_v51 = vld [vmem:[#allocation5 + $0x11e8] sm:$0xff] }
 0x2ca   :  { %7996 = vmatpush1.bf16.msra.mxu1 %v7995_v57  ;;  %7806 = vmatprep.subr.bf16.mxu0 %v7805_v60  ;;  %v589_v57 = vld [vmem:[#allocation5 + $0xf00] sm:$0xff]  ;;  %v607_v60 = vld [vmem:[#allocation5 + $0xf90] sm:$0xff]  ;;  %v718_v12 = vld [vmem:[#allocation5 + $0x1308] sm:$0xff] }
 0x2cb   :  { %7998 = vmatprep.subr.bf16.mxu1 %v7997_v2  ;;  %v644_v2 = vld [vmem:[#allocation5 + $0x10b8] sm:$0xff]  ;;  %v7815_v20 = vpack.c.bf16 %v607_v60, %v589_v57  ;;  %v663_v60 = vld [vmem:[#allocation5 + $0x1150] sm:$0xff] }
 0x2cc   :  { %v7817_v27 = vpack.c.bf16 %v644_v2, %v626_v8  ;;  %v698_v8 = vld [vmem:[#allocation5 + $0x1268] sm:$0xff]  ;;  %v700_v2 = vld [vmem:[#allocation5 + $0x1278] sm:$0xff] }
 0x2cd   :  { %7808 = vmatpush1.bf16.msra.mxu0 %v7807_v63  ;;  %v8007_v63 = vpack.c.bf16 %v609_v5, %v591_v62  ;;  %v8013_v62 = vpack.c.bf16 %v682_v51, %v664_v44  ;;  %v681_v5 = vld [vmem:[#allocation5 + $0x11e0] sm:$0xff]  ;;  %v754_v44 = vld [vmem:[#allocation5 + $0x1428] sm:$0xff] }
 0x2ce   :  { %8000 = vmatpush1.bf16.msra.mxu1 %v7999_v25  ;;  %7810 = vmatprep.subr.bf16.mxu0 %v7809_v36  ;;  %v625_v25 = vld [vmem:[#allocation5 + $0x1020] sm:$0xff]  ;;  %v643_v36 = vld [vmem:[#allocation5 + $0x10b0] sm:$0xff] }
 0x2cf   :  { %8002 = vmatprep.subr.bf16.mxu1 %v8001_v41  ;;  %v680_v41 = vld [vmem:[#allocation5 + $0x11d8] sm:$0xff]  ;;  %v7819_v53 = vpack.c.bf16 %v643_v36, %v625_v25  ;;  %v699_v36 = vld [vmem:[#allocation5 + $0x1270] sm:$0xff] }
 0x2d0   :  { %v7821_v57 = vpack.c.bf16 %v680_v41, %v662_v47  ;;  %v734_v47 = vld [vmem:[#allocation5 + $0x1388] sm:$0xff]  ;;  %v736_v41 = vld [vmem:[#allocation5 + $0x1398] sm:$0xff] }
 0x2d1   :  { %7812 = vmatpush1.bf16.msra.mxu0 %v7811_v59  ;;  %v8011_v59 = vpack.c.bf16 %v645_v46, %v627_v35  ;;  %v8017_v35 = vpack.c.bf16 %v718_v12, %v700_v2  ;;  %v717_v46 = vld [vmem:[#allocation5 + $0x1300] sm:$0xff]  ;;  %v772_v2 = vld [vmem:[#allocation5 + $0x14b8] sm:$0xff]  ;;  %v790_v12 = vld [vmem:[#allocation5 + $0x1548] sm:$0xff] }
 0x2d2   :  { %8004 = vmatpush1.bf16.msra.mxu1 %v8003_v56  ;;  %7814 = vmatprep.subr.bf16.mxu0 %v7813_v61  ;;  %v661_v56 = vld [vmem:[#allocation5 + $0x1140] sm:$0xff]  ;;  %v679_v61 = vld [vmem:[#allocation5 + $0x11d0] sm:$0xff] }
 0x2d3   :  { %8006 = vmatprep.subr.bf16.mxu1 %v8005_v4  ;;  %v716_v4 = vld [vmem:[#allocation5 + $0x12f8] sm:$0xff]  ;;  %v7823_v13 = vpack.c.bf16 %v679_v61, %v661_v56  ;;  %v735_v61 = vld [vmem:[#allocation5 + $0x1390] sm:$0xff] }
 0x2d4   :  { %v7825_v25 = vpack.c.bf16 %v716_v4, %v698_v8  ;;  %v770_v8 = vld [vmem:[#allocation5 + $0x14a8] sm:$0xff]  ;;  %v8915_v4 = vld [vmem:[#allocation2] sm:$0xff] }
 0x2d5   :  { %7816 = vmatpush1.bf16.msra.mxu0 %v7815_v20  ;;  %v8015_v20 = vpack.c.bf16 %v681_v5, %v663_v60  ;;  %v8021_v60 = vpack.c.bf16 %v754_v44, %v736_v41  ;;  %v753_v5 = vld [vmem:[#allocation5 + $0x1420] sm:$0xff]  ;;  %v8916_v41 = vld [vmem:[#allocation2 + $0x38] sm:$0xff] }
 0x2d6   :  { %8008 = vmatpush1.bf16.msra.mxu1 %v8007_v63  ;;  %7818 = vmatprep.subr.bf16.mxu0 %v7817_v27  ;;  %v697_v63 = vld [vmem:[#allocation5 + $0x1260] sm:$0xff]  ;;  %v715_v27 = vld [vmem:[#allocation5 + $0x12f0] sm:$0xff]  ;;  %v808_v44 = vld [vmem:[#allocation5 + $0x15d8] sm:$0xff] }
 0x2d7   :  { %8010 = vmatprep.subr.bf16.mxu1 %v8009_v37  ;;  %v752_v37 = vld [vmem:[#allocation5 + $0x1418] sm:$0xff]  ;;  %v7827_v51 = vpack.c.bf16 %v715_v27, %v697_v63  ;;  %v769_v63 = vld [vmem:[#allocation5 + $0x14a0] sm:$0xff]  ;;  %v787_v27 = vld [vmem:[#allocation5 + $0x1530] sm:$0xff] }
 0x2d8   :  { %v7829_v56 = vpack.c.bf16 %v752_v37, %v734_v47  ;;  %v806_v47 = vld [vmem:[#allocation5 + $0x15c8] sm:$0xff]  ;;  %v824_v37 = vld [vmem:[#allocation5 + $0x1658] sm:$0xff] }
 0x2d9   :  { %7820 = vmatpush1.bf16.msra.mxu0 %v7819_v53  ;;  %v8019_v53 = vpack.c.bf16 %v717_v46, %v699_v36  ;;  %v771_v36 = vld [vmem:[#allocation5 + $0x14b0] sm:$0xff]  ;;  %v789_v46 = vld [vmem:[#allocation5 + $0x1540] sm:$0xff] }
 0x2da   :  { %8012 = vmatpush1.bf16.msra.mxu1 %v8011_v59  ;;  %7822 = vmatprep.subr.bf16.mxu0 %v7821_v57  ;;  %v733_v59 = vld [vmem:[#allocation5 + $0x1380] sm:$0xff]  ;;  %v751_v57 = vld [vmem:[#allocation5 + $0x1410] sm:$0xff] }
 0x2db   :  { %8014 = vmatprep.subr.bf16.mxu1 %v8013_v62  ;;  %v788_v62 = vld [vmem:[#allocation5 + $0x1538] sm:$0xff] }
 0x2dd   :  { %7824 = vmatpush1.bf16.msra.mxu0 %v7823_v13  ;;  %v7831_v13 = vpack.c.bf16 %v751_v57, %v733_v59  ;;  %v7837_v59 = vpack.c.bf16 %v824_v37, %v806_v47  ;;  %v805_v57 = vld [vmem:[#allocation5 + $0x15c0] sm:$0xff]  ;;  %v878_v47 = vld [vmem:[#allocation5 + $0x1808] sm:$0xff]  ;;  %v896_v37 = vld [vmem:[#allocation5 + $0x1898] sm:$0xff] }
 0x2de   :  { %8016 = vmatpush1.bf16.msra.mxu1 %v8015_v20  ;;  %7826 = vmatprep.subr.bf16.mxu0 %v7825_v25  ;;  %v8023_v20 = vpack.c.bf16 %v753_v5, %v735_v61  ;;  %v7833_v25 = vpack.c.bf16 %v788_v62, %v770_v8  ;;  %v823_v61 = vld [vmem:[#allocation5 + $0x1650] sm:$0xff]  ;;  %v8029_v5 = vpack.c.bf16 %v826_v31, %v808_v44  ;;  %v825_v8 = vld [vmem:[#allocation5 + $0x1660] sm:$0xff]  ;;  %v842_v62 = vld [vmem:[#allocation5 + $0x16e8] sm:$0xff] }
 0x2df   :  { %8018 = vmatprep.subr.bf16.mxu1 %v8017_v35  ;;  %v8025_v35 = vpack.c.bf16 %v790_v12, %v772_v2  ;;  %v8918_v2 = vld [vmem:[#allocation2 + $0x68] sm:$0xff]  ;;  %v844_v12 = vld [vmem:[#allocation5 + $0x16f8] sm:$0xff]  ;;  %v843_v31 = vld [vmem:[#allocation5 + $0x16f0] sm:$0xff] }
 0x2e0   :  { %3600 = vmatmul.mubr.f32.vlgmr.msra.gmra.mrb[24].mxu0 %v8915_v4  ;;  %v8920_v44 = vld [vmem:[#allocation2 + $0x98] sm:$0xff] }
 0x2e1   :  { %7828 = vmatpush1.bf16.msra.mxu0 %v7827_v51  ;;  %3867 = vmatmul.mubr.f32.vlgmr.msra.gmra.mrb[24].mxu1 %v8915_v4  ;;  %v8917_v51 = vld [vmem:[#allocation2 + $0x30] sm:$0xff]  ;;  %v860_v4 = vld [vmem:[#allocation5 + $0x1778] sm:$0xff] }
 0x2e2   :  { %8020 = vmatpush1.bf16.msra.mxu1 %v8019_v53  ;;  %7830 = vmatprep.subr.bf16.mxu0 %v7829_v56  ;;  %v7835_v53 = vpack.c.bf16 %v787_v27, %v769_v63  ;;  %v8027_v56 = vpack.c.bf16 %v789_v46, %v771_v36  ;;  %v7841_v63 = vpack.c.bf16 %v860_v4, %v842_v62  ;;  %v841_v27 = vld [vmem:[#allocation5 + $0x16e0] sm:$0xff]  ;;  %v859_v36 = vld [vmem:[#allocation5 + $0x1770] sm:$0xff]  ;;  %v914_v4 = vld [vmem:[#allocation5 + $0x1928] sm:$0xff] }
 0x2e3   :  { %8022 = vmatprep.subr.bf16.mxu1 %v8021_v60  ;;  %3605 = vmatprep.mubr.f32.mxu0 %v8916_v41  ;;  %v807_v60 = vld [vmem:[#allocation5 + $0x15d0] sm:$0xff]  ;;  %v861_v46 = vld [vmem:[#allocation5 + $0x1780] sm:$0xff] }
 0x2e4   :  { %3872 = vmatprep.mubr.f32.mxu1 %v8916_v41  ;;  %3606 = vmatmul.mubr.f32.gmra.mrb[26].mxu0 %v8917_v51  ;;  %v862_v41 = vld [vmem:[#allocation5 + $0x1788] sm:$0xff]  ;;  %v897_v62 = vld [vmem:[#allocation5 + $0x18a0] sm:$0xff] }
 0x2e5   :  { %7832 = vmatpush1.bf16.msra.mxu0 %v7831_v13  ;;  %3873 = vmatmul.mubr.f32.gmra.mrb[26].mxu1 %v8917_v51  ;;  %v8919_v13 = vld [vmem:[#allocation2 + $0x60] sm:$0xff]  ;;  %v880_v51 = vld [vmem:[#allocation5 + $0x1818] sm:$0xff] }
 0x2e6   :  { %8024 = vmatpush1.bf16.msra.mxu1 %v8023_v20  ;;  %7834 = vmatprep.subr.bf16.mxu0 %v7833_v25  ;;  %v7839_v20 = vpack.c.bf16 %v823_v61, %v805_v57  ;;  %v8031_v25 = vpack.c.bf16 %v825_v8, %v807_v60  ;;  %v7845_v57 = vpack.c.bf16 %v896_v37, %v878_v47  ;;  %v877_v61 = vld [vmem:[#allocation5 + $0x1800] sm:$0xff]  ;;  %v895_v60 = vld [vmem:[#allocation5 + $0x1890] sm:$0xff]  ;;  %v950_v47 = vld [vmem:[#allocation5 + $0x1a48] sm:$0xff] }
 0x2e7   :  { %8026 = vmatprep.subr.bf16.mxu1 %v8025_v35  ;;  %3611 = vmatprep.mubr.f32.mxu0 %v8918_v2  ;;  %v8033_v35 = vpack.c.bf16 %v862_v41, %v844_v12  ;;  %v932_v12 = vld [vmem:[#allocation5 + $0x19b8] sm:$0xff] }
 0x2e8   :  { %3878 = vmatprep.mubr.f32.mxu1 %v8918_v2  ;;  %3612 = vmatmul.mubr.f32.gmra.mrb[28].mxu0 %v8919_v13  ;;  %v898_v2 = vld [vmem:[#allocation5 + $0x18a8] sm:$0xff]  ;;  %v8922_v41 = vld [vmem:[#allocation2 + $0x18] sm:$0xff] }
 0x2e9   :  { %7836 = vmatpush1.bf16.msra.mxu0 %v7835_v53  ;;  %3879 = vmatmul.mubr.f32.gmra.mrb[28].mxu1 %v8919_v13  ;;  %v8921_v53 = vld [vmem:[#allocation2 + $0x90] sm:$0xff]  ;;  %v8037_v8 = vpack.c.bf16 %v898_v2, %v880_v51  ;;  %v916_v13 = vld [vmem:[#allocation5 + $0x1938] sm:$0xff]  ;;  %v970_v2 = vld [vmem:[#allocation5 + $0x1ae8] sm:$0xff] }
 0x2ea   :  { %8028 = vmatpush1.bf16.msra.mxu1 %v8027_v56  ;;  %7838 = vmatprep.subr.bf16.mxu0 %v7837_v59  ;;  %v7843_v56 = vpack.c.bf16 %v859_v36, %v841_v27  ;;  %v8035_v59 = vpack.c.bf16 %v861_v46, %v843_v31  ;;  %v913_v27 = vld [vmem:[#allocation5 + $0x1920] sm:$0xff]  ;;  %v931_v36 = vld [vmem:[#allocation5 + $0x19b0] sm:$0xff]  ;;  %v968_v37 = vld [vmem:[#allocation5 + $0x1ad8] sm:$0xff] }
 0x2eb   :  { %8030 = vmatprep.subr.bf16.mxu1 %v8029_v5  ;;  %3617 = vmatprep.mubr.f32.mxu0 %v8920_v44  ;;  %v879_v5 = vld [vmem:[#allocation5 + $0x1810] sm:$0xff]  ;;  %v933_v46 = vld [vmem:[#allocation5 + $0x19c0] sm:$0xff]  ;;  %v952_v51 = vld [vmem:[#allocation5 + $0x1a58] sm:$0xff] }
 0x2ec   :  { %3884 = vmatprep.mubr.f32.mxu1 %v8920_v44  ;;  %3618 = vmatmul.mubr.f32.gmra.mrb[30].mxu0 %v8921_v53  ;;  %v934_v44 = vld [vmem:[#allocation5 + $0x19c8] sm:$0xff]  ;;  %v915_v31 = vld [vmem:[#allocation5 + $0x1930] sm:$0xff] }
 0x2ed   :  { %7840 = vmatpush1.bf16.msra.mxu0 %v7839_v20  ;;  %3885 = vmatmul.mubr.f32.gmra.mrb[30].mxu1 %v8921_v53  ;;  %v7847_v20 = vpack.c.bf16 %v895_v60, %v877_v61  ;;  %v7851_v53 = vpack.c.bf16 %v931_v36, %v913_v27  ;;  %v7853_v61 = vpack.c.bf16 %v968_v37, %v950_v47  ;;  %v951_v60 = vld [vmem:[#allocation5 + $0x1a50] sm:$0xff]  ;;  %v1024_v47 = vld [vmem:[#allocation5 + $0x1c98] sm:$0xff]  ;;  %v1042_v37 = vld [vmem:[#allocation5 + $0x1d28] sm:$0xff] }
 0x2ee   :  { %8032 = vmatpush1.bf16.msra.mxu1 %v8031_v25  ;;  %7842 = vmatprep.subr.bf16.mxu0 %v7841_v63  ;;  %v8039_v25 = vpack.c.bf16 %v897_v62, %v879_v5  ;;  %v7849_v63 = vpack.c.bf16 %v932_v12, %v914_v4  ;;  %v8045_v5 = vpack.c.bf16 %v970_v2, %v952_v51  ;;  %v969_v62 = vld [vmem:[#allocation5 + $0x1ae0] sm:$0xff]  ;;  %v986_v4 = vld [vmem:[#allocation5 + $0x1b68] sm:$0xff]  ;;  %v988_v12 = vld [vmem:[#allocation5 + $0x1b78] sm:$0xff] }
 0x2ef   :  { %8034 = vmatprep.subr.bf16.mxu1 %v8033_v35  ;;  %3688 = vmatprep.mubr.f32.mxu0 %v8922_v41  ;;  %v8041_v35 = vpack.c.bf16 %v934_v44, %v916_v13  ;;  %v8047_v44 = vpack.c.bf16 %v969_v62, %v951_v60  ;;  %v987_v27 = vld [vmem:[#allocation5 + $0x1b70] sm:$0xff]  ;;  %v1041_v60 = vld [vmem:[#allocation5 + $0x1d20] sm:$0xff]  ;;  %v1058_v62 = vld [vmem:[#allocation5 + $0x1da8] sm:$0xff] }
 0x2f0   :  { %3955 = vmatprep.mubr.f32.mxu1 %v8922_v41  ;;  %v1006_v41 = vld [vmem:[#allocation5 + $0x1c08] sm:$0xff] }
 0x2f1   :  { %7844 = vmatpush1.bf16.msra.mxu0 %v7843_v56  ;;  %v8043_v56 = vpack.c.bf16 %v933_v46, %v915_v31  ;;  %v8049_v36 = vpack.c.bf16 %v1006_v41, %v988_v12  ;;  %v1005_v31 = vld [vmem:[#allocation5 + $0x1c00] sm:$0xff]  ;;  %v1022_v46 = vld [vmem:[#allocation5 + $0x1c88] sm:$0xff] }
 0x2f2   :  { %8036 = vmatpush1.bf16.msra.mxu1 %v8035_v59  ;;  %7846 = vmatprep.subr.bf16.mxu0 %v7845_v57  ;;  %v949_v59 = vld [vmem:[#allocation5 + $0x1a40] sm:$0xff]  ;;  %v967_v57 = vld [vmem:[#allocation5 + $0x1ad0] sm:$0xff]  ;;  %v8051_v2 = vpack.c.bf16 %v1005_v31, %v987_v27  ;;  %v1094_v31 = vld [vmem:[#allocation5 + $0x1ec8] sm:$0xff] }
 0x2f3   :  { %8038 = vmatprep.subr.bf16.mxu1 %v8037_v8  ;;  %v1004_v8 = vld [vmem:[#allocation5 + $0x1bf8] sm:$0xff]  ;;  %v7855_v13 = vpack.c.bf16 %v967_v57, %v949_v59  ;;  %v1023_v59 = vld [vmem:[#allocation5 + $0x1c90] sm:$0xff]  ;;  %v8053_v57 = vpack.c.bf16 %v1042_v37, %v1024_v47  ;;  %v1077_v27 = vld [vmem:[#allocation5 + $0x1e40] sm:$0xff] }
 0x2f4   :  { %v8055_v41 = vpack.c.bf16 %v1041_v60, %v1023_v59  ;;  %v1113_v59 = vld [vmem:[#allocation5 + $0x1f60] sm:$0xff]  ;;  %v1130_v60 = vld [vmem:[#allocation5 + $0x1fe8] sm:$0xff] }
 0x2f5   :  { %7848 = vmatpush1.bf16.msra.mxu0 %v7847_v20  ;;  %v7857_v20 = vpack.c.bf16 %v1004_v8, %v986_v4  ;;  %v1060_v4 = vld [vmem:[#allocation5 + $0x1db8] sm:$0xff]  ;;  %v1078_v8 = vld [vmem:[#allocation5 + $0x1e48] sm:$0xff] }
 0x2f6   :  { %8040 = vmatpush1.bf16.msra.mxu1 %v8039_v25  ;;  %7850 = vmatprep.subr.bf16.mxu0 %v7849_v63  ;;  %v985_v25 = vld [vmem:[#allocation5 + $0x1b60] sm:$0xff]  ;;  %v1003_v63 = vld [vmem:[#allocation5 + $0x1bf0] sm:$0xff] }
 0x2f7   :  { %8042 = vmatprep.subr.bf16.mxu1 %v8041_v35  ;;  %v1040_v35 = vld [vmem:[#allocation5 + $0x1d18] sm:$0xff]  ;;  %v7859_v51 = vpack.c.bf16 %v1003_v63, %v985_v25  ;;  %v1059_v25 = vld [vmem:[#allocation5 + $0x1db0] sm:$0xff]  ;;  %v8057_v63 = vpack.c.bf16 %v1078_v8, %v1060_v4 }
 0x2f8   :  { %v8059_v37 = vpack.c.bf16 %v1077_v27, %v1059_v25  ;;  %v1149_v25 = vld [vmem:[#allocation5 + $0x2080] sm:$0xff]  ;;  %v1166_v27 = vld [vmem:[#allocation5 + $0x2108] sm:$0xff] }
 0x2f9   :  { %7852 = vmatpush1.bf16.msra.mxu0 %v7851_v53  ;;  %v7861_v53 = vpack.c.bf16 %v1040_v35, %v1022_v46  ;;  %v1096_v46 = vld [vmem:[#allocation5 + $0x1ed8] sm:$0xff]  ;;  %v1114_v35 = vld [vmem:[#allocation5 + $0x1f68] sm:$0xff] }
 0x2fa   :  { %8044 = vmatpush1.bf16.msra.mxu1 %v8043_v56  ;;  %7854 = vmatprep.subr.bf16.mxu0 %v7853_v61  ;;  %v1021_v56 = vld [vmem:[#allocation5 + $0x1c80] sm:$0xff]  ;;  %v1039_v61 = vld [vmem:[#allocation5 + $0x1d10] sm:$0xff] }
 0x2fb   :  { %8046 = vmatprep.subr.bf16.mxu1 %v8045_v5  ;;  %v1076_v5 = vld [vmem:[#allocation5 + $0x1e38] sm:$0xff]  ;;  %v7863_v12 = vpack.c.bf16 %v1039_v61, %v1021_v56  ;;  %v1095_v56 = vld [vmem:[#allocation5 + $0x1ed0] sm:$0xff]  ;;  %v8061_v61 = vpack.c.bf16 %v1114_v35, %v1096_v46 }
 0x2fc   :  { %v8063_v8 = vpack.c.bf16 %v1113_v59, %v1095_v56  ;;  %v1185_v56 = vld [vmem:[#allocation5 + $0x21a0] sm:$0xff]  ;;  %v1202_v59 = vld [vmem:[#allocation5 + $0x2228] sm:$0xff] }
 0x2fd   :  { %7856 = vmatpush1.bf16.msra.mxu0 %v7855_v13  ;;  %v7865_v13 = vpack.c.bf16 %v1076_v5, %v1058_v62  ;;  %v1132_v62 = vld [vmem:[#allocation5 + $0x1ff8] sm:$0xff]  ;;  %v1150_v5 = vld [vmem:[#allocation5 + $0x2088] sm:$0xff] }
 0x2fe   :  { %8048 = vmatpush1.bf16.msra.mxu1 %v8047_v44  ;;  %7858 = vmatprep.subr.bf16.mxu0 %v7857_v20  ;;  %v1057_v44 = vld [vmem:[#allocation5 + $0x1da0] sm:$0xff]  ;;  %v1075_v20 = vld [vmem:[#allocation5 + $0x1e30] sm:$0xff] }
 0x2ff   :  { %8050 = vmatprep.subr.bf16.mxu1 %v8049_v36  ;;  %v1112_v36 = vld [vmem:[#allocation5 + $0x1f58] sm:$0xff]  ;;  %v7867_v47 = vpack.c.bf16 %v1075_v20, %v1057_v44  ;;  %v1131_v44 = vld [vmem:[#allocation5 + $0x1ff0] sm:$0xff]  ;;  %v8065_v20 = vpack.c.bf16 %v1150_v5, %v1132_v62 }
 0x300   :  { %v8067_v35 = vpack.c.bf16 %v1149_v25, %v1131_v44  ;;  %v1221_v44 = vld [vmem:[#allocation5 + $0x22c0] sm:$0xff]  ;;  %v1238_v25 = vld [vmem:[#allocation5 + $0x2348] sm:$0xff] }
 0x301   :  { %7860 = vmatpush1.bf16.msra.mxu0 %v7859_v51  ;;  %v7869_v51 = vpack.c.bf16 %v1112_v36, %v1094_v31  ;;  %v1168_v31 = vld [vmem:[#allocation5 + $0x2118] sm:$0xff]  ;;  %v1186_v36 = vld [vmem:[#allocation5 + $0x21a8] sm:$0xff] }
 0x302   :  { %8052 = vmatpush1.bf16.msra.mxu1 %v8051_v2  ;;  %7862 = vmatprep.subr.bf16.mxu0 %v7861_v53  ;;  %v1093_v2 = vld [vmem:[#allocation5 + $0x1ec0] sm:$0xff]  ;;  %v1111_v53 = vld [vmem:[#allocation5 + $0x1f50] sm:$0xff] }
 0x303   :  { %8054 = vmatprep.subr.bf16.mxu1 %v8053_v57  ;;  %v1148_v57 = vld [vmem:[#allocation5 + $0x2078] sm:$0xff]  ;;  %v7871_v4 = vpack.c.bf16 %v1111_v53, %v1093_v2  ;;  %v1167_v2 = vld [vmem:[#allocation5 + $0x2110] sm:$0xff]  ;;  %v8069_v53 = vpack.c.bf16 %v1186_v36, %v1168_v31 }
 0x304   :  { %v8071_v5 = vpack.c.bf16 %v1185_v56, %v1167_v2  ;;  %v1257_v2 = vld [vmem:[#allocation5 + $0x23e0] sm:$0xff]  ;;  %v1274_v56 = vld [vmem:[#allocation5 + $0x2468] sm:$0xff] }
 0x305   :  { %7864 = vmatpush1.bf16.msra.mxu0 %v7863_v12  ;;  %v7873_v12 = vpack.c.bf16 %v1148_v57, %v1130_v60  ;;  %v1204_v60 = vld [vmem:[#allocation5 + $0x2238] sm:$0xff]  ;;  %v1222_v57 = vld [vmem:[#allocation5 + $0x22c8] sm:$0xff] }
 0x306   :  { %8056 = vmatpush1.bf16.msra.mxu1 %v8055_v41  ;;  %7866 = vmatprep.subr.bf16.mxu0 %v7865_v13  ;;  %v1129_v41 = vld [vmem:[#allocation5 + $0x1fe0] sm:$0xff]  ;;  %v1147_v13 = vld [vmem:[#allocation5 + $0x2070] sm:$0xff] }
 0x307   :  { %8058 = vmatprep.subr.bf16.mxu1 %v8057_v63  ;;  %v1184_v63 = vld [vmem:[#allocation5 + $0x2198] sm:$0xff]  ;;  %v7875_v46 = vpack.c.bf16 %v1147_v13, %v1129_v41  ;;  %v1203_v41 = vld [vmem:[#allocation5 + $0x2230] sm:$0xff]  ;;  %v8073_v13 = vpack.c.bf16 %v1222_v57, %v1204_v60 }
 0x308   :  { %v8075_v36 = vpack.c.bf16 %v1221_v44, %v1203_v41  ;;  %v1293_v41 = vld [vmem:[#allocation5 + $0x2500] sm:$0xff]  ;;  %v1310_v44 = vld [vmem:[#allocation5 + $0x2588] sm:$0xff] }
 0x309   :  { %7868 = vmatpush1.bf16.msra.mxu0 %v7867_v47  ;;  %v7877_v47 = vpack.c.bf16 %v1184_v63, %v1166_v27  ;;  %v1240_v27 = vld [vmem:[#allocation5 + $0x2358] sm:$0xff]  ;;  %v1258_v63 = vld [vmem:[#allocation5 + $0x23e8] sm:$0xff] }
 0x30a   :  { %8060 = vmatpush1.bf16.msra.mxu1 %v8059_v37  ;;  %7870 = vmatprep.subr.bf16.mxu0 %v7869_v51  ;;  %v1165_v37 = vld [vmem:[#allocation5 + $0x2100] sm:$0xff]  ;;  %v1183_v51 = vld [vmem:[#allocation5 + $0x2190] sm:$0xff] }
 0x30b   :  { %8062 = vmatprep.subr.bf16.mxu1 %v8061_v61  ;;  %v1220_v61 = vld [vmem:[#allocation5 + $0x22b8] sm:$0xff]  ;;  %v7879_v62 = vpack.c.bf16 %v1183_v51, %v1165_v37  ;;  %v1239_v37 = vld [vmem:[#allocation5 + $0x2350] sm:$0xff]  ;;  %v8077_v51 = vpack.c.bf16 %v1258_v63, %v1240_v27 }
 0x30c   :  { %v8079_v57 = vpack.c.bf16 %v1257_v2, %v1239_v37  ;;  %v1329_v37 = vld [vmem:[#allocation5 + $0x2620] sm:$0xff]  ;;  %v1346_v2 = vld [vmem:[#allocation5 + $0x26a8] sm:$0xff] }
 0x30d   :  { %7872 = vmatpush1.bf16.msra.mxu0 %v7871_v4  ;;  %v7881_v4 = vpack.c.bf16 %v1220_v61, %v1202_v59  ;;  %v1276_v59 = vld [vmem:[#allocation5 + $0x2478] sm:$0xff]  ;;  %v1294_v61 = vld [vmem:[#allocation5 + $0x2508] sm:$0xff] }
 0x30e   :  { %8064 = vmatpush1.bf16.msra.mxu1 %v8063_v8  ;;  %7874 = vmatprep.subr.bf16.mxu0 %v7873_v12  ;;  %v1201_v8 = vld [vmem:[#allocation5 + $0x2220] sm:$0xff]  ;;  %v1219_v12 = vld [vmem:[#allocation5 + $0x22b0] sm:$0xff] }
 0x30f   :  { %8066 = vmatprep.subr.bf16.mxu1 %v8065_v20  ;;  %v1256_v20 = vld [vmem:[#allocation5 + $0x23d8] sm:$0xff]  ;;  %v7883_v31 = vpack.c.bf16 %v1219_v12, %v1201_v8  ;;  %v1275_v8 = vld [vmem:[#allocation5 + $0x2470] sm:$0xff]  ;;  %v8081_v12 = vpack.c.bf16 %v1294_v61, %v1276_v59  ;;  %v1366_v59 = vld [vmem:[#allocation5 + $0x2748] sm:$0xff] }
 0x310   :  { %v8083_v63 = vpack.c.bf16 %v1293_v41, %v1275_v8  ;;  %v1382_v41 = vld [vmem:[#allocation5 + $0x27c8] sm:$0xff] }
 0x311   :  { %7876 = vmatpush1.bf16.msra.mxu0 %v7875_v46  ;;  %v7885_v46 = vpack.c.bf16 %v1256_v20, %v1238_v25  ;;  %v1312_v25 = vld [vmem:[#allocation5 + $0x2598] sm:$0xff]  ;;  %v1330_v20 = vld [vmem:[#allocation5 + $0x2628] sm:$0xff] }
 0x312   :  { %8068 = vmatpush1.bf16.msra.mxu1 %v8067_v35  ;;  %7878 = vmatprep.subr.bf16.mxu0 %v7877_v47  ;;  %v1237_v35 = vld [vmem:[#allocation5 + $0x2340] sm:$0xff]  ;;  %v1255_v47 = vld [vmem:[#allocation5 + $0x23d0] sm:$0xff] }
 0x313   :  { %8070 = vmatprep.subr.bf16.mxu1 %v8069_v53  ;;  %v1292_v53 = vld [vmem:[#allocation5 + $0x24f8] sm:$0xff]  ;;  %v7887_v60 = vpack.c.bf16 %v1255_v47, %v1237_v35  ;;  %v1311_v35 = vld [vmem:[#allocation5 + $0x2590] sm:$0xff]  ;;  %v8085_v47 = vpack.c.bf16 %v1330_v20, %v1312_v25  ;;  %v1402_v20 = vld [vmem:[#allocation5 + $0x2868] sm:$0xff] }
 0x314   :  { %v1384_v25 = vld [vmem:[#allocation5 + $0x27d8] sm:$0xff] }
 0x315   :  { %7880 = vmatpush1.bf16.msra.mxu0 %v7879_v62  ;;  %v7889_v62 = vpack.c.bf16 %v1292_v53, %v1274_v56  ;;  %v8923_v56 = vld [vmem:[#allocation2 + $0x10] sm:$0xff]  ;;  %v1348_v53 = vld [vmem:[#allocation5 + $0x26b8] sm:$0xff] }
 0x316   :  { %8072 = vmatpush1.bf16.msra.mxu1 %v8071_v5  ;;  %7882 = vmatprep.subr.bf16.mxu0 %v7881_v4  ;;  %v1273_v5 = vld [vmem:[#allocation5 + $0x2460] sm:$0xff]  ;;  %v1291_v4 = vld [vmem:[#allocation5 + $0x24f0] sm:$0xff]  ;;  %v8089_v8 = vpack.c.bf16 %v1366_v59, %v1348_v53  ;;  %v8926_v53 = vld [vmem:[#allocation2 + $0x78] sm:$0xff] }
 0x317   :  { %8074 = vmatprep.subr.bf16.mxu1 %v8073_v13  ;;  %v1328_v13 = vld [vmem:[#allocation5 + $0x2618] sm:$0xff]  ;;  %v7891_v27 = vpack.c.bf16 %v1291_v4, %v1273_v5  ;;  %v1363_v5 = vld [vmem:[#allocation5 + $0x2730] sm:$0xff] }
 0x318   :  { %v1347_v4 = vld [vmem:[#allocation5 + $0x26b0] sm:$0xff]  ;;  %v1420_v59 = vld [vmem:[#allocation5 + $0x28f8] sm:$0xff] }
 0x319   :  { %7884 = vmatpush1.bf16.msra.mxu0 %v7883_v31  ;;  %v7893_v31 = vpack.c.bf16 %v1328_v13, %v1310_v44  ;;  %v1400_v44 = vld [vmem:[#allocation5 + $0x2858] sm:$0xff]  ;;  %v8924_v13 = vld [vmem:[#allocation2 + $0x48] sm:$0xff] }
 0x31a   :  { %8076 = vmatpush1.bf16.msra.mxu1 %v8075_v36  ;;  %7886 = vmatprep.subr.bf16.mxu0 %v7885_v46  ;;  %v1309_v36 = vld [vmem:[#allocation5 + $0x2580] sm:$0xff]  ;;  %v1327_v46 = vld [vmem:[#allocation5 + $0x2610] sm:$0xff] }
 0x31b   :  { %8078 = vmatprep.subr.bf16.mxu1 %v8077_v51  ;;  %v1364_v51 = vld [vmem:[#allocation5 + $0x2738] sm:$0xff]  ;;  %v7895_v61 = vpack.c.bf16 %v1327_v46, %v1309_v36  ;;  %v7901_v36 = vpack.c.bf16 %v1400_v44, %v1382_v41  ;;  %v1381_v46 = vld [vmem:[#allocation5 + $0x27c0] sm:$0xff]  ;;  %v1454_v44 = vld [vmem:[#allocation5 + $0x2a08] sm:$0xff] }
 0x31c   :  { %v1437_v41 = vld [vmem:[#allocation5 + $0x2980] sm:$0xff] }
 0x31d   :  { %7888 = vmatpush1.bf16.msra.mxu0 %v7887_v60  ;;  %v8087_v60 = vpack.c.bf16 %v1329_v37, %v1311_v35  ;;  %v1399_v35 = vld [vmem:[#allocation5 + $0x2850] sm:$0xff]  ;;  %v8093_v37 = vpack.c.bf16 %v1402_v20, %v1384_v25  ;;  %v1472_v25 = vld [vmem:[#allocation5 + $0x2a98] sm:$0xff]  ;;  %v8928_v20 = vld [vmem:[#allocation2 + $0xa8] sm:$0xff] }
 0x31e   :  { %8080 = vmatpush1.bf16.msra.mxu1 %v8079_v57  ;;  %7890 = vmatprep.subr.bf16.mxu0 %v7889_v62  ;;  %v7897_v57 = vpack.c.bf16 %v1364_v51, %v1346_v2  ;;  %v1345_v62 = vld [vmem:[#allocation5 + $0x26a0] sm:$0xff]  ;;  %v1418_v51 = vld [vmem:[#allocation5 + $0x28e8] sm:$0xff] }
 0x31f   :  { %8082 = vmatprep.subr.bf16.mxu1 %v8081_v12  ;;  %v1365_v12 = vld [vmem:[#allocation5 + $0x2740] sm:$0xff] }
 0x320   :  { %3689 = vmatmul.mubr.f32.vlgmr.msra.gmra.mrb[24].mxu0 %v8923_v56  ;;  %v1401_v2 = vld [vmem:[#allocation5 + $0x2860] sm:$0xff] }
 0x321   :  { %7892 = vmatpush1.bf16.msra.mxu0 %v7891_v27  ;;  %3956 = vmatmul.mubr.f32.vlgmr.msra.gmra.mrb[24].mxu1 %v8923_v56  ;;  %v8925_v27 = vld [vmem:[#allocation2 + $0x40] sm:$0xff]  ;;  %v1436_v56 = vld [vmem:[#allocation5 + $0x2978] sm:$0xff] }
 0x322   :  { %8084 = vmatpush1.bf16.msra.mxu1 %v8083_v63  ;;  %7894 = vmatprep.subr.bf16.mxu0 %v7893_v31  ;;  %v7899_v63 = vpack.c.bf16 %v1363_v5, %v1345_v62  ;;  %v8091_v31 = vpack.c.bf16 %v1365_v12, %v1347_v4  ;;  %v7905_v62 = vpack.c.bf16 %v1436_v56, %v1418_v51  ;;  %v1417_v5 = vld [vmem:[#allocation5 + $0x28e0] sm:$0xff]  ;;  %v1435_v4 = vld [vmem:[#allocation5 + $0x2970] sm:$0xff]  ;;  %v1490_v56 = vld [vmem:[#allocation5 + $0x2b28] sm:$0xff] }
 0x323   :  { %8086 = vmatprep.subr.bf16.mxu1 %v8085_v47  ;;  %3694 = vmatprep.mubr.f32.mxu0 %v8924_v13  ;;  %v1383_v47 = vld [vmem:[#allocation5 + $0x27d0] sm:$0xff]  ;;  %v1473_v51 = vld [vmem:[#allocation5 + $0x2aa0] sm:$0xff] }
 0x324   :  { %3961 = vmatprep.mubr.f32.mxu1 %v8924_v13  ;;  %3695 = vmatmul.mubr.f32.gmra.mrb[26].mxu0 %v8925_v27  ;;  %v1438_v13 = vld [vmem:[#allocation5 + $0x2988] sm:$0xff] }
 0x325   :  { %7896 = vmatpush1.bf16.msra.mxu0 %v7895_v61  ;;  %3962 = vmatmul.mubr.f32.gmra.mrb[26].mxu1 %v8925_v27  ;;  %v8927_v61 = vld [vmem:[#allocation2 + $0x70] sm:$0xff]  ;;  %v8097_v12 = vpack.c.bf16 %v1438_v13, %v1420_v59  ;;  %v1456_v27 = vld [vmem:[#allocation5 + $0x2a18] sm:$0xff]  ;;  %v8930_v13 = vld [vmem:[#allocation2 + $0x28] sm:$0xff] }
 0x326   :  { %8088 = vmatpush1.bf16.msra.mxu1 %v8087_v60  ;;  %7898 = vmatprep.subr.bf16.mxu0 %v7897_v57  ;;  %v7903_v60 = vpack.c.bf16 %v1399_v35, %v1381_v46  ;;  %v8095_v57 = vpack.c.bf16 %v1401_v2, %v1383_v47  ;;  %v7909_v46 = vpack.c.bf16 %v1472_v25, %v1454_v44  ;;  %v1453_v35 = vld [vmem:[#allocation5 + $0x2a00] sm:$0xff]  ;;  %v1471_v47 = vld [vmem:[#allocation5 + $0x2a90] sm:$0xff]  ;;  %v1508_v59 = vld [vmem:[#allocation5 + $0x2bb8] sm:$0xff] }
 0x327   :  { %8090 = vmatprep.subr.bf16.mxu1 %v8089_v8  ;;  %3700 = vmatprep.mubr.f32.mxu0 %v8926_v53  ;;  %v1419_v8 = vld [vmem:[#allocation5 + $0x28f0] sm:$0xff]  ;;  %v1526_v44 = vld [vmem:[#allocation5 + $0x2c48] sm:$0xff]  ;;  %v1544_v25 = vld [vmem:[#allocation5 + $0x2cd8] sm:$0xff] }
 0x328   :  { %3967 = vmatprep.mubr.f32.mxu1 %v8926_v53  ;;  %3701 = vmatmul.mubr.f32.gmra.mrb[28].mxu0 %v8927_v61  ;;  %v1474_v53 = vld [vmem:[#allocation5 + $0x2aa8] sm:$0xff] }
 0x329   :  { %7900 = vmatpush1.bf16.msra.mxu0 %v7899_v63  ;;  %3968 = vmatmul.mubr.f32.gmra.mrb[28].mxu1 %v8927_v61  ;;  %v8929_v63 = vld [vmem:[#allocation2 + $0xa0] sm:$0xff]  ;;  %v8101_v2 = vpack.c.bf16 %v1474_v53, %v1456_v27  ;;  %v1492_v61 = vld [vmem:[#allocation5 + $0x2b38] sm:$0xff]  ;;  %v1546_v53 = vld [vmem:[#allocation5 + $0x2ce8] sm:$0xff] }
 0x32a   :  { %8092 = vmatpush1.bf16.msra.mxu1 %v8091_v31  ;;  %7902 = vmatprep.subr.bf16.mxu0 %v7901_v36  ;;  %v7907_v31 = vpack.c.bf16 %v1435_v4, %v1417_v5  ;;  %v8099_v36 = vpack.c.bf16 %v1437_v41, %v1419_v8  ;;  %v1489_v5 = vld [vmem:[#allocation5 + $0x2b20] sm:$0xff]  ;;  %v1507_v4 = vld [vmem:[#allocation5 + $0x2bb0] sm:$0xff]  ;;  %v1528_v27 = vld [vmem:[#allocation5 + $0x2c58] sm:$0xff] }
 0x32b   :  { %8094 = vmatprep.subr.bf16.mxu1 %v8093_v37  ;;  %3706 = vmatprep.mubr.f32.mxu0 %v8928_v20  ;;  %v1455_v37 = vld [vmem:[#allocation5 + $0x2a10] sm:$0xff]  ;;  %v1509_v41 = vld [vmem:[#allocation5 + $0x2bc0] sm:$0xff] }
 0x32c   :  { %3973 = vmatprep.mubr.f32.mxu1 %v8928_v20  ;;  %3707 = vmatmul.mubr.f32.gmra.mrb[30].mxu0 %v8929_v63  ;;  %v1510_v20 = vld [vmem:[#allocation5 + $0x2bc8] sm:$0xff]  ;;  %v1491_v8 = vld [vmem:[#allocation5 + $0x2b30] sm:$0xff] }
 0x32d   :  { %7904 = vmatpush1.bf16.msra.mxu0 %v7903_v60  ;;  %3974 = vmatmul.mubr.f32.gmra.mrb[30].mxu1 %v8929_v63  ;;  %v7911_v60 = vpack.c.bf16 %v1471_v47, %v1453_v35  ;;  %v7915_v63 = vpack.c.bf16 %v1507_v4, %v1489_v5  ;;  %v7917_v35 = vpack.c.bf16 %v1544_v25, %v1526_v44  ;;  %v1527_v47 = vld [vmem:[#allocation5 + $0x2c50] sm:$0xff]  ;;  %v1600_v44 = vld [vmem:[#allocation5 + $0x2e98] sm:$0xff]  ;;  %v1618_v25 = vld [vmem:[#allocation5 + $0x2f28] sm:$0xff] }
 0x32e   :  { %8096 = vmatpush1.bf16.msra.mxu1 %v8095_v57  ;;  %7906 = vmatprep.subr.bf16.mxu0 %v7905_v62  ;;  %v8103_v57 = vpack.c.bf16 %v1473_v51, %v1455_v37  ;;  %v7913_v62 = vpack.c.bf16 %v1508_v59, %v1490_v56  ;;  %v8109_v37 = vpack.c.bf16 %v1546_v53, %v1528_v27  ;;  %v1545_v51 = vld [vmem:[#allocation5 + $0x2ce0] sm:$0xff]  ;;  %v1562_v56 = vld [vmem:[#allocation5 + $0x2d68] sm:$0xff]  ;;  %v1564_v59 = vld [vmem:[#allocation5 + $0x2d78] sm:$0xff] }
 0x32f   :  { %8098 = vmatprep.subr.bf16.mxu1 %v8097_v12  ;;  %3777 = vmatprep.mubr.f32.mxu0 %v8930_v13  ;;  %v8105_v12 = vpack.c.bf16 %v1510_v20, %v1492_v61  ;;  %v8111_v20 = vpack.c.bf16 %v1545_v51, %v1527_v47  ;;  %v1563_v5 = vld [vmem:[#allocation5 + $0x2d70] sm:$0xff]  ;;  %v1617_v47 = vld [vmem:[#allocation5 + $0x2f20] sm:$0xff]  ;;  %v1634_v51 = vld [vmem:[#allocation5 + $0x2fa8] sm:$0xff] }
 0x330   :  { %4044 = vmatprep.mubr.f32.mxu1 %v8930_v13  ;;  %v1582_v13 = vld [vmem:[#allocation5 + $0x2e08] sm:$0xff] }
 0x331   :  { %7908 = vmatpush1.bf16.msra.mxu0 %v7907_v31  ;;  %v8107_v31 = vpack.c.bf16 %v1509_v41, %v1491_v8  ;;  %v8113_v4 = vpack.c.bf16 %v1582_v13, %v1564_v59  ;;  %v1581_v8 = vld [vmem:[#allocation5 + $0x2e00] sm:$0xff]  ;;  %v1598_v41 = vld [vmem:[#allocation5 + $0x2e88] sm:$0xff] }
 0x332   :  { %8100 = vmatpush1.bf16.msra.mxu1 %v8099_v36  ;;  %7910 = vmatprep.subr.bf16.mxu0 %v7909_v46  ;;  %v1525_v36 = vld [vmem:[#allocation5 + $0x2c40] sm:$0xff]  ;;  %v1543_v46 = vld [vmem:[#allocation5 + $0x2cd0] sm:$0xff]  ;;  %v8115_v53 = vpack.c.bf16 %v1581_v8, %v1563_v5  ;;  %v1670_v8 = vld [vmem:[#allocation5 + $0x30c8] sm:$0xff] }
 0x333   :  { %8102 = vmatprep.subr.bf16.mxu1 %v8101_v2  ;;  %v1580_v2 = vld [vmem:[#allocation5 + $0x2df8] sm:$0xff]  ;;  %v7919_v61 = vpack.c.bf16 %v1543_v46, %v1525_v36  ;;  %v1599_v36 = vld [vmem:[#allocation5 + $0x2e90] sm:$0xff]  ;;  %v8117_v46 = vpack.c.bf16 %v1618_v25, %v1600_v44  ;;  %v1653_v5 = vld [vmem:[#allocation5 + $0x3040] sm:$0xff] }
 0x334   :  { %v8119_v13 = vpack.c.bf16 %v1617_v47, %v1599_v36  ;;  %v1689_v36 = vld [vmem:[#allocation5 + $0x3160] sm:$0xff]  ;;  %v1706_v47 = vld [vmem:[#allocation5 + $0x31e8] sm:$0xff] }
 0x335   :  { %7912 = vmatpush1.bf16.msra.mxu0 %v7911_v60  ;;  %v7921_v60 = vpack.c.bf16 %v1580_v2, %v1562_v56  ;;  %v1636_v56 = vld [vmem:[#allocation5 + $0x2fb8] sm:$0xff]  ;;  %v1654_v2 = vld [vmem:[#allocation5 + $0x3048] sm:$0xff] }
 0x336   :  { %8104 = vmatpush1.bf16.msra.mxu1 %v8103_v57  ;;  %7914 = vmatprep.subr.bf16.mxu0 %v7913_v62  ;;  %v1561_v57 = vld [vmem:[#allocation5 + $0x2d60] sm:$0xff]  ;;  %v1579_v62 = vld [vmem:[#allocation5 + $0x2df0] sm:$0xff] }
 0x337   :  { %8106 = vmatprep.subr.bf16.mxu1 %v8105_v12  ;;  %v1616_v12 = vld [vmem:[#allocation5 + $0x2f18] sm:$0xff]  ;;  %v7923_v27 = vpack.c.bf16 %v1579_v62, %v1561_v57  ;;  %v1635_v57 = vld [vmem:[#allocation5 + $0x2fb0] sm:$0xff]  ;;  %v8121_v62 = vpack.c.bf16 %v1654_v2, %v1636_v56 }
 0x338   :  { %v8123_v25 = vpack.c.bf16 %v1653_v5, %v1635_v57  ;;  %v1725_v57 = vld [vmem:[#allocation5 + $0x3280] sm:$0xff]  ;;  %v1742_v5 = vld [vmem:[#allocation5 + $0x3308] sm:$0xff] }
 0x339   :  { %7916 = vmatpush1.bf16.msra.mxu0 %v7915_v63  ;;  %v7925_v63 = vpack.c.bf16 %v1616_v12, %v1598_v41  ;;  %v1672_v41 = vld [vmem:[#allocation5 + $0x30d8] sm:$0xff]  ;;  %v1690_v12 = vld [vmem:[#allocation5 + $0x3168] sm:$0xff] }
 0x33a   :  { %8108 = vmatpush1.bf16.msra.mxu1 %v8107_v31  ;;  %7918 = vmatprep.subr.bf16.mxu0 %v7917_v35  ;;  %v1597_v31 = vld [vmem:[#allocation5 + $0x2e80] sm:$0xff]  ;;  %v1615_v35 = vld [vmem:[#allocation5 + $0x2f10] sm:$0xff] }
 0x33b   :  { %8110 = vmatprep.subr.bf16.mxu1 %v8109_v37  ;;  %v1652_v37 = vld [vmem:[#allocation5 + $0x3038] sm:$0xff]  ;;  %v7927_v59 = vpack.c.bf16 %v1615_v35, %v1597_v31  ;;  %v1671_v31 = vld [vmem:[#allocation5 + $0x30d0] sm:$0xff]  ;;  %v8125_v35 = vpack.c.bf16 %v1690_v12, %v1672_v41 }
 0x33c   :  { %v8127_v2 = vpack.c.bf16 %v1689_v36, %v1671_v31  ;;  %v1761_v31 = vld [vmem:[#allocation5 + $0x33a0] sm:$0xff]  ;;  %v1778_v36 = vld [vmem:[#allocation5 + $0x3428] sm:$0xff] }
 0x33d   :  { %7920 = vmatpush1.bf16.msra.mxu0 %v7919_v61  ;;  %v7929_v61 = vpack.c.bf16 %v1652_v37, %v1634_v51  ;;  %v1708_v51 = vld [vmem:[#allocation5 + $0x31f8] sm:$0xff]  ;;  %v1726_v37 = vld [vmem:[#allocation5 + $0x3288] sm:$0xff] }
 0x33e   :  { %8112 = vmatpush1.bf16.msra.mxu1 %v8111_v20  ;;  %7922 = vmatprep.subr.bf16.mxu0 %v7921_v60  ;;  %v1633_v20 = vld [vmem:[#allocation5 + $0x2fa0] sm:$0xff]  ;;  %v1651_v60 = vld [vmem:[#allocation5 + $0x3030] sm:$0xff] }
 0x33f   :  { %8114 = vmatprep.subr.bf16.mxu1 %v8113_v4  ;;  %v1688_v4 = vld [vmem:[#allocation5 + $0x3158] sm:$0xff]  ;;  %v7931_v44 = vpack.c.bf16 %v1651_v60, %v1633_v20  ;;  %v1707_v20 = vld [vmem:[#allocation5 + $0x31f0] sm:$0xff]  ;;  %v8129_v60 = vpack.c.bf16 %v1726_v37, %v1708_v51 }
 0x340   :  { %v8131_v12 = vpack.c.bf16 %v1725_v57, %v1707_v20  ;;  %v1797_v20 = vld [vmem:[#allocation5 + $0x34c0] sm:$0xff]  ;;  %v1814_v57 = vld [vmem:[#allocation5 + $0x3548] sm:$0xff] }
 0x341   :  { %7924 = vmatpush1.bf16.msra.mxu0 %v7923_v27  ;;  %v7933_v27 = vpack.c.bf16 %v1688_v4, %v1670_v8  ;;  %v1744_v8 = vld [vmem:[#allocation5 + $0x3318] sm:$0xff]  ;;  %v1762_v4 = vld [vmem:[#allocation5 + $0x33a8] sm:$0xff] }
 0x342   :  { %8116 = vmatpush1.bf16.msra.mxu1 %v8115_v53  ;;  %7926 = vmatprep.subr.bf16.mxu0 %v7925_v63  ;;  %v1669_v53 = vld [vmem:[#allocation5 + $0x30c0] sm:$0xff]  ;;  %v1687_v63 = vld [vmem:[#allocation5 + $0x3150] sm:$0xff] }
 0x343   :  { %8118 = vmatprep.subr.bf16.mxu1 %v8117_v46  ;;  %v1724_v46 = vld [vmem:[#allocation5 + $0x3278] sm:$0xff]  ;;  %v7935_v56 = vpack.c.bf16 %v1687_v63, %v1669_v53  ;;  %v1743_v53 = vld [vmem:[#allocation5 + $0x3310] sm:$0xff]  ;;  %v8133_v63 = vpack.c.bf16 %v1762_v4, %v1744_v8 }
 0x344   :  { %v8135_v37 = vpack.c.bf16 %v1761_v31, %v1743_v53  ;;  %v1833_v53 = vld [vmem:[#allocation5 + $0x35e0] sm:$0xff]  ;;  %v126_v31 = vld [vmem:[#allocation5 + $0x88] sm:$0xff] }
 0x345   :  { %7928 = vmatpush1.bf16.msra.mxu0 %v7927_v59  ;;  %v7937_v59 = vpack.c.bf16 %v1724_v46, %v1706_v47  ;;  %v1780_v47 = vld [vmem:[#allocation5 + $0x3438] sm:$0xff]  ;;  %v1798_v46 = vld [vmem:[#allocation5 + $0x34c8] sm:$0xff] }
 0x346   :  { %8120 = vmatpush1.bf16.msra.mxu1 %v8119_v13  ;;  %7930 = vmatprep.subr.bf16.mxu0 %v7929_v61  ;;  %v1705_v13 = vld [vmem:[#allocation5 + $0x31e0] sm:$0xff]  ;;  %v1723_v61 = vld [vmem:[#allocation5 + $0x3270] sm:$0xff] }
 0x347   :  { %8122 = vmatprep.subr.bf16.mxu1 %v8121_v62  ;;  %v1760_v62 = vld [vmem:[#allocation5 + $0x3398] sm:$0xff]  ;;  %v7939_v41 = vpack.c.bf16 %v1723_v61, %v1705_v13  ;;  %v1779_v13 = vld [vmem:[#allocation5 + $0x3430] sm:$0xff]  ;;  %v8137_v61 = vpack.c.bf16 %v1798_v46, %v1780_v47  ;;  %v125_v46 = vld [vmem:[#allocation5 + $0x80] sm:$0xff] }
 0x348   :  { %v8139_v4 = vpack.c.bf16 %v1797_v20, %v1779_v13  ;;  %v161_v13 = vld [vmem:[#allocation5 + $0x1a0] sm:$0xff] }
 0x349   :  { %7932 = vmatpush1.bf16.msra.mxu0 %v7931_v44  ;;  %v7941_v44 = vpack.c.bf16 %v1760_v62, %v1742_v5  ;;  %v1816_v5 = vld [vmem:[#allocation5 + $0x3558] sm:$0xff]  ;;  %v1834_v62 = vld [vmem:[#allocation5 + $0x35e8] sm:$0xff]  ;;  %v8931_v20 = vld [vmem:[#allocation2 + $0x20] sm:$0xff] }
 0x34a   :  { %8124 = vmatpush1.bf16.msra.mxu1 %v8123_v25  ;;  %7934 = vmatprep.subr.bf16.mxu0 %v7933_v27  ;;  %v1741_v25 = vld [vmem:[#allocation5 + $0x3300] sm:$0xff]  ;;  %v1759_v27 = vld [vmem:[#allocation5 + $0x3390] sm:$0xff] }
 0x34b   :  { %8126 = vmatprep.subr.bf16.mxu1 %v8125_v35  ;;  %v1796_v35 = vld [vmem:[#allocation5 + $0x34b8] sm:$0xff]  ;;  %v7943_v51 = vpack.c.bf16 %v1759_v27, %v1741_v25  ;;  %v1815_v25 = vld [vmem:[#allocation5 + $0x3550] sm:$0xff]  ;;  %v8141_v27 = vpack.c.bf16 %v1834_v62, %v1816_v5 }
 0x34c   :  { %v8932_v5 = vld [vmem:[#allocation2 + $0x58] sm:$0xff] }
 0x34d   :  { %7936 = vmatpush1.bf16.msra.mxu0 %v7935_v56  ;;  %v7945_v56 = vpack.c.bf16 %v1796_v35, %v1778_v36  ;;  %v8143_v35 = vpack.c.bf16 %v1833_v53, %v1815_v25 }
 0x34e   :  { %8128 = vmatpush1.bf16.msra.mxu1 %v8127_v2  ;;  %7938 = vmatprep.subr.bf16.mxu0 %v7937_v59  ;;  %v1777_v2 = vld [vmem:[#allocation5 + $0x3420] sm:$0xff]  ;;  %v1795_v59 = vld [vmem:[#allocation5 + $0x34b0] sm:$0xff] }
 0x34f   :  { %8130 = vmatprep.subr.bf16.mxu1 %v8129_v60  ;;  %v1832_v60 = vld [vmem:[#allocation5 + $0x35d8] sm:$0xff]  ;;  %v7947_v8 = vpack.c.bf16 %v1795_v59, %v1777_v2 }
 0x351   :  { %7940 = vmatpush1.bf16.msra.mxu0 %v7939_v41  ;;  %v7949_v41 = vpack.c.bf16 %v1832_v60, %v1814_v57  ;;  %v198_v57 = vld [vmem:[#allocation5 + $0x2c8] sm:$0xff]  ;;  %v216_v60 = vld [vmem:[#allocation5 + $0x358] sm:$0xff] }
 0x352   :  { %8132 = vmatpush1.bf16.msra.mxu1 %v8131_v12  ;;  %7942 = vmatprep.subr.bf16.mxu0 %v7941_v44  ;;  %v1813_v12 = vld [vmem:[#allocation5 + $0x3540] sm:$0xff]  ;;  %v1831_v44 = vld [vmem:[#allocation5 + $0x35d0] sm:$0xff] }
 0x353   :  { %8134 = vmatprep.subr.bf16.mxu1 %v8133_v63  ;;  %v144_v63 = vld [vmem:[#allocation5 + $0x118] sm:$0xff]  ;;  %v7951_v36 = vpack.c.bf16 %v1831_v44, %v1813_v12  ;;  %v9304_v44 = vld [vmem:[#allocation2 + $0x88] sm:$0xff] }
 0x354   :  { %v8145_v47 = vpack.c.bf16 %v144_v63, %v126_v31  ;;  %v252_v12 = vld [vmem:[#allocation5 + $0x478] sm:$0xff]  ;;  %v233_v31 = vld [vmem:[#allocation5 + $0x3e0] sm:$0xff]  ;;  %v251_v63 = vld [vmem:[#allocation5 + $0x470] sm:$0xff] }
 0x355   :  { %7944 = vmatpush1.bf16.msra.mxu0 %v7943_v51  ;;  %v143_v51 = vld [vmem:[#allocation5 + $0x110] sm:$0xff]  ;;  %v8159_v15 = vpack.c.bf16 %v251_v63, %v233_v31 }
 0x356   :  { %8136 = vmatpush1.bf16.msra.mxu1 %v8135_v37  ;;  %7946 = vmatprep.subr.bf16.mxu0 %v7945_v56  ;;  %v162_v37 = vld [vmem:[#allocation5 + $0x1a8] sm:$0xff]  ;;  %v180_v56 = vld [vmem:[#allocation5 + $0x238] sm:$0xff]  ;;  %v8147_v2 = vpack.c.bf16 %v143_v51, %v125_v46  ;;  %v9320_v51 = vld [vmem:[#allocation2 + $0x80] sm:$0xff] }
 0x357   :  { %8138 = vmatprep.subr.bf16.mxu1 %v8137_v61  ;;  %v8149_v59 = vpack.c.bf16 %v180_v56, %v162_v37  ;;  %v179_v61 = vld [vmem:[#allocation5 + $0x230] sm:$0xff]  ;;  %v288_v46 = vld [vmem:[#allocation5 + $0x598] sm:$0xff]  ;;  %10170 = vst [vmem:[#allocation18_spill] sm:$0xff] %v9320_v51  ;;  %v269_v56 = vld [vmem:[#allocation5 + $0x500] sm:$0xff] }
 0x358   :  { %v8151_v62 = vpack.c.bf16 %v179_v61, %v161_v13  ;;  %v1857_v13 = vsub.s32 3, %v9234_v18  ;;  %v306_v61 = vld [vmem:[#allocation5 + $0x628] sm:$0xff] }
 0x359   :  { %7948 = vmatpush1.bf16.msra.mxu0 %v7947_v8  ;;  %v8153_v8 = vpack.c.bf16 %v216_v60, %v198_v57  ;;  %v9335_v57 = vld [vmem:[#allocation2 + $0xb0] sm:$0xff]  ;;  %v8939_v60 = vld [vmem:[#allocation2 + $0x8] sm:$0xff] }
 0x35a   :  { %8140 = vmatpush1.bf16.msra.mxu1 %v8139_v4  ;;  %7950 = vmatprep.subr.bf16.mxu0 %v7949_v41  ;;  %v197_v4 = vld [vmem:[#allocation5 + $0x2c0] sm:$0xff]  ;;  %v215_v41 = vld [vmem:[#allocation5 + $0x350] sm:$0xff]  ;;  %10172 = vst [vmem:[#allocation20_spill] sm:$0xff] %v9335_v57 }
 0x35b   :  { %8142 = vmatprep.subr.bf16.mxu1 %v8141_v27  ;;  %v8155_v25 = vpack.c.bf16 %v215_v41, %v197_v4  ;;  %v9309_v27 = vsub.s32 0, %v9234_v18  ;;  %v323_v4 = vld [vmem:[#allocation5 + $0x6b0] sm:$0xff] }
 0x35d   :  { %7952 = vmatpush1.bf16.msra.mxu0 %v7951_v36  ;;  %10169 = vst [vmem:[#allocation17_spill] sm:$0xff] %v9309_v27  ;;  %v9314_v36 = vld [vmem:[#allocation7] sm:$0xff] }
 0x35e   :  { %8144 = vmatpush1.bf16.msra.mxu1 %v8143_v35  ;;  %8146 = vmatprep.subr.bf16.mxu0 %v8145_v47  ;;  %v9318_v35 = vrot.slane %v9314_v36, %v9298_v21  ;;  %v270_v47 = vld [vmem:[#allocation5 + $0x508] sm:$0xff]  ;;  %v9342_v41 = vrot.slane %v9314_v36, %v1857_v13 }
 0x35f   :  { %8338 = vmatprep.subr.bf16.mxu1 %v8337_v43  ;;  %v234_v43 = vld [vmem:[#allocation5 + $0x3e8] sm:$0xff]  ;;  %v8161_v37 = vpack.c.bf16 %v288_v46, %v270_v47 }
 0x360   :  { %3778 = vmatmul.mubr.f32.vlgmr.msra.gmra.mrb[24].mxu0 %v8931_v20  ;;  %v8157_v53 = vpack.c.bf16 %v252_v12, %v234_v43  ;;  %v8580_v43 = vadd.f32 %v9213_v23, %v9318_v35  ;;  %v342_v12 = vld [vmem:[#allocation5 + $0x748] sm:$0xff]  ;;  %v8586_v23 = vadd.f32 %v9207_v10, %v9342_v41 }
 0x361   :  { %4045 = vmatmul.mubr.f32.vlgmr.msra.gmra.mrb[24].mxu1 %v8931_v20  ;;  %3783 = vmatprep.mubr.f32.mxu0 %v8932_v5  ;;  %v324_v20 = vld [vmem:[#allocation5 + $0x6b8] sm:$0xff] }
 0x362   :  { %4050 = vmatprep.mubr.f32.mxu1 %v8932_v5  ;;  %8148 = vmatpush1.bf16.msra.mxu0 %v8147_v2  ;;  %v287_v2 = vld [vmem:[#allocation5 + $0x590] sm:$0xff] }
 0x363   :  { %8150 = vmatprep.subr.bf16.mxu0 %v8149_v59  ;;  %v8578_v59 = vadd.f32 %v9205_v7, %v9318_v35  ;;  %v8163_v5 = vpack.c.bf16 %v287_v2, %v269_v56  ;;  %v8165_v7 = vpack.c.bf16 %v324_v20, %v306_v61  ;;  %v378_v61 = vld [vmem:[#allocation5 + $0x868] sm:$0xff]  ;;  %v396_v20 = vld [vmem:[#allocation5 + $0x8f8] sm:$0xff] }
 0x364   :  { %3784 = vmatmul.mubr.f32.gmra.mrb[26].mxu0 %v9300_v24 }
 0x365   :  { %4051 = vmatmul.mubr.f32.gmra.mrb[26].mxu1 %v9300_v24  ;;  %3789 = vmatprep.mubr.f32.mxu0 %v9304_v44 }
 0x366   :  { %4056 = vmatprep.mubr.f32.mxu1 %v9304_v44  ;;  %8152 = vmatpush1.bf16.msra.mxu0 %v8151_v62 }
 0x367   :  { %8340 = vmatpush1.bf16.xpose.msra.mxu1 %v8339_v32  ;;  %8154 = vmatprep.subr.bf16.mxu0 %v8153_v8  ;;  %v9330_v32 = vrot.slane %v9314_v36, %v9309_v27  ;;  %v305_v8 = vld [vmem:[#allocation5 + $0x620] sm:$0xff] }
 0x368   :  { %3790 = vmatmul.mubr.f32.gmra.mrb[28].mxu0 %v9320_v51  ;;  %v8167_v31 = vpack.c.bf16 %v323_v4, %v305_v8  ;;  %v8173_v8 = vpack.c.bf16 %v396_v20, %v378_v61  ;;  %v377_v4 = vld [vmem:[#allocation5 + $0x860] sm:$0xff] }
 0x369   :  { %4057 = vmatmul.mubr.f32.gmra.mrb[28].mxu1 %v9320_v51  ;;  %3795 = vmatprep.mubr.f32.mxu0 %v9324_v14  ;;  %v8577_v62 = vadd.f32 %v9201_v1, %v9330_v32  ;;  %v1853_v1 = vsub.s32 2, %v9234_v18  ;;  %v8579_v63 = vadd.f32 %v9209_v17, %v9330_v32  ;;  %v468_v51 = vld [vmem:[#allocation5 + $0xb38] sm:$0xff] }
 0x36a   :  { %4062 = vmatprep.mubr.f32.mxu1 %v9324_v14  ;;  %8156 = vmatpush1.bf16.msra.mxu0 %v8155_v25  ;;  %v360_v25 = vld [vmem:[#allocation5 + $0x7d8] sm:$0xff]  ;;  %v450_v14 = vld [vmem:[#allocation5 + $0xaa8] sm:$0xff] }
 0x36b   :  { %8158 = vmatprep.subr.bf16.mxu0 %v8157_v53  ;;  %v9346_v53 = vld [vmem:[#allocation7 + $0x8] sm:$0xff]  ;;  %v8169_v46 = vpack.c.bf16 %v360_v25, %v342_v12 }
 0x36c   :  { %3796 = vmatmul.mubr.f32.gmra.mrb[30].mxu0 %v9335_v57  ;;  %10173 = vst [vmem:[#allocation21_spill] sm:$0xff] %v9346_v53  ;;  %v1878_v56 = vrot.slane %v9346_v53, %v9309_v27  ;;  %v1882_v17 = vrot.slane %v9346_v53, %v9298_v21  ;;  %v432_v27 = vld [vmem:[#allocation5 + $0xa18] sm:$0xff] }
 0x36d   :  { %4063 = vmatmul.mubr.f32.gmra.mrb[30].mxu1 %v9335_v57  ;;  %4133 = vmatprep.mubr.f32.mxu0 %v8939_v60  ;;  %v1886_v60 = vrot.slane %v9346_v53, %v1853_v1 }
 0x36e   :  { %4400 = vmatprep.mubr.f32.mxu1 %v8578_v59  ;;  %8160 = vmatpush1.bf16.msra.mxu0 %v8159_v15  ;;  %v341_v15 = vld [vmem:[#allocation5 + $0x740] sm:$0xff] }
 0x36f   :  { %8162 = vmatprep.subr.bf16.mxu0 %v8161_v37  ;;  %v359_v37 = vld [vmem:[#allocation5 + $0x7d0] sm:$0xff] }
 0x370   :  { %v8171_v10 = vpack.c.bf16 %v359_v37, %v341_v15 }
 0x371   :  { %4401 = vmatmul.mubr.f32.vlgmr.msra.gmra.mrb[32].mxu1 %v8577_v62  ;;  %v9359_v62 = vrot.slane %v9346_v53, %v1857_v13 }
 0x372   :  { %4405 = vmatprep.mubr.f32.mxu1 %v8580_v43  ;;  %8164 = vmatpush1.bf16.msra.mxu0 %v8163_v5  ;;  %v395_v43 = vld [vmem:[#allocation5 + $0x8f0] sm:$0xff] }
 0x373   :  { %v3245_v47 = vpop.f32.mrb[16].mxu0  ;;  %8166 = vmatprep.subr.bf16.mxu0 %v8165_v7  ;;  %v8175_v37 = vpack.c.bf16 %v395_v43, %v377_v4 }
 0x374   :  { %v3512_v2 = vpop.f32.mrb[16].mxu1  ;;  %v3247_v59 = vpop.f32.mrb[17].mxu0  ;;  %v8609_v12 = vadd.f32 %v3245_v47, %v1878_v56 }
 0x375   :  { %v3514_v5 = vpop.f32.mrb[17].mxu1  ;;  %4406 = vmatmul.mubr.f32.gmra.mrb[34].mxu1 %v8579_v63  ;;  %v9361_v21 = vadd.f32 %v3512_v2, %v1886_v60  ;;  %v8610_v63 = vadd.f32 %v3247_v59, %v1882_v17  ;;  %v8177_v2 = vpack.c.bf16 %v432_v27, %v414_v50  ;;  %v431_v59 = vld [vmem:[#allocation5 + $0xa10] sm:$0xff]  ;;  %v1865_v50 = vsub.s32 5, %v9234_v18 }
 0x376   :  { %4475 = vmatprep.mubr.f32.mxu1 %v8586_v23  ;;  %8168 = vmatpush1.bf16.msra.mxu0 %v8167_v31  ;;  %v8618_v31 = vadd.f32 %v3514_v5, %v9359_v62 }
 0x377   :  { %v3251_v7 = vpop.f32.mrb[18].mxu0  ;;  %8170 = vmatprep.subr.bf16.mxu0 %v8169_v46 }
 0x378   :  { %v8611_v25 = vadd.f32 %v3251_v7, %v1878_v56  ;;  %v3518_v29 = vpop.f32.mrb[18].mxu1  ;;  %v3253_v52 = vpop.f32.mrb[19].mxu0  ;;  %v413_v7 = vld [vmem:[#allocation5 + $0x980] sm:$0xff] }
 0x379   :  { %v9363_v57 = vadd.f32 %v3518_v29, %v1886_v60  ;;  %v8612_v13 = vadd.f32 %v3253_v52, %v1882_v17  ;;  %v3520_v23 = vpop.f32.mrb[19].mxu1 }
 0x37a   :  { %v8343_v15 = vpack.c.bf16 %v8611_v25, %v8609_v12  ;;  %v8620_v46 = vadd.f32 %v3520_v23, %v9359_v62  ;;  %8172 = vmatpush1.bf16.msra.mxu0 %v8171_v10  ;;  %v9370_v12 = vrot.slane %v9314_v36, %v1853_v1  ;;  %v8179_v10 = vpack.c.bf16 %v431_v59, %v413_v7  ;;  %v449_v25 = vld [vmem:[#allocation5 + $0xaa0] sm:$0xff] }
 0x37b   :  { %v8347_v47 = vpack.c.bf16 %v9363_v57, %v9361_v21  ;;  %v8341_v61 = vpack.c.bf16 %v8612_v13, %v8610_v63  ;;  %v3257_v20 = vpop.f32.mrb[20].mxu0  ;;  %8174 = vmatprep.subr.bf16.mxu0 %v8173_v8  ;;  %v8181_v57 = vpack.c.bf16 %v468_v51, %v450_v14  ;;  %v467_v63 = vld [vmem:[#allocation5 + $0xb30] sm:$0xff]  ;;  %v485_v59 = vld [vmem:[#allocation5 + $0xbc0] sm:$0xff] }
 0x37c   :  { %v8345_v29 = vpack.c.bf16 %v8620_v46, %v8618_v31  ;;  %v3524_v53 = vpop.f32.mrb[20].mxu1  ;;  %v3259_v52 = vpop.f32.mrb[21].mxu0  ;;  %v9373_v27 = vadd.f32 %v3257_v20, %v1878_v56  ;;  %v486_v46 = vld [vmem:[#allocation5 + $0xbc8] sm:$0xff]  ;;  %v8585_v51 = vadd.f32 %v9203_v6, %v9370_v12  ;;  %v8183_v20 = vpack.c.bf16 %v467_v63, %v449_v25  ;;  %v539_v25 = vld [vmem:[#allocation5 + $0xd70] sm:$0xff]  ;;  %v576_v63 = vld [vmem:[#allocation5 + $0xe98] sm:$0xff] }
 0x37d   :  { %v3526_v5 = vpop.f32.mrb[21].mxu1  ;;  %8342 = vmatprep.subr.bf16.mxu1 %v8341_v61  ;;  %v9377_v13 = vadd.f32 %v3524_v53, %v1886_v60  ;;  %v8614_v1 = vadd.f32 %v3259_v52, %v1882_v17  ;;  %v1861_v53 = vsub.s32 4, %v9234_v18  ;;  %v8588_v6 = vadd.f32 %v9215_v26, %v9342_v41  ;;  %v522_v52 = vld [vmem:[#allocation5 + $0xce8] sm:$0xff] }
 0x37e   :  { %8344 = vmatpush1.bf16.xpose.msra.mxu1 %v8343_v15  ;;  %8176 = vmatpush1.bf16.msra.mxu0 %v8175_v37  ;;  %v504_v37 = vld [vmem:[#allocation5 + $0xc58] sm:$0xff]  ;;  %v9384_v14 = vadd.f32 %v3526_v5, %v9359_v62 }
 0x37f   :  { %v3263_v21 = vpop.f32.mrb[22].mxu0  ;;  %8346 = vmatprep.subr.bf16.mxu1 %v8345_v29  ;;  %8178 = vmatprep.subr.bf16.mxu0 %v8177_v2  ;;  %v9399_v2 = vrot.slane %v9314_v36, %v1865_v50  ;;  %v8185_v7 = vpack.c.bf16 %v504_v37, %v486_v46  ;;  %v503_v29 = vld [vmem:[#allocation5 + $0xc50] sm:$0xff]  ;;  %v540_v5 = vld [vmem:[#allocation5 + $0xd78] sm:$0xff]  ;;  %v9408_v26 = vrot.slane %v9314_v36, %v1861_v53 }
 0x380   :  { %v9375_v8 = vadd.f32 %v3263_v21, %v1878_v56  ;;  %v3530_v4 = vpop.f32.mrb[22].mxu1  ;;  %v3265_v43 = vpop.f32.mrb[23].mxu0  ;;  %v10174_v21 = vpack.c.bf16 %v9288_v30, %v9285_v28  ;;  %v612_v46 = vld [vmem:[#allocation5 + $0xfb8] sm:$0xff]  ;;  %v10175_v37 = vpack.c.bf16 %v9282_v19, %v9279_v16  ;;  %v8581_v16 = vadd.f32 %v9217_v33, %v9330_v32 }
 0x381   :  { %v9379_v23 = vadd.f32 %v3530_v4, %v1886_v60  ;;  %v8616_v31 = vadd.f32 %v3265_v43, %v1882_v17  ;;  %v3532_v15 = vpop.f32.mrb[23].mxu1  ;;  %v8594_v4 = vadd.f32 %v9240_v48, %v9399_v2  ;;  %v8189_v43 = vpack.c.bf16 %v540_v5, %v522_v52  ;;  %v575_v48 = vld [vmem:[#allocation5 + $0xe90] sm:$0xff]  ;;  %v629_v52 = vld [vmem:[#allocation5 + $0x1040] sm:$0xff]  ;;  %v666_v5 = vld [vmem:[#allocation5 + $0x1168] sm:$0xff] }
 0x382   :  { %v8355_v56 = vpack.c.bf16 %v9375_v8, %v9373_v27  ;;  %v9389_v61 = vadd.f32 %v3532_v15, %v9359_v62  ;;  %8180 = vmatpush1.bf16.msra.mxu0 %v8179_v10  ;;  %v8587_v10 = vadd.f32 %v9211_v22, %v9370_v12  ;;  %v558_v22 = vld [vmem:[#allocation5 + $0xe08] sm:$0xff]  ;;  %v8593_v36 = vadd.f32 %v9238_v40, %v9408_v26  ;;  %v720_v27 = vld [vmem:[#allocation5 + $0x1318] sm:$0xff] }
 0x383   :  { %v8359_v60 = vpack.c.bf16 %v9379_v23, %v9377_v13  ;;  %v8353_v17 = vpack.c.bf16 %v8616_v31, %v8614_v1  ;;  %8182 = vmatprep.subr.bf16.mxu0 %v8181_v57  ;;  %v8187_v57 = vpack.c.bf16 %v503_v29, %v485_v59  ;;  %v8596_v28 = vadd.f32 %v9252_v11, %v9399_v2  ;;  %v557_v31 = vld [vmem:[#allocation5 + $0xe00] sm:$0xff]  ;;  %v594_v15 = vld [vmem:[#allocation5 + $0xf28] sm:$0xff]  ;;  %v648_v29 = vld [vmem:[#allocation5 + $0x10d8] sm:$0xff] }
 0x384   :  { %v8357_v62 = vpack.c.bf16 %v9389_v61, %v9384_v14  ;;  %v8193_v30 = vpack.c.bf16 %v576_v63, %v558_v22  ;;  %v8595_v40 = vadd.f32 %v9250_v3, %v9408_v26  ;;  %v8582_v11 = vadd.f32 %v9221_v39, %v9318_v35  ;;  %v630_v59 = vld [vmem:[#allocation5 + $0x1048] sm:$0xff]  ;;  %v647_v39 = vld [vmem:[#allocation5 + $0x10d0] sm:$0xff] }
 0x385   :  { %4476 = vmatmul.mubr.f32.vlgmr.msra.gmra.mrb[32].mxu1 %v8585_v51  ;;  %v8195_v51 = vpack.c.bf16 %v575_v48, %v557_v31  ;;  %v8584_v3 = vadd.f32 %v9229_v55, %v9318_v35  ;;  %v8583_v33 = vadd.f32 %v9225_v49, %v9330_v32  ;;  %v8203_v55 = vpack.c.bf16 %v647_v39, %v629_v52  ;;  %v738_v61 = vld [vmem:[#allocation5 + $0x13a8] sm:$0xff]  ;;  %v755_v22 = vld [vmem:[#allocation5 + $0x1430] sm:$0xff]  ;;  %v828_v31 = vld [vmem:[#allocation5 + $0x1678] sm:$0xff] }
 0x386   :  { %4480 = vmatprep.mubr.f32.mxu1 %v8588_v6  ;;  %8348 = vmatpush1.bf16.xpose.msra.mxu1 %v8347_v47  ;;  %v521_v47 = vld [vmem:[#allocation5 + $0xce0] sm:$0xff]  ;;  %v8590_v35 = vadd.f32 %v9223_v42, %v9342_v41  ;;  %v8589_v49 = vadd.f32 %v9219_v38, %v9370_v12  ;;  %v8592_v8 = vadd.f32 %v9231_v58, %v9342_v41  ;;  %v719_v42 = vld [vmem:[#allocation5 + $0x1310] sm:$0xff]  ;;  %v774_v63 = vld [vmem:[#allocation5 + $0x14c8] sm:$0xff] }
 0x387   :  { %8350 = vmatprep.subr.bf16.mxu1 %v10174_v21  ;;  %8184 = vmatpush1.bf16.msra.mxu0 %v8183_v20  ;;  %v8191_v1 = vpack.c.bf16 %v539_v25, %v521_v47  ;;  %v8197_v20 = vpack.c.bf16 %v612_v46, %v594_v15  ;;  %v593_v6 = vld [vmem:[#allocation5 + $0xf20] sm:$0xff]  ;;  %v8591_v38 = vadd.f32 %v9227_v54, %v9370_v12  ;;  %v8941_v12 = vld [vmem:[#allocation2 + $0x38] sm:$0xff]  ;;  %v8942_v48 = vld [vmem:[#allocation2 + $0x30] sm:$0xff] }
 0x388   :  { %8186 = vmatprep.subr.bf16.mxu0 %v8185_v7  ;;  %v611_v7 = vld [vmem:[#allocation5 + $0xfb0] sm:$0xff]  ;;  %v8598_v58 = vadd.f32 %v9272_v45, %v9399_v2  ;;  %v737_v25 = vld [vmem:[#allocation5 + $0x13a0] sm:$0xff]  ;;  %v8597_v13 = vadd.f32 %v9268_v34, %v9408_v26  ;;  %v8600_v45 = vadd.f32 %v9276_v9, %v9399_v2  ;;  %v8599_v34 = vadd.f32 %v9274_v0, %v9408_v26  ;;  %v8943_v46 = vld [vmem:[#allocation2 + $0x68] sm:$0xff] }
 0x389   :  { %4481 = vmatmul.mubr.f32.gmra.mrb[34].mxu1 %v8587_v10  ;;  %v8199_v19 = vpack.c.bf16 %v611_v7, %v593_v6  ;;  %v684_v10 = vld [vmem:[#allocation5 + $0x11f8] sm:$0xff]  ;;  %v8215_v54 = vpack.c.bf16 %v755_v22, %v737_v25  ;;  %v809_v9 = vld [vmem:[#allocation5 + $0x15e0] sm:$0xff]  ;;  %v827_v2 = vld [vmem:[#allocation5 + $0x1670] sm:$0xff] }
 0x38a   :  { %4550 = vmatprep.mubr.f32.mxu1 %v8594_v4  ;;  %v8205_v21 = vpack.c.bf16 %v684_v10, %v666_v5  ;;  %v683_v4 = vld [vmem:[#allocation5 + $0x11f0] sm:$0xff]  ;;  %v8945_v6 = vld [vmem:[#allocation2 + $0x98] sm:$0xff]  ;;  %v845_v0 = vld [vmem:[#allocation5 + $0x1700] sm:$0xff] }
 0x38b   :  { %8188 = vmatpush1.bf16.msra.mxu0 %v8187_v57  ;;  %v665_v57 = vld [vmem:[#allocation5 + $0x1160] sm:$0xff]  ;;  %v863_v26 = vld [vmem:[#allocation5 + $0x1790] sm:$0xff]  ;;  %v918_v5 = vld [vmem:[#allocation5 + $0x1948] sm:$0xff] }
 0x38c   :  { %8190 = vmatprep.subr.bf16.mxu0 %v8189_v43  ;;  %v702_v43 = vld [vmem:[#allocation5 + $0x1288] sm:$0xff]  ;;  %v8207_v32 = vpack.c.bf16 %v683_v4, %v665_v57  ;;  %v881_v52 = vld [vmem:[#allocation5 + $0x1820] sm:$0xff]  ;;  %v899_v39 = vld [vmem:[#allocation5 + $0x18b0] sm:$0xff] }
 0x38d   :  { %4551 = vmatmul.mubr.f32.vlgmr.msra.gmra.mrb[32].mxu1 %v8593_v36  ;;  %v8209_v14 = vpack.c.bf16 %v720_v27, %v702_v43  ;;  %v792_v36 = vld [vmem:[#allocation5 + $0x1558] sm:$0xff]  ;;  %v954_v57 = vld [vmem:[#allocation5 + $0x1a68] sm:$0xff]  ;;  %v1025_v25 = vld [vmem:[#allocation5 + $0x1ca0] sm:$0xff] }
 0x38e   :  { %4555 = vmatprep.mubr.f32.mxu1 %v8596_v28  ;;  %8352 = vmatpush1.bf16.xpose.msra.mxu1 %v10175_v37  ;;  %v8217_v23 = vpack.c.bf16 %v792_v36, %v774_v63  ;;  %v791_v28 = vld [vmem:[#allocation5 + $0x1550] sm:$0xff]  ;;  %v936_v10 = vld [vmem:[#allocation5 + $0x19d8] sm:$0xff]  ;;  %v1062_v63 = vld [vmem:[#allocation5 + $0x1dc8] sm:$0xff] }
 0x38f   :  { %8354 = vmatprep.subr.bf16.mxu1 %v8353_v17  ;;  %8192 = vmatpush1.bf16.msra.mxu0 %v8191_v1  ;;  %v8201_v17 = vpack.c.bf16 %v648_v29, %v630_v59  ;;  %v8940_v1 = vld [vmem:[#allocation2] sm:$0xff]  ;;  %v882_v59 = vld [vmem:[#allocation5 + $0x1828] sm:$0xff]  ;;  %v900_v29 = vld [vmem:[#allocation5 + $0x18b8] sm:$0xff] }
 0x390   :  { %8194 = vmatprep.subr.bf16.mxu0 %v8193_v30  ;;  %v810_v30 = vld [vmem:[#allocation5 + $0x15e8] sm:$0xff]  ;;  %v972_v4 = vld [vmem:[#allocation5 + $0x1af8] sm:$0xff]  ;;  %v1043_v22 = vld [vmem:[#allocation5 + $0x1d30] sm:$0xff] }
 0x391   :  { %4556 = vmatmul.mubr.f32.gmra.mrb[34].mxu1 %v8595_v40  ;;  %v8221_v37 = vpack.c.bf16 %v828_v31, %v810_v30  ;;  %v846_v40 = vld [vmem:[#allocation5 + $0x1708] sm:$0xff]  ;;  %v8237_v27 = vpack.c.bf16 %v972_v4, %v954_v57  ;;  %v1080_v36 = vld [vmem:[#allocation5 + $0x1e58] sm:$0xff]  ;;  %v1097_v30 = vld [vmem:[#allocation5 + $0x1ee0] sm:$0xff] }
 0x392   :  { %4625 = vmatprep.mubr.f32.mxu1 %v8582_v11  ;;  %v8944_v11 = vld [vmem:[#allocation2 + $0x60] sm:$0xff]  ;;  %v1115_v31 = vld [vmem:[#allocation5 + $0x1f70] sm:$0xff]  ;;  %v1314_v4 = vld [vmem:[#allocation5 + $0x25a8] sm:$0xff] }
 0x393   :  { %8196 = vmatpush1.bf16.msra.mxu0 %v8195_v51  ;;  %v864_v51 = vld [vmem:[#allocation5 + $0x1798] sm:$0xff]  ;;  %v1295_v57 = vld [vmem:[#allocation5 + $0x2510] sm:$0xff] }
 0x394   :  { %8198 = vmatprep.subr.bf16.mxu0 %v8197_v20  ;;  %v8223_v20 = vpack.c.bf16 %v827_v2, %v809_v9  ;;  %v8225_v7 = vpack.c.bf16 %v864_v51, %v846_v40  ;;  %v1151_v9 = vld [vmem:[#allocation5 + $0x2090] sm:$0xff]  ;;  %v1170_v2 = vld [vmem:[#allocation5 + $0x2128] sm:$0xff]  ;;  %v1188_v40 = vld [vmem:[#allocation5 + $0x21b8] sm:$0xff] }
 0x395   :  { %4626 = vmatmul.mubr.f32.vlgmr.msra.gmra.mrb[36].mxu1 %v8581_v16  ;;  %v8946_v16 = vld [vmem:[#allocation2 + $0x90] sm:$0xff] }
 0x396   :  { %4630 = vmatprep.mubr.f32.mxu1 %v8584_v3  ;;  %8356 = vmatpush1.bf16.xpose.msra.mxu1 %v8355_v56  ;;  %v701_v56 = vld [vmem:[#allocation5 + $0x1280] sm:$0xff]  ;;  %v8947_v3 = vld [vmem:[#allocation2 + $0x18] sm:$0xff] }
 0x397   :  { %8358 = vmatprep.subr.bf16.mxu1 %v8357_v62  ;;  %8200 = vmatpush1.bf16.msra.mxu0 %v8199_v19  ;;  %v756_v62 = vld [vmem:[#allocation5 + $0x1438] sm:$0xff]  ;;  %v8211_v47 = vpack.c.bf16 %v719_v42, %v701_v56  ;;  %v8227_v19 = vpack.c.bf16 %v863_v26, %v845_v0 }
 0x398   :  { %8202 = vmatprep.subr.bf16.mxu0 %v8201_v17  ;;  %v8213_v41 = vpack.c.bf16 %v756_v62, %v738_v61  ;;  %v8229_v17 = vpack.c.bf16 %v900_v29, %v882_v59  ;;  %v989_v61 = vld [vmem:[#allocation5 + $0x1b80] sm:$0xff]  ;;  %v1007_v62 = vld [vmem:[#allocation5 + $0x1c10] sm:$0xff]  ;;  %v1224_v0 = vld [vmem:[#allocation5 + $0x22d8] sm:$0xff] }
 0x399   :  { %4631 = vmatmul.mubr.f32.gmra.mrb[38].mxu1 %v8583_v33  ;;  %v8231_v33 = vpack.c.bf16 %v899_v39, %v881_v52  ;;  %v1205_v29 = vld [vmem:[#allocation5 + $0x2240] sm:$0xff] }
 0x39a   :  { %4700 = vmatprep.mubr.f32.mxu1 %v8590_v35  ;;  %v917_v35 = vld [vmem:[#allocation5 + $0x1940] sm:$0xff] }
 0x39b   :  { %8204 = vmatpush1.bf16.msra.mxu0 %v8203_v55  ;;  %v8233_v55 = vpack.c.bf16 %v936_v10, %v918_v5  ;;  %v1241_v39 = vld [vmem:[#allocation5 + $0x2360] sm:$0xff]  ;;  %v1259_v5 = vld [vmem:[#allocation5 + $0x23f0] sm:$0xff]  ;;  %v1278_v10 = vld [vmem:[#allocation5 + $0x2488] sm:$0xff] }
 0x39c   :  { %8206 = vmatprep.subr.bf16.mxu0 %v8205_v21  ;;  %v935_v21 = vld [vmem:[#allocation5 + $0x19d0] sm:$0xff] }
 0x39d   :  { %4701 = vmatmul.mubr.f32.vlgmr.msra.gmra.mrb[36].mxu1 %v8589_v49  ;;  %v8235_v43 = vpack.c.bf16 %v935_v21, %v917_v35  ;;  %v953_v49 = vld [vmem:[#allocation5 + $0x1a60] sm:$0xff] }
 0x39e   :  { %4705 = vmatprep.mubr.f32.mxu1 %v8592_v8  ;;  %8360 = vmatpush1.bf16.xpose.msra.mxu1 %v8359_v60  ;;  %v773_v60 = vld [vmem:[#allocation5 + $0x14c0] sm:$0xff]  ;;  %v990_v8 = vld [vmem:[#allocation5 + $0x1b88] sm:$0xff] }
 0x39f   :  { %8208 = vmatpush1.bf16.msra.mxu0 %v8207_v32  ;;  %v8219_v15 = vpack.c.bf16 %v791_v28, %v773_v60  ;;  %v971_v32 = vld [vmem:[#allocation5 + $0x1af0] sm:$0xff]  ;;  %v1277_v21 = vld [vmem:[#allocation5 + $0x2480] sm:$0xff] }
 0x3a0   :  { %8210 = vmatprep.subr.bf16.mxu0 %v8209_v14  ;;  %v1008_v14 = vld [vmem:[#allocation5 + $0x1c18] sm:$0xff]  ;;  %v8239_v56 = vpack.c.bf16 %v971_v32, %v953_v49  ;;  %v1313_v32 = vld [vmem:[#allocation5 + $0x25a0] sm:$0xff] }
 0x3a1   :  { %4706 = vmatmul.mubr.f32.gmra.mrb[38].mxu1 %v8591_v38  ;;  %v8241_v42 = vpack.c.bf16 %v1008_v14, %v990_v8  ;;  %v1026_v38 = vld [vmem:[#allocation5 + $0x1ca8] sm:$0xff]  ;;  %v1331_v8 = vld [vmem:[#allocation5 + $0x2630] sm:$0xff] }
 0x3a2   :  { %4775 = vmatprep.mubr.f32.mxu1 %v8598_v58  ;;  %4134 = vmatmul.mubr.f32.vlgmr.msra.gmra.mrb[32].mxu0 %v8940_v1  ;;  %v8243_v58 = vpack.c.bf16 %v1007_v62, %v989_v61  ;;  %v8247_v1 = vpack.c.bf16 %v1043_v22, %v1025_v25  ;;  %v1350_v14 = vld [vmem:[#allocation5 + $0x26c8] sm:$0xff]  ;;  %v8279_v61 = vpack.c.bf16 %v1331_v8, %v1313_v32  ;;  %v1404_v25 = vld [vmem:[#allocation5 + $0x2878] sm:$0xff]  ;;  %v8950_v22 = vld [vmem:[#allocation2 + $0x40] sm:$0xff] }
 0x3a3   :  { %8212 = vmatpush1.bf16.msra.mxu0 %v8211_v47  ;;  %4139 = vmatprep.mubr.f32.mxu0 %v8941_v12  ;;  %v1044_v47 = vld [vmem:[#allocation5 + $0x1d38] sm:$0xff]  ;;  %v1079_v12 = vld [vmem:[#allocation5 + $0x1e50] sm:$0xff]  ;;  %v8949_v62 = vld [vmem:[#allocation2 + $0x48] sm:$0xff] }
 0x3a4   :  { %8214 = vmatprep.subr.bf16.mxu0 %v8213_v41  ;;  %v8245_v41 = vpack.c.bf16 %v1044_v47, %v1026_v38  ;;  %v1349_v47 = vld [vmem:[#allocation5 + $0x26c0] sm:$0xff]  ;;  %v1656_v32 = vld [vmem:[#allocation5 + $0x3058] sm:$0xff] }
 0x3a5   :  { %4776 = vmatmul.mubr.f32.vlgmr.msra.gmra.mrb[36].mxu1 %v8597_v13  ;;  %v8249_v13 = vpack.c.bf16 %v1080_v36, %v1062_v63  ;;  %v8951_v36 = vld [vmem:[#allocation2 + $0x78] sm:$0xff] }
 0x3a6   :  { %4780 = vmatprep.mubr.f32.mxu1 %v8600_v45  ;;  %4140 = vmatmul.mubr.f32.gmra.mrb[34].mxu0 %v8942_v48  ;;  %v1098_v45 = vld [vmem:[#allocation5 + $0x1ee8] sm:$0xff] }
 0x3a7   :  { %8216 = vmatpush1.bf16.msra.mxu0 %v8215_v54  ;;  %4145 = vmatprep.mubr.f32.mxu0 %v8943_v46  ;;  %v1061_v54 = vld [vmem:[#allocation5 + $0x1dc0] sm:$0xff]  ;;  %v1134_v48 = vld [vmem:[#allocation5 + $0x2008] sm:$0xff] }
 0x3a8   :  { %8218 = vmatprep.subr.bf16.mxu0 %v8217_v23  ;;  %v1116_v23 = vld [vmem:[#allocation5 + $0x1f78] sm:$0xff]  ;;  %v8251_v60 = vpack.c.bf16 %v1079_v12, %v1061_v54  ;;  %v1403_v54 = vld [vmem:[#allocation5 + $0x2870] sm:$0xff]  ;;  %v1422_v12 = vld [vmem:[#allocation5 + $0x2908] sm:$0xff] }
 0x3a9   :  { %4781 = vmatmul.mubr.f32.gmra.mrb[38].mxu1 %v8599_v34  ;;  %v8253_v28 = vpack.c.bf16 %v1116_v23, %v1098_v45  ;;  %v1152_v34 = vld [vmem:[#allocation5 + $0x2098] sm:$0xff]  ;;  %v8952_v23 = vld [vmem:[#allocation2 + $0x70] sm:$0xff] }
 0x3aa   :  { %4146 = vmatmul.mubr.f32.gmra.mrb[36].mxu0 %v8944_v11  ;;  %v8257_v46 = vpack.c.bf16 %v1152_v34, %v1134_v48  ;;  %v8261_v11 = vpack.c.bf16 %v1188_v40, %v1170_v2  ;;  %v1440_v45 = vld [vmem:[#allocation5 + $0x2998] sm:$0xff]  ;;  %v1439_v48 = vld [vmem:[#allocation5 + $0x2990] sm:$0xff]  ;;  %v1458_v34 = vld [vmem:[#allocation5 + $0x2a28] sm:$0xff] }
 0x3ab   :  { %8220 = vmatpush1.bf16.msra.mxu0 %v8219_v15  ;;  %4151 = vmatprep.mubr.f32.mxu0 %v8945_v6  ;;  %v8255_v15 = vpack.c.bf16 %v1115_v31, %v1097_v30  ;;  %v1187_v6 = vld [vmem:[#allocation5 + $0x21b0] sm:$0xff]  ;;  %v8289_v30 = vpack.c.bf16 %v1440_v45, %v1422_v12  ;;  %v1421_v31 = vld [vmem:[#allocation5 + $0x2900] sm:$0xff]  ;;  %v1764_v12 = vld [vmem:[#allocation5 + $0x33b8] sm:$0xff] }
 0x3ac   :  { %8222 = vmatprep.subr.bf16.mxu0 %v8221_v37  ;;  %v1133_v37 = vld [vmem:[#allocation5 + $0x2000] sm:$0xff] }
 0x3ad   :  { %v8259_v51 = vpack.c.bf16 %v1151_v9, %v1133_v37  ;;  %v8291_v37 = vpack.c.bf16 %v1439_v48, %v1421_v31  ;;  %v8955_v9 = vld [vmem:[#allocation2 + $0x28] sm:$0xff]  ;;  %v1457_v40 = vld [vmem:[#allocation5 + $0x2a20] sm:$0xff]  ;;  %v1800_v31 = vld [vmem:[#allocation5 + $0x34d8] sm:$0xff] }
 0x3ae   :  { %4152 = vmatmul.mubr.f32.gmra.mrb[38].mxu0 %v8946_v16  ;;  %v1223_v16 = vld [vmem:[#allocation5 + $0x22d0] sm:$0xff] }
 0x3af   :  { %8224 = vmatpush1.bf16.msra.mxu0 %v8223_v20  ;;  %4222 = vmatprep.mubr.f32.mxu0 %v8947_v3  ;;  %v1169_v20 = vld [vmem:[#allocation5 + $0x2120] sm:$0xff]  ;;  %v1260_v3 = vld [vmem:[#allocation5 + $0x23f8] sm:$0xff] }
 0x3b0   :  { %8226 = vmatprep.subr.bf16.mxu0 %v8225_v7  ;;  %v1206_v7 = vld [vmem:[#allocation5 + $0x2248] sm:$0xff]  ;;  %v8263_v26 = vpack.c.bf16 %v1187_v6, %v1169_v20  ;;  %v1512_v20 = vld [vmem:[#allocation5 + $0x2bd8] sm:$0xff] }
 0x3b1   :  { %v8265_v59 = vpack.c.bf16 %v1224_v0, %v1206_v7  ;;  %v1493_v0 = vld [vmem:[#allocation5 + $0x2b40] sm:$0xff] }
 0x3b3   :  { %8228 = vmatpush1.bf16.msra.mxu0 %v8227_v19  ;;  %v1242_v19 = vld [vmem:[#allocation5 + $0x2368] sm:$0xff] }
 0x3b4   :  { %8230 = vmatprep.subr.bf16.mxu0 %v8229_v17  ;;  %v8267_v17 = vpack.c.bf16 %v1223_v16, %v1205_v29  ;;  %v8269_v52 = vpack.c.bf16 %v1260_v3, %v1242_v19  ;;  %v1548_v29 = vld [vmem:[#allocation5 + $0x2cf8] sm:$0xff]  ;;  %v1529_v3 = vld [vmem:[#allocation5 + $0x2c60] sm:$0xff] }
 0x3b7   :  { %8232 = vmatpush1.bf16.msra.mxu0 %v8231_v33  ;;  %v1296_v33 = vld [vmem:[#allocation5 + $0x2518] sm:$0xff] }
 0x3b8   :  { %8234 = vmatprep.subr.bf16.mxu0 %v8233_v55  ;;  %v8271_v55 = vpack.c.bf16 %v1259_v5, %v1241_v39  ;;  %v8273_v35 = vpack.c.bf16 %v1296_v33, %v1278_v10  ;;  %v1584_v39 = vld [vmem:[#allocation5 + $0x2e18] sm:$0xff]  ;;  %v1565_v33 = vld [vmem:[#allocation5 + $0x2d80] sm:$0xff] }
 0x3bb   :  { %8236 = vmatpush1.bf16.msra.mxu0 %v8235_v43  ;;  %v1332_v43 = vld [vmem:[#allocation5 + $0x2638] sm:$0xff] }
 0x3bc   :  { %8238 = vmatprep.subr.bf16.mxu0 %v8237_v27  ;;  %v8275_v27 = vpack.c.bf16 %v1295_v57, %v1277_v21  ;;  %v8277_v49 = vpack.c.bf16 %v1332_v43, %v1314_v4  ;;  %v1620_v21 = vld [vmem:[#allocation5 + $0x2f38] sm:$0xff]  ;;  %v1601_v43 = vld [vmem:[#allocation5 + $0x2ea0] sm:$0xff] }
 0x3bf   :  { %8240 = vmatpush1.bf16.msra.mxu0 %v8239_v56  ;;  %v1368_v56 = vld [vmem:[#allocation5 + $0x2758] sm:$0xff] }
 0x3c0   :  { %8242 = vmatprep.subr.bf16.mxu0 %v8241_v42  ;;  %v8948_v42 = vld [vmem:[#allocation2 + $0x10] sm:$0xff]  ;;  %v8281_v38 = vpack.c.bf16 %v1368_v56, %v1350_v14  ;;  %v1637_v56 = vld [vmem:[#allocation5 + $0x2fc0] sm:$0xff] }
 0x3c3   :  { %8244 = vmatpush1.bf16.msra.mxu0 %v8243_v58  ;;  %v1367_v58 = vld [vmem:[#allocation5 + $0x2750] sm:$0xff] }
 0x3c4   :  { %8246 = vmatprep.subr.bf16.mxu0 %v8245_v41  ;;  %v1386_v41 = vld [vmem:[#allocation5 + $0x27e8] sm:$0xff]  ;;  %v8283_v63 = vpack.c.bf16 %v1367_v58, %v1349_v47  ;;  %v1673_v58 = vld [vmem:[#allocation5 + $0x30e0] sm:$0xff] }
 0x3c7   :  { %8248 = vmatpush1.bf16.msra.mxu0 %v8247_v1  ;;  %v8285_v1 = vpack.c.bf16 %v1404_v25, %v1386_v41  ;;  %v1691_v41 = vld [vmem:[#allocation5 + $0x3170] sm:$0xff]  ;;  %v1710_v25 = vld [vmem:[#allocation5 + $0x3208] sm:$0xff] }
 0x3c8   :  { %8250 = vmatprep.subr.bf16.mxu0 %v8249_v13  ;;  %v1385_v13 = vld [vmem:[#allocation5 + $0x27e0] sm:$0xff] }
 0x3cb   :  { %8252 = vmatpush1.bf16.msra.mxu0 %v8251_v60  ;;  %v8287_v60 = vpack.c.bf16 %v1403_v54, %v1385_v13  ;;  %v1727_v13 = vld [vmem:[#allocation5 + $0x3290] sm:$0xff]  ;;  %v1746_v54 = vld [vmem:[#allocation5 + $0x3328] sm:$0xff] }
 0x3cc   :  { %8254 = vmatprep.subr.bf16.mxu0 %v8253_v28  ;;  %v8953_v28 = vld [vmem:[#allocation2 + $0xa8] sm:$0xff] }
 0x3cf   :  { %8256 = vmatpush1.bf16.msra.mxu0 %v8255_v15  ;;  %v1476_v15 = vld [vmem:[#allocation5 + $0x2ab8] sm:$0xff] }
 0x3d0   :  { %8258 = vmatprep.subr.bf16.mxu0 %v8257_v46  ;;  %v8954_v46 = vld [vmem:[#allocation2 + $0xa0] sm:$0xff]  ;;  %v8293_v2 = vpack.c.bf16 %v1476_v15, %v1458_v34 }
 0x3d1   :  { %v1781_v15 = vld [vmem:[#allocation5 + $0x3440] sm:$0xff] }
 0x3d3   :  { %8260 = vmatpush1.bf16.msra.mxu0 %v8259_v51  ;;  %v1475_v51 = vld [vmem:[#allocation5 + $0x2ab0] sm:$0xff] }
 0x3d4   :  { %8262 = vmatprep.subr.bf16.mxu0 %v8261_v11  ;;  %v1494_v11 = vld [vmem:[#allocation5 + $0x2b48] sm:$0xff]  ;;  %v8295_v6 = vpack.c.bf16 %v1475_v51, %v1457_v40  ;;  %v1817_v51 = vld [vmem:[#allocation5 + $0x3560] sm:$0xff] }
 0x3d5   :  { %v8297_v7 = vpack.c.bf16 %v1512_v20, %v1494_v11  ;;  %v1835_v11 = vld [vmem:[#allocation5 + $0x35f0] sm:$0xff] }
 0x3d6   :  { %v8335_v20 = vpack.c.bf16 %v1835_v11, %v1817_v51 }
 0x3d7   :  { %8264 = vmatpush1.bf16.msra.mxu0 %v8263_v26  ;;  %v1511_v26 = vld [vmem:[#allocation5 + $0x2bd0] sm:$0xff] }
 0x3d8   :  { %8266 = vmatprep.subr.bf16.mxu0 %v8265_v59  ;;  %v1530_v59 = vld [vmem:[#allocation5 + $0x2c68] sm:$0xff]  ;;  %v8299_v16 = vpack.c.bf16 %v1511_v26, %v1493_v0 }
 0x3d9   :  { %v8301_v19 = vpack.c.bf16 %v1548_v29, %v1530_v59  ;;  %v10176_v0 = vld [vmem:[#allocation18_spill] sm:$0xff]  ;;  %v10177_v26 = vld [vmem:[#allocation19_spill] sm:$0xff]  ;;  %v10178_v59 = vld [vmem:[#allocation20_spill] sm:$0xff] }
 0x3da   :  { %v10179_v29 = vld [vmem:[#allocation21_spill] sm:$0xff] }
 0x3db   :  { %8268 = vmatpush1.bf16.msra.mxu0 %v8267_v17  ;;  %v1547_v17 = vld [vmem:[#allocation5 + $0x2cf0] sm:$0xff] }
 0x3dc   :  { %8270 = vmatprep.subr.bf16.mxu0 %v8269_v52  ;;  %v1566_v52 = vld [vmem:[#allocation5 + $0x2d88] sm:$0xff]  ;;  %v8303_v5 = vpack.c.bf16 %v1547_v17, %v1529_v3  ;;  %v1898_v3 = vrot.slane %v10179_v29, %v1865_v50 }
 0x3dd   :  { %v8305_v10 = vpack.c.bf16 %v1584_v39, %v1566_v52 }
 0x3df   :  { %8272 = vmatpush1.bf16.msra.mxu0 %v8271_v55  ;;  %v1583_v55 = vld [vmem:[#allocation5 + $0x2e10] sm:$0xff] }
 0x3e0   :  { %8274 = vmatprep.subr.bf16.mxu0 %v8273_v35  ;;  %v1602_v35 = vld [vmem:[#allocation5 + $0x2ea8] sm:$0xff]  ;;  %v8307_v57 = vpack.c.bf16 %v1583_v55, %v1565_v33 }
 0x3e1   :  { %v8309_v4 = vpack.c.bf16 %v1620_v21, %v1602_v35 }
 0x3e2   :  { %4223 = vmatmul.mubr.f32.vlgmr.msra.gmra.mrb[32].mxu0 %v8948_v42  ;;  %v1655_v42 = vld [vmem:[#allocation5 + $0x3050] sm:$0xff] }
 0x3e3   :  { %8276 = vmatpush1.bf16.msra.mxu0 %v8275_v27  ;;  %4228 = vmatprep.mubr.f32.mxu0 %v8949_v62  ;;  %v1619_v27 = vld [vmem:[#allocation5 + $0x2f30] sm:$0xff]  ;;  %v1692_v62 = vld [vmem:[#allocation5 + $0x3178] sm:$0xff] }
 0x3e4   :  { %8278 = vmatprep.subr.bf16.mxu0 %v8277_v49  ;;  %v1638_v49 = vld [vmem:[#allocation5 + $0x2fc8] sm:$0xff]  ;;  %v8311_v8 = vpack.c.bf16 %v1619_v27, %v1601_v43 }
 0x3e5   :  { %v8313_v14 = vpack.c.bf16 %v1656_v32, %v1638_v49 }
 0x3e6   :  { %4229 = vmatmul.mubr.f32.gmra.mrb[34].mxu0 %v8950_v22  ;;  %v1728_v22 = vld [vmem:[#allocation5 + $0x3298] sm:$0xff] }
 0x3e7   :  { %8280 = vmatpush1.bf16.msra.mxu0 %v8279_v61  ;;  %4234 = vmatprep.mubr.f32.mxu0 %v8951_v36  ;;  %v1674_v61 = vld [vmem:[#allocation5 + $0x30e8] sm:$0xff]  ;;  %v8321_v36 = vpack.c.bf16 %v1728_v22, %v1710_v25 }
 0x3e8   :  { %8282 = vmatprep.subr.bf16.mxu0 %v8281_v38  ;;  %v8315_v38 = vpack.c.bf16 %v1655_v42, %v1637_v56  ;;  %v8317_v47 = vpack.c.bf16 %v1692_v62, %v1674_v61 }
 0x3ea   :  { %4235 = vmatmul.mubr.f32.gmra.mrb[36].mxu0 %v8952_v23  ;;  %v8325_v23 = vpack.c.bf16 %v1764_v12, %v1746_v54 }
 0x3eb   :  { %8284 = vmatpush1.bf16.msra.mxu0 %v8283_v63  ;;  %4240 = vmatprep.mubr.f32.mxu0 %v8953_v28  ;;  %v8319_v63 = vpack.c.bf16 %v1691_v41, %v1673_v58  ;;  %v1763_v28 = vld [vmem:[#allocation5 + $0x33b0] sm:$0xff] }
 0x3ec   :  { %8286 = vmatprep.subr.bf16.mxu0 %v8285_v1  ;;  %v1709_v1 = vld [vmem:[#allocation5 + $0x3200] sm:$0xff] }
 0x3ed   :  { %v8323_v45 = vpack.c.bf16 %v1727_v13, %v1709_v1 }
 0x3ee   :  { %4241 = vmatmul.mubr.f32.gmra.mrb[38].mxu0 %v8954_v46  ;;  %v1799_v46 = vld [vmem:[#allocation5 + $0x34d0] sm:$0xff] }
 0x3ef   :  { %8288 = vmatpush1.bf16.msra.mxu0 %v8287_v60  ;;  %4311 = vmatprep.mubr.f32.mxu0 %v8955_v9  ;;  %v1745_v60 = vld [vmem:[#allocation5 + $0x3320] sm:$0xff]  ;;  %v1836_v9 = vld [vmem:[#allocation5 + $0x35f8] sm:$0xff] }
 0x3f0   :  { %8290 = vmatprep.subr.bf16.mxu0 %v8289_v30  ;;  %v1782_v30 = vld [vmem:[#allocation5 + $0x3448] sm:$0xff]  ;;  %v8327_v48 = vpack.c.bf16 %v1763_v28, %v1745_v60 }
 0x3f1   :  { %v8329_v34 = vpack.c.bf16 %v1800_v31, %v1782_v30 }
 0x3f3   :  { %8292 = vmatpush1.bf16.msra.mxu0 %v8291_v37  ;;  %v1818_v37 = vld [vmem:[#allocation5 + $0x3568] sm:$0xff] }
 0x3f4   :  { %8294 = vmatprep.subr.bf16.mxu0 %v8293_v2  ;;  %v8331_v2 = vpack.c.bf16 %v1799_v46, %v1781_v15  ;;  %v8333_v40 = vpack.c.bf16 %v1836_v9, %v1818_v37 }
 0x3f7   :  { %8296 = vmatpush1.bf16.msra.mxu0 %v8295_v6  ;;  %v8956_v6 = vld [vmem:[#allocation2 + $0x20] sm:$0xff] }
 0x3f8   :  { %8298 = vmatprep.subr.bf16.mxu0 %v8297_v7  ;;  %v8957_v7 = vld [vmem:[#allocation2 + $0x58] sm:$0xff] }
 0x3fb   :  { %8300 = vmatpush1.bf16.msra.mxu0 %v8299_v16  ;;  %v1894_v16 = vrot.slane %v10179_v29, %v1861_v53 }
 0x3fc   :  { %8302 = vmatprep.subr.bf16.mxu0 %v8301_v19 }
 0x3ff   :  { %8304 = vmatpush1.bf16.msra.mxu0 %v8303_v5  ;;  %v10181_v5 = vsub.s32 7, %v9234_v18 }
 0x400   :  { %8306 = vmatprep.subr.bf16.mxu0 %v8305_v10 }
 0x401   :  { %v1906_v10 = vrot.slane %v10179_v29, %v10181_v5 }
 0x403   :  { %8308 = vmatpush1.bf16.msra.mxu0 %v8307_v57 }
 0x404   :  { %8310 = vmatprep.subr.bf16.mxu0 %v8309_v4 }
 0x407   :  { %8312 = vmatpush1.bf16.msra.mxu0 %v8311_v8 }
 0x408   :  { %8314 = vmatprep.subr.bf16.mxu0 %v8313_v14 }
 0x40b   :  { %8316 = vmatpush1.bf16.msra.mxu0 %v8315_v38 }
 0x40c   :  { %8318 = vmatprep.subr.bf16.mxu0 %v8317_v47 }
 0x40f   :  { %8320 = vmatpush1.bf16.msra.mxu0 %v8319_v63 }
 0x410   :  { %8322 = vmatprep.subr.bf16.mxu0 %v8321_v36 }
 0x413   :  { %8324 = vmatpush1.bf16.msra.mxu0 %v8323_v45 }
 0x414   :  { %8326 = vmatprep.subr.bf16.mxu0 %v8325_v23 }
 0x417   :  { %8328 = vmatpush1.bf16.msra.mxu0 %v8327_v48  ;;  %v10182_v48 = vlaneseq }
 0x418   :  { %8330 = vmatprep.subr.bf16.mxu0 %v8329_v34 }
 0x419   :  { %v9505_v34 = vand.u32 127, %v10182_v48 }
 0x41b   :  { %8332 = vmatpush1.bf16.msra.mxu0 %v8331_v2  ;;  %10183 = vst [vmem:[#allocation18_spill] sm:$0xff] %v9505_v34  ;;  %vm4788_vm0 = vcmp.lt.s32.totalorder %v9505_v34, 13  ;;  %v9739_v34 = vld [vmem:[#allocation8 + $0x1f0] sm:$0xff] }
 0x41c   :  { %8334 = vmatprep.subr.bf16.mxu0 %v8333_v40  ;;  %10197 = vst [vmem:[#allocation28_spill] sm:$0xff] %v9739_v34 }
 0x41f   :  { %8336 = vmatpush1.bf16.msra.mxu0 %v8335_v20 }
 0x422   :  { %4312 = vmatmul.mubr.f32.vlgmr.msra.gmra.mrb[32].mxu0 %v8956_v6 }
 0x423   :  { %4317 = vmatprep.mubr.f32.mxu0 %v8957_v7 }
 0x426   :  { %4318 = vmatmul.mubr.f32.gmra.mrb[34].mxu0 %v9300_v24  ;;  %v10180_v24 = vsub.s32 6, %v9234_v18 }
 0x427   :  { %4323 = vmatprep.mubr.f32.mxu0 %v9304_v44 }
 0x428   :  { %v1902_v44 = vrot.slane %v10179_v29, %v10180_v24 }
 0x42a   :  { %4324 = vmatmul.mubr.f32.gmra.mrb[36].mxu0 %v10176_v0 }
 0x42b   :  { %4329 = vmatprep.mubr.f32.mxu0 %v10177_v26 }
 0x42e   :  { %4330 = vmatmul.mubr.f32.gmra.mrb[38].mxu0 %v10178_v59 }
 0x433   :  { %v3779_v19 = vpop.f32.mrb[24].mxu0 }
 0x434   :  { %v4046_v17 = vpop.f32.mrb[24].mxu1  ;;  %v3781_v52 = vpop.f32.mrb[25].mxu0  ;;  %v8625_v33 = vadd.f32 %v3779_v19, %v1894_v16 }
 0x435   :  { %v4048_v39 = vpop.f32.mrb[25].mxu1  ;;  %v8626_v55 = vadd.f32 %v3781_v52, %v1898_v3  ;;  %v9474_v4 = vadd.f32 %v4046_v17, %v1902_v44  ;;  %v1839_v17 = vld [vmem:[#allocation7 + $0x10] sm:$0x3] }
 0x436   :  { %v8634_v49 = vadd.f32 %v4048_v39, %v1906_v10 }
 0x437   :  { %v3785_v35 = vpop.f32.mrb[26].mxu0 }
 0x438   :  { %v8627_v53 = vadd.f32 %v3785_v35, %v1894_v16  ;;  %v4052_v21 = vpop.f32.mrb[26].mxu1  ;;  %v3787_v57 = vpop.f32.mrb[27].mxu0 }
 0x439   :  { %v9476_v50 = vadd.f32 %v4052_v21, %v1902_v44  ;;  %v8628_v43 = vadd.f32 %v3787_v57, %v1898_v3  ;;  %v4054_v27 = vpop.f32.mrb[27].mxu1 }
 0x43a   :  { %v8363_v32 = vpack.c.bf16 %v8627_v53, %v8625_v33  ;;  %v8636_v8 = vadd.f32 %v4054_v27, %v1906_v10  ;;  %v10185_v33 = vld [vmem:[#allocation16_spill] sm:$0xff] }
 0x43b   :  { %v8367_v14 = vpack.c.bf16 %v9476_v50, %v9474_v4  ;;  %v8361_v56 = vpack.c.bf16 %v8628_v43, %v8626_v55  ;;  %v3791_v42 = vpop.f32.mrb[28].mxu0  ;;  %v1914_v55 = vrot.slane %v1839_v17, %v10185_v33  ;;  %v5761_v33 = vld [vmem:[#allocation8 + $0xa8] sm:$0xff] }
 0x43c   :  { %v8365_v61 = vpack.c.bf16 %v8636_v8, %v8634_v49  ;;  %v4058_v62 = vpop.f32.mrb[28].mxu1  ;;  %v9480_v38 = vadd.f32 %v3791_v42, %v1894_v16  ;;  %v3793_v47 = vpop.f32.mrb[29].mxu0 }
 0x43d   :  { %v4060_v58 = vpop.f32.mrb[29].mxu1  ;;  %8362 = vmatprep.subr.bf16.mxu1 %v8361_v56  ;;  %v9482_v41 = vadd.f32 %v3793_v47, %v1898_v3  ;;  %v9488_v13 = vadd.f32 %v4058_v62, %v1902_v44 }
 0x43e   :  { %v9484_v25 = vadd.f32 %v4060_v58, %v1906_v10  ;;  %8364 = vmatpush1.bf16.msra.mxu1 %v8363_v32 }
 0x43f   :  { %8366 = vmatprep.subr.bf16.mxu1 %v8365_v61  ;;  %v3797_v22 = vpop.f32.mrb[30].mxu0 }
 0x440   :  { %v4064_v63 = vpop.f32.mrb[30].mxu1  ;;  %v9486_v36 = vadd.f32 %v3797_v22, %v1894_v16  ;;  %v3799_v1 = vpop.f32.mrb[31].mxu0 }
 0x441   :  { %v9490_v54 = vadd.f32 %v4064_v63, %v1902_v44  ;;  %v4066_v12 = vpop.f32.mrb[31].mxu1  ;;  %v9492_v45 = vadd.f32 %v3799_v1, %v1898_v3  ;;  %v10184_v44 = vld [vmem:[#allocation17_spill] sm:$0xff] }
 0x442   :  { %v9494_v23 = vadd.f32 %v4066_v12, %v1906_v10  ;;  %v8375_v60 = vpack.c.bf16 %v9486_v36, %v9480_v38  ;;  %v1910_v39 = vrot.slane %v1839_v17, %v10184_v44  ;;  %v5757_v36 = vld [vmem:[#allocation8 + $0x88] sm:$0xff] }
 0x443   :  { %v8379_v28 = vpack.c.bf16 %v9490_v54, %v9488_v13  ;;  %v8373_v30 = vpack.c.bf16 %v9492_v45, %v9482_v41  ;;  %v5740_v54 = vld [vmem:[#allocation8] sm:$0xff]  ;;  %v5741_v45 = vld [vmem:[#allocation8 + $0x8] sm:$0xff] }
 0x444   :  { %v8377_v31 = vpack.c.bf16 %v9494_v23, %v9484_v25  ;;  %v5756_v25 = vld [vmem:[#allocation8 + $0x80] sm:$0xff]  ;;  %v8387_v23 = vpack.c.bf16 %v5741_v45, %v5740_v54 }
 0x445   :  { %v8385_v13 = vpack.c.bf16 %v5757_v36, %v5756_v25  ;;  %v5856_v36 = vld [vmem:[#allocation8 + $0x3a0] sm:$0xff] }
 0x446   :  { %v5840_v45 = vld [vmem:[#allocation8 + $0x320] sm:$0xff] }
 0x460   :  { %v4552_v15 = vpop.f32.mrb[32].mxu1 }
 0x461   :  { %v4789_v46 = vsel %vm4788_vm0, %v4552_v15, -1e+30  ;;  %v4554_v37 = vpop.f32.mrb[33].mxu1 }
 0x462   :  { %v4794_v9 = vsel %vm4793_vm1, %v4789_v46, -inf }
 0x463   :  { %4795 = vmax.xlane.f32.xlu0 %v4794_v9 }
 0x464   :  { %v4557_v2 = vpop.f32.mrb[34].mxu1 }
 0x465   :  { %v4790_v40 = vsel %vm4788_vm0, %v4557_v2, -1e+30  ;;  %v4559_v51 = vpop.f32.mrb[35].mxu1 }
 0x466   :  { %v4797_v11 = vsel %vm4793_vm1, %v4790_v40, -inf }
 0x467   :  { %4798 = vmax.xlane.f32.xlu0 %v4797_v11 }
 0x478   :  { %v4777_v20 = vpop.f32.mrb[36].mxu1 }
 0x479   :  { %v4791_v6 = vsel %vm4788_vm0, %v4777_v20, -1e+30  ;;  %v4779_v7 = vpop.f32.mrb[37].mxu1 }
 0x47a   :  { %v4800_v0 = vsel %vm4793_vm1, %v4791_v6, -inf }
 0x47b   :  { %4801 = vmax.xlane.f32.xlu1 %v4800_v0 }
 0x47c   :  { %v4782_v26 = vpop.f32.mrb[38].mxu1 }
 0x47d   :  { %v4792_v59 = vsel %vm4788_vm0, %v4782_v26, -1e+30  ;;  %v4784_v29 = vpop.f32.mrb[39].mxu1 }
 0x47e   :  { %v4803_v16 = vsel %vm4793_vm1, %v4792_v59, -inf }
 0x47f   :  { %4804 = vmax.xlane.f32.xlu1 %v4803_v16  ;;  %v9109_v16 = vmov 0.0  }
 0x480   :  { %4908 = vmatprep.mubr.f32.mxu1 %v9109_v16 }
 0x4f0   :  { %v4796_v19 = vpop.xlane.xlu0 %4795 }
 0x4f1   :  { %v4806_v3 = vsub.f32 %v4789_v46, %v4796_v19 }
 0x4f3   :  { %v4810_v52 = vmul.f32 1.442695, %v4806_v3 }
 0x4f4   :  { %v4799_v24 = vpop.xlane.xlu0 %4798 }
 0x4f5   :  { %8822 = vpow2.f32 %v4810_v52  ;;  %v4807_v5 = vsub.f32 %v4790_v40, %v4799_v24  ;;  %v4313_v10 = vpop.f32.mrb[32].mxu0 }
 0x4f6   :  { %v4315_v35 = vpop.f32.mrb[33].mxu0  ;;  %v8641_v21 = vadd.f32 %v4313_v10, %v1910_v39  ;;  %v5760_v10 = vld [vmem:[#allocation8 + $0xa0] sm:$0xff] }
 0x4f7   :  { %v4812_v53 = vmul.f32 1.442695, %v4807_v5  ;;  %v8642_v57 = vadd.f32 %v4315_v35, %v1914_v55  ;;  %v5744_v35 = vld [vmem:[#allocation8 + $0x20] sm:$0xff] }
 0x4f9   :  { %8824 = vpow2.f32 %v4812_v53  ;;  %v4319_v43 = vpop.f32.mrb[34].mxu0  ;;  %v5745_v53 = vld [vmem:[#allocation8 + $0x28] sm:$0xff] }
 0x4fa   :  { %v8643_v27 = vadd.f32 %v4319_v43, %v1910_v39  ;;  %v4321_v49 = vpop.f32.mrb[35].mxu0  ;;  %v5763_v43 = vld [vmem:[#allocation8 + $0xb8] sm:$0xff] }
 0x4fb   :  { %v8644_v32 = vadd.f32 %v4321_v49, %v1914_v55  ;;  %v5746_v49 = vld [vmem:[#allocation8 + $0x30] sm:$0xff] }
 0x4fc   :  { %v8371_v8 = vpack.c.bf16 %v8643_v27, %v8641_v21  ;;  %v8395_v21 = vpack.c.bf16 %v5745_v53, %v5744_v35  ;;  %v5844_v53 = vld [vmem:[#allocation8 + $0x340] sm:$0xff] }
 0x4fd   :  { %v8369_v56 = vpack.c.bf16 %v8644_v32, %v8642_v57  ;;  %v4325_v42 = vpop.f32.mrb[36].mxu0  ;;  %v5762_v57 = vld [vmem:[#allocation8 + $0xb0] sm:$0xff]  ;;  %v5747_v32 = vld [vmem:[#allocation8 + $0x38] sm:$0xff] }
 0x4fe   :  { %v4327_v61 = vpop.f32.mrb[37].mxu0  ;;  %v9523_v58 = vadd.f32 %v4325_v42, %v1910_v39  ;;  %v8397_v27 = vpack.c.bf16 %v5763_v43, %v5762_v57  ;;  %v5765_v42 = vld [vmem:[#allocation8 + $0xc8] sm:$0xff]  ;;  %v5862_v43 = vld [vmem:[#allocation8 + $0x3d0] sm:$0xff] }
 0x4ff   :  { %v8823_v62 = vpop.eup %8822  ;;  %v8646_v22 = vadd.f32 %v4327_v61, %v1914_v55 }
 0x500   :  { %v4818_v47 = vsel %vm4793_vm1, %v8823_v62, 0.0 }
 0x501   :  { %4819 = vadd.xlane.f32.xlu0 %v4818_v47  ;;  %v4331_v63 = vpop.f32.mrb[38].mxu0  ;;  %v5749_v47 = vld [vmem:[#allocation8 + $0x48] sm:$0xff] }
 0x502   :  { %v9525_v1 = vadd.f32 %v4331_v63, %v1910_v39  ;;  %v4333_v12 = vpop.f32.mrb[39].mxu0  ;;  %v5743_v39 = vld [vmem:[#allocation8 + $0x18] sm:$0xff] }
 0x503   :  { %v8825_v48 = vpop.eup %8824  ;;  %v8648_v15 = vadd.f32 %v4333_v12, %v1914_v55  ;;  %v8393_v55 = vpack.c.bf16 %v5761_v33, %v5760_v10  ;;  %v5767_v63 = vld [vmem:[#allocation8 + $0xd8] sm:$0xff]  ;;  %v5750_v12 = vld [vmem:[#allocation8 + $0x50] sm:$0xff]  ;;  %v5860_v33 = vld [vmem:[#allocation8 + $0x3c0] sm:$0xff] }
 0x504   :  { %v4821_v46 = vsel %vm4793_vm1, %v8825_v48, 0.0  ;;  %v8383_v37 = vpack.c.bf16 %v9525_v1, %v9523_v58 }
 0x505   :  { %4822 = vadd.xlane.f32.xlu1 %v4821_v46  ;;  %v8381_v9 = vpack.c.bf16 %v8648_v15, %v8646_v22  ;;  %v5766_v22 = vld [vmem:[#allocation8 + $0xd0] sm:$0xff]  ;;  %v5768_v46 = vld [vmem:[#allocation8 + $0xe0] sm:$0xff] }
 0x506   :  { %v8405_v1 = vpack.c.bf16 %v5767_v63, %v5766_v22  ;;  %v5866_v63 = vld [vmem:[#allocation8 + $0x3f0] sm:$0xff] }
 0x508   :  { %v4802_v2 = vpop.xlane.xlu1 %4801 }
 0x509   :  { %v4808_v40 = vsub.f32 %v4791_v6, %v4802_v2  ;;  %v5752_v2 = vld [vmem:[#allocation8 + $0x60] sm:$0xff] }
 0x50b   :  { %v4814_v51 = vmul.f32 1.442695, %v4808_v40  ;;  %v5753_v40 = vld [vmem:[#allocation8 + $0x68] sm:$0xff] }
 0x50c   :  { %v4805_v11 = vpop.xlane.xlu1 %4804 }
 0x50d   :  { %8826 = vpow2.f32 %v4814_v51  ;;  %v4809_v20 = vsub.f32 %v4792_v59, %v4805_v11  ;;  %v8411_v51 = vpack.c.bf16 %v5753_v40, %v5752_v2  ;;  %v5770_v11 = vld [vmem:[#allocation8 + $0xf0] sm:$0xff]  ;;  %v9560_v40 = vadd.s32 8, %v9234_v18 }
 0x50f   :  { %v4816_v7 = vmul.f32 1.442695, %v4809_v20  ;;  %v5771_v20 = vld [vmem:[#allocation8 + $0xf8] sm:$0xff]  ;;  %vm5316_vm2 = vcmp.lt.s32.totalorder %v9560_v40, 13 }
 0x511   :  { %8828 = vpow2.f32 %v4816_v7  ;;  %v8413_v7 = vpack.c.bf16 %v5771_v20, %v5770_v11 }
 0x517   :  { %v8827_v0 = vpop.eup %8826 }
 0x518   :  { %v4824_v26 = vsel %vm4793_vm1, %v8827_v0, 0.0 }
 0x519   :  { %4825 = vadd.xlane.f32.xlu0 %v4824_v26  ;;  %v5755_v26 = vld [vmem:[#allocation8 + $0x78] sm:$0xff] }
 0x51b   :  { %v8829_v29 = vpop.eup %8828 }
 0x51c   :  { %v4827_v19 = vsel %vm4793_vm1, %v8829_v29, 0.0 }
 0x51d   :  { %4828 = vadd.xlane.f32.xlu1 %v4827_v19  ;;  %v5789_v19 = vld [vmem:[#allocation8 + $0x188] sm:$0xff] }
 0x58e   :  { %v4820_v3 = vpop.xlane.xlu0 %4819 }
 0x58f   :  { %8830 = vrcp.f32 %v4820_v3 }
 0x592   :  { %v4823_v17 = vpop.xlane.xlu1 %4822 }
 0x593   :  { %8832 = vrcp.f32 %v4823_v17  ;;  %v5852_v17 = vld [vmem:[#allocation8 + $0x380] sm:$0xff] }
 0x599   :  { %v8831_v6 = vpop.eup %8830 }
 0x59a   :  { %v4834_v52 = vmul.f32 %v8831_v6, %v8823_v62  ;;  %v5748_v62 = vld [vmem:[#allocation8 + $0x40] sm:$0xff]  ;;  %v5853_v6 = vld [vmem:[#allocation8 + $0x388] sm:$0xff] }
 0x59b   :  { %v8403_v58 = vpack.c.bf16 %v5749_v47, %v5748_v62  ;;  %v5848_v47 = vld [vmem:[#allocation8 + $0x360] sm:$0xff] }
 0x59c   :  { %6385 = vmatmul.mubr.msk.f32.vlgmr.msra.gmra.mrb[40].mxu1 %vm4793_vm1, %v4834_v52 }
 0x59d   :  { %v8833_v59 = vpop.eup %8832  ;;  %8368 = vmatpush1.bf16.msra.mxu1 %v8367_v14  ;;  %4914 = vmatprep.mubr.f32.mxu1 %v9109_v16 }
 0x59e   :  { %8370 = vmatprep.subr.bf16.mxu1 %v8369_v56  ;;  %v4835_v24 = vmul.f32 %v8833_v59, %v8825_v48  ;;  %v5764_v56 = vld [vmem:[#allocation8 + $0xc0] sm:$0xff]  ;;  %v5751_v48 = vld [vmem:[#allocation8 + $0x58] sm:$0xff] }
 0x59f   :  { %v8401_v61 = vpack.c.bf16 %v5765_v42, %v5764_v56  ;;  %v8407_v15 = vpack.c.bf16 %v5751_v48, %v5750_v12  ;;  %v5836_v59 = vld [vmem:[#allocation8 + $0x300] sm:$0xff]  ;;  %v5850_v48 = vld [vmem:[#allocation8 + $0x370] sm:$0xff] }
 0x5a0   :  { %6386 = vmatmul.mubr.msk.f32.gmra.mrb[42].mxu1 %vm4793_vm1, %v4835_v24  ;;  %v5864_v42 = vld [vmem:[#allocation8 + $0x3e0] sm:$0xff] }
 0x5a1   :  { %4985 = vmatprep.mubr.f32.mxu1 %v9109_v16 }
 0x5a4   :  { %6387 = vmatmul.mubr.msk.f32.vlgmr.msra.gmra.mrb[44].mxu1 %vm4793_vm1, %v4834_v52 }
 0x5a5   :  { %8372 = vmatpush1.bf16.msra.mxu1 %v8371_v8  ;;  %4991 = vmatprep.mubr.f32.mxu1 %v9109_v16  ;;  %v8399_v8 = vpack.c.bf16 %v5747_v32, %v5746_v49  ;;  %v5846_v32 = vld [vmem:[#allocation8 + $0x350] sm:$0xff] }
 0x5a6   :  { %8374 = vmatprep.subr.bf16.mxu1 %v8373_v30  ;;  %v4826_v44 = vpop.xlane.xlu0 %4825 }
 0x5a7   :  { %8834 = vrcp.f32 %v4826_v44 }
 0x5a8   :  { %6388 = vmatmul.mubr.msk.f32.gmra.mrb[46].mxu1 %vm4793_vm1, %v4835_v24 }
 0x5a9   :  { %5062 = vmatprep.mubr.f32.mxu1 %v9109_v16 }
 0x5aa   :  { %v4829_v4 = vpop.xlane.xlu1 %4828 }
 0x5ab   :  { %8836 = vrcp.f32 %v4829_v4  ;;  %v5854_v4 = vld [vmem:[#allocation8 + $0x390] sm:$0xff] }
 0x5ac   :  { %6389 = vmatmul.mubr.msk.f32.vlgmr.msra.gmra.mrb[48].mxu1 %vm4793_vm1, %v4834_v52  ;;  %v8481_v52 = vpack.c.bf16 %v5853_v6, %v5852_v17 }
 0x5ad   :  { %8376 = vmatpush1.bf16.msra.mxu1 %v8375_v60  ;;  %5068 = vmatprep.mubr.f32.mxu1 %v9109_v16  ;;  %v5758_v60 = vld [vmem:[#allocation8 + $0x90] sm:$0xff] }
 0x5ae   :  { %8378 = vmatprep.subr.bf16.mxu1 %v8377_v31  ;;  %v5742_v31 = vld [vmem:[#allocation8 + $0x10] sm:$0xff]  ;;  %8482 = vmatprep.subr.bf16.mxu0 %v8481_v52 }
 0x5af   :  { %v8391_v5 = vpack.c.bf16 %v5743_v39, %v5742_v31  ;;  %v5842_v39 = vld [vmem:[#allocation8 + $0x330] sm:$0xff] }
 0x5b0   :  { %6390 = vmatmul.mubr.msk.f32.gmra.mrb[50].mxu1 %vm4793_vm1, %v4835_v24  ;;  %v5837_v24 = vld [vmem:[#allocation8 + $0x308] sm:$0xff] }
 0x5b1   :  { %v8835_v50 = vpop.eup %8834  ;;  %5145 = vmatprep.mubr.f32.mxu1 %v9109_v16  ;;  %v8483_v44 = vpack.c.bf16 %v5837_v24, %v5836_v59 }
 0x5b2   :  { %v4836_v14 = vmul.f32 %v8835_v50, %v8827_v0  ;;  %v5754_v0 = vld [vmem:[#allocation8 + $0x70] sm:$0xff]  ;;  %v5855_v50 = vld [vmem:[#allocation8 + $0x398] sm:$0xff] }
 0x5b3   :  { %8484 = vmatpush3.bf16.msra.mxu0 %v8483_v44 }
 0x5b4   :  { %6391 = vmatmul.mubr.msk.f32.vlgmr.msra.gmra.mrb[52].mxu1 %vm4793_vm1, %v4836_v14 }
 0x5b5   :  { %v8837_v41 = vpop.eup %8836  ;;  %8380 = vmatpush1.bf16.msra.mxu1 %v8379_v28  ;;  %5151 = vmatprep.mubr.f32.mxu1 %v9109_v16  ;;  %v5759_v28 = vld [vmem:[#allocation8 + $0x98] sm:$0xff] }
 0x5b6   :  { %8382 = vmatprep.subr.bf16.mxu1 %v8381_v9  ;;  %v4837_v38 = vmul.f32 %v8837_v41, %v8829_v29  ;;  %v8389_v30 = vpack.c.bf16 %v5759_v28, %v5758_v60  ;;  %v8415_v29 = vpack.c.bf16 %v5755_v26, %v5754_v0  ;;  %v5838_v41 = vld [vmem:[#allocation8 + $0x310] sm:$0xff] }
 0x5b7   :  { %v5858_v28 = vld [vmem:[#allocation8 + $0x3b0] sm:$0xff] }
 0x5b8   :  { %6392 = vmatmul.mubr.msk.f32.gmra.mrb[54].mxu1 %vm4793_vm1, %v4837_v38 }
 0x5b9   :  { %5222 = vmatprep.mubr.f32.mxu1 %v9109_v16 }
 0x5bc   :  { %6393 = vmatmul.mubr.msk.f32.vlgmr.msra.gmra.mrb[56].mxu1 %vm4793_vm1, %v4836_v14 }
 0x5bd   :  { %8384 = vmatpush1.bf16.msra.mxu1 %v8383_v37  ;;  %5228 = vmatprep.mubr.f32.mxu1 %v9109_v16  ;;  %v5769_v37 = vld [vmem:[#allocation8 + $0xe8] sm:$0xff] }
 0x5be   :  { %8386 = vmatprep.subr.bf16.mxu1 %v8385_v13  ;;  %v8409_v9 = vpack.c.bf16 %v5769_v37, %v5768_v46  ;;  %v5857_v13 = vld [vmem:[#allocation8 + $0x3a8] sm:$0xff]  ;;  %v5916_v37 = vld [vmem:[#allocation8 + $0x580] sm:$0xff] }
 0x5bf   :  { %v8489_v54 = vpack.c.bf16 %v5857_v13, %v5856_v36 }
 0x5c0   :  { %6394 = vmatmul.mubr.msk.f32.gmra.mrb[58].mxu1 %vm4793_vm1, %v4837_v38 }
 0x5c1   :  { %5299 = vmatprep.mubr.f32.mxu1 %v9109_v16 }
 0x5c4   :  { %6395 = vmatmul.mubr.msk.f32.vlgmr.msra.gmra.mrb[60].mxu1 %vm4793_vm1, %v4836_v14  ;;  %v8485_v14 = vpack.c.bf16 %v5855_v50, %v5854_v4 }
 0x5c5   :  { %5305 = vmatprep.mubr.f32.mxu1 %v9109_v16  ;;  %8388 = vmatpush3.bf16.msra.mxu1 %v8387_v23  ;;  %v5788_v16 = vld [vmem:[#allocation8 + $0x180] sm:$0xff]  ;;  %v5841_v23 = vld [vmem:[#allocation8 + $0x328] sm:$0xff] }
 0x5c6   :  { %8390 = vmatprep.subr.bf16.mxu1 %v8389_v30  ;;  %v8417_v3 = vpack.c.bf16 %v5789_v19, %v5788_v16  ;;  %8486 = vmatprep.subr.bf16.mxu0 %v8485_v14  ;;  %v8491_v60 = vpack.c.bf16 %v5841_v23, %v5840_v45  ;;  %v5859_v30 = vld [vmem:[#allocation8 + $0x3b8] sm:$0xff] }
 0x5c7   :  { %v8493_v31 = vpack.c.bf16 %v5859_v30, %v5858_v28  ;;  %v9587_v30 = vld [vmem:[#allocation8 + $0x100] sm:$0xff] }
 0x5c8   :  { %6396 = vmatmul.mubr.msk.f32.gmra.mrb[62].mxu1 %vm4793_vm1, %v4837_v38  ;;  %v5839_v38 = vld [vmem:[#allocation8 + $0x318] sm:$0xff] }
 0x5c9   :  { %8392 = vmatpush3.bf16.msra.mxu1 %v8391_v5  ;;  %v8487_v25 = vpack.c.bf16 %v5839_v38, %v5838_v41  ;;  %v5843_v5 = vld [vmem:[#allocation8 + $0x338] sm:$0xff] }
 0x5ca   :  { %8394 = vmatprep.subr.bf16.mxu1 %v8393_v55  ;;  %v8495_v10 = vpack.c.bf16 %v5843_v5, %v5842_v39  ;;  %v5861_v55 = vld [vmem:[#allocation8 + $0x3c8] sm:$0xff] }
 0x5cb   :  { %8488 = vmatpush3.bf16.msra.mxu0 %v8487_v25  ;;  %v8497_v35 = vpack.c.bf16 %v5861_v55, %v5860_v33  ;;  %v9593_v33 = vld [vmem:[#allocation8 + $0x198] sm:$0xff] }
 0x5cc   :  { %8490 = vmatprep.subr.bf16.mxu0 %v8489_v54 }
 0x5cd   :  { %8396 = vmatpush3.bf16.msra.mxu1 %v8395_v21  ;;  %v5845_v21 = vld [vmem:[#allocation8 + $0x348] sm:$0xff] }
 0x5ce   :  { %8398 = vmatprep.subr.bf16.mxu1 %v8397_v27  ;;  %v8499_v57 = vpack.c.bf16 %v5845_v21, %v5844_v53  ;;  %v5863_v27 = vld [vmem:[#allocation8 + $0x3d8] sm:$0xff] }
 0x5cf   :  { %8492 = vmatpush3.bf16.msra.mxu0 %v8491_v60  ;;  %v8501_v49 = vpack.c.bf16 %v5863_v27, %v5862_v43 }
 0x5d0   :  { %8494 = vmatprep.subr.bf16.mxu0 %v8493_v31  ;;  %v9589_v31 = vld [vmem:[#allocation8 + $0x108] sm:$0xff] }
 0x5d1   :  { %8400 = vmatpush3.bf16.msra.mxu1 %v8399_v8  ;;  %v5847_v8 = vld [vmem:[#allocation8 + $0x358] sm:$0xff] }
 0x5d2   :  { %8402 = vmatprep.subr.bf16.mxu1 %v8401_v61  ;;  %v8503_v56 = vpack.c.bf16 %v5847_v8, %v5846_v32  ;;  %v5865_v61 = vld [vmem:[#allocation8 + $0x3e8] sm:$0xff] }
 0x5d3   :  { %8496 = vmatpush3.bf16.msra.mxu0 %v8495_v10  ;;  %v8505_v62 = vpack.c.bf16 %v5865_v61, %v5864_v42  ;;  %v9591_v10 = vld [vmem:[#allocation8 + $0x190] sm:$0xff] }
 0x5d4   :  { %8498 = vmatprep.subr.bf16.mxu0 %v8497_v35 }
 0x5d5   :  { %8404 = vmatpush3.bf16.msra.mxu1 %v8403_v58  ;;  %v5849_v58 = vld [vmem:[#allocation8 + $0x368] sm:$0xff] }
 0x5d6   :  { %8406 = vmatprep.subr.bf16.mxu1 %v8405_v1  ;;  %v8507_v22 = vpack.c.bf16 %v5849_v58, %v5848_v47  ;;  %v5867_v1 = vld [vmem:[#allocation8 + $0x3f8] sm:$0xff] }
 0x5d7   :  { %8500 = vmatpush3.bf16.msra.mxu0 %v8499_v57  ;;  %v8509_v12 = vpack.c.bf16 %v5867_v1, %v5866_v63 }
 0x5d8   :  { %8502 = vmatprep.subr.bf16.mxu0 %v8501_v49 }
 0x5d9   :  { %8408 = vmatpush3.bf16.msra.mxu1 %v8407_v15  ;;  %v5851_v15 = vld [vmem:[#allocation8 + $0x378] sm:$0xff] }
 0x5da   :  { %8410 = vmatprep.subr.bf16.mxu1 %v8409_v9  ;;  %v8511_v46 = vpack.c.bf16 %v5851_v15, %v5850_v48  ;;  %v5917_v9 = vld [vmem:[#allocation8 + $0x588] sm:$0xff]  ;;  %v9620_v48 = vld [vmem:[#allocation8 + $0x118] sm:$0xff] }
 0x5db   :  { %8504 = vmatpush3.bf16.msra.mxu0 %v8503_v56  ;;  %v8545_v2 = vpack.c.bf16 %v5917_v9, %v5916_v37 }
 0x5dc   :  { %8506 = vmatprep.subr.bf16.mxu0 %v8505_v62 }
 0x5dd   :  { %8412 = vmatpush3.bf16.msra.mxu1 %v8411_v51 }
 0x5de   :  { %8414 = vmatprep.subr.bf16.mxu1 %v8413_v7 }
 0x5df   :  { %8508 = vmatpush3.bf16.msra.mxu0 %v8507_v22 }
 0x5e0   :  { %8510 = vmatprep.subr.bf16.mxu0 %v8509_v12  ;;  %v9618_v12 = vld [vmem:[#allocation8 + $0x110] sm:$0xff] }
 0x5e1   :  { %8416 = vmatpush3.bf16.msra.mxu1 %v8415_v29 }
 0x5e2   :  { %8418 = vmatprep.subr.bf16.mxu1 %v8417_v3 }
 0x5e3   :  { %8512 = vmatpush3.bf16.msra.mxu0 %v8511_v46 }
 0x5e4   :  { %8546 = vmatprep.subr.bf16.mxu0 %v8545_v2 }
 0x66f   :  { %v4910_v51 = vpop.f32.mrb[40].mxu1 }
 0x670   :  { %v4912_v11 = vpop.f32.mrb[41].mxu1 }
 0x673   :  { %v4916_v20 = vpop.f32.mrb[42].mxu1 }
 0x674   :  { %v5323_v7 = vsel %vm5316_vm2, %v4916_v20, 0.0  ;;  %v4918_v0 = vpop.f32.mrb[43].mxu1 }
 0x675   :  { %v5341_v26 = vadd.f32 %v5323_v7, %v4910_v51  ;;  %v5324_v29 = vsel %vm5316_vm2, %v4918_v0, 0.0 }
 0x676   :  { %v5348_v16 = vadd.f32 %v5324_v29, %v4912_v11 }
 0x677   :  { %v5342_v19 = vrot.slane %v5341_v26, 4  ;;  %v9567_v3 = vpop.f32.mrb[44].mxu1 }
 0x678   :  { %v5349_v17 = vrot.slane %v5348_v16, 4  ;;  %v9569_v18 = vpop.f32.mrb[45].mxu1 }
 0x679   :  { %v5343_v6 = vadd.f32 %v5342_v19, %v5341_v26 }
 0x67a   :  { %v5350_v52 = vadd.f32 %v5349_v17, %v5348_v16 }
 0x67b   :  { %v5344_v59 = vrot.slane %v5343_v6, 2  ;;  %v9571_v24 = vpop.f32.mrb[46].mxu1 }
 0x67c   :  { %v5351_v44 = vrot.slane %v5350_v52, 2  ;;  %v5325_v4 = vsel %vm5316_vm2, %v9571_v24, 0.0  ;;  %v9576_v50 = vpop.f32.mrb[47].mxu1 }
 0x67d   :  { %v5345_v14 = vadd.f32 %v5344_v59, %v5343_v6  ;;  %v5355_v41 = vadd.f32 %v5325_v4, %v9567_v3  ;;  %v5326_v38 = vsel %vm5316_vm2, %v9576_v50, 0.0  ;;  %v9637_v59 = vld [vmem:[#allocation8 + $0x128] sm:$0xff] }
 0x67e   :  { %v5352_v25 = vadd.f32 %v5351_v44, %v5350_v52  ;;  %v5362_v36 = vadd.f32 %v5326_v38, %v9569_v18  ;;  %v9635_v52 = vld [vmem:[#allocation8 + $0x120] sm:$0xff] }
 0x67f   :  { %v5346_v13 = vrot.slane %v5345_v14, 1  ;;  %v5356_v54 = vrot.slane %v5355_v41, 4  ;;  %v9583_v45 = vpop.f32.mrb[48].mxu1 }
 0x680   :  { %v5353_v23 = vrot.slane %v5352_v25, 1  ;;  %v5363_v60 = vrot.slane %v5362_v36, 4  ;;  %v9585_v28 = vpop.f32.mrb[49].mxu1 }
 0x681   :  { %v5347_v39 = vadd.f32 %v5346_v13, %v5345_v14  ;;  %v5357_v5 = vadd.f32 %v5356_v54, %v5355_v41  ;;  %v9725_v41 = vld [vmem:[#allocation8 + $0x160] sm:$0xff]  ;;  %v9727_v14 = vld [vmem:[#allocation8 + $0x168] sm:$0xff] }
 0x682   :  { %v5354_v55 = vadd.f32 %v5353_v23, %v5352_v25  ;;  %v5364_v35 = vadd.f32 %v5363_v60, %v5362_v36  ;;  %10195 = vst [vmem:[#allocation26_spill] sm:$0xff] %v9725_v41  ;;  %10196 = vst [vmem:[#allocation27_spill] sm:$0xff] %v9727_v14 }
 0x683   :  { %v9595_v53 = vmul.f32 0.07692308, %v5347_v39  ;;  %v5358_v21 = vrot.slane %v5357_v5, 2  ;;  %v9597_v57 = vpop.f32.mrb[50].mxu1 }
 0x684   :  { %v9601_v27 = vmul.f32 0.07692308, %v5354_v55  ;;  %v5365_v49 = vrot.slane %v5364_v35, 2  ;;  %v5327_v32 = vsel %vm5316_vm2, %v9597_v57, 0.0  ;;  %v9606_v8 = vpop.f32.mrb[51].mxu1 }
 0x685   :  { %v5438_v42 = vsub.f32 %v4910_v51, %v9595_v53  ;;  %v5444_v61 = vsub.f32 %v4916_v20, %v9595_v53  ;;  %v5359_v62 = vadd.f32 %v5358_v21, %v5357_v5  ;;  %v5369_v47 = vadd.f32 %v5327_v32, %v9583_v45  ;;  %v9626_v51 = vld [vmem:[#allocation8 + $0x1a0] sm:$0xff] }
 0x686   :  { %v5439_v58 = vsub.f32 %v4912_v11, %v9601_v27  ;;  %v5445_v22 = vsub.f32 %v4918_v0, %v9601_v27  ;;  %v5366_v63 = vadd.f32 %v5365_v49, %v5364_v35  ;;  %v5328_v1 = vsel %vm5316_vm2, %v9606_v8, 0.0  ;;  %v9628_v11 = vld [vmem:[#allocation8 + $0x1a8] sm:$0xff] }
 0x687   :  { %v5468_v15 = vsel %vm5316_vm2, %v5444_v61, 0.0  ;;  %v5486_v46 = vmul.f32 %v5438_v42, %v5438_v42  ;;  %v5360_v37 = vrot.slane %v5359_v62, 1  ;;  %v5370_v9 = vrot.slane %v5369_v47, 4  ;;  %v9624_v2 = vpop.f32.mrb[52].mxu1 }
 0x688   :  { %v5492_v20 = vmul.f32 %v5468_v15, %v5468_v15  ;;  %v5469_v7 = vsel %vm5316_vm2, %v5445_v22, 0.0  ;;  %v5487_v0 = vmul.f32 %v5439_v58, %v5439_v58  ;;  %v5367_v26 = vrot.slane %v5366_v63, 1  ;;  %v9632_v29 = vpop.f32.mrb[53].mxu1 }
 0x689   :  { %v5493_v16 = vmul.f32 %v5469_v7, %v5469_v7  ;;  %v5361_v19 = vadd.f32 %v5360_v37, %v5359_v62  ;;  %v5371_v17 = vadd.f32 %v5370_v9, %v5369_v47  ;;  %v5376_v6 = vadd.f32 %v5328_v1, %v9585_v28  ;;  %v9678_v7 = vld [vmem:[#allocation8 + $0x138] sm:$0xff] }
 0x68a   :  { %v5510_v44 = vadd.f32 %v5492_v20, %v5486_v46  ;;  %v5368_v4 = vadd.f32 %v5367_v26, %v5366_v63  ;;  %v9676_v20 = vld [vmem:[#allocation8 + $0x130] sm:$0xff] }
 0x68b   :  { %v5517_v38 = vadd.f32 %v5493_v16, %v5487_v0  ;;  %v9643_v25 = vmul.f32 0.07692308, %v5361_v19  ;;  %v5372_v36 = vrot.slane %v5371_v17, 2  ;;  %v5377_v13 = vrot.slane %v5376_v6, 4  ;;  %v9645_v54 = vpop.f32.mrb[54].mxu1 }
 0x68c   :  { %v5511_v23 = vrot.slane %v5510_v44, 4  ;;  %v9647_v60 = vmul.f32 0.07692308, %v5368_v4  ;;  %v5335_v39 = vsel %vm5316_vm2, %v9645_v54, 0.0  ;;  %v9652_v5 = vpop.f32.mrb[55].mxu1 }
 0x68d   :  { %v5518_v35 = vrot.slane %v5517_v38, 4  ;;  %v5440_v21 = vsub.f32 %v9567_v3, %v9643_v25  ;;  %v5446_v49 = vsub.f32 %v9571_v24, %v9643_v25  ;;  %v5373_v32 = vadd.f32 %v5372_v36, %v5371_v17  ;;  %v9668_v3 = vld [vmem:[#allocation8 + $0x1b0] sm:$0xff]  ;;  %v9670_v24 = vld [vmem:[#allocation8 + $0x1b8] sm:$0xff]  ;;  %v9680_v17 = vld [vmem:[#allocation8 + $0x1c0] sm:$0xff] }
 0x68e   :  { %v5512_v42 = vadd.f32 %v5511_v23, %v5510_v44  ;;  %v5441_v61 = vsub.f32 %v9569_v18, %v9647_v60  ;;  %v5447_v62 = vsub.f32 %v9576_v50, %v9647_v60  ;;  %v5378_v47 = vadd.f32 %v5377_v13, %v5376_v6  ;;  %v9682_v6 = vld [vmem:[#allocation8 + $0x1c8] sm:$0xff]  ;;  %v9690_v13 = vld [vmem:[#allocation8 + $0x140] sm:$0xff] }
 0x68f   :  { %v5519_v58 = vadd.f32 %v5518_v35, %v5517_v38  ;;  %v5470_v22 = vsel %vm5316_vm2, %v5446_v49, 0.0  ;;  %v5488_v63 = vmul.f32 %v5440_v21, %v5440_v21  ;;  %v5374_v1 = vrot.slane %v5373_v32, 1  ;;  %v9666_v15 = vpop.f32.mrb[56].mxu1  ;;  %10186 = vst [vmem:[#allocation19_spill] sm:$0xff] %v9690_v13  ;;  %v9692_v23 = vld [vmem:[#allocation8 + $0x148] sm:$0xff]  ;;  %v9755_v13 = vld [vmem:[#allocation8 + $0x170] sm:$0xff] }
 0x690   :  { %v5513_v46 = vrot.slane %v5512_v42, 2  ;;  %v5494_v37 = vmul.f32 %v5470_v22, %v5470_v22  ;;  %v5471_v18 = vsel %vm5316_vm2, %v5447_v62, 0.0  ;;  %v5489_v9 = vmul.f32 %v5441_v61, %v5441_v61  ;;  %v9674_v50 = vpop.f32.mrb[57].mxu1  ;;  %10187 = vst [vmem:[#allocation20_spill] sm:$0xff] %v9692_v23  ;;  %v9700_v61 = vld [vmem:[#allocation8 + $0x1d0] sm:$0xff]  ;;  %v9702_v62 = vld [vmem:[#allocation8 + $0x1d8] sm:$0xff] }
 0x691   :  { %v5520_v0 = vrot.slane %v5519_v58, 2  ;;  %v5495_v26 = vmul.f32 %v5471_v18, %v5471_v18  ;;  %v5375_v16 = vadd.f32 %v5374_v1, %v5373_v32  ;;  %v5379_v19 = vrot.slane %v5378_v47, 2  ;;  %10189 = vst [vmem:[#allocation17_spill] sm:$0xff] %v9700_v61  ;;  %10190 = vst [vmem:[#allocation16_spill] sm:$0xff] %v9702_v62  ;;  %v9704_v22 = vld [vmem:[#allocation8 + $0x150] sm:$0xff]  ;;  %v9757_v62 = vld [vmem:[#allocation8 + $0x178] sm:$0xff] }
 0x692   :  { %v5524_v44 = vadd.f32 %v5494_v37, %v5488_v63  ;;  %v5383_v4 = vadd.f32 %v5335_v39, %v9624_v2  ;;  %v5336_v38 = vsel %vm5316_vm2, %v9652_v5, 0.0  ;;  %10191 = vst [vmem:[#allocation22_spill] sm:$0xff] %v9704_v22  ;;  %v5514_v63 = vadd.f32 %v5513_v46, %v5512_v42  ;;  %10199 = vst [vmem:[#allocation30_spill] sm:$0xff] %v9755_v13 }
 0x693   :  { %v5531_v35 = vadd.f32 %v5495_v26, %v5489_v9  ;;  %v9694_v21 = vmul.f32 0.07692308, %v5375_v16  ;;  %v5380_v49 = vadd.f32 %v5379_v19, %v5378_v47  ;;  %v9696_v32 = vpop.f32.mrb[58].mxu1  ;;  %v5390_v37 = vadd.f32 %v5336_v38, %v9632_v29  ;;  %v9711_v9 = vld [vmem:[#allocation8 + $0x158] sm:$0xff]  ;;  %v9713_v26 = vld [vmem:[#allocation8 + $0x1e0] sm:$0xff]  ;;  %v9715_v16 = vld [vmem:[#allocation8 + $0x1e8] sm:$0xff] }
 0x694   :  { %v5384_v1 = vrot.slane %v5383_v4, 4  ;;  %v9707_v18 = vpop.f32.mrb[59].mxu1  ;;  %10192 = vst [vmem:[#allocation23_spill] sm:$0xff] %v9711_v9  ;;  %10193 = vst [vmem:[#allocation24_spill] sm:$0xff] %v9713_v26  ;;  %v5521_v19 = vadd.f32 %v5520_v0, %v5519_v58  ;;  %v5525_v38 = vrot.slane %v5524_v44, 4 }
 0x695   :  { %10188 = vst [vmem:[#allocation21_spill] sm:$0xff] %v9694_v21  ;;  %10194 = vst [vmem:[#allocation25_spill] sm:$0xff] %v9715_v16  ;;  %v5442_v39 = vsub.f32 %v9583_v45, %v9694_v21  ;;  %v5448_v42 = vsub.f32 %v9597_v57, %v9694_v21  ;;  %v5381_v36 = vrot.slane %v5380_v49, 1  ;;  %v9741_v21 = vld [vmem:[#allocation8 + $0x1f8] sm:$0xff]  ;;  %v5391_v61 = vrot.slane %v5390_v37, 4 }
 0x696   :  { %v5385_v55 = vadd.f32 %v5384_v1, %v5383_v4  ;;  %v5515_v4 = vrot.slane %v5514_v63, 1  ;;  %v5532_v1 = vrot.slane %v5531_v35, 4  ;;  %10198 = vst [vmem:[#allocation29_spill] sm:$0xff] %v9741_v21  ;;  %v5526_v57 = vadd.f32 %v5525_v38, %v5524_v44  ;;  %10200 = vst [vmem:[#allocation31_spill] sm:$0xff] %v9757_v62 }
 0x697   :  { %v5472_v58 = vsel %vm5316_vm2, %v5448_v42, 0.0  ;;  %v5490_v45 = vmul.f32 %v5442_v39, %v5442_v39  ;;  %v9731_v0 = vpop.f32.mrb[60].mxu1  ;;  %v5382_v47 = vadd.f32 %v5381_v36, %v5380_v49  ;;  %v5522_v42 = vrot.slane %v5521_v19, 1 }
 0x698   :  { %v5496_v56 = vmul.f32 %v5472_v58, %v5472_v58  ;;  %v9737_v43 = vpop.f32.mrb[61].mxu1  ;;  %v5386_v39 = vrot.slane %v5385_v55, 2  ;;  %v5337_v36 = vsel %vm5316_vm2, %v9696_v32, 0.0  ;;  %v5392_v58 = vadd.f32 %v5391_v61, %v5390_v37 }
 0x699   :  { %v9745_v9 = vmul.f32 0.07692308, %v5382_v47  ;;  %v5397_v46 = vadd.f32 %v5337_v36, %v9666_v15  ;;  %v5533_v44 = vadd.f32 %v5532_v1, %v5531_v35  ;;  %v5523_v37 = vadd.f32 %v5522_v42, %v5521_v19 }
 0x69a   :  { %v5538_v22 = vadd.f32 %v5496_v56, %v5490_v45  ;;  %v5387_v49 = vadd.f32 %v5386_v39, %v5385_v55  ;;  %v5516_v56 = vadd.f32 %v5515_v4, %v5514_v63  ;;  %v5393_v45 = vrot.slane %v5392_v58, 2 }
 0x69b   :  { %v9751_v26 = vpop.f32.mrb[62].mxu1  ;;  %v5443_v47 = vsub.f32 %v9585_v28, %v9745_v9  ;;  %v5449_v55 = vsub.f32 %v9606_v8, %v9745_v9  ;;  %v5398_v39 = vrot.slane %v5397_v46, 4  ;;  %v5527_v36 = vrot.slane %v5526_v57, 2 }
 0x69c   :  { %v9763_v61 = vpop.f32.mrb[63].mxu1  ;;  %v5388_v38 = vrot.slane %v5387_v49, 1  ;;  %v5539_v63 = vrot.slane %v5538_v22, 4  ;;  %v5394_v1 = vadd.f32 %v5393_v45, %v5392_v58  ;;  %v9769_v21 = vmul.f32 0.083333336, %v5516_v56 }
 0x69d   :  { %v5473_v16 = vsel %vm5316_vm2, %v5449_v55, 0.0  ;;  %v5491_v34 = vmul.f32 %v5443_v47, %v5443_v47  ;;  %v5534_v8 = vrot.slane %v5533_v44, 2  ;;  %v5399_v41 = vadd.f32 %v5398_v39, %v5397_v46 }
 0x69e   :  { %v5497_v4 = vmul.f32 %v5473_v16, %v5473_v16  ;;  %v5389_v28 = vadd.f32 %v5388_v38, %v5387_v49  ;;  %v5338_v19 = vsel %vm5316_vm2, %v9707_v18, 0.0  ;;  %v9774_v42 = vmul.f32 0.083333336, %v5523_v37 }
 0x69f   :  { %v5395_v14 = vrot.slane %v5394_v1, 1  ;;  %v9778_v35 = vadd.f32 %v5527_v36, %v5526_v57  ;;  %v5400_v16 = vrot.slane %v5399_v41, 2  ;;  %v5404_v49 = vadd.f32 %v5338_v19, %v9674_v50 }
 0x6a0   :  { %v5545_v55 = vadd.f32 %v5497_v4, %v5491_v34  ;;  %v9776_v47 = vmul.f32 0.07692308, %v5389_v28  ;;  %v5339_v46 = vsel %vm5316_vm2, %v9751_v26, 0.0  ;;  %v5540_v58 = vadd.f32 %v5539_v63, %v5538_v22 }
 0x6a1   :  { %v5396_v34 = vadd.f32 %v5395_v14, %v5394_v1  ;;  %v9788_v38 = vadd.f32 %v5534_v8, %v5533_v44  ;;  %v5401_v45 = vadd.f32 %v5400_v16, %v5399_v41  ;;  %v5405_v57 = vrot.slane %v5404_v49, 4 }
 0x6a2   :  { %v5450_v56 = vsub.f32 %v9624_v2, %v9776_v47  ;;  %v5456_v37 = vsub.f32 %v9645_v54, %v9776_v47  ;;  %v5411_v39 = vadd.f32 %v5339_v46, %v9731_v0  ;;  %v5546_v36 = vrot.slane %v5545_v55, 4 }
 0x6a3   :  { %v5433_v19 = vmul.f32 0.07692308, %v5396_v34  ;;  %v5402_v2 = vrot.slane %v5401_v45, 1  ;;  %v5406_v13 = vadd.f32 %v5405_v57, %v5404_v49  ;;  %v5541_v62 = vrot.slane %v5540_v58, 2 }
 0x6a4   :  { %v5480_v4 = vsel %vm5316_vm2, %v5456_v37, 0.0  ;;  %v5498_v28 = vmul.f32 %v5450_v56, %v5450_v56  ;;  %v5412_v41 = vrot.slane %v5411_v39, 4  ;;  %v5536_v44 = vrot.slane %v9788_v38, 1 }
 0x6a5   :  { %v5504_v63 = vmul.f32 %v5480_v4, %v5480_v4  ;;  %v5451_v14 = vsub.f32 %v9632_v29, %v5433_v19  ;;  %v5457_v54 = vsub.f32 %v9652_v5, %v5433_v19  ;;  %v5403_v8 = vadd.f32 %v5402_v2, %v5401_v45 }
 0x6a6   :  { %v5407_v16 = vrot.slane %v5406_v13, 2  ;;  %v5547_v46 = vadd.f32 %v5546_v36, %v5545_v55  ;;  %v5413_v34 = vadd.f32 %v5412_v41, %v5411_v39  ;;  %v9799_v23 = vadd.f32 %v5541_v62, %v5540_v58 }
 0x6a7   :  { %v5552_v1 = vadd.f32 %v5504_v63, %v5498_v28  ;;  %v5481_v56 = vsel %vm5316_vm2, %v5457_v54, 0.0  ;;  %v5499_v37 = vmul.f32 %v5451_v14, %v5451_v14  ;;  %v5434_v49 = vmul.f32 0.07692308, %v5403_v8 }
 0x6a8   :  { %v5505_v22 = vmul.f32 %v5481_v56, %v5481_v56  ;;  %v5408_v57 = vadd.f32 %v5407_v16, %v5406_v13  ;;  %v5414_v29 = vrot.slane %v5413_v34, 2  ;;  %v5340_v5 = vsel %vm5316_vm2, %v9763_v61, 0.0 }
 0x6a9   :  { %v5553_v4 = vrot.slane %v5552_v1, 4  ;;  %v5705_v45 = vsel %vm5703_vm3, %v5433_v19, %v9601_v27  ;;  %v5452_v28 = vsub.f32 %v9666_v15, %v5434_v49  ;;  %v5458_v39 = vsub.f32 %v9696_v32, %v5434_v49 }
 0x6aa   :  { %v5559_v36 = vadd.f32 %v5505_v22, %v5499_v37  ;;  %6003 = vmatprep.mubr.f32.mxu1 %v5705_v45  ;;  %v5548_v63 = vrot.slane %v5547_v46, 2  ;;  %v5409_v2 = vrot.slane %v5408_v57, 1  ;;  %v5415_v13 = vadd.f32 %v5414_v29, %v5413_v34 }
 0x6ab   :  { %v5554_v55 = vadd.f32 %v5553_v4, %v5552_v1  ;;  %v5418_v62 = vadd.f32 %v5340_v5, %v9737_v43  ;;  %v5482_v54 = vsel %vm5316_vm2, %v5458_v39, 0.0  ;;  %v5500_v41 = vmul.f32 %v5452_v28, %v5452_v28 }
 0x6ac   :  { %v5560_v14 = vrot.slane %v5559_v36, 4  ;;  %v5543_v27 = vrot.slane %v9799_v23, 1  ;;  %v5506_v19 = vmul.f32 %v5482_v54, %v5482_v54  ;;  %v5410_v22 = vadd.f32 %v5409_v2, %v5408_v57 }
 0x6ad   :  { %v5555_v58 = vrot.slane %v5554_v55, 2  ;;  %v5416_v1 = vrot.slane %v5415_v13, 1  ;;  %v5419_v32 = vrot.slane %v5418_v62, 4  ;;  %v5704_v16 = vsel %vm5703_vm3, %v9776_v47, %v9595_v53 }
 0x6ae   :  { %v5561_v8 = vadd.f32 %v5560_v14, %v5559_v36  ;;  %v5566_v56 = vadd.f32 %v5506_v19, %v5500_v41  ;;  %v5435_v37 = vmul.f32 0.07692308, %v5410_v22  ;;  %6004 = vmatmul.mubr.f32.vlgmr.msra.gmra.mrb[64].mxu1 %v5704_v16  ;;  %v9817_v4 = vsel %vm5703_vm3, %v5434_v49, %v9643_v25 }
 0x6af   :  { %v5556_v15 = vadd.f32 %v5555_v58, %v5554_v55  ;;  %v5417_v34 = vadd.f32 %v5416_v1, %v5415_v13  ;;  %v5549_v29 = vadd.f32 %v5548_v63, %v5547_v46  ;;  %v5420_v57 = vadd.f32 %v5419_v32, %v5418_v62  ;;  %v9849_v1 = vld [vmem:[#allocation8 + $0x280] sm:$0xff]  ;;  %v9861_v32 = vld [vmem:[#allocation8 + $0x590] sm:$0xff] }
 0x6b0   :  { %v5562_v45 = vrot.slane %v5561_v8, 2  ;;  %v10201_v55 = vpack.c.bf16 %v9589_v31, %v9587_v30  ;;  %v5567_v36 = vrot.slane %v5566_v56, 4  ;;  %v5453_v28 = vsub.f32 %v9674_v50, %v5435_v37 }
 0x6b1   :  { %v5557_v5 = vrot.slane %v5556_v15, 1  ;;  %v5459_v53 = vsub.f32 %v9707_v18, %v5435_v37  ;;  %v9824_v47 = vmul.f32 0.07692308, %v5417_v34  ;;  %v10202_v39 = vpack.c.bf16 %v9593_v33, %v9591_v10 }
 0x6b2   :  { %8420 = vmatpush3.bf16.msra.mxu1 %v10201_v55  ;;  %v5563_v25 = vadd.f32 %v5562_v45, %v5561_v8  ;;  %v5421_v46 = vrot.slane %v5420_v57, 2  ;;  %v5707_v49 = vsel %vm5703_vm3, %v5435_v37, %v9647_v60  ;;  %8838 = vrsqrt.f32 %v9774_v42 }
 0x6b3   :  { %8422 = vmatprep.subr.bf16.mxu1 %v10202_v39  ;;  %v5568_v30 = vadd.f32 %v5567_v36, %v5566_v56  ;;  %v5483_v31 = vsel %vm5316_vm2, %v5459_v53, 0.0  ;;  %v5501_v50 = vmul.f32 %v5453_v28, %v5453_v28  ;;  %v5454_v18 = vsub.f32 %v9731_v0, %v9824_v47  ;;  %6073 = vmatprep.mubr.f32.mxu1 %v5707_v49 }
 0x6b4   :  { %v5558_v63 = vadd.f32 %v5557_v5, %v5556_v15  ;;  %v5564_v2 = vrot.slane %v5563_v25, 1  ;;  %v5507_v10 = vmul.f32 %v5483_v31, %v5483_v31  ;;  %v5460_v33 = vsub.f32 %v9751_v26, %v9824_v47 }
 0x6b5   :  { %v10203_v60 = vpack.c.bf16 %v9620_v48, %v9618_v12  ;;  %v10204_v13 = vrot.slane %v9778_v35, 1  ;;  %v5550_v58 = vrot.slane %v5549_v29, 1  ;;  %v5502_v14 = vmul.f32 %v5454_v18, %v5454_v18  ;;  %v9851_v12 = vld [vmem:[#allocation8 + $0x288] sm:$0xff] }
 0x6b6   :  { %v5422_v54 = vadd.f32 %v5421_v46, %v5420_v57  ;;  %v10205_v0 = vpack.c.bf16 %v9628_v11, %v9626_v51  ;;  %v5565_v41 = vadd.f32 %v5564_v2, %v5563_v25  ;;  %v5569_v19 = vrot.slane %v5568_v30, 2  ;;  %v9857_v51 = vld [vmem:[#allocation8 + $0x500] sm:$0xff]  ;;  %v9859_v11 = vld [vmem:[#allocation8 + $0x508] sm:$0xff] }
 0x6b7   :  { %8424 = vmatpush3.bf16.msra.mxu1 %v10203_v60  ;;  %v5530_v62 = vadd.f32 %v10204_v13, %v9778_v35  ;;  %v5573_v22 = vadd.f32 %v5507_v10, %v5501_v50  ;;  %v5484_v26 = vsel %vm5316_vm2, %v5460_v33, 0.0  ;;  %v5537_v48 = vadd.f32 %v5536_v44, %v9788_v38  ;;  %v10210_v33 = vld [vmem:[#allocation20_spill] sm:$0xff] }
 0x6b8   :  { %8426 = vmatprep.subr.bf16.mxu1 %v10205_v0  ;;  %v5544_v35 = vadd.f32 %v5543_v27, %v9799_v23  ;;  %v5508_v15 = vmul.f32 %v5484_v26, %v5484_v26  ;;  %v5423_v8 = vrot.slane %v5422_v54, 1  ;;  %v9863_v16 = vmul.f32 0.083333336, %v5558_v63  ;;  %v9871_v23 = vld [vmem:[#allocation8 + $0x598] sm:$0xff]  ;;  %v10213_v13 = vld [vmem:[#allocation16_spill] sm:$0xff] }
 0x6b9   :  { %v9865_v56 = vmul.f32 0.083333336, %v5565_v41  ;;  %v5574_v37 = vrot.slane %v5573_v22, 4  ;;  %v10206_v34 = vpack.c.bf16 %v9637_v59, %v9635_v52  ;;  %8840 = vrsqrt.f32 %v9769_v21 }
 0x6ba   :  { %v5551_v38 = vadd.f32 %v5550_v58, %v5549_v29  ;;  %v5580_v44 = vadd.f32 %v5508_v15, %v5502_v14  ;;  %v5424_v27 = vadd.f32 %v5423_v8, %v5422_v54  ;;  %v10207_v5 = vpack.c.bf16 %v9670_v24, %v9668_v3 }
 0x6bb   :  { %8428 = vmatpush3.bf16.msra.mxu1 %v10206_v34  ;;  %v8449_v45 = vpack.c.bf16 %v9851_v12, %v9849_v1  ;;  %v5570_v57 = vadd.f32 %v5569_v19, %v5568_v30  ;;  %v5575_v55 = vadd.f32 %v5574_v37, %v5573_v22  ;;  %8842 = vrsqrt.f32 %v9865_v56  ;;  %v10216_v19 = vld [vmem:[#allocation21_spill] sm:$0xff]  ;;  %v10217_v37 = vld [vmem:[#allocation23_spill] sm:$0xff]  ;;  %v10218_v34 = vld [vmem:[#allocation22_spill] sm:$0xff] }
 0x6bc   :  { %8430 = vmatprep.subr.bf16.mxu1 %v10207_v5  ;;  %v8547_v52 = vpack.c.bf16 %v9859_v11, %v9857_v51  ;;  %v9881_v59 = vmul.f32 0.083333336, %v5530_v62  ;;  %v5581_v36 = vrot.slane %v5580_v44, 4  ;;  %v5437_v29 = vmul.f32 0.07692308, %v5424_v27  ;;  %v8839_v53 = vpop.eup %8838  ;;  %v10214_v62 = vld [vmem:[#allocation17_spill] sm:$0xff] }
 0x6bd   :  { %v8549_v28 = vpack.c.bf16 %v9871_v23, %v9861_v32  ;;  %v9885_v3 = vmul.f32 0.083333336, %v5537_v48  ;;  %v9887_v24 = vmul.f32 0.083333336, %v5544_v35  ;;  %v5576_v39 = vrot.slane %v5575_v55, 2  ;;  %v10220_v5 = vld [vmem:[#allocation25_spill] sm:$0xff] }
 0x6be   :  { %v10208_v25 = vpack.c.bf16 %v9678_v7, %v9676_v20  ;;  %8844 = vrsqrt.f32 %v9863_v16  ;;  %v9893_v46 = vmul.f32 0.083333336, %v5551_v38  ;;  %v5582_v49 = vadd.f32 %v5581_v36, %v5580_v44 }
 0x6bf   :  { %v5455_v30 = vsub.f32 %v9737_v43, %v5437_v29  ;;  %v5461_v31 = vsub.f32 %v9763_v61, %v5437_v29  ;;  %v10209_v50 = vpack.c.bf16 %v9682_v6, %v9680_v17  ;;  %v5571_v18 = vrot.slane %v5570_v57, 1  ;;  %v10211_v17 = vld [vmem:[#allocation19_spill] sm:$0xff] }
 0x6c0   :  { %8432 = vmatpush3.bf16.msra.mxu1 %v10208_v25  ;;  %v5577_v63 = vadd.f32 %v5576_v39, %v5575_v55  ;;  %v9902_v2 = vsel %vm5703_vm3, %v5437_v29, %v9745_v9  ;;  %vm5616_vm4 = vcmp.eq.f32.partialorder %v9774_v42, inf  ;;  %v5583_v20 = vrot.slane %v5582_v49, 2 }
 0x6c1   :  { %8434 = vmatprep.subr.bf16.mxu1 %v10209_v50  ;;  %v5485_v7 = vsel %vm5316_vm2, %v5461_v31, 0.0  ;;  %v5503_v10 = vmul.f32 %v5455_v30, %v5455_v30  ;;  %vm5618_vm5 = vcmp.eq.f32.partialorder %v9774_v42, 0.0  ;;  %v10212_v6 = vpack.c.bf16 %v10210_v33, %v10211_v17  ;;  %v9948_v30 = vld [vmem:[#allocation8 + $0x200] sm:$0xff]  ;;  %v9950_v31 = vld [vmem:[#allocation8 + $0x208] sm:$0xff]  ;;  %v9952_v50 = vld [vmem:[#allocation8 + $0x290] sm:$0xff] }
 0x6c2   :  { %v5578_v43 = vrot.slane %v5577_v63, 1  ;;  %v5509_v61 = vmul.f32 %v5485_v7, %v5485_v7  ;;  %v5619_v60 = vand.u32 2147483648, %v9774_v42  ;;  %vm5609_vm6 = vcmp.eq.f32.partialorder %v9769_v21, inf }
 0x6c3   :  { %v5584_v9 = vadd.f32 %v5583_v20, %v5582_v49  ;;  %v10215_v58 = vpack.c.bf16 %v10213_v13, %v10214_v62  ;;  %v5615_v40 = vmul.f32 %v8839_v53, %v9774_v42  ;;  %vm5658_vm7 = vcmp.eq.f32.partialorder %v9865_v56, inf  ;;  %v8841_v14 = vpop.eup %8840  ;;  %v9972_v13 = vld [vmem:[#allocation8 + $0x218] sm:$0xff] }
 0x6c4   :  { %8436 = vmatpush3.bf16.msra.mxu1 %v10212_v6  ;;  %vm5611_vm8 = vcmp.eq.f32.partialorder %v9769_v21, 0.0  ;;  %v5572_v54 = vadd.f32 %v5571_v18, %v5570_v57  ;;  %v5579_v0 = vadd.f32 %v5578_v43, %v5577_v63  ;;  %v5587_v41 = vadd.f32 %v5509_v61, %v5503_v10  ;;  %v10221_v57 = vld [vmem:[#allocation24_spill] sm:$0xff]  ;;  %v9954_v18 = vld [vmem:[#allocation8 + $0x298] sm:$0xff] }
 0x6c5   :  { %8438 = vmatprep.subr.bf16.mxu1 %v10215_v58  ;;  %v9922_v22 = vsel %vm5703_vm3, %v9824_v47, %v10216_v19  ;;  %v5585_v26 = vrot.slane %v5584_v9, 1  ;;  %vm5660_vm9 = vcmp.eq.f32.partialorder %v9865_v56, 0.0  ;;  %v5608_v48 = vmul.f32 %v8841_v14, %v9769_v21  ;;  %v8843_v35 = vpop.eup %8842  ;;  %v10223_v43 = vld [vmem:[#allocation27_spill] sm:$0xff]  ;;  %v10224_v61 = vld [vmem:[#allocation26_spill] sm:$0xff]  ;;  %v10226_v14 = vld [vmem:[#allocation29_spill] sm:$0xff] }
 0x6c6   :  { %8846 = vrsqrt.f32 %v9885_v3  ;;  %v9927_v15 = vmul.f32 0.083333336, %v5579_v0  ;;  %v5588_v8 = vrot.slane %v5587_v41, 4  ;;  %v10219_v38 = vpack.c.bf16 %v10217_v37, %v10218_v34  ;;  %v9975_v58 = vld [vmem:[#allocation8 + $0x2a0] sm:$0xff]  ;;  %v5902_v19 = vld [vmem:[#allocation8 + $0x510] sm:$0xff]  ;;  %v9996_v34 = vld [vmem:[#allocation8 + $0x2b8] sm:$0xff] }
 0x6c7   :  { %v5661_v44 = vand.u32 2147483648, %v9865_v56  ;;  %v5612_v47 = vand.u32 2147483648, %v9769_v21  ;;  %v5586_v27 = vadd.f32 %v5585_v26, %v5584_v9  ;;  %v10222_v55 = vpack.c.bf16 %v10220_v5, %v10221_v57  ;;  %v9970_v9 = vld [vmem:[#allocation8 + $0x210] sm:$0xff]  ;;  %v5903_v26 = vld [vmem:[#allocation8 + $0x518] sm:$0xff]  ;;  %v10004_v57 = vld [vmem:[#allocation8 + $0x520] sm:$0xff] }
 0x6c8   :  { %8440 = vmatpush3.bf16.msra.mxu1 %v10219_v38  ;;  %v5617_v36 = vsel %vm5616_vm4, %v9774_v42, %v5615_v40  ;;  %v5657_v29 = vmul.f32 %v8843_v35, %v9865_v56  ;;  %8848 = vrsqrt.f32 %v9887_v24  ;;  %v8845_v53 = vpop.eup %8844  ;;  %v9942_v39 = vmul.f32 0.083333336, %v5572_v54  ;;  %v9977_v40 = vld [vmem:[#allocation8 + $0x2a8] sm:$0xff]  ;;  %v9994_v37 = vld [vmem:[#allocation8 + $0x2b0] sm:$0xff]  ;;  %v5920_v38 = vld [vmem:[#allocation8 + $0x5a0] sm:$0xff] }
 0x6c9   :  { %8442 = vmatprep.subr.bf16.mxu1 %v10222_v55  ;;  %v5589_v25 = vadd.f32 %v5588_v8, %v5587_v41  ;;  %vm5651_vm10 = vcmp.eq.f32.partialorder %v9863_v16, inf  ;;  %8850 = vrsqrt.f32 %v9927_v15  ;;  %v9946_v49 = vmul.f32 0.083333336, %v5586_v27  ;;  %v10227_v54 = vld [vmem:[#allocation28_spill] sm:$0xff]  ;;  %v10002_v5 = vld [vmem:[#allocation8 + $0x238] sm:$0xff] }
 0x6ca   :  { %v5659_v63 = vsel %vm5658_vm7, %v9865_v56, %v5657_v29  ;;  %v5610_v20 = vsel %vm5609_vm6, %v9769_v21, %v5608_v48  ;;  %v5650_v7 = vmul.f32 %v8845_v53, %v9863_v16  ;;  %v10225_v33 = vpack.c.bf16 %v10223_v43, %v10224_v61  ;;  %v9989_v41 = vld [vmem:[#allocation8 + $0x228] sm:$0xff]  ;;  %v10032_v61 = vld [vmem:[#allocation8 + $0x538] sm:$0xff] }
 0x6cb   :  { %v5590_v10 = vrot.slane %v5589_v25, 2  ;;  %v5620_v17 = vsel %vm5618_vm5, %v5619_v60, %v5617_v36  ;;  %v5662_v6 = vsel %vm5660_vm9, %v5661_v44, %v5659_v63  ;;  %v5654_v62 = vand.u32 2147483648, %v9863_v16  ;;  %v9987_v60 = vld [vmem:[#allocation8 + $0x220] sm:$0xff]  ;;  %v9998_v44 = vld [vmem:[#allocation8 + $0x230] sm:$0xff]  ;;  %v10006_v55 = vld [vmem:[#allocation8 + $0x528] sm:$0xff] }
 0x6cc   :  { %8444 = vmatpush3.bf16.msra.mxu1 %v10225_v33  ;;  %v10228_v0 = vpack.c.bf16 %v10226_v14, %v10227_v54  ;;  %v5729_v42 = vsel %vm5703_vm3, %v5662_v6, %v5620_v17  ;;  %v5652_v56 = vsel %vm5651_vm10, %v9863_v16, %v5650_v7  ;;  %vm5653_vm11 = vcmp.eq.f32.partialorder %v9863_v16, 0.0  ;;  %v5921_v16 = vld [vmem:[#allocation8 + $0x5a8] sm:$0xff]  ;;  %v10230_v36 = vld [vmem:[#allocation30_spill] sm:$0xff]  ;;  %v10015_v63 = vld [vmem:[#allocation8 + $0x2c0] sm:$0xff] }
 0x6cd   :  { %8852 = vrsqrt.f32 %v9893_v46  ;;  %v5591_v48 = vadd.f32 %v5590_v10, %v5589_v25  ;;  %6213 = vmatprep.mubr.f32.mxu0 %v5729_v42  ;;  %v5613_v35 = vsel %vm5611_vm8, %v5612_v47, %v5610_v20  ;;  %v5655_v8 = vsel %vm5653_vm11, %v5654_v62, %v5652_v56  ;;  %v10229_v47 = vld [vmem:[#allocation31_spill] sm:$0xff]  ;;  %v10017_v20 = vld [vmem:[#allocation8 + $0x2c8] sm:$0xff]  ;;  %v5922_v7 = vld [vmem:[#allocation8 + $0x5b0] sm:$0xff] }
 0x6ce   :  { %8446 = vmatprep.subr.bf16.mxu1 %v10228_v0  ;;  %8854 = vrsqrt.f32 %v9946_v49  ;;  %v5728_v27 = vsel %vm5703_vm3, %v5655_v8, %v5613_v35  ;;  %v10231_v29 = vpack.c.bf16 %v10229_v47, %v10230_v36  ;;  %v8451_v53 = vpack.c.bf16 %v9950_v31, %v9948_v30  ;;  %v10056_v62 = vld [vmem:[#allocation8 + $0x540] sm:$0xff] }
 0x6cf   :  { %v5592_v21 = vrot.slane %v5591_v48, 1  ;;  %v8453_v25 = vpack.c.bf16 %v9954_v18, %v9952_v50  ;;  %6214 = vmatmul.mubr.f32.vlgmr.msra.gmra.mrb[40].mxu0 %v5728_v27  ;;  %8856 = vrsqrt.f32 %v9881_v59  ;;  %v8455_v43 = vpack.c.bf16 %v9972_v13, %v9970_v9  ;;  %v5923_v50 = vld [vmem:[#allocation8 + $0x5b8] sm:$0xff]  ;;  %v10030_v18 = vld [vmem:[#allocation8 + $0x530] sm:$0xff]  ;;  %v5924_v9 = vld [vmem:[#allocation8 + $0x5c0] sm:$0xff] }
 0x6d0   :  { %8448 = vmatpush3.bf16.msra.mxu1 %v10231_v29  ;;  %v8847_v10 = vpop.eup %8846  ;;  %8548 = vmatpush3.bf16.msra.mxu0 %v8547_v52  ;;  %v8457_v30 = vpack.c.bf16 %v9977_v40, %v9975_v58  ;;  %v8551_v31 = vpack.c.bf16 %v5903_v26, %v5902_v19  ;;  %8858 = vrsqrt.f32 %v9942_v39  ;;  %v8459_v12 = vpack.c.bf16 %v9989_v41, %v9987_v60  ;;  %v5925_v13 = vld [vmem:[#allocation8 + $0x5c8] sm:$0xff]  ;;  %v5926_v27 = vld [vmem:[#allocation8 + $0x5d0] sm:$0xff]  ;;  %v5812_v47 = vld [vmem:[#allocation8 + $0x240] sm:$0xff] }
 0x6d1   :  { %8450 = vmatprep.subr.bf16.mxu1 %v8449_v45  ;;  %v5593_v1 = vadd.f32 %v5592_v21, %v5591_v48  ;;  %8550 = vmatprep.subr.bf16.mxu0 %v8549_v28  ;;  %v8553_v51 = vpack.c.bf16 %v5921_v16, %v5920_v38  ;;  %v5629_v11 = vmul.f32 %v8847_v10, %v9885_v3  ;;  %vm5630_vm12 = vcmp.eq.f32.partialorder %v9885_v3, inf  ;;  %v10058_v58 = vld [vmem:[#allocation8 + $0x548] sm:$0xff]  ;;  %v5830_v10 = vld [vmem:[#allocation8 + $0x2d0] sm:$0xff] }
 0x6d2   :  { %v8849_v45 = vpop.eup %8848  ;;  %v8461_v52 = vpack.c.bf16 %v9996_v34, %v9994_v37  ;;  %v8463_v33 = vpack.c.bf16 %v10002_v5, %v9998_v44  ;;  %v8555_v17 = vpack.c.bf16 %v10006_v55, %v10004_v57  ;;  %v8465_v32 = vpack.c.bf16 %v10017_v20, %v10015_v63  ;;  %v5927_v57 = vld [vmem:[#allocation8 + $0x5d8] sm:$0xff]  ;;  %v5832_v44 = vld [vmem:[#allocation8 + $0x2e0] sm:$0xff]  ;;  %v5913_v20 = vld [vmem:[#allocation8 + $0x568] sm:$0xff] }
 0x6d3   :  { %6074 = vmatmul.mubr.f32.vlgmr.msra.gmra.mrb[66].mxu1 %v9817_v4  ;;  %v8851_v23 = vpop.eup %8850  ;;  %v10050_v28 = vmul.f32 0.083333336, %v5593_v1  ;;  %v8557_v6 = vpack.c.bf16 %v5923_v50, %v5922_v7  ;;  %v8559_v4 = vpack.c.bf16 %v10032_v61, %v10030_v18  ;;  %v5631_v40 = vsel %vm5630_vm12, %v9885_v3, %v5629_v11  ;;  %v5813_v7 = vld [vmem:[#allocation8 + $0x248] sm:$0xff]  ;;  %v5910_v50 = vld [vmem:[#allocation8 + $0x550] sm:$0xff]  ;;  %v5911_v18 = vld [vmem:[#allocation8 + $0x558] sm:$0xff] }
 0x6d4   :  { %8452 = vmatpush3.bf16.msra.mxu1 %v8451_v53  ;;  %6143 = vmatprep.mubr.f32.mxu1 %v9902_v2  ;;  %v5671_v14 = vmul.f32 %v8851_v23, %v9927_v15  ;;  %v5636_v2 = vmul.f32 %v8849_v45, %v9887_v24  ;;  %v5633_v54 = vand.u32 2147483648, %v9885_v3  ;;  %vm5672_vm13 = vcmp.eq.f32.partialorder %v9927_v15, inf  ;;  %v5928_v1 = vld [vmem:[#allocation8 + $0x5e0] sm:$0xff] }
 0x6d5   :  { %8454 = vmatprep.subr.bf16.mxu1 %v8453_v25  ;;  %8552 = vmatpush3.bf16.msra.mxu0 %v8551_v31  ;;  %8860 = vrsqrt.f32 %v10050_v28  ;;  %v5675_v0 = vand.u32 2147483648, %v9927_v15  ;;  %v8561_v56 = vpack.c.bf16 %v5925_v13, %v5924_v9  ;;  %vm5632_vm14 = vcmp.eq.f32.partialorder %v9885_v3, 0.0  ;;  %v5833_v13 = vld [vmem:[#allocation8 + $0x2e8] sm:$0xff]  ;;  %v5912_v63 = vld [vmem:[#allocation8 + $0x560] sm:$0xff] }
 0x6d6   :  { %8554 = vmatprep.subr.bf16.mxu0 %v8553_v51  ;;  %v5673_v60 = vsel %vm5672_vm13, %v9927_v15, %v5671_v14  ;;  %vm5674_vm15 = vcmp.eq.f32.partialorder %v9927_v15, 0.0  ;;  %v8563_v19 = vpack.c.bf16 %v10058_v58, %v10056_v62  ;;  %v5634_v26 = vsel %vm5632_vm14, %v5633_v54, %v5631_v40  ;;  %v5930_v58 = vld [vmem:[#allocation8 + $0x5f0] sm:$0xff]  ;;  %v5931_v40 = vld [vmem:[#allocation8 + $0x5f8] sm:$0xff] }
 0x6d7   :  { %v8853_v42 = vpop.eup %8852  ;;  %v5676_v48 = vsel %vm5674_vm15, %v5675_v0, %v5673_v60  ;;  %vm5637_vm0 = vcmp.eq.f32.partialorder %v9887_v24, inf  ;;  %vm5639_vm1 = vcmp.eq.f32.partialorder %v9887_v24, 0.0  ;;  %v5640_v37 = vand.u32 2147483648, %v9887_v24  ;;  %v5817_v60 = vld [vmem:[#allocation8 + $0x268] sm:$0xff] }
 0x6d8   :  { %v8855_v41 = vpop.eup %8854  ;;  %8456 = vmatpush3.bf16.msra.mxu1 %v8455_v43  ;;  %v10074_v35 = vsel %vm5703_vm3, %v5676_v48, %v5634_v26  ;;  %v5638_v3 = vsel %vm5637_vm0, %v9887_v24, %v5636_v2  ;;  %vm5679_vm2 = vcmp.eq.f32.partialorder %v9946_v49, inf  ;;  %vm5681_vm4 = vcmp.eq.f32.partialorder %v9946_v49, 0.0  ;;  %v5831_v43 = vld [vmem:[#allocation8 + $0x2d8] sm:$0xff] }
 0x6d9   :  { %8458 = vmatprep.subr.bf16.mxu1 %v8457_v30  ;;  %8556 = vmatpush3.bf16.msra.mxu0 %v8555_v17  ;;  %v5678_v15 = vmul.f32 %v8855_v41, %v9946_v49  ;;  %v8857_v8 = vpop.eup %8856  ;;  %v5682_v34 = vand.u32 2147483648, %v9946_v49  ;;  %v5643_v16 = vmul.f32 %v8853_v42, %v9893_v46  ;;  %vm5623_vm5 = vcmp.eq.f32.partialorder %v9881_v59, inf  ;;  %v5834_v41 = vld [vmem:[#allocation8 + $0x2f0] sm:$0xff]  ;;  %v5915_v48 = vld [vmem:[#allocation8 + $0x578] sm:$0xff] }
 0x6da   :  { %8558 = vmatprep.subr.bf16.mxu0 %v8557_v6  ;;  %v8859_v38 = vpop.eup %8858  ;;  %v5622_v21 = vmul.f32 %v8857_v8, %v9881_v59  ;;  %v5641_v36 = vsel %vm5639_vm1, %v5640_v37, %v5638_v3  ;;  %v5626_v53 = vand.u32 2147483648, %v9881_v59  ;;  %vm5665_vm6 = vcmp.eq.f32.partialorder %v9942_v39, inf  ;;  %v5814_v6 = vld [vmem:[#allocation8 + $0x250] sm:$0xff]  ;;  %v5819_v37 = vld [vmem:[#allocation8 + $0x278] sm:$0xff] }
 0x6db   :  { %v5680_v55 = vsel %vm5679_vm2, %v9946_v49, %v5678_v15  ;;  %v5664_v25 = vmul.f32 %v8859_v38, %v9942_v39  ;;  %v5668_v24 = vand.u32 2147483648, %v9942_v39  ;;  %v8565_v31 = vpack.c.bf16 %v5927_v57, %v5926_v27  ;;  %v5818_v8 = vld [vmem:[#allocation8 + $0x270] sm:$0xff]  ;;  %v5884_v38 = vld [vmem:[#allocation8 + $0x480] sm:$0xff] }
 0x6dc   :  { %8460 = vmatpush3.bf16.msra.mxu1 %v8459_v12  ;;  %v5683_v29 = vsel %vm5681_vm4, %v5682_v34, %v5680_v55  ;;  %v5624_v30 = vsel %vm5623_vm5, %v9881_v59, %v5622_v21  ;;  %vm5625_vm7 = vcmp.eq.f32.partialorder %v9881_v59, 0.0  ;;  %vm5667_vm8 = vcmp.eq.f32.partialorder %v9942_v39, 0.0  ;;  %v5929_v12 = vld [vmem:[#allocation8 + $0x5e8] sm:$0xff]  ;;  %v5868_v55 = vld [vmem:[#allocation8 + $0x400] sm:$0xff] }
 0x6dd   :  { %8462 = vmatprep.subr.bf16.mxu1 %v8461_v52  ;;  %8560 = vmatpush3.bf16.msra.mxu0 %v8559_v4  ;;  %v10092_v49 = vsel %vm5703_vm3, %v5683_v29, %v5641_v36  ;;  %v5666_v61 = vsel %vm5665_vm6, %v9942_v39, %v5664_v25  ;;  %v5627_v51 = vsel %vm5625_vm7, %v5626_v53, %v5624_v30  ;;  %vm5644_vm9 = vcmp.eq.f32.partialorder %v9893_v46, inf  ;;  %v5815_v4 = vld [vmem:[#allocation8 + $0x258] sm:$0xff]  ;;  %v5869_v21 = vld [vmem:[#allocation8 + $0x408] sm:$0xff]  ;;  %v5870_v25 = vld [vmem:[#allocation8 + $0x410] sm:$0xff] }
 0x6de   :  { %8562 = vmatprep.subr.bf16.mxu0 %v8561_v56  ;;  %v5669_v11 = vsel %vm5667_vm8, %v5668_v24, %v5666_v61  ;;  %v8467_v52 = vpack.c.bf16 %v5813_v7, %v5812_v47  ;;  %v8469_v17 = vpack.c.bf16 %v5831_v43, %v5830_v10  ;;  %v5645_v59 = vsel %vm5644_vm9, %v9893_v46, %v5643_v16  ;;  %v5816_v56 = vld [vmem:[#allocation8 + $0x260] sm:$0xff]  ;;  %v5885_v16 = vld [vmem:[#allocation8 + $0x488] sm:$0xff]  ;;  %v5886_v47 = vld [vmem:[#allocation8 + $0x490] sm:$0xff] }
 0x6df   :  { %v8861_v45 = vpop.eup %8860  ;;  %v10105_v23 = vsel %vm5703_vm3, %v5669_v11, %v5627_v51  ;;  %v8567_v5 = vpack.c.bf16 %v5911_v18, %v5910_v50  ;;  %vm5686_vm10 = vcmp.eq.f32.partialorder %v10050_v28, inf  ;;  %v5689_v9 = vand.u32 2147483648, %v10050_v28  ;;  %v5887_v36 = vld [vmem:[#allocation8 + $0x498] sm:$0xff]  ;;  %v5888_v10 = vld [vmem:[#allocation8 + $0x4a0] sm:$0xff]  ;;  %v5889_v43 = vld [vmem:[#allocation8 + $0x4a8] sm:$0xff] }
 0x6e0   :  { %8464 = vmatpush3.bf16.msra.mxu1 %v8463_v33  ;;  %v5685_v39 = vmul.f32 %v8861_v45, %v10050_v28  ;;  %v5647_v33 = vand.u32 2147483648, %v9893_v46  ;;  %v8569_v62 = vpack.c.bf16 %v5929_v12, %v5928_v1  ;;  %vm5646_vm11 = vcmp.eq.f32.partialorder %v9893_v46, 0.0  ;;  %v5835_v46 = vld [vmem:[#allocation8 + $0x2f8] sm:$0xff]  ;;  %v5873_v50 = vld [vmem:[#allocation8 + $0x428] sm:$0xff]  ;;  %v5890_v18 = vld [vmem:[#allocation8 + $0x4b0] sm:$0xff] }
 0x6e1   :  { %8466 = vmatprep.subr.bf16.mxu1 %v8465_v32  ;;  %8564 = vmatpush3.bf16.msra.mxu0 %v8563_v19  ;;  %vm5688_vm12 = vcmp.eq.f32.partialorder %v10050_v28, 0.0  ;;  %v8471_v54 = vpack.c.bf16 %v5815_v4, %v5814_v6  ;;  %v8473_v42 = vpack.c.bf16 %v5833_v13, %v5832_v44  ;;  %v8571_v19 = vpack.c.bf16 %v5913_v20, %v5912_v63  ;;  %v5871_v7 = vld [vmem:[#allocation8 + $0x418] sm:$0xff]  ;;  %v5874_v12 = vld [vmem:[#allocation8 + $0x430] sm:$0xff]  ;;  %v5892_v11 = vld [vmem:[#allocation8 + $0x4c0] sm:$0xff] }
 0x6e2   :  { %8566 = vmatprep.subr.bf16.mxu0 %v8565_v31  ;;  %v5687_v32 = vsel %vm5686_vm10, %v10050_v28, %v5685_v39  ;;  %v5648_v14 = vsel %vm5646_vm11, %v5647_v33, %v5645_v59  ;;  %v8573_v26 = vpack.c.bf16 %v5931_v40, %v5930_v58  ;;  %v5914_v28 = vld [vmem:[#allocation8 + $0x570] sm:$0xff]  ;;  %v8475_v3 = vpack.c.bf16 %v5817_v60, %v5816_v56  ;;  %v5872_v31 = vld [vmem:[#allocation8 + $0x420] sm:$0xff]  ;;  %v5891_v61 = vld [vmem:[#allocation8 + $0x4b8] sm:$0xff] }
 0x6e3   :  { %v5690_v2 = vsel %vm5688_vm12, %v5689_v9, %v5687_v32  ;;  %v8477_v15 = vpack.c.bf16 %v5835_v46, %v5834_v41  ;;  %v8575_v34 = vpack.c.bf16 %v5915_v48, %v5914_v28  ;;  %v8479_v27 = vpack.c.bf16 %v5819_v37, %v5818_v8  ;;  %v5875_v51 = vld [vmem:[#allocation8 + $0x438] sm:$0xff]  ;;  %v5893_v45 = vld [vmem:[#allocation8 + $0x4c8] sm:$0xff]  ;;  %v5894_v59 = vld [vmem:[#allocation8 + $0x4d0] sm:$0xff] }
 0x6e4   :  { %8468 = vmatpush3.bf16.msra.mxu1 %v8467_v52  ;;  %v5733_v0 = vsel %vm5703_vm3, %v5690_v2, %v5648_v14  ;;  %v8513_v57 = vpack.c.bf16 %v5885_v16, %v5884_v38  ;;  %v8515_v29 = vpack.c.bf16 %v5869_v21, %v5868_v55  ;;  %v8517_v53 = vpack.c.bf16 %v5887_v36, %v5886_v47  ;;  %v5895_v39 = vld [vmem:[#allocation8 + $0x4d8] sm:$0xff]  ;;  %v5878_v44 = vld [vmem:[#allocation8 + $0x450] sm:$0xff]  ;;  %v5896_v33 = vld [vmem:[#allocation8 + $0x4e0] sm:$0xff] }
 0x6e5   :  { %8470 = vmatprep.subr.bf16.mxu1 %v8469_v17  ;;  %8568 = vmatpush3.bf16.msra.mxu0 %v8567_v5  ;;  %v8519_v30 = vpack.c.bf16 %v5871_v7, %v5870_v25  ;;  %v8521_v24 = vpack.c.bf16 %v5889_v43, %v5888_v10  ;;  %v8525_v1 = vpack.c.bf16 %v5891_v61, %v5890_v18  ;;  %v5877_v17 = vld [vmem:[#allocation8 + $0x448] sm:$0xff]  ;;  %v5879_v5 = vld [vmem:[#allocation8 + $0x458] sm:$0xff]  ;;  %v5880_v63 = vld [vmem:[#allocation8 + $0x460] sm:$0xff] }
 0x6e6   :  { %6353 = vmatprep.mubr.f32.mxu0 %v5733_v0  ;;  %8570 = vmatprep.subr.bf16.mxu0 %v8569_v62  ;;  %v8529_v52 = vpack.c.bf16 %v5893_v45, %v5892_v11  ;;  %v8533_v4 = vpack.c.bf16 %v5895_v39, %v5894_v59  ;;  %v5897_v9 = vld [vmem:[#allocation8 + $0x4e8] sm:$0xff]  ;;  %v8535_v13 = vpack.c.bf16 %v5879_v5, %v5878_v44  ;;  %v5898_v32 = vld [vmem:[#allocation8 + $0x4f0] sm:$0xff]  ;;  %v5899_v58 = vld [vmem:[#allocation8 + $0x4f8] sm:$0xff] }
 0x6e7   :  { %v8537_v62 = vpack.c.bf16 %v5897_v9, %v5896_v33  ;;  %v5881_v20 = vld [vmem:[#allocation8 + $0x468] sm:$0xff]  ;;  %v8541_v14 = vpack.c.bf16 %v5899_v58, %v5898_v32  ;;  %v5882_v2 = vld [vmem:[#allocation8 + $0x470] sm:$0xff]  ;;  %v6397_v46 = vld [vmem:[#allocation10] ss:$0 sm:$0xff] }
 0x6e8   :  { %8472 = vmatpush3.bf16.msra.mxu1 %v8471_v54  ;;  %v8539_v40 = vpack.c.bf16 %v5881_v20, %v5880_v63  ;;  %v5883_v54 = vld [vmem:[#allocation8 + $0x478] sm:$0xff] }
 0x6e9   :  { %8474 = vmatprep.subr.bf16.mxu1 %v8473_v42  ;;  %8572 = vmatpush3.bf16.msra.mxu0 %v8571_v19  ;;  %v8543_v0 = vpack.c.bf16 %v5883_v54, %v5882_v2  ;;  %v10232_v43 = vld [vmem:[#allocation18_spill] sm:$0xff] }
 0x6ea   :  { %8574 = vmatprep.subr.bf16.mxu0 %v8573_v26  ;;  %vm6359_vm3 = vcmp.eq.s32.totalorder %v10232_v43, 2 }
 0x6ec   :  { %8476 = vmatpush3.bf16.msra.mxu1 %v8475_v3 }
 0x6ed   :  { %8478 = vmatprep.subr.bf16.mxu1 %v8477_v15  ;;  %8576 = vmatpush3.bf16.msra.mxu0 %v8575_v34 }
 0x6f0   :  { %8480 = vmatpush3.bf16.msra.mxu1 %v8479_v27  ;;  %6354 = vmatmul.mubr.f32.vlgmr.msra.gmra.mrb[42].mxu0 %v10092_v49  ;;  %v8523_v49 = vpack.c.bf16 %v5873_v50, %v5872_v31 }
 0x6f1   :  { %8514 = vmatprep.subr.bf16.mxu1 %v8513_v57 }
 0x6f3   :  { %6144 = vmatmul.mubr.f32.vlgmr.msra.gmra.mrb[68].mxu1 %v9922_v22  ;;  %v8527_v22 = vpack.c.bf16 %v5875_v51, %v5874_v12 }
 0x6f4   :  { %8516 = vmatpush3.bf16.msra.mxu1 %v8515_v29  ;;  %6283 = vmatprep.mubr.f32.mxu1 %v10074_v35  ;;  %v5876_v35 = vld [vmem:[#allocation8 + $0x440] sm:$0xff] }
 0x6f5   :  { %8518 = vmatprep.subr.bf16.mxu1 %v8517_v53  ;;  %v8531_v6 = vpack.c.bf16 %v5877_v17, %v5876_v35 }
 0x6f8   :  { %8520 = vmatpush3.bf16.msra.mxu1 %v8519_v30 }
 0x6f9   :  { %8522 = vmatprep.subr.bf16.mxu1 %v8521_v24 }
 0x6fc   :  { %8524 = vmatpush3.bf16.msra.mxu1 %v8523_v49 }
 0x6fd   :  { %8526 = vmatprep.subr.bf16.mxu1 %v8525_v1 }
 0x700   :  { %8528 = vmatpush3.bf16.msra.mxu1 %v8527_v22 }
 0x701   :  { %8530 = vmatprep.subr.bf16.mxu1 %v8529_v52 }
 0x704   :  { %8532 = vmatpush3.bf16.msra.mxu1 %v8531_v6 }
 0x705   :  { %8534 = vmatprep.subr.bf16.mxu1 %v8533_v4 }
 0x708   :  { %8536 = vmatpush3.bf16.msra.mxu1 %v8535_v13 }
 0x709   :  { %8538 = vmatprep.subr.bf16.mxu1 %v8537_v62 }
 0x70c   :  { %8540 = vmatpush3.bf16.msra.mxu1 %v8539_v40 }
 0x70d   :  { %8542 = vmatprep.subr.bf16.mxu1 %v8541_v14 }
 0x710   :  { %8544 = vmatpush3.bf16.msra.mxu1 %v8543_v0 }
 0x713   :  { %6284 = vmatmul.mubr.f32.vlgmr.msra.gmra.mrb[70].mxu1 %v10105_v23 }
 0x781   :  { %v6431_v42 = vpop.f32.mrb[64].mxu1 }
 0x782   :  { %v6432_v56 = vpop.f32.mrb[65].mxu1 }
 0x783   :  { %v6433_v60 = vadd.f32 %v6432_v56, %v6431_v42 }
 0x785   :  { %v6006_v3 = vadd.f32 %v6433_v60, %v6397_v46 }
 0x7a2   :  { %v6536_v41 = vpop.f32.mrb[40].mxu0 }
 0x7a3   :  { %v6537_v19 = vpop.f32.mrb[41].mxu0 }
 0x7a4   :  { %v6538_v26 = vadd.f32 %v6537_v19, %v6536_v41 }
 0x7a6   :  { %v6466_v28 = vpop.f32.mrb[66].mxu1 }
 0x7a7   :  { %v6467_v48 = vpop.f32.mrb[67].mxu1 }
 0x7a8   :  { %v6468_v15 = vadd.f32 %v6467_v48, %v6466_v28 }
 0x7aa   :  { %v6076_v8 = vadd.f32 %v6468_v15, %v6006_v3 }
 0x7c3   :  { %v6606_v37 = vpop.f32.mrb[42].mxu0 }
 0x7c4   :  { %v6607_v34 = vpop.f32.mrb[43].mxu0 }
 0x7c5   :  { %v6608_v38 = vadd.f32 %v6607_v34, %v6606_v37 }
 0x7c6   :  { %v6501_v16 = vpop.f32.mrb[68].mxu1 }
 0x7c7   :  { %v6502_v27 = vpop.f32.mrb[69].mxu1 }
 0x7c8   :  { %v6503_v57 = vadd.f32 %v6502_v27, %v6501_v16 }
 0x7ca   :  { %v6146_v55 = vadd.f32 %v6503_v57, %v6076_v8 }
 0x7cc   :  { %v6216_v23 = vadd.f32 %v6538_v26, %v6146_v55 }
 0x7e6   :  { %v6571_v21 = vpop.f32.mrb[70].mxu1 }
 0x7e7   :  { %v6572_v47 = vpop.f32.mrb[71].mxu1 }
 0x7e8   :  { %v6573_v36 = vadd.f32 %v6572_v47, %v6571_v21 }
 0x7ea   :  { %v6286_v29 = vadd.f32 %v6573_v36, %v6216_v23 }
 0x7ec   :  { %v6356_v53 = vadd.f32 %v6608_v38, %v6286_v29 }
 0x7ee   :  { %v6398_v25 = vmul.f32 -1.442695, %v6356_v53 }
 0x7f0   :  { %8862 = vpow2.f32 %v6398_v25 }
 0x7fa   :  { %v8863_v7 = vpop.eup %8862 }
 0x7fb   :  { %v6363_v10 = vadd.f32 1.0, %v8863_v7 }
 0x7fd   :  { %8864 = vrcp.f32 %v6363_v10 }
 0x807   :  { %v8865_v30 = vpop.eup %8864 }
 0x808   :  { %v6366_v24 = vsel %vm6359_vm3, %v8865_v30, %v6356_v53 }
 0x809   :  { %6367 = vst [vmem:[#allocation11] sm:$0x3] %v6366_v24 }
 0x80a   :  { %9079 = shalt.err (!%p9076_p2)
}
 0x80b   :  { %s9080_s8 = scalar_lea.hbm %s10141_s5, 32 }
 0x80c   :  { %p9081_p3 = scmp.ne.s32.totalorder %s10141_s5, %s9080_s8  ;;  %p9084_p4 = scmp.lt.u32.totalorder %s9080_s8, %s10141_s5 }
 0x80e   :  { %p9086_p5 = pnand %p9084_p4, %p9081_p3 }
 0x810   :  { %9089 = shalt.err (!%p9086_p5)
}
 0x811   :  { %6377 = dma.vmem_to_hbm [thread:$0]  %s6375_s3, 32, %s10141_s5, [#allocation4]  }
 0x812   :  { %9096 = dma.done.wait [#allocation4], 32  }
 0x813   :  { %9097 = vsyncadd [#allocation4], 4294967264 }
 0x814   :  { %6381 = vsyncpa [#allocation3], 1 }
 0x815   :  { %6382 = vsyncpa [#allocation6], 1 }
 0x816   :  { %6383 = vsyncpa [#allocation9], 1 }
 0x817   :  { %6384 = vsyncpa [#allocation4], 1 }

</bundles_post_ra>
